<compile_context>
chip_gen: v7x
topology: tpu7x:2x2x1
jax: 0.10.0
libtpu: 0.0.40
codegen_flags: <defaults>
</compile_context>

<pallas_src>
import jax
import jax.numpy as jnp
from jax.experimental import pallas as pl
from jax.experimental.pallas import tpu as pltpu

_BN_EPS = 1e-5


# ----------------------------------------------------------------------------
# Pallas kernels
# ----------------------------------------------------------------------------
def _vmem_specs(n):
    return [pl.BlockSpec(memory_space=pltpu.MemorySpace.VMEM) for _ in range(n)]


def _conv_bn_relu_kernel(p_ref, w_ref, s_ref, t_ref, o_ref):
    """relu((patches @ W) * scale + shift) — conv-as-im2col matmul.

    Conv2d bias and eval-mode BatchNorm2d are pre-folded into (scale, shift).
    bf16 weights, f32 accumulation. Whole arrays in VMEM, no grid.
    """
    y = jnp.dot(p_ref[...].astype(jnp.bfloat16), w_ref[...],
                preferred_element_type=jnp.float32)
    o_ref[...] = jnp.maximum(y * s_ref[...] + t_ref[...], 0.0)


def conv_bn_relu(patches, w_bf16, scale, shift):
    P, _ = patches.shape
    cout = w_bf16.shape[1]
    return pl.pallas_call(
        _conv_bn_relu_kernel,
        out_shape=jax.ShapeDtypeStruct((P, cout), jnp.float32),
        in_specs=_vmem_specs(4),
        out_specs=pl.BlockSpec(memory_space=pltpu.MemorySpace.VMEM),
    )(patches, w_bf16, scale, shift)


def _head_kernel(xenc_ref, act_ref, desc_ref,
                 wenc_ref, benc_ref,
                 wg1_ref, bg1_ref, wg2_ref, bg2_ref, wg3_ref, bg3_ref,
                 w0s_ref, w0g_ref, w0d_ref, b0_ref, s0_ref, t0_ref,
                 w1_ref, b1_ref, s1_ref, t1_ref,
                 w2_ref, b2_ref, s2_ref, t2_ref,
                 w3_ref, b3_ref, s3_ref, t3_ref,
                 w4_ref, b4_ref,
                 out_ref):
    """Fused head: encoder fc4 + gamma chain + fc0..fc3 (+ReLU +BN eval) + fc4 + softmax."""

    def mm(x, w_ref):
        return jnp.dot(x.astype(jnp.bfloat16), w_ref[...],
                       preferred_element_type=jnp.float32)

    # state encoder fc4 (3136 -> 512) + relu
    s = jnp.maximum(mm(xenc_ref[...], wenc_ref) + benc_ref[...], 0.0)

    # gamma3(gamma2(gamma1(action))) — pure linear chain 4 -> 128 -> 256 -> 512
    g = mm(act_ref[...], wg1_ref) + bg1_ref[...]
    g = mm(g, wg2_ref) + bg2_ref[...]
    g = mm(g, wg3_ref) + bg3_ref[...]

    # fc0 on cat([state_enc, gamma, desc]) expressed as a split matmul (no concat needed)
    h = (mm(s, w0s_ref) + mm(g, w0g_ref) + mm(desc_ref[...], w0d_ref) + b0_ref[...])
    h = jnp.maximum(h, 0.0) * s0_ref[...] + t0_ref[...]                       # bn0(relu(fc0))
    h = jnp.maximum(mm(h, w1_ref) + b1_ref[...], 0.0) * s1_ref[...] + t1_ref[...]
    h = jnp.maximum(mm(h, w2_ref) + b2_ref[...], 0.0) * s2_ref[...] + t2_ref[...]
    h = jnp.maximum(mm(h, w3_ref) + b3_ref[...], 0.0) * s3_ref[...] + t3_ref[...]

    # fc4 (32 -> 2) + softmax over dim=1
    logits = mm(h, w4_ref) + b4_ref[...]
    m = jnp.max(logits, axis=-1, keepdims=True)
    e = jnp.exp(logits - m)
    out_ref[...] = e * pl.reciprocal(jnp.sum(e, axis=-1, keepdims=True), approx=False)


def fused_head(xenc, act, desc, p):
    B = xenc.shape[0]
    ins = (xenc, act, desc,
           p["w_enc"], p["b_enc"],
           p["wg1"], p["bg1"], p["wg2"], p["bg2"], p["wg3"], p["bg3"],
           p["w0s"], p["w0g"], p["w0d"], p["b0"], p["s0"], p["t0"],
           p["w1"], p["b1"], p["s1"], p["t1"],
           p["w2"], p["b2"], p["s2"], p["t2"],
           p["w3"], p["b3"], p["s3"], p["t3"],
           p["w4"], p["b4"])
    return pl.pallas_call(
        _head_kernel,
        out_shape=jax.ShapeDtypeStruct((B, 2), jnp.float32),
        in_specs=_vmem_specs(len(ins)),
        out_specs=pl.BlockSpec(memory_space=pltpu.MemorySpace.VMEM),
    )(*ins)


# ----------------------------------------------------------------------------
# Wrapper-side layout plumbing (im2col patch extraction — pure strided slicing)
# ----------------------------------------------------------------------------
def _extract_patches_nhwc(x, ksize, stride):
    """x: (B, H, W, C) -> ((B*Ho*Wo, ksize*ksize*C), Ho, Wo); K ordered (ki, kj, c)."""
    B, H, W, C = x.shape
    Ho = (H - ksize) // stride + 1
    Wo = (W - ksize) // stride + 1
    cols = []
    for ki in range(ksize):
        for kj in range(ksize):
            cols.append(x[:, ki:ki + stride * Ho:stride, kj:kj + stride * Wo:stride, :])
    patches = jnp.concatenate(cols, axis=-1)
    return patches.reshape(B * Ho * Wo, ksize * ksize * C), Ho, Wo


# ----------------------------------------------------------------------------
# Parameter init (PyTorch-default-style) with BN folding
# ----------------------------------------------------------------------------
def _linear_init(key, fan_in, fan_out):
    kw, kb = jax.random.split(key)
    bound = 1.0 / (fan_in ** 0.5)
    w = jax.random.uniform(kw, (fan_in, fan_out), jnp.float32, -bound, bound)
    b = jax.random.uniform(kb, (fan_out,), jnp.float32, -bound, bound)
    return w, b


def _conv_init(key, cin, cout, ksz):
    kw, kb = jax.random.split(key)
    fan_in = cin * ksz * ksz
    bound = 1.0 / (fan_in ** 0.5)
    # weight already in im2col layout: (ksz*ksz*cin, cout)
    w = jax.random.uniform(kw, (ksz * ksz * cin, cout), jnp.float32, -bound, bound)
    b = jax.random.uniform(kb, (cout,), jnp.float32, -bound, bound)
    return w, b


def _bn_default(n):
    return dict(gamma=jnp.ones((n,), jnp.float32), beta=jnp.zeros((n,), jnp.float32),
                mean=jnp.zeros((n,), jnp.float32), var=jnp.ones((n,), jnp.float32))


def _bn_scale_shift(bn):
    s = bn["gamma"] / jnp.sqrt(bn["var"] + _BN_EPS)
    t = bn["beta"] - bn["mean"] * s
    return s, t


def init_params(key, desc_feats=10):
    k = jax.random.split(key, 12)
    bf16 = jnp.bfloat16
    p = {}

    # DQNImgEncoder convs: relu(BN(conv(x))) -> fold conv bias + eval BN into scale/shift
    for name, kk, cin, cout, ksz in (("c1", k[0], 4, 32, 8),
                                     ("c2", k[1], 32, 64, 4),
                                     ("c3", k[2], 64, 64, 3)):
        w, b = _conv_init(kk, cin, cout, ksz)
        s, t = _bn_scale_shift(_bn_default(cout))
        p[f"w_{name}"] = w.astype(bf16)
        p[f"s_{name}"] = s.reshape(1, cout)
        p[f"t_{name}"] = (b * s + t).reshape(1, cout)   # == (b - mean)*s + beta

    # encoder fc4: 3136 -> 512 (+relu, no BN)
    w, b = _linear_init(k[3], 64 * 7 * 7, 512)
    p["w_enc"], p["b_enc"] = w.astype(bf16), b.reshape(1, -1)

    # gamma1..3: 4 -> 128 -> 256 -> 512 (pure linear chain)
    for i, (kk, fin, fout) in enumerate(((k[4], 4, 128),
                                         (k[5], 128, 256),
                                         (k[6], 256, 512)), start=1):
        w, b = _linear_init(kk, fin, fout)
        p[f"wg{i}"], p[f"bg{i}"] = w.astype(bf16), b.reshape(1, -1)

    # fc0: 1034 -> 512, split across the concat segments [state(512) | gamma(512) | desc]
    w0, b0 = _linear_init(k[7], 512 + 512 + desc_feats, 512)
    p["w0s"] = w0[:512].astype(bf16)
    p["w0g"] = w0[512:1024].astype(bf16)
    p["w0d"] = w0[1024:].astype(bf16)
    p["b0"] = b0.reshape(1, -1)
    s, t = _bn_scale_shift(_bn_default(512))
    p["s0"], p["t0"] = s.reshape(1, -1), t.reshape(1, -1)

    # fc1..fc3 (+relu, +eval BN after relu)
    for i, (kk, fin, fout) in enumerate(((k[8], 512, 128),
                                         (k[9], 128, 64),
                                         (k[10], 64, 32)), start=1):
        w, b = _linear_init(kk, fin, fout)
        p[f"w{i}"], p[f"b{i}"] = w.astype(bf16), b.reshape(1, -1)
        s, t = _bn_scale_shift(_bn_default(fout))
        p[f"s{i}"], p[f"t{i}"] = s.reshape(1, -1), t.reshape(1, -1)

    # fc4: 32 -> 2, softmax (bn4 / leakyrelu exist in the module but are unused in forward)
    w, b = _linear_init(k[11], 32, 2)
    p["w4"], p["b4"] = w.astype(bf16), b.reshape(1, -1)
    return p


# ----------------------------------------------------------------------------
# Whole forward (jitted)
# ----------------------------------------------------------------------------
@jax.jit
def forward(params, state, desc, action):
    # state: NHWC (B, 84, 84, 4). PyTorch's permute(0,3,1,2)/256 is matched by keeping NHWC
    # (weights stored in NHWC im2col order) and dividing by 256.
    B = state.shape[0]
    x = state.astype(jnp.float32) / 256.0

    pch, ho, wo = _extract_patches_nhwc(x, 8, 4)                      # conv1: k=8 s=4
    y = conv_bn_relu(pch, params["w_c1"], params["s_c1"], params["t_c1"]).reshape(B, ho, wo, -1)
    pch, ho, wo = _extract_patches_nhwc(y, 4, 2)                      # conv2: k=4 s=2
    y = conv_bn_relu(pch, params["w_c2"], params["s_c2"], params["t_c2"]).reshape(B, ho, wo, -1)
    pch, ho, wo = _extract_patches_nhwc(y, 3, 1)                      # conv3: k=3 s=1
    y = conv_bn_relu(pch, params["w_c3"], params["s_c3"], params["t_c3"]).reshape(B, ho, wo, -1)

    # match PyTorch flatten of NCHW (channel-major) ordering for fc4 of the encoder
    xenc = jnp.transpose(y, (0, 3, 1, 2)).reshape(B, 64 * 7 * 7)
    act = action.reshape(B, -1).astype(jnp.float32)                   # action.flatten(1).float()
    d = desc.reshape(B, -1).astype(jnp.float32)                       # desc.squeeze()

    return fused_head(xenc, act, d, params)


if __name__ == "__main__":
    key = jax.random.PRNGKey(0)
    kp, ks, kd, ka = jax.random.split(key, 4)

    params = init_params(kp, desc_feats=10)

    batch = 2
    state = jax.random.uniform(ks, (batch, 84, 84, 4), jnp.float32, 0.0, 255.0)  # NHWC image
    desc = jax.random.normal(kd, (batch, 10), jnp.float32)
    action = jax.random.normal(ka, (batch, 4), jnp.float32)

    out = forward(params, state, desc, action)
    out = jax.block_until_ready(out)

    assert out.shape == (batch, 2)
    assert bool(jnp.all(jnp.isfinite(out)))
    # softmax rows must sum to 1
    assert bool(jnp.allclose(jnp.sum(out, axis=1), 1.0, atol=1e-5))

    print("KERNEL_OK")
</pallas_src>

<mosaic_0001>
module attributes {stable_mosaic.version = 11 : i64} {
  func.func @_conv_bn_relu_kernel(%arg0: memref<800x256xf32, #tpu.memory_space<vmem>>, %arg1: memref<256x32xbf16, #tpu.memory_space<vmem>>, %arg2: memref<1x32xf32, #tpu.memory_space<vmem>>, %arg3: memref<1x32xf32, #tpu.memory_space<vmem>>, %arg4: memref<800x32xf32, #tpu.memory_space<vmem>>) attributes {dimension_semantics = [], scalar_prefetch = 0 : i64, scratch_operands = 0 : i64, tpu.core_type = #tpu.core_type<tc>} {
    %c0 = arith.constant 0 : index
    %c0_0 = arith.constant 0 : index
    %0 = vector.load %arg0[%c0, %c0_0] : memref<800x256xf32, #tpu.memory_space<vmem>>, vector<800x256xf32>
    %1 = arith.truncf %0 : vector<800x256xf32> to vector<800x256xbf16>
    %c0_1 = arith.constant 0 : index
    %c0_2 = arith.constant 0 : index
    %2 = vector.load %arg1[%c0_1, %c0_2] : memref<256x32xbf16, #tpu.memory_space<vmem>>, vector<256x32xbf16>
    %cst = arith.constant dense<0.000000e+00> : vector<800x32xf32>
    %3 = tpu.matmul %1, %2, %cst {dimension_numbers = #tpu.dot_dimension_numbers<[1], [0], [0], [1], [0, 0, 1, 1], [], []>} : vector<800x256xbf16>, vector<256x32xbf16>, vector<800x32xf32> -> vector<800x32xf32>
    %c0_3 = arith.constant 0 : index
    %c0_4 = arith.constant 0 : index
    %4 = vector.load %arg2[%c0_3, %c0_4] : memref<1x32xf32, #tpu.memory_space<vmem>>, vector<1x32xf32>
    %5 = vector.broadcast %4 : vector<1x32xf32> to vector<800x32xf32>
    %6 = arith.mulf %3, %5 : vector<800x32xf32>
    %c0_5 = arith.constant 0 : index
    %c0_6 = arith.constant 0 : index
    %7 = vector.load %arg3[%c0_5, %c0_6] : memref<1x32xf32, #tpu.memory_space<vmem>>, vector<1x32xf32>
    %8 = vector.broadcast %7 : vector<1x32xf32> to vector<800x32xf32>
    %9 = arith.addf %6, %8 : vector<800x32xf32>
    %cst_7 = arith.constant 0.000000e+00 : f32
    %10 = vector.broadcast %cst_7 : f32 to vector<800x32xf32>
    %11 = arith.maximumf %9, %10 : vector<800x32xf32>
    %c0_8 = arith.constant 0 : index
    %c0_9 = arith.constant 0 : index
    %12 = vector.load %arg4[%c0_8, %c0_9] : memref<800x32xf32, #tpu.memory_space<vmem>>, vector<800x32xf32>
    tpu.vector_store %arg4[%c0_8, %c0_9], %11 {strides = array<i32>} : memref<800x32xf32, #tpu.memory_space<vmem>>, vector<800x32xf32>,
    return
  }
}

module attributes {stable_mosaic.version = 11 : i64} {
  func.func @_conv_bn_relu_kernel(%arg0: memref<162x512xf32, #tpu.memory_space<vmem>>, %arg1: memref<512x64xbf16, #tpu.memory_space<vmem>>, %arg2: memref<1x64xf32, #tpu.memory_space<vmem>>, %arg3: memref<1x64xf32, #tpu.memory_space<vmem>>, %arg4: memref<162x64xf32, #tpu.memory_space<vmem>>) attributes {dimension_semantics = [], scalar_prefetch = 0 : i64, scratch_operands = 0 : i64, tpu.core_type = #tpu.core_type<tc>} {
    %c0 = arith.constant 0 : index
    %c0_0 = arith.constant 0 : index
    %0 = vector.load %arg0[%c0, %c0_0] : memref<162x512xf32, #tpu.memory_space<vmem>>, vector<162x512xf32>
    %1 = arith.truncf %0 : vector<162x512xf32> to vector<162x512xbf16>
    %c0_1 = arith.constant 0 : index
    %c0_2 = arith.constant 0 : index
    %2 = vector.load %arg1[%c0_1, %c0_2] : memref<512x64xbf16, #tpu.memory_space<vmem>>, vector<512x64xbf16>
    %cst = arith.constant dense<0.000000e+00> : vector<162x64xf32>
    %3 = tpu.matmul %1, %2, %cst {dimension_numbers = #tpu.dot_dimension_numbers<[1], [0], [0], [1], [0, 0, 1, 1], [], []>} : vector<162x512xbf16>, vector<512x64xbf16>, vector<162x64xf32> -> vector<162x64xf32>
    %c0_3 = arith.constant 0 : index
    %c0_4 = arith.constant 0 : index
    %4 = vector.load %arg2[%c0_3, %c0_4] : memref<1x64xf32, #tpu.memory_space<vmem>>, vector<1x64xf32>
    %5 = vector.broadcast %4 : vector<1x64xf32> to vector<162x64xf32>
    %6 = arith.mulf %3, %5 : vector<162x64xf32>
    %c0_5 = arith.constant 0 : index
    %c0_6 = arith.constant 0 : index
    %7 = vector.load %arg3[%c0_5, %c0_6] : memref<1x64xf32, #tpu.memory_space<vmem>>, vector<1x64xf32>
    %8 = vector.broadcast %7 : vector<1x64xf32> to vector<162x64xf32>
    %9 = arith.addf %6, %8 : vector<162x64xf32>
    %cst_7 = arith.constant 0.000000e+00 : f32
    %10 = vector.broadcast %cst_7 : f32 to vector<162x64xf32>
    %11 = arith.maximumf %9, %10 : vector<162x64xf32>
    %c0_8 = arith.constant 0 : index
    %c0_9 = arith.constant 0 : index
    %12 = vector.load %arg4[%c0_8, %c0_9] : memref<162x64xf32, #tpu.memory_space<vmem>>, vector<162x64xf32>
    tpu.vector_store %arg4[%c0_8, %c0_9], %11 {strides = array<i32>} : memref<162x64xf32, #tpu.memory_space<vmem>>, vector<162x64xf32>,
    return
  }
}

module attributes {stable_mosaic.version = 11 : i64} {
  func.func @_conv_bn_relu_kernel(%arg0: memref<98x576xf32, #tpu.memory_space<vmem>>, %arg1: memref<576x64xbf16, #tpu.memory_space<vmem>>, %arg2: memref<1x64xf32, #tpu.memory_space<vmem>>, %arg3: memref<1x64xf32, #tpu.memory_space<vmem>>, %arg4: memref<98x64xf32, #tpu.memory_space<vmem>>) attributes {dimension_semantics = [], scalar_prefetch = 0 : i64, scratch_operands = 0 : i64, tpu.core_type = #tpu.core_type<tc>} {
    %c0 = arith.constant 0 : index
    %c0_0 = arith.constant 0 : index
    %0 = vector.load %arg0[%c0, %c0_0] : memref<98x576xf32, #tpu.memory_space<vmem>>, vector<98x576xf32>
    %1 = arith.truncf %0 : vector<98x576xf32> to vector<98x576xbf16>
    %c0_1 = arith.constant 0 : index
    %c0_2 = arith.constant 0 : index
    %2 = vector.load %arg1[%c0_1, %c0_2] : memref<576x64xbf16, #tpu.memory_space<vmem>>, vector<576x64xbf16>
    %cst = arith.constant dense<0.000000e+00> : vector<98x64xf32>
    %3 = tpu.matmul %1, %2, %cst {dimension_numbers = #tpu.dot_dimension_numbers<[1], [0], [0], [1], [0, 0, 1, 1], [], []>} : vector<98x576xbf16>, vector<576x64xbf16>, vector<98x64xf32> -> vector<98x64xf32>
    %c0_3 = arith.constant 0 : index
    %c0_4 = arith.constant 0 : index
    %4 = vector.load %arg2[%c0_3, %c0_4] : memref<1x64xf32, #tpu.memory_space<vmem>>, vector<1x64xf32>
    %5 = vector.broadcast %4 : vector<1x64xf32> to vector<98x64xf32>
    %6 = arith.mulf %3, %5 : vector<98x64xf32>
    %c0_5 = arith.constant 0 : index
    %c0_6 = arith.constant 0 : index
    %7 = vector.load %arg3[%c0_5, %c0_6] : memref<1x64xf32, #tpu.memory_space<vmem>>, vector<1x64xf32>
    %8 = vector.broadcast %7 : vector<1x64xf32> to vector<98x64xf32>
    %9 = arith.addf %6, %8 : vector<98x64xf32>
    %cst_7 = arith.constant 0.000000e+00 : f32
    %10 = vector.broadcast %cst_7 : f32 to vector<98x64xf32>
    %11 = arith.maximumf %9, %10 : vector<98x64xf32>
    %c0_8 = arith.constant 0 : index
    %c0_9 = arith.constant 0 : index
    %12 = vector.load %arg4[%c0_8, %c0_9] : memref<98x64xf32, #tpu.memory_space<vmem>>, vector<98x64xf32>
    tpu.vector_store %arg4[%c0_8, %c0_9], %11 {strides = array<i32>} : memref<98x64xf32, #tpu.memory_space<vmem>>, vector<98x64xf32>,
    return
  }
}

module attributes {stable_mosaic.version = 11 : i64} {
  func.func @_head_kernel(%arg0: memref<2x3136xf32, #tpu.memory_space<vmem>>, %arg1: memref<2x4xf32, #tpu.memory_space<vmem>>, %arg2: memref<2x10xf32, #tpu.memory_space<vmem>>, %arg3: memref<3136x512xbf16, #tpu.memory_space<vmem>>, %arg4: memref<1x512xf32, #tpu.memory_space<vmem>>, %arg5: memref<4x128xbf16, #tpu.memory_space<vmem>>, %arg6: memref<1x128xf32, #tpu.memory_space<vmem>>, %arg7: memref<128x256xbf16, #tpu.memory_space<vmem>>, %arg8: memref<1x256xf32, #tpu.memory_space<vmem>>, %arg9: memref<256x512xbf16, #tpu.memory_space<vmem>>, %arg10: memref<1x512xf32, #tpu.memory_space<vmem>>, %arg11: memref<512x512xbf16, #tpu.memory_space<vmem>>, %arg12: memref<512x512xbf16, #tpu.memory_space<vmem>>, %arg13: memref<10x512xbf16, #tpu.memory_space<vmem>>, %arg14: memref<1x512xf32, #tpu.memory_space<vmem>>, %arg15: memref<1x512xf32, #tpu.memory_space<vmem>>, %arg16: memref<1x512xf32, #tpu.memory_space<vmem>>, %arg17: memref<512x128xbf16, #tpu.memory_space<vmem>>, %arg18: memref<1x128xf32, #tpu.memory_space<vmem>>, %arg19: memref<1x128xf32, #tpu.memory_space<vmem>>, %arg20: memref<1x128xf32, #tpu.memory_space<vmem>>, %arg21: memref<128x64xbf16, #tpu.memory_space<vmem>>, %arg22: memref<1x64xf32, #tpu.memory_space<vmem>>, %arg23: memref<1x64xf32, #tpu.memory_space<vmem>>, %arg24: memref<1x64xf32, #tpu.memory_space<vmem>>, %arg25: memref<64x32xbf16, #tpu.memory_space<vmem>>, %arg26: memref<1x32xf32, #tpu.memory_space<vmem>>, %arg27: memref<1x32xf32, #tpu.memory_space<vmem>>, %arg28: memref<1x32xf32, #tpu.memory_space<vmem>>, %arg29: memref<32x2xbf16, #tpu.memory_space<vmem>>, %arg30: memref<1x2xf32, #tpu.memory_space<vmem>>, %arg31: memref<2x2xf32, #tpu.memory_space<vmem>>) attributes {dimension_semantics = [], scalar_prefetch = 0 : i64, scratch_operands = 0 : i64, tpu.core_type = #tpu.core_type<tc>} {
    %c0 = arith.constant 0 : index
    %c0_0 = arith.constant 0 : index
    %0 = vector.load %arg0[%c0, %c0_0] : memref<2x3136xf32, #tpu.memory_space<vmem>>, vector<2x3136xf32>
    %1 = arith.truncf %0 : vector<2x3136xf32> to vector<2x3136xbf16>
    %c0_1 = arith.constant 0 : index
    %c0_2 = arith.constant 0 : index
    %2 = vector.load %arg3[%c0_1, %c0_2] : memref<3136x512xbf16, #tpu.memory_space<vmem>>, vector<3136x512xbf16>
    %cst = arith.constant dense<0.000000e+00> : vector<2x512xf32>
    %3 = tpu.matmul %1, %2, %cst {dimension_numbers = #tpu.dot_dimension_numbers<[1], [0], [0], [1], [0, 0, 1, 1], [], []>} : vector<2x3136xbf16>, vector<3136x512xbf16>, vector<2x512xf32> -> vector<2x512xf32>
    %c0_3 = arith.constant 0 : index
    %c0_4 = arith.constant 0 : index
    %4 = vector.load %arg4[%c0_3, %c0_4] : memref<1x512xf32, #tpu.memory_space<vmem>>, vector<1x512xf32>
    %5 = vector.broadcast %4 : vector<1x512xf32> to vector<2x512xf32>
    %6 = arith.addf %3, %5 : vector<2x512xf32>
    %cst_5 = arith.constant 0.000000e+00 : f32
    %7 = vector.broadcast %cst_5 : f32 to vector<2x512xf32>
    %8 = arith.maximumf %6, %7 : vector<2x512xf32>
    %c0_6 = arith.constant 0 : index
    %c0_7 = arith.constant 0 : index
    %9 = vector.load %arg1[%c0_6, %c0_7] : memref<2x4xf32, #tpu.memory_space<vmem>>, vector<2x4xf32>
    %10 = arith.truncf %9 : vector<2x4xf32> to vector<2x4xbf16>
    %c0_8 = arith.constant 0 : index
    %c0_9 = arith.constant 0 : index
    %11 = vector.load %arg5[%c0_8, %c0_9] : memref<4x128xbf16, #tpu.memory_space<vmem>>, vector<4x128xbf16>
    %cst_10 = arith.constant dense<0.000000e+00> : vector<2x128xf32>
    %12 = tpu.matmul %10, %11, %cst_10 {dimension_numbers = #tpu.dot_dimension_numbers<[1], [0], [0], [1], [0, 0, 1, 1], [], []>} : vector<2x4xbf16>, vector<4x128xbf16>, vector<2x128xf32> -> vector<2x128xf32>
    %c0_11 = arith.constant 0 : index
    %c0_12 = arith.constant 0 : index
    %13 = vector.load %arg6[%c0_11, %c0_12] : memref<1x128xf32, #tpu.memory_space<vmem>>, vector<1x128xf32>
    %14 = vector.broadcast %13 : vector<1x128xf32> to vector<2x128xf32>
    %15 = arith.addf %12, %14 : vector<2x128xf32>
    %16 = arith.truncf %15 : vector<2x128xf32> to vector<2x128xbf16>
    %c0_13 = arith.constant 0 : index
    %c0_14 = arith.constant 0 : index
    %17 = vector.load %arg7[%c0_13, %c0_14] : memref<128x256xbf16, #tpu.memory_space<vmem>>, vector<128x256xbf16>
    %cst_15 = arith.constant dense<0.000000e+00> : vector<2x256xf32>
    %18 = tpu.matmul %16, %17, %cst_15 {dimension_numbers = #tpu.dot_dimension_numbers<[1], [0], [0], [1], [0, 0, 1, 1], [], []>} : vector<2x128xbf16>, vector<128x256xbf16>, vector<2x256xf32> -> vector<2x256xf32>
    %c0_16 = arith.constant 0 : index
    %c0_17 = arith.constant 0 : index
    %19 = vector.load %arg8[%c0_16, %c0_17] : memref<1x256xf32, #tpu.memory_space<vmem>>, vector<1x256xf32>
    %20 = vector.broadcast %19 : vector<1x256xf32> to vector<2x256xf32>
    %21 = arith.addf %18, %20 : vector<2x256xf32>
    %22 = arith.truncf %21 : vector<2x256xf32> to vector<2x256xbf16>
    %c0_18 = arith.constant 0 : index
    %c0_19 = arith.constant 0 : index
    %23 = vector.load %arg9[%c0_18, %c0_19] : memref<256x512xbf16, #tpu.memory_space<vmem>>, vector<256x512xbf16>
    %cst_20 = arith.constant dense<0.000000e+00> : vector<2x512xf32>
    %24 = tpu.matmul %22, %23, %cst_20 {dimension_numbers = #tpu.dot_dimension_numbers<[1], [0], [0], [1], [0, 0, 1, 1], [], []>} : vector<2x256xbf16>, vector<256x512xbf16>, vector<2x512xf32> -> vector<2x512xf32>
    %c0_21 = arith.constant 0 : index
    %c0_22 = arith.constant 0 : index
    %25 = vector.load %arg10[%c0_21, %c0_22] : memref<1x512xf32, #tpu.memory_space<vmem>>, vector<1x512xf32>
    %26 = vector.broadcast %25 : vector<1x512xf32> to vector<2x512xf32>
    %27 = arith.addf %24, %26 : vector<2x512xf32>
    %28 = arith.truncf %8 : vector<2x512xf32> to vector<2x512xbf16>
    %c0_23 = arith.constant 0 : index
    %c0_24 = arith.constant 0 : index
    %29 = vector.load %arg11[%c0_23, %c0_24] : memref<512x512xbf16, #tpu.memory_space<vmem>>, vector<512x512xbf16>
    %cst_25 = arith.constant dense<0.000000e+00> : vector<2x512xf32>
    %30 = tpu.matmul %28, %29, %cst_25 {dimension_numbers = #tpu.dot_dimension_numbers<[1], [0], [0], [1], [0, 0, 1, 1], [], []>} : vector<2x512xbf16>, vector<512x512xbf16>, vector<2x512xf32> -> vector<2x512xf32>
    %31 = arith.truncf %27 : vector<2x512xf32> to vector<2x512xbf16>
    %c0_26 = arith.constant 0 : index
    %c0_27 = arith.constant 0 : index
    %32 = vector.load %arg12[%c0_26, %c0_27] : memref<512x512xbf16, #tpu.memory_space<vmem>>, vector<512x512xbf16>
    %cst_28 = arith.constant dense<0.000000e+00> : vector<2x512xf32>
    %33 = tpu.matmul %31, %32, %cst_28 {dimension_numbers = #tpu.dot_dimension_numbers<[1], [0], [0], [1], [0, 0, 1, 1], [], []>} : vector<2x512xbf16>, vector<512x512xbf16>, vector<2x512xf32> -> vector<2x512xf32>
    %34 = arith.addf %30, %33 : vector<2x512xf32>
    %c0_29 = arith.constant 0 : index
    %c0_30 = arith.constant 0 : index
    %35 = vector.load %arg2[%c0_29, %c0_30] : memref<2x10xf32, #tpu.memory_space<vmem>>, vector<2x10xf32>
    %36 = arith.truncf %35 : vector<2x10xf32> to vector<2x10xbf16>
    %c0_31 = arith.constant 0 : index
    %c0_32 = arith.constant 0 : index
    %37 = vector.load %arg13[%c0_31, %c0_32] : memref<10x512xbf16, #tpu.memory_space<vmem>>, vector<10x512xbf16>
    %cst_33 = arith.constant dense<0.000000e+00> : vector<2x512xf32>
    %38 = tpu.matmul %36, %37, %cst_33 {dimension_numbers = #tpu.dot_dimension_numbers<[1], [0], [0], [1], [0, 0, 1, 1], [], []>} : vector<2x10xbf16>, vector<10x512xbf16>, vector<2x512xf32> -> vector<2x512xf32>
    %39 = arith.addf %34, %38 : vector<2x512xf32>
    %c0_34 = arith.constant 0 : index
    %c0_35 = arith.constant 0 : index
    %40 = vector.load %arg14[%c0_34, %c0_35] : memref<1x512xf32, #tpu.memory_space<vmem>>, vector<1x512xf32>
    %41 = vector.broadcast %40 : vector<1x512xf32> to vector<2x512xf32>
    %42 = arith.addf %39, %41 : vector<2x512xf32>
    %cst_36 = arith.constant 0.000000e+00 : f32
    %43 = vector.broadcast %cst_36 : f32 to vector<2x512xf32>
    %44 = arith.maximumf %42, %43 : vector<2x512xf32>
    %c0_37 = arith.constant 0 : index
    %c0_38 = arith.constant 0 : index
    %45 = vector.load %arg15[%c0_37, %c0_38] : memref<1x512xf32, #tpu.memory_space<vmem>>, vector<1x512xf32>
    %46 = vector.broadcast %45 : vector<1x512xf32> to vector<2x512xf32>
    %47 = arith.mulf %44, %46 : vector<2x512xf32>
    %c0_39 = arith.constant 0 : index
    %c0_40 = arith.constant 0 : index
    %48 = vector.load %arg16[%c0_39, %c0_40] : memref<1x512xf32, #tpu.memory_space<vmem>>, vector<1x512xf32>
    %49 = vector.broadcast %48 : vector<1x512xf32> to vector<2x512xf32>
    %50 = arith.addf %47, %49 : vector<2x512xf32>
    %51 = arith.truncf %50 : vector<2x512xf32> to vector<2x512xbf16>
    %c0_41 = arith.constant 0 : index
    %c0_42 = arith.constant 0 : index
    %52 = vector.load %arg17[%c0_41, %c0_42] : memref<512x128xbf16, #tpu.memory_space<vmem>>, vector<512x128xbf16>
    %cst_43 = arith.constant dense<0.000000e+00> : vector<2x128xf32>
    %53 = tpu.matmul %51, %52, %cst_43 {dimension_numbers = #tpu.dot_dimension_numbers<[1], [0], [0], [1], [0, 0, 1, 1], [], []>} : vector<2x512xbf16>, vector<512x128xbf16>, vector<2x128xf32> -> vector<2x128xf32>
    %c0_44 = arith.constant 0 : index
    %c0_45 = arith.constant 0 : index
    %54 = vector.load %arg18[%c0_44, %c0_45] : memref<1x128xf32, #tpu.memory_space<vmem>>, vector<1x128xf32>
    %55 = vector.broadcast %54 : vector<1x128xf32> to vector<2x128xf32>
    %56 = arith.addf %53, %55 : vector<2x128xf32>
    %cst_46 = arith.constant 0.000000e+00 : f32
    %57 = vector.broadcast %cst_46 : f32 to vector<2x128xf32>
    %58 = arith.maximumf %56, %57 : vector<2x128xf32>
    %c0_47 = arith.constant 0 : index
    %c0_48 = arith.constant 0 : index
    %59 = vector.load %arg19[%c0_47, %c0_48] : memref<1x128xf32, #tpu.memory_space<vmem>>, vector<1x128xf32>
    %60 = vector.broadcast %59 : vector<1x128xf32> to vector<2x128xf32>
    %61 = arith.mulf %58, %60 : vector<2x128xf32>
    %c0_49 = arith.constant 0 : index
    %c0_50 = arith.constant 0 : index
    %62 = vector.load %arg20[%c0_49, %c0_50] : memref<1x128xf32, #tpu.memory_space<vmem>>, vector<1x128xf32>
    %63 = vector.broadcast %62 : vector<1x128xf32> to vector<2x128xf32>
    %64 = arith.addf %61, %63 : vector<2x128xf32>
    %65 = arith.truncf %64 : vector<2x128xf32> to vector<2x128xbf16>
    %c0_51 = arith.constant 0 : index
    %c0_52 = arith.constant 0 : index
    %66 = vector.load %arg21[%c0_51, %c0_52] : memref<128x64xbf16, #tpu.memory_space<vmem>>, vector<128x64xbf16>
    %cst_53 = arith.constant dense<0.000000e+00> : vector<2x64xf32>
    %67 = tpu.matmul %65, %66, %cst_53 {dimension_numbers = #tpu.dot_dimension_numbers<[1], [0], [0], [1], [0, 0, 1, 1], [], []>} : vector<2x128xbf16>, vector<128x64xbf16>, vector<2x64xf32> -> vector<2x64xf32>
    %c0_54 = arith.constant 0 : index
    %c0_55 = arith.constant 0 : index
    %68 = vector.load %arg22[%c0_54, %c0_55] : memref<1x64xf32, #tpu.memory_space<vmem>>, vector<1x64xf32>
    %69 = vector.broadcast %68 : vector<1x64xf32> to vector<2x64xf32>
    %70 = arith.addf %67, %69 : vector<2x64xf32>
    %cst_56 = arith.constant 0.000000e+00 : f32
    %71 = vector.broadcast %cst_56 : f32 to vector<2x64xf32>
    %72 = arith.maximumf %70, %71 : vector<2x64xf32>
    %c0_57 = arith.constant 0 : index
    %c0_58 = arith.constant 0 : index
    %73 = vector.load %arg23[%c0_57, %c0_58] : memref<1x64xf32, #tpu.memory_space<vmem>>, vector<1x64xf32>
    %74 = vector.broadcast %73 : vector<1x64xf32> to vector<2x64xf32>
    %75 = arith.mulf %72, %74 : vector<2x64xf32>
    %c0_59 = arith.constant 0 : index
    %c0_60 = arith.constant 0 : index
    %76 = vector.load %arg24[%c0_59, %c0_60] : memref<1x64xf32, #tpu.memory_space<vmem>>, vector<1x64xf32>
    %77 = vector.broadcast %76 : vector<1x64xf32> to vector<2x64xf32>
    %78 = arith.addf %75, %77 : vector<2x64xf32>
    %79 = arith.truncf %78 : vector<2x64xf32> to vector<2x64xbf16>
    %c0_61 = arith.constant 0 : index
    %c0_62 = arith.constant 0 : index
    %80 = vector.load %arg25[%c0_61, %c0_62] : memref<64x32xbf16, #tpu.memory_space<vmem>>, vector<64x32xbf16>
    %cst_63 = arith.constant dense<0.000000e+00> : vector<2x32xf32>
    %81 = tpu.matmul %79, %80, %cst_63 {dimension_numbers = #tpu.dot_dimension_numbers<[1], [0], [0], [1], [0, 0, 1, 1], [], []>} : vector<2x64xbf16>, vector<64x32xbf16>, vector<2x32xf32> -> vector<2x32xf32>
    %c0_64 = arith.constant 0 : index
    %c0_65 = arith.constant 0 : index
    %82 = vector.load %arg26[%c0_64, %c0_65] : memref<1x32xf32, #tpu.memory_space<vmem>>, vector<1x32xf32>
    %83 = vector.broadcast %82 : vector<1x32xf32> to vector<2x32xf32>
    %84 = arith.addf %81, %83 : vector<2x32xf32>
    %cst_66 = arith.constant 0.000000e+00 : f32
    %85 = vector.broadcast %cst_66 : f32 to vector<2x32xf32>
    %86 = arith.maximumf %84, %85 : vector<2x32xf32>
    %c0_67 = arith.constant 0 : index
    %c0_68 = arith.constant 0 : index
    %87 = vector.load %arg27[%c0_67, %c0_68] : memref<1x32xf32, #tpu.memory_space<vmem>>, vector<1x32xf32>
    %88 = vector.broadcast %87 : vector<1x32xf32> to vector<2x32xf32>
    %89 = arith.mulf %86, %88 : vector<2x32xf32>
    %c0_69 = arith.constant 0 : index
    %c0_70 = arith.constant 0 : index
    %90 = vector.load %arg28[%c0_69, %c0_70] : memref<1x32xf32, #tpu.memory_space<vmem>>, vector<1x32xf32>
    %91 = vector.broadcast %90 : vector<1x32xf32> to vector<2x32xf32>
    %92 = arith.addf %89, %91 : vector<2x32xf32>
    %93 = arith.truncf %92 : vector<2x32xf32> to vector<2x32xbf16>
    %c0_71 = arith.constant 0 : index
    %c0_72 = arith.constant 0 : index
    %94 = vector.load %arg29[%c0_71, %c0_72] : memref<32x2xbf16, #tpu.memory_space<vmem>>, vector<32x2xbf16>
    %cst_73 = arith.constant dense<0.000000e+00> : vector<2x2xf32>
    %95 = tpu.matmul %93, %94, %cst_73 {dimension_numbers = #tpu.dot_dimension_numbers<[1], [0], [0], [1], [0, 0, 1, 1], [], []>} : vector<2x32xbf16>, vector<32x2xbf16>, vector<2x2xf32> -> vector<2x2xf32>
    %c0_74 = arith.constant 0 : index
    %c0_75 = arith.constant 0 : index
    %96 = vector.load %arg30[%c0_74, %c0_75] : memref<1x2xf32, #tpu.memory_space<vmem>>, vector<1x2xf32>
    %97 = vector.broadcast %96 : vector<1x2xf32> to vector<2x2xf32>
    %98 = arith.addf %95, %97 : vector<2x2xf32>
    %cst_76 = arith.constant dense<0xFF800000> : vector<2xf32>
    %99 = vector.multi_reduction <maximumf>, %98, %cst_76 [1] : vector<2x2xf32> to vector<2xf32>
    %100 = vector.shape_cast %99 : vector<2xf32> to vector<2x1xf32>
    %101 = vector.broadcast %100 : vector<2x1xf32> to vector<2x2xf32>
    %102 = arith.subf %98, %101 : vector<2x2xf32>
    %103 = math.exp %102 : vector<2x2xf32>
    %cst_77 = arith.constant dense<0.000000e+00> : vector<2xf32>
    %104 = vector.multi_reduction <add>, %103, %cst_77 [1] : vector<2x2xf32> to vector<2xf32>
    %105 = vector.shape_cast %104 : vector<2xf32> to vector<2x1xf32>
    %106 = tpu.reciprocal %105 : vector<2x1xf32> -> vector<2x1xf32>
    %107 = vector.broadcast %106 : vector<2x1xf32> to vector<2x2xf32>
    %108 = arith.mulf %103, %107 : vector<2x2xf32>
    %c0_78 = arith.constant 0 : index
    %c0_79 = arith.constant 0 : index
    %109 = vector.load %arg31[%c0_78, %c0_79] : memref<2x2xf32, #tpu.memory_space<vmem>>, vector<2x2xf32>
    tpu.vector_store %arg31[%c0_78, %c0_79], %108 {strides = array<i32>} : memref<2x2xf32, #tpu.memory_space<vmem>>, vector<2x2xf32>,
    return
  }
}

</mosaic_0001>

<bundles_post_ra>
// kernel: forward.4
= control target key start
LH: loop header
LB: loop body
LE: loop exit
PB: predicated region body
PF: predicated region fallthrough
CT: control target
= control target key end

     0   :  { %v1367_v0 = vmov 0   ;;  %vm1193_vm0 = vcmask 261120   ;;  %s2693_s1 = inlined_call_operand.vmem [shape: bf16[256,32], index: 1, kind: input, shape index: {}]   ;;  %s2694_s0 = inlined_call_operand.vmem [shape: f32[800,256], index: 0, kind: input, shape index: {}]   ;;  %s2695_s2 = inlined_call_operand.vmem [shape: f32[1,32], index: 2, kind: input, shape index: {}]   ;;  %s2696_s3 = inlined_call_operand.vmem [shape: f32[1,32], index: 3, kind: input, shape index: {}]   ;;  %s2697_s4 = inlined_call_operand.vmem [shape: f32[800,32], index: 4, kind: output, shape index: {}]  }
   0x1   :  { %446 = vmatprep.subr.bf16.mxu0 %v1367_v0  ;;  %1316 = vmatprep.subr.bf16.mxu1 %v1367_v0  ;;  %v1349_v1 = vld [vmem:[%s2693_s1] sm:$0xff]   ;;  %v1350_v2 = vld [vmem:[%s2693_s1 + $0x8] sm:$0xff]   ;;  %v1351_v3 = vld [vmem:[%s2693_s1 + $0x10] sm:$0xff]  }
   0x2   :  { %447 = vmatpush1.bf16.msra.mxu0 %v1349_v1  ;;  %1332 = vmatpush1.bf16.msra.mxu1 %v1349_v1  ;;  %v1352_v4 = vld [vmem:[%s2693_s1 + $0x18] sm:$0xff]   ;;  %v1353_v5 = vld [vmem:[%s2693_s1 + $0x20] sm:$0xff]   ;;  %v19_v6 = vld [vmem:[%s2694_s0 + $0x8] sm:$0xff] }
   0x3   :  { %448 = vmatprep.subr.bf16.mxu0 %v1367_v0  ;;  %1317 = vmatprep.subr.bf16.mxu1 %v1367_v0  ;;  %v21_v7 = vld [vmem:[%s2694_s0 + $0x18] sm:$0xff]  ;;  %v119_v8 = vld [vmem:[%s2694_s0 + $0x328] sm:$0xff]  ;;  %v1355_v13 = vld [vmem:[%s2693_s1 + $0x30] sm:$0xff]  }
   0x4   :  { %v219_v9 = vpack.c.bf16 %v21_v7, %v19_v6  ;;  %v121_v10 = vld [vmem:[%s2694_s0 + $0x338] sm:$0xff]  ;;  %v1354_v11 = vld [vmem:[%s2693_s1 + $0x28] sm:$0xff]   ;;  %v1357_v15 = vld [vmem:[%s2693_s1 + $0x40] sm:$0xff]  }
   0x5   :  { %v269_v12 = vpack.c.bf16 %v121_v10, %v119_v8  ;;  %v1356_v14 = vld [vmem:[%s2693_s1 + $0x38] sm:$0xff]   ;;  %v1358_v16 = vld [vmem:[%s2693_s1 + $0x48] sm:$0xff]   ;;  %v1359_v17 = vld [vmem:[%s2693_s1 + $0x50] sm:$0xff]  }
   0x6   :  { %449 = vmatpush1.bf16.msra.mxu0 %v1350_v2  ;;  %1333 = vmatpush1.bf16.msra.mxu1 %v1350_v2  ;;  %v1360_v18 = vld [vmem:[%s2693_s1 + $0x58] sm:$0xff]   ;;  %v1361_v19 = vld [vmem:[%s2693_s1 + $0x60] sm:$0xff]   ;;  %v1362_v20 = vld [vmem:[%s2693_s1 + $0x68] sm:$0xff]  }
   0x7   :  { %450 = vmatprep.subr.bf16.mxu0 %v1367_v0  ;;  %1318 = vmatprep.subr.bf16.mxu1 %v1367_v0  ;;  %v1363_v21 = vld [vmem:[%s2693_s1 + $0x70] sm:$0xff]   ;;  %v1364_v22 = vld [vmem:[%s2693_s1 + $0x78] sm:$0xff]   ;;  %v18_v23 = vld [vmem:[%s2694_s0] sm:$0xff] }
   0x8   :  { %478 = vmatprep.mubr.bf16.mxu0 %v219_v9  ;;  %678 = vmatprep.mubr.bf16.mxu1 %v269_v12  ;;  %v20_v24 = vld [vmem:[%s2694_s0 + $0x10] sm:$0xff]  ;;  %v118_v25 = vld [vmem:[%s2694_s0 + $0x320] sm:$0xff]  ;;  %v23_v27 = vld [vmem:[%s2694_s0 + $0x28] sm:$0xff] }
   0x9   :  { %v120_v26 = vld [vmem:[%s2694_s0 + $0x330] sm:$0xff]  ;;  %v25_v28 = vld [vmem:[%s2694_s0 + $0x38] sm:$0xff]  ;;  %v123_v29 = vld [vmem:[%s2694_s0 + $0x348] sm:$0xff]  ;;  %v218_v31 = vpack.c.bf16 %v20_v24, %v18_v23 }
   0xa   :  { %451 = vmatpush1.bf16.msra.mxu0 %v1351_v3  ;;  %1334 = vmatpush1.bf16.msra.mxu1 %v1351_v3  ;;  %v125_v30 = vld [vmem:[%s2694_s0 + $0x358] sm:$0xff]  ;;  %v268_v32 = vpack.c.bf16 %v120_v26, %v118_v25  ;;  %v221_v33 = vpack.c.bf16 %v25_v28, %v23_v27  ;;  %v22_v35 = vld [vmem:[%s2694_s0 + $0x20] sm:$0xff]  ;;  %v24_v36 = vld [vmem:[%s2694_s0 + $0x30] sm:$0xff] }
   0xb   :  { %452 = vmatprep.subr.bf16.mxu0 %v1367_v0  ;;  %1319 = vmatprep.subr.bf16.mxu1 %v1367_v0  ;;  %v271_v34 = vpack.c.bf16 %v125_v30, %v123_v29  ;;  %v122_v37 = vld [vmem:[%s2694_s0 + $0x340] sm:$0xff]  ;;  %v124_v38 = vld [vmem:[%s2694_s0 + $0x350] sm:$0xff]  ;;  %v27_v39 = vld [vmem:[%s2694_s0 + $0x48] sm:$0xff]  ;;  %v220_v43 = vpack.c.bf16 %v24_v36, %v22_v35 }
   0xc   :  { %v29_v40 = vld [vmem:[%s2694_s0 + $0x58] sm:$0xff]  ;;  %v127_v41 = vld [vmem:[%s2694_s0 + $0x368] sm:$0xff]  ;;  %v270_v44 = vpack.c.bf16 %v124_v38, %v122_v37  ;;  %v26_v47 = vld [vmem:[%s2694_s0 + $0x40] sm:$0xff] }
   0xd   :  { %v129_v42 = vld [vmem:[%s2694_s0 + $0x378] sm:$0xff]  ;;  %v223_v45 = vpack.c.bf16 %v29_v40, %v27_v39  ;;  %v28_v48 = vld [vmem:[%s2694_s0 + $0x50] sm:$0xff]  ;;  %v126_v49 = vld [vmem:[%s2694_s0 + $0x360] sm:$0xff] }
   0xe   :  { %453 = vmatpush1.bf16.msra.mxu0 %v1352_v4  ;;  %1335 = vmatpush1.bf16.msra.mxu1 %v1352_v4  ;;  %v273_v46 = vpack.c.bf16 %v129_v42, %v127_v41  ;;  %v128_v50 = vld [vmem:[%s2694_s0 + $0x370] sm:$0xff]  ;;  %v31_v51 = vld [vmem:[%s2694_s0 + $0x68] sm:$0xff]  ;;  %v33_v52 = vld [vmem:[%s2694_s0 + $0x78] sm:$0xff]  ;;  %v222_v55 = vpack.c.bf16 %v28_v48, %v26_v47 }
   0xf   :  { %454 = vmatprep.subr.bf16.mxu0 %v1367_v0  ;;  %1320 = vmatprep.subr.bf16.mxu1 %v1367_v0  ;;  %v131_v53 = vld [vmem:[%s2694_s0 + $0x388] sm:$0xff]  ;;  %v133_v54 = vld [vmem:[%s2694_s0 + $0x398] sm:$0xff]  ;;  %v272_v56 = vpack.c.bf16 %v128_v50, %v126_v49  ;;  %v225_v57 = vpack.c.bf16 %v33_v52, %v31_v51  ;;  %v30_v59 = vld [vmem:[%s2694_s0 + $0x60] sm:$0xff] }
  0x10   :  { %v275_v58 = vpack.c.bf16 %v133_v54, %v131_v53  ;;  %v32_v60 = vld [vmem:[%s2694_s0 + $0x70] sm:$0xff]  ;;  %v130_v61 = vld [vmem:[%s2694_s0 + $0x380] sm:$0xff]  ;;  %v35_v63 = vld [vmem:[%s2694_s0 + $0x88] sm:$0xff] }
  0x11   :  { %v132_v62 = vld [vmem:[%s2694_s0 + $0x390] sm:$0xff]  ;;  %v135_v1 = vld [vmem:[%s2694_s0 + $0x3a8] sm:$0xff]  ;;  %v137_v2 = vld [vmem:[%s2694_s0 + $0x3b8] sm:$0xff]  ;;  %v224_v3 = vpack.c.bf16 %v32_v60, %v30_v59 }
  0x12   :  { %455 = vmatpush1.bf16.msra.mxu0 %v1353_v5  ;;  %1336 = vmatpush1.bf16.msra.mxu1 %v1353_v5  ;;  %v274_v4 = vpack.c.bf16 %v132_v62, %v130_v61  ;;  %v277_v6 = vpack.c.bf16 %v137_v2, %v135_v1  ;;  %v34_v7 = vld [vmem:[%s2694_s0 + $0x80] sm:$0xff]  ;;  %v36_v8 = vld [vmem:[%s2694_s0 + $0x90] sm:$0xff]  ;;  %v41_v12 = vld [vmem:[%s2694_s0 + $0xb8] sm:$0xff] }
  0x13   :  { %456 = vmatprep.subr.bf16.mxu0 %v1367_v0  ;;  %1321 = vmatprep.subr.bf16.mxu1 %v1367_v0  ;;  %v134_v9 = vld [vmem:[%s2694_s0 + $0x3a0] sm:$0xff]  ;;  %v136_v10 = vld [vmem:[%s2694_s0 + $0x3b0] sm:$0xff]  ;;  %v43_v23 = vld [vmem:[%s2694_s0 + $0xc8] sm:$0xff] }
  0x14   :  { %v45_v24 = vld [vmem:[%s2694_s0 + $0xd8] sm:$0xff]  ;;  %v143_v25 = vld [vmem:[%s2694_s0 + $0x3e8] sm:$0xff] }
  0x15   :  { %v145_v26 = vld [vmem:[%s2694_s0 + $0x3f8] sm:$0xff]  ;;  %v231_v29 = vpack.c.bf16 %v45_v24, %v43_v23  ;;  %v47_v35 = vld [vmem:[%s2694_s0 + $0xe8] sm:$0xff] }
  0x16   :  { %457 = vmatpush1.bf16.msra.mxu0 %v1354_v11  ;;  %1337 = vmatpush1.bf16.msra.mxu1 %v1354_v11  ;;  %v39_v11 = vld [vmem:[%s2694_s0 + $0xa8] sm:$0xff]  ;;  %v281_v30 = vpack.c.bf16 %v145_v26, %v143_v25  ;;  %v49_v36 = vld [vmem:[%s2694_s0 + $0xf8] sm:$0xff] }
  0x17   :  { %458 = vmatprep.subr.bf16.mxu0 %v1367_v0  ;;  %1322 = vmatprep.subr.bf16.mxu1 %v1367_v0  ;;  %v147_v37 = vld [vmem:[%s2694_s0 + $0x408] sm:$0xff]  ;;  %v149_v38 = vld [vmem:[%s2694_s0 + $0x418] sm:$0xff]  ;;  %v233_v41 = vpack.c.bf16 %v49_v36, %v47_v35 }
  0x18   :  { %v283_v42 = vpack.c.bf16 %v149_v38, %v147_v37  ;;  %v51_v47 = vld [vmem:[%s2694_s0 + $0x108] sm:$0xff]  ;;  %v53_v48 = vld [vmem:[%s2694_s0 + $0x118] sm:$0xff] }
  0x19   :  { %v151_v49 = vld [vmem:[%s2694_s0 + $0x428] sm:$0xff]  ;;  %v153_v50 = vld [vmem:[%s2694_s0 + $0x438] sm:$0xff]  ;;  %v235_v53 = vpack.c.bf16 %v53_v48, %v51_v47 }
  0x1a   :  { %459 = vmatpush1.bf16.msra.mxu0 %v1355_v13  ;;  %1338 = vmatpush1.bf16.msra.mxu1 %v1355_v13  ;;  %v139_v13 = vld [vmem:[%s2694_s0 + $0x3c8] sm:$0xff]  ;;  %v285_v54 = vpack.c.bf16 %v153_v50, %v151_v49  ;;  %v57_v60 = vld [vmem:[%s2694_s0 + $0x138] sm:$0xff] }
  0x1b   :  { %460 = vmatprep.subr.bf16.mxu0 %v1367_v0  ;;  %1323 = vmatprep.subr.bf16.mxu1 %v1367_v0  ;;  %v55_v59 = vld [vmem:[%s2694_s0 + $0x128] sm:$0xff]  ;;  %v157_v62 = vld [vmem:[%s2694_s0 + $0x458] sm:$0xff] }
  0x1c   :  { %v155_v61 = vld [vmem:[%s2694_s0 + $0x448] sm:$0xff]  ;;  %v237_v1 = vpack.c.bf16 %v57_v60, %v55_v59 }
  0x1d   :  { %v287_v2 = vpack.c.bf16 %v157_v62, %v155_v61 }
  0x1e   :  { %461 = vmatpush1.bf16.msra.mxu0 %v1356_v14  ;;  %1339 = vmatpush1.bf16.msra.mxu1 %v1356_v14  ;;  %v141_v14 = vld [vmem:[%s2694_s0 + $0x3d8] sm:$0xff] }
  0x1f   :  { %462 = vmatprep.subr.bf16.mxu0 %v1367_v0  ;;  %1324 = vmatprep.subr.bf16.mxu1 %v1367_v0 }
  0x22   :  { %463 = vmatpush1.bf16.msra.mxu0 %v1357_v15  ;;  %1340 = vmatpush1.bf16.msra.mxu1 %v1357_v15  ;;  %v226_v15 = vpack.c.bf16 %v36_v8, %v34_v7  ;;  %v59_v7 = vld [vmem:[%s2694_s0 + $0x148] sm:$0xff]  ;;  %v61_v8 = vld [vmem:[%s2694_s0 + $0x158] sm:$0xff] }
  0x23   :  { %464 = vmatprep.subr.bf16.mxu0 %v1367_v0  ;;  %1325 = vmatprep.subr.bf16.mxu1 %v1367_v0 }
  0x26   :  { %465 = vmatpush1.bf16.msra.mxu0 %v1358_v16  ;;  %1341 = vmatpush1.bf16.msra.mxu1 %v1358_v16  ;;  %v276_v16 = vpack.c.bf16 %v136_v10, %v134_v9  ;;  %v159_v9 = vld [vmem:[%s2694_s0 + $0x468] sm:$0xff]  ;;  %v161_v10 = vld [vmem:[%s2694_s0 + $0x478] sm:$0xff] }
  0x27   :  { %466 = vmatprep.subr.bf16.mxu0 %v1367_v0  ;;  %1326 = vmatprep.subr.bf16.mxu1 %v1367_v0 }
  0x2a   :  { %467 = vmatpush1.bf16.msra.mxu0 %v1359_v17  ;;  %1342 = vmatpush1.bf16.msra.mxu1 %v1359_v17  ;;  %v229_v17 = vpack.c.bf16 %v41_v12, %v39_v11 }
  0x2b   :  { %468 = vmatprep.subr.bf16.mxu0 %v1367_v0  ;;  %1327 = vmatprep.subr.bf16.mxu1 %v1367_v0 }
  0x2e   :  { %469 = vmatpush1.bf16.msra.mxu0 %v1360_v18  ;;  %1343 = vmatpush1.bf16.msra.mxu1 %v1360_v18  ;;  %v279_v18 = vpack.c.bf16 %v141_v14, %v139_v13  ;;  %v239_v13 = vpack.c.bf16 %v61_v8, %v59_v7  ;;  %v289_v14 = vpack.c.bf16 %v161_v10, %v159_v9 }
  0x2f   :  { %470 = vmatprep.subr.bf16.mxu0 %v1367_v0  ;;  %1328 = vmatprep.subr.bf16.mxu1 %v1367_v0 }
  0x32   :  { %471 = vmatpush1.bf16.msra.mxu0 %v1361_v19  ;;  %1344 = vmatpush1.bf16.msra.mxu1 %v1361_v19  ;;  %v38_v19 = vld [vmem:[%s2694_s0 + $0xa0] sm:$0xff] }
  0x33   :  { %472 = vmatprep.subr.bf16.mxu0 %v1367_v0  ;;  %1329 = vmatprep.subr.bf16.mxu1 %v1367_v0 }
  0x36   :  { %473 = vmatpush1.bf16.msra.mxu0 %v1362_v20  ;;  %1345 = vmatpush1.bf16.msra.mxu1 %v1362_v20  ;;  %v40_v20 = vld [vmem:[%s2694_s0 + $0xb0] sm:$0xff] }
  0x37   :  { %474 = vmatprep.subr.bf16.mxu0 %v1367_v0  ;;  %1330 = vmatprep.subr.bf16.mxu1 %v1367_v0  ;;  %v228_v27 = vpack.c.bf16 %v40_v20, %v38_v19  ;;  %v63_v19 = vld [vmem:[%s2694_s0 + $0x168] sm:$0xff]  ;;  %v65_v20 = vld [vmem:[%s2694_s0 + $0x178] sm:$0xff] }
  0x38   :  { %v241_v25 = vpack.c.bf16 %v65_v20, %v63_v19 }
  0x3a   :  { %475 = vmatpush1.bf16.msra.mxu0 %v1363_v21  ;;  %1346 = vmatpush1.bf16.msra.mxu1 %v1363_v21  ;;  %v138_v21 = vld [vmem:[%s2694_s0 + $0x3c0] sm:$0xff] }
  0x3b   :  { %476 = vmatprep.subr.bf16.mxu0 %v1367_v0  ;;  %1331 = vmatprep.subr.bf16.mxu1 %v1367_v0  ;;  %v37_v0 = vld [vmem:[%s2694_s0 + $0x98] sm:$0xff] }
  0x3c   :  { %v227_v5 = vpack.c.bf16 %v37_v0, %v35_v63 }
  0x3e   :  { %477 = vmatpush1.bf16.msra.mxu0 %v1364_v22  ;;  %1347 = vmatpush1.bf16.msra.mxu1 %v1364_v22  ;;  %v140_v22 = vld [vmem:[%s2694_s0 + $0x3d0] sm:$0xff] }
  0x3f   :  { %v278_v28 = vpack.c.bf16 %v140_v22, %v138_v21  ;;  %v163_v21 = vld [vmem:[%s2694_s0 + $0x488] sm:$0xff]  ;;  %v165_v22 = vld [vmem:[%s2694_s0 + $0x498] sm:$0xff] }
  0x40   :  { %v291_v26 = vpack.c.bf16 %v165_v22, %v163_v21 }
  0x41   :  { %479 = vmatmul.mubr.bf16.vlgmr.msra.gmra.mrb[0].mxu0 %v218_v31  ;;  %679 = vmatmul.mubr.bf16.vlgmr.msra.gmra.mrb[0].mxu1 %v268_v32  ;;  %v42_v31 = vld [vmem:[%s2694_s0 + $0xc0] sm:$0xff]  ;;  %v44_v32 = vld [vmem:[%s2694_s0 + $0xd0] sm:$0xff] }
  0x42   :  { %486 = vmatprep.mubr.bf16.mxu0 %v221_v33  ;;  %686 = vmatprep.mubr.bf16.mxu1 %v271_v34  ;;  %v142_v33 = vld [vmem:[%s2694_s0 + $0x3e0] sm:$0xff]  ;;  %v144_v34 = vld [vmem:[%s2694_s0 + $0x3f0] sm:$0xff]  ;;  %v230_v39 = vpack.c.bf16 %v44_v32, %v42_v31  ;;  %v67_v31 = vld [vmem:[%s2694_s0 + $0x188] sm:$0xff] }
  0x43   :  { %v280_v40 = vpack.c.bf16 %v144_v34, %v142_v33  ;;  %v69_v32 = vld [vmem:[%s2694_s0 + $0x198] sm:$0xff]  ;;  %v167_v33 = vld [vmem:[%s2694_s0 + $0x4a8] sm:$0xff] }
  0x44   :  { %v169_v34 = vld [vmem:[%s2694_s0 + $0x4b8] sm:$0xff]  ;;  %v243_v37 = vpack.c.bf16 %v69_v32, %v67_v31 }
  0x45   :  { %v293_v38 = vpack.c.bf16 %v169_v34, %v167_v33 }
  0x49   :  { %487 = vmatmul.mubr.bf16.gmra.mrb[4].mxu0 %v220_v43  ;;  %687 = vmatmul.mubr.bf16.gmra.mrb[4].mxu1 %v270_v44  ;;  %v46_v43 = vld [vmem:[%s2694_s0 + $0xe0] sm:$0xff]  ;;  %v48_v44 = vld [vmem:[%s2694_s0 + $0xf0] sm:$0xff] }
  0x4a   :  { %494 = vmatprep.mubr.bf16.mxu0 %v223_v45  ;;  %694 = vmatprep.mubr.bf16.mxu1 %v273_v46  ;;  %v146_v45 = vld [vmem:[%s2694_s0 + $0x400] sm:$0xff]  ;;  %v148_v46 = vld [vmem:[%s2694_s0 + $0x410] sm:$0xff]  ;;  %v232_v51 = vpack.c.bf16 %v48_v44, %v46_v43  ;;  %v71_v43 = vld [vmem:[%s2694_s0 + $0x1a8] sm:$0xff] }
  0x4b   :  { %v282_v52 = vpack.c.bf16 %v148_v46, %v146_v45  ;;  %v73_v44 = vld [vmem:[%s2694_s0 + $0x1b8] sm:$0xff]  ;;  %v171_v45 = vld [vmem:[%s2694_s0 + $0x4c8] sm:$0xff] }
  0x4c   :  { %v173_v46 = vld [vmem:[%s2694_s0 + $0x4d8] sm:$0xff]  ;;  %v245_v49 = vpack.c.bf16 %v73_v44, %v71_v43 }
  0x4d   :  { %v295_v50 = vpack.c.bf16 %v173_v46, %v171_v45 }
  0x51   :  { %495 = vmatmul.mubr.bf16.gmra.mrb[8].mxu0 %v222_v55  ;;  %695 = vmatmul.mubr.bf16.gmra.mrb[8].mxu1 %v272_v56  ;;  %v50_v55 = vld [vmem:[%s2694_s0 + $0x100] sm:$0xff]  ;;  %v52_v56 = vld [vmem:[%s2694_s0 + $0x110] sm:$0xff] }
  0x52   :  { %502 = vmatprep.mubr.bf16.mxu0 %v225_v57  ;;  %702 = vmatprep.mubr.bf16.mxu1 %v275_v58  ;;  %v150_v57 = vld [vmem:[%s2694_s0 + $0x420] sm:$0xff]  ;;  %v152_v58 = vld [vmem:[%s2694_s0 + $0x430] sm:$0xff]  ;;  %v234_v63 = vpack.c.bf16 %v52_v56, %v50_v55  ;;  %v75_v55 = vld [vmem:[%s2694_s0 + $0x1c8] sm:$0xff] }
  0x53   :  { %v284_v0 = vpack.c.bf16 %v152_v58, %v150_v57  ;;  %v77_v56 = vld [vmem:[%s2694_s0 + $0x1d8] sm:$0xff]  ;;  %v175_v57 = vld [vmem:[%s2694_s0 + $0x4e8] sm:$0xff] }
  0x54   :  { %v177_v58 = vld [vmem:[%s2694_s0 + $0x4f8] sm:$0xff]  ;;  %v247_v61 = vpack.c.bf16 %v77_v56, %v75_v55 }
  0x55   :  { %v297_v62 = vpack.c.bf16 %v177_v58, %v175_v57 }
  0x59   :  { %503 = vmatmul.mubr.bf16.gmra.mrb[12].mxu0 %v224_v3  ;;  %703 = vmatmul.mubr.bf16.gmra.mrb[12].mxu1 %v274_v4  ;;  %v54_v3 = vld [vmem:[%s2694_s0 + $0x120] sm:$0xff]  ;;  %v56_v4 = vld [vmem:[%s2694_s0 + $0x130] sm:$0xff] }
  0x5a   :  { %510 = vmatprep.mubr.bf16.mxu0 %v227_v5  ;;  %710 = vmatprep.mubr.bf16.mxu1 %v277_v6  ;;  %v154_v5 = vld [vmem:[%s2694_s0 + $0x440] sm:$0xff]  ;;  %v156_v6 = vld [vmem:[%s2694_s0 + $0x450] sm:$0xff]  ;;  %v236_v11 = vpack.c.bf16 %v56_v4, %v54_v3  ;;  %v79_v3 = vld [vmem:[%s2694_s0 + $0x1e8] sm:$0xff] }
  0x5b   :  { %v286_v12 = vpack.c.bf16 %v156_v6, %v154_v5  ;;  %v81_v4 = vld [vmem:[%s2694_s0 + $0x1f8] sm:$0xff]  ;;  %v179_v5 = vld [vmem:[%s2694_s0 + $0x508] sm:$0xff] }
  0x5c   :  { %v181_v6 = vld [vmem:[%s2694_s0 + $0x518] sm:$0xff]  ;;  %v249_v9 = vpack.c.bf16 %v81_v4, %v79_v3 }
  0x5d   :  { %v299_v10 = vpack.c.bf16 %v181_v6, %v179_v5 }
  0x61   :  { %511 = vmatmul.mubr.bf16.gmra.mrb[16].mxu0 %v226_v15  ;;  %711 = vmatmul.mubr.bf16.gmra.mrb[16].mxu1 %v276_v16  ;;  %v58_v15 = vld [vmem:[%s2694_s0 + $0x140] sm:$0xff]  ;;  %v60_v16 = vld [vmem:[%s2694_s0 + $0x150] sm:$0xff] }
  0x62   :  { %518 = vmatprep.mubr.bf16.mxu0 %v229_v17  ;;  %718 = vmatprep.mubr.bf16.mxu1 %v279_v18  ;;  %v158_v17 = vld [vmem:[%s2694_s0 + $0x460] sm:$0xff]  ;;  %v160_v18 = vld [vmem:[%s2694_s0 + $0x470] sm:$0xff]  ;;  %v238_v23 = vpack.c.bf16 %v60_v16, %v58_v15  ;;  %v83_v15 = vld [vmem:[%s2694_s0 + $0x208] sm:$0xff] }
  0x63   :  { %v288_v24 = vpack.c.bf16 %v160_v18, %v158_v17  ;;  %v85_v16 = vld [vmem:[%s2694_s0 + $0x218] sm:$0xff]  ;;  %v183_v17 = vld [vmem:[%s2694_s0 + $0x528] sm:$0xff] }
  0x64   :  { %v185_v18 = vld [vmem:[%s2694_s0 + $0x538] sm:$0xff]  ;;  %v251_v21 = vpack.c.bf16 %v85_v16, %v83_v15 }
  0x65   :  { %v301_v22 = vpack.c.bf16 %v185_v18, %v183_v17 }
  0x69   :  { %519 = vmatmul.mubr.bf16.gmra.mrb[20].mxu0 %v228_v27  ;;  %719 = vmatmul.mubr.bf16.gmra.mrb[20].mxu1 %v278_v28  ;;  %v62_v27 = vld [vmem:[%s2694_s0 + $0x160] sm:$0xff]  ;;  %v64_v28 = vld [vmem:[%s2694_s0 + $0x170] sm:$0xff] }
  0x6a   :  { %526 = vmatprep.mubr.bf16.mxu0 %v231_v29  ;;  %726 = vmatprep.mubr.bf16.mxu1 %v281_v30  ;;  %v162_v29 = vld [vmem:[%s2694_s0 + $0x480] sm:$0xff]  ;;  %v164_v30 = vld [vmem:[%s2694_s0 + $0x490] sm:$0xff]  ;;  %v240_v35 = vpack.c.bf16 %v64_v28, %v62_v27  ;;  %v87_v27 = vld [vmem:[%s2694_s0 + $0x228] sm:$0xff] }
  0x6b   :  { %v290_v36 = vpack.c.bf16 %v164_v30, %v162_v29  ;;  %v89_v28 = vld [vmem:[%s2694_s0 + $0x238] sm:$0xff]  ;;  %v187_v29 = vld [vmem:[%s2694_s0 + $0x548] sm:$0xff] }
  0x6c   :  { %v189_v30 = vld [vmem:[%s2694_s0 + $0x558] sm:$0xff]  ;;  %v253_v33 = vpack.c.bf16 %v89_v28, %v87_v27 }
  0x6d   :  { %v303_v34 = vpack.c.bf16 %v189_v30, %v187_v29 }
  0x71   :  { %527 = vmatmul.mubr.bf16.gmra.mrb[24].mxu0 %v230_v39  ;;  %727 = vmatmul.mubr.bf16.gmra.mrb[24].mxu1 %v280_v40  ;;  %v66_v39 = vld [vmem:[%s2694_s0 + $0x180] sm:$0xff]  ;;  %v68_v40 = vld [vmem:[%s2694_s0 + $0x190] sm:$0xff] }
  0x72   :  { %534 = vmatprep.mubr.bf16.mxu0 %v233_v41  ;;  %734 = vmatprep.mubr.bf16.mxu1 %v283_v42  ;;  %v166_v41 = vld [vmem:[%s2694_s0 + $0x4a0] sm:$0xff]  ;;  %v168_v42 = vld [vmem:[%s2694_s0 + $0x4b0] sm:$0xff]  ;;  %v242_v47 = vpack.c.bf16 %v68_v40, %v66_v39  ;;  %v91_v39 = vld [vmem:[%s2694_s0 + $0x248] sm:$0xff] }
  0x73   :  { %v292_v48 = vpack.c.bf16 %v168_v42, %v166_v41  ;;  %v93_v40 = vld [vmem:[%s2694_s0 + $0x258] sm:$0xff]  ;;  %v191_v41 = vld [vmem:[%s2694_s0 + $0x568] sm:$0xff] }
  0x74   :  { %v193_v42 = vld [vmem:[%s2694_s0 + $0x578] sm:$0xff]  ;;  %v255_v45 = vpack.c.bf16 %v93_v40, %v91_v39 }
  0x75   :  { %v305_v46 = vpack.c.bf16 %v193_v42, %v191_v41 }
  0x79   :  { %535 = vmatmul.mubr.bf16.gmra.mrb[28].mxu0 %v232_v51  ;;  %735 = vmatmul.mubr.bf16.gmra.mrb[28].mxu1 %v282_v52  ;;  %v70_v51 = vld [vmem:[%s2694_s0 + $0x1a0] sm:$0xff]  ;;  %v72_v52 = vld [vmem:[%s2694_s0 + $0x1b0] sm:$0xff] }
  0x7a   :  { %542 = vmatprep.mubr.bf16.mxu0 %v235_v53  ;;  %742 = vmatprep.mubr.bf16.mxu1 %v285_v54  ;;  %v170_v53 = vld [vmem:[%s2694_s0 + $0x4c0] sm:$0xff]  ;;  %v172_v54 = vld [vmem:[%s2694_s0 + $0x4d0] sm:$0xff]  ;;  %v244_v59 = vpack.c.bf16 %v72_v52, %v70_v51  ;;  %v95_v51 = vld [vmem:[%s2694_s0 + $0x268] sm:$0xff] }
  0x7b   :  { %v294_v60 = vpack.c.bf16 %v172_v54, %v170_v53  ;;  %v97_v52 = vld [vmem:[%s2694_s0 + $0x278] sm:$0xff]  ;;  %v195_v53 = vld [vmem:[%s2694_s0 + $0x588] sm:$0xff] }
  0x7c   :  { %v197_v54 = vld [vmem:[%s2694_s0 + $0x598] sm:$0xff]  ;;  %v257_v57 = vpack.c.bf16 %v97_v52, %v95_v51 }
  0x7d   :  { %v307_v58 = vpack.c.bf16 %v197_v54, %v195_v53 }
  0x81   :  { %543 = vmatmul.mubr.bf16.gmra.mrb[32].mxu0 %v234_v63  ;;  %743 = vmatmul.mubr.bf16.gmra.mrb[32].mxu1 %v284_v0  ;;  %v74_v63 = vld [vmem:[%s2694_s0 + $0x1c0] sm:$0xff]  ;;  %v76_v0 = vld [vmem:[%s2694_s0 + $0x1d0] sm:$0xff] }
  0x82   :  { %550 = vmatprep.mubr.bf16.mxu0 %v237_v1  ;;  %750 = vmatprep.mubr.bf16.mxu1 %v287_v2  ;;  %v174_v1 = vld [vmem:[%s2694_s0 + $0x4e0] sm:$0xff]  ;;  %v176_v2 = vld [vmem:[%s2694_s0 + $0x4f0] sm:$0xff]  ;;  %v246_v7 = vpack.c.bf16 %v76_v0, %v74_v63  ;;  %v99_v63 = vld [vmem:[%s2694_s0 + $0x288] sm:$0xff] }
  0x83   :  { %v296_v8 = vpack.c.bf16 %v176_v2, %v174_v1  ;;  %v101_v0 = vld [vmem:[%s2694_s0 + $0x298] sm:$0xff]  ;;  %v199_v1 = vld [vmem:[%s2694_s0 + $0x5a8] sm:$0xff] }
  0x84   :  { %v201_v2 = vld [vmem:[%s2694_s0 + $0x5b8] sm:$0xff]  ;;  %v259_v5 = vpack.c.bf16 %v101_v0, %v99_v63  ;;  %v2081_v63 = vld [vmem:[%s2696_s3] ss:$0 sm:$0xff] }
  0x85   :  { %v309_v6 = vpack.c.bf16 %v201_v2, %v199_v1 }
  0x89   :  { %551 = vmatmul.mubr.bf16.gmra.mrb[36].mxu0 %v236_v11  ;;  %751 = vmatmul.mubr.bf16.gmra.mrb[36].mxu1 %v286_v12  ;;  %v78_v11 = vld [vmem:[%s2694_s0 + $0x1e0] sm:$0xff]  ;;  %v80_v12 = vld [vmem:[%s2694_s0 + $0x1f0] sm:$0xff] }
  0x8a   :  { %558 = vmatprep.mubr.bf16.mxu0 %v239_v13  ;;  %758 = vmatprep.mubr.bf16.mxu1 %v289_v14  ;;  %v178_v13 = vld [vmem:[%s2694_s0 + $0x500] sm:$0xff]  ;;  %v180_v14 = vld [vmem:[%s2694_s0 + $0x510] sm:$0xff]  ;;  %v248_v19 = vpack.c.bf16 %v80_v12, %v78_v11  ;;  %v103_v11 = vld [vmem:[%s2694_s0 + $0x2a8] sm:$0xff] }
  0x8b   :  { %v298_v20 = vpack.c.bf16 %v180_v14, %v178_v13  ;;  %v105_v12 = vld [vmem:[%s2694_s0 + $0x2b8] sm:$0xff]  ;;  %v203_v13 = vld [vmem:[%s2694_s0 + $0x5c8] sm:$0xff] }
  0x8c   :  { %v205_v14 = vld [vmem:[%s2694_s0 + $0x5d8] sm:$0xff]  ;;  %v261_v17 = vpack.c.bf16 %v105_v12, %v103_v11 }
  0x8d   :  { %v311_v18 = vpack.c.bf16 %v205_v14, %v203_v13 }
  0x91   :  { %559 = vmatmul.mubr.bf16.gmra.mrb[40].mxu0 %v238_v23  ;;  %759 = vmatmul.mubr.bf16.gmra.mrb[40].mxu1 %v288_v24  ;;  %v82_v23 = vld [vmem:[%s2694_s0 + $0x200] sm:$0xff]  ;;  %v84_v24 = vld [vmem:[%s2694_s0 + $0x210] sm:$0xff] }
  0x92   :  { %566 = vmatprep.mubr.bf16.mxu0 %v241_v25  ;;  %766 = vmatprep.mubr.bf16.mxu1 %v291_v26  ;;  %v182_v25 = vld [vmem:[%s2694_s0 + $0x520] sm:$0xff]  ;;  %v184_v26 = vld [vmem:[%s2694_s0 + $0x530] sm:$0xff]  ;;  %v250_v31 = vpack.c.bf16 %v84_v24, %v82_v23  ;;  %v107_v23 = vld [vmem:[%s2694_s0 + $0x2c8] sm:$0xff] }
  0x93   :  { %v300_v32 = vpack.c.bf16 %v184_v26, %v182_v25  ;;  %v109_v24 = vld [vmem:[%s2694_s0 + $0x2d8] sm:$0xff]  ;;  %v207_v25 = vld [vmem:[%s2694_s0 + $0x5e8] sm:$0xff] }
  0x94   :  { %v209_v26 = vld [vmem:[%s2694_s0 + $0x5f8] sm:$0xff]  ;;  %v263_v29 = vpack.c.bf16 %v109_v24, %v107_v23 }
  0x95   :  { %v313_v30 = vpack.c.bf16 %v209_v26, %v207_v25 }
  0x99   :  { %567 = vmatmul.mubr.bf16.gmra.mrb[44].mxu0 %v240_v35  ;;  %767 = vmatmul.mubr.bf16.gmra.mrb[44].mxu1 %v290_v36  ;;  %v86_v35 = vld [vmem:[%s2694_s0 + $0x220] sm:$0xff]  ;;  %v88_v36 = vld [vmem:[%s2694_s0 + $0x230] sm:$0xff] }
  0x9a   :  { %574 = vmatprep.mubr.bf16.mxu0 %v243_v37  ;;  %774 = vmatprep.mubr.bf16.mxu1 %v293_v38  ;;  %v186_v37 = vld [vmem:[%s2694_s0 + $0x540] sm:$0xff]  ;;  %v188_v38 = vld [vmem:[%s2694_s0 + $0x550] sm:$0xff]  ;;  %v252_v43 = vpack.c.bf16 %v88_v36, %v86_v35  ;;  %v111_v35 = vld [vmem:[%s2694_s0 + $0x2e8] sm:$0xff] }
  0x9b   :  { %v302_v44 = vpack.c.bf16 %v188_v38, %v186_v37  ;;  %v113_v36 = vld [vmem:[%s2694_s0 + $0x2f8] sm:$0xff]  ;;  %v211_v37 = vld [vmem:[%s2694_s0 + $0x608] sm:$0xff] }
  0x9c   :  { %v213_v38 = vld [vmem:[%s2694_s0 + $0x618] sm:$0xff]  ;;  %v265_v41 = vpack.c.bf16 %v113_v36, %v111_v35 }
  0x9d   :  { %v315_v42 = vpack.c.bf16 %v213_v38, %v211_v37 }
  0xa1   :  { %575 = vmatmul.mubr.bf16.gmra.mrb[48].mxu0 %v242_v47  ;;  %775 = vmatmul.mubr.bf16.gmra.mrb[48].mxu1 %v292_v48  ;;  %v90_v47 = vld [vmem:[%s2694_s0 + $0x240] sm:$0xff]  ;;  %v92_v48 = vld [vmem:[%s2694_s0 + $0x250] sm:$0xff] }
  0xa2   :  { %582 = vmatprep.mubr.bf16.mxu0 %v245_v49  ;;  %782 = vmatprep.mubr.bf16.mxu1 %v295_v50  ;;  %v190_v49 = vld [vmem:[%s2694_s0 + $0x560] sm:$0xff]  ;;  %v192_v50 = vld [vmem:[%s2694_s0 + $0x570] sm:$0xff]  ;;  %v254_v55 = vpack.c.bf16 %v92_v48, %v90_v47  ;;  %v115_v47 = vld [vmem:[%s2694_s0 + $0x308] sm:$0xff] }
  0xa3   :  { %v304_v56 = vpack.c.bf16 %v192_v50, %v190_v49  ;;  %v117_v48 = vld [vmem:[%s2694_s0 + $0x318] sm:$0xff]  ;;  %v215_v49 = vld [vmem:[%s2694_s0 + $0x628] sm:$0xff] }
  0xa4   :  { %v217_v50 = vld [vmem:[%s2694_s0 + $0x638] sm:$0xff]  ;;  %v267_v53 = vpack.c.bf16 %v117_v48, %v115_v47 }
  0xa5   :  { %v317_v54 = vpack.c.bf16 %v217_v50, %v215_v49 }
  0xa9   :  { %583 = vmatmul.mubr.bf16.gmra.mrb[52].mxu0 %v244_v59  ;;  %783 = vmatmul.mubr.bf16.gmra.mrb[52].mxu1 %v294_v60  ;;  %v94_v59 = vld [vmem:[%s2694_s0 + $0x260] sm:$0xff]  ;;  %v96_v60 = vld [vmem:[%s2694_s0 + $0x270] sm:$0xff] }
  0xaa   :  { %590 = vmatprep.mubr.bf16.mxu0 %v247_v61  ;;  %790 = vmatprep.mubr.bf16.mxu1 %v297_v62  ;;  %v194_v61 = vld [vmem:[%s2694_s0 + $0x580] sm:$0xff]  ;;  %v196_v62 = vld [vmem:[%s2694_s0 + $0x590] sm:$0xff]  ;;  %v256_v3 = vpack.c.bf16 %v96_v60, %v94_v59 }
  0xab   :  { %v306_v4 = vpack.c.bf16 %v196_v62, %v194_v61  ;;  %v2076_v61 = vld [vmem:[%s2695_s2] ss:$0 sm:$0xff] }
  0xb1   :  { %591 = vmatmul.mubr.bf16.gmra.mrb[56].mxu0 %v246_v7  ;;  %791 = vmatmul.mubr.bf16.gmra.mrb[56].mxu1 %v296_v8  ;;  %v98_v7 = vld [vmem:[%s2694_s0 + $0x280] sm:$0xff]  ;;  %v100_v8 = vld [vmem:[%s2694_s0 + $0x290] sm:$0xff] }
  0xb2   :  { %598 = vmatprep.mubr.bf16.mxu0 %v249_v9  ;;  %798 = vmatprep.mubr.bf16.mxu1 %v299_v10  ;;  %v198_v9 = vld [vmem:[%s2694_s0 + $0x5a0] sm:$0xff]  ;;  %v200_v10 = vld [vmem:[%s2694_s0 + $0x5b0] sm:$0xff]  ;;  %v258_v15 = vpack.c.bf16 %v100_v8, %v98_v7 }
  0xb3   :  { %v308_v16 = vpack.c.bf16 %v200_v10, %v198_v9 }
  0xb9   :  { %599 = vmatmul.mubr.bf16.gmra.mrb[60].mxu0 %v248_v19  ;;  %799 = vmatmul.mubr.bf16.gmra.mrb[60].mxu1 %v298_v20  ;;  %v102_v19 = vld [vmem:[%s2694_s0 + $0x2a0] sm:$0xff]  ;;  %v104_v20 = vld [vmem:[%s2694_s0 + $0x2b0] sm:$0xff] }
  0xba   :  { %606 = vmatprep.mubr.bf16.mxu0 %v251_v21  ;;  %806 = vmatprep.mubr.bf16.mxu1 %v301_v22  ;;  %v202_v21 = vld [vmem:[%s2694_s0 + $0x5c0] sm:$0xff]  ;;  %v204_v22 = vld [vmem:[%s2694_s0 + $0x5d0] sm:$0xff]  ;;  %v260_v27 = vpack.c.bf16 %v104_v20, %v102_v19 }
  0xbb   :  { %v310_v28 = vpack.c.bf16 %v204_v22, %v202_v21 }
  0xc1   :  { %607 = vmatmul.mubr.bf16.gmra.mrb[64].mxu0 %v250_v31  ;;  %807 = vmatmul.mubr.bf16.gmra.mrb[64].mxu1 %v300_v32  ;;  %v106_v31 = vld [vmem:[%s2694_s0 + $0x2c0] sm:$0xff]  ;;  %v108_v32 = vld [vmem:[%s2694_s0 + $0x2d0] sm:$0xff] }
  0xc2   :  { %614 = vmatprep.mubr.bf16.mxu0 %v253_v33  ;;  %814 = vmatprep.mubr.bf16.mxu1 %v303_v34  ;;  %v206_v33 = vld [vmem:[%s2694_s0 + $0x5e0] sm:$0xff]  ;;  %v208_v34 = vld [vmem:[%s2694_s0 + $0x5f0] sm:$0xff]  ;;  %v262_v39 = vpack.c.bf16 %v108_v32, %v106_v31 }
  0xc3   :  { %v312_v40 = vpack.c.bf16 %v208_v34, %v206_v33 }
  0xc9   :  { %615 = vmatmul.mubr.bf16.gmra.mrb[68].mxu0 %v252_v43  ;;  %815 = vmatmul.mubr.bf16.gmra.mrb[68].mxu1 %v302_v44  ;;  %v110_v43 = vld [vmem:[%s2694_s0 + $0x2e0] sm:$0xff]  ;;  %v112_v44 = vld [vmem:[%s2694_s0 + $0x2f0] sm:$0xff] }
  0xca   :  { %622 = vmatprep.mubr.bf16.mxu0 %v255_v45  ;;  %822 = vmatprep.mubr.bf16.mxu1 %v305_v46  ;;  %v210_v45 = vld [vmem:[%s2694_s0 + $0x600] sm:$0xff]  ;;  %v212_v46 = vld [vmem:[%s2694_s0 + $0x610] sm:$0xff]  ;;  %v264_v51 = vpack.c.bf16 %v112_v44, %v110_v43 }
  0xcb   :  { %v314_v52 = vpack.c.bf16 %v212_v46, %v210_v45 }
  0xd1   :  { %623 = vmatmul.mubr.bf16.gmra.mrb[72].mxu0 %v254_v55  ;;  %823 = vmatmul.mubr.bf16.gmra.mrb[72].mxu1 %v304_v56  ;;  %v114_v55 = vld [vmem:[%s2694_s0 + $0x300] sm:$0xff]  ;;  %v116_v56 = vld [vmem:[%s2694_s0 + $0x310] sm:$0xff] }
  0xd2   :  { %630 = vmatprep.mubr.bf16.mxu0 %v257_v57  ;;  %830 = vmatprep.mubr.bf16.mxu1 %v307_v58  ;;  %v214_v57 = vld [vmem:[%s2694_s0 + $0x620] sm:$0xff]  ;;  %v216_v58 = vld [vmem:[%s2694_s0 + $0x630] sm:$0xff]  ;;  %v266_v59 = vpack.c.bf16 %v116_v56, %v114_v55 }
  0xd3   :  { %v316_v60 = vpack.c.bf16 %v216_v58, %v214_v57 }
  0xd9   :  { %631 = vmatmul.mubr.bf16.gmra.mrb[76].mxu0 %v256_v3  ;;  %831 = vmatmul.mubr.bf16.gmra.mrb[76].mxu1 %v306_v4 }
  0xda   :  { %638 = vmatprep.mubr.bf16.mxu0 %v259_v5  ;;  %838 = vmatprep.mubr.bf16.mxu1 %v309_v6 }
  0xe1   :  { %639 = vmatmul.mubr.bf16.gmra.mrb[80].mxu0 %v258_v15  ;;  %839 = vmatmul.mubr.bf16.gmra.mrb[80].mxu1 %v308_v16 }
  0xe2   :  { %646 = vmatprep.mubr.bf16.mxu0 %v261_v17  ;;  %846 = vmatprep.mubr.bf16.mxu1 %v311_v18 }
  0xe9   :  { %647 = vmatmul.mubr.bf16.gmra.mrb[84].mxu0 %v260_v27  ;;  %847 = vmatmul.mubr.bf16.gmra.mrb[84].mxu1 %v310_v28 }
  0xea   :  { %654 = vmatprep.mubr.bf16.mxu0 %v263_v29  ;;  %854 = vmatprep.mubr.bf16.mxu1 %v313_v30 }
  0xf1   :  { %655 = vmatmul.mubr.bf16.gmra.mrb[88].mxu0 %v262_v39  ;;  %855 = vmatmul.mubr.bf16.gmra.mrb[88].mxu1 %v312_v40 }
  0xf2   :  { %662 = vmatprep.mubr.bf16.mxu0 %v265_v41  ;;  %862 = vmatprep.mubr.bf16.mxu1 %v315_v42 }
  0xf9   :  { %663 = vmatmul.mubr.bf16.gmra.mrb[92].mxu0 %v264_v51  ;;  %863 = vmatmul.mubr.bf16.gmra.mrb[92].mxu1 %v314_v52 }
  0xfa   :  { %670 = vmatprep.mubr.bf16.mxu0 %v267_v53  ;;  %870 = vmatprep.mubr.bf16.mxu1 %v317_v54 }
 0x101   :  { %671 = vmatmul.mubr.bf16.gmra.mrb[96].mxu0 %v266_v59  ;;  %871 = vmatmul.mubr.bf16.gmra.mrb[96].mxu1 %v316_v60 }
 0x114   :  { %v480_v62 = vpop.f32.mrb[0].mxu0  ;;  %v680_v0 = vpop.f32.mrb[0].mxu1 }
 0x115   :  { %v886_v1 = vmul.f32 %v2076_v61, %v480_v62  ;;  %v936_v2 = vmul.f32 %v2076_v61, %v680_v0  ;;  %v482_v3 = vpop.f32.mrb[1].mxu0  ;;  %v682_v4 = vpop.f32.mrb[1].mxu1 }
 0x116   :  { %v483_v5 = vpop.f32.mrb[2].mxu0  ;;  %v683_v6 = vpop.f32.mrb[2].mxu1 }
 0x117   :  { %v993_v7 = vadd.f32 %v2081_v63, %v886_v1  ;;  %v1043_v8 = vadd.f32 %v2081_v63, %v936_v2  ;;  %v887_v9 = vmul.f32 %v2076_v61, %v483_v5  ;;  %v937_v10 = vmul.f32 %v2076_v61, %v683_v6  ;;  %v485_v11 = vpop.f32.mrb[3].mxu0  ;;  %v685_v12 = vpop.f32.mrb[3].mxu1 }
 0x119   :  { %v1093_v13 = vmax.f32 %v993_v7, 0.0  ;;  %v1143_v14 = vmax.f32 %v1043_v8, 0.0  ;;  %v994_v15 = vadd.f32 %v2081_v63, %v887_v9  ;;  %v1044_v16 = vadd.f32 %v2081_v63, %v937_v10 }
 0x11b   :  { %1194 = vst.msk [vmem:[%s2697_s4] sm:$0xff] %vm1193_vm0, %v1093_v13  ;;  %1244 = vst.msk [vmem:[%s2697_s4 + $0x190] sm:$0xff] %vm1193_vm0, %v1143_v14  ;;  %v1094_v17 = vmax.f32 %v994_v15, 0.0  ;;  %v1144_v18 = vmax.f32 %v1044_v16, 0.0 }
 0x11c   :  { %v488_v19 = vpop.f32.mrb[4].mxu0  ;;  %v688_v20 = vpop.f32.mrb[4].mxu1 }
 0x11d   :  { %1195 = vst.msk [vmem:[%s2697_s4 + $0x8] sm:$0xff] %vm1193_vm0, %v1094_v17  ;;  %1245 = vst.msk [vmem:[%s2697_s4 + $0x198] sm:$0xff] %vm1193_vm0, %v1144_v18  ;;  %v888_v21 = vmul.f32 %v2076_v61, %v488_v19  ;;  %v938_v22 = vmul.f32 %v2076_v61, %v688_v20  ;;  %v490_v23 = vpop.f32.mrb[5].mxu0  ;;  %v690_v24 = vpop.f32.mrb[5].mxu1 }
 0x11e   :  { %v491_v25 = vpop.f32.mrb[6].mxu0  ;;  %v691_v26 = vpop.f32.mrb[6].mxu1 }
 0x11f   :  { %v995_v27 = vadd.f32 %v2081_v63, %v888_v21  ;;  %v1045_v28 = vadd.f32 %v2081_v63, %v938_v22  ;;  %v889_v29 = vmul.f32 %v2076_v61, %v491_v25  ;;  %v939_v30 = vmul.f32 %v2076_v61, %v691_v26  ;;  %v493_v31 = vpop.f32.mrb[7].mxu0  ;;  %v693_v32 = vpop.f32.mrb[7].mxu1 }
 0x121   :  { %v1095_v33 = vmax.f32 %v995_v27, 0.0  ;;  %v1145_v34 = vmax.f32 %v1045_v28, 0.0  ;;  %v996_v35 = vadd.f32 %v2081_v63, %v889_v29  ;;  %v1046_v36 = vadd.f32 %v2081_v63, %v939_v30 }
 0x123   :  { %1196 = vst.msk [vmem:[%s2697_s4 + $0x10] sm:$0xff] %vm1193_vm0, %v1095_v33  ;;  %1246 = vst.msk [vmem:[%s2697_s4 + $0x1a0] sm:$0xff] %vm1193_vm0, %v1145_v34  ;;  %v1096_v37 = vmax.f32 %v996_v35, 0.0  ;;  %v1146_v38 = vmax.f32 %v1046_v36, 0.0 }
 0x124   :  { %v496_v39 = vpop.f32.mrb[8].mxu0  ;;  %v696_v40 = vpop.f32.mrb[8].mxu1 }
 0x125   :  { %1197 = vst.msk [vmem:[%s2697_s4 + $0x18] sm:$0xff] %vm1193_vm0, %v1096_v37  ;;  %1247 = vst.msk [vmem:[%s2697_s4 + $0x1a8] sm:$0xff] %vm1193_vm0, %v1146_v38  ;;  %v890_v41 = vmul.f32 %v2076_v61, %v496_v39  ;;  %v940_v42 = vmul.f32 %v2076_v61, %v696_v40  ;;  %v498_v43 = vpop.f32.mrb[9].mxu0  ;;  %v698_v44 = vpop.f32.mrb[9].mxu1 }
 0x126   :  { %v499_v45 = vpop.f32.mrb[10].mxu0  ;;  %v699_v46 = vpop.f32.mrb[10].mxu1 }
 0x127   :  { %v997_v47 = vadd.f32 %v2081_v63, %v890_v41  ;;  %v1047_v48 = vadd.f32 %v2081_v63, %v940_v42  ;;  %v891_v49 = vmul.f32 %v2076_v61, %v499_v45  ;;  %v941_v50 = vmul.f32 %v2076_v61, %v699_v46  ;;  %v501_v51 = vpop.f32.mrb[11].mxu0  ;;  %v701_v52 = vpop.f32.mrb[11].mxu1 }
 0x129   :  { %v1097_v53 = vmax.f32 %v997_v47, 0.0  ;;  %v1147_v54 = vmax.f32 %v1047_v48, 0.0  ;;  %v998_v55 = vadd.f32 %v2081_v63, %v891_v49  ;;  %v1048_v56 = vadd.f32 %v2081_v63, %v941_v50 }
 0x12b   :  { %1198 = vst.msk [vmem:[%s2697_s4 + $0x20] sm:$0xff] %vm1193_vm0, %v1097_v53  ;;  %1248 = vst.msk [vmem:[%s2697_s4 + $0x1b0] sm:$0xff] %vm1193_vm0, %v1147_v54  ;;  %v1098_v57 = vmax.f32 %v998_v55, 0.0  ;;  %v1148_v58 = vmax.f32 %v1048_v56, 0.0 }
 0x12c   :  { %v504_v59 = vpop.f32.mrb[12].mxu0  ;;  %v704_v60 = vpop.f32.mrb[12].mxu1 }
 0x12d   :  { %1199 = vst.msk [vmem:[%s2697_s4 + $0x28] sm:$0xff] %vm1193_vm0, %v1098_v57  ;;  %1249 = vst.msk [vmem:[%s2697_s4 + $0x1b8] sm:$0xff] %vm1193_vm0, %v1148_v58  ;;  %v892_v62 = vmul.f32 %v2076_v61, %v504_v59  ;;  %v942_v0 = vmul.f32 %v2076_v61, %v704_v60  ;;  %v506_v1 = vpop.f32.mrb[13].mxu0  ;;  %v706_v2 = vpop.f32.mrb[13].mxu1 }
 0x12e   :  { %v507_v3 = vpop.f32.mrb[14].mxu0  ;;  %v707_v4 = vpop.f32.mrb[14].mxu1 }
 0x12f   :  { %v999_v5 = vadd.f32 %v2081_v63, %v892_v62  ;;  %v1049_v6 = vadd.f32 %v2081_v63, %v942_v0  ;;  %v893_v7 = vmul.f32 %v2076_v61, %v507_v3  ;;  %v943_v8 = vmul.f32 %v2076_v61, %v707_v4  ;;  %v509_v9 = vpop.f32.mrb[15].mxu0  ;;  %v709_v10 = vpop.f32.mrb[15].mxu1 }
 0x131   :  { %v1099_v11 = vmax.f32 %v999_v5, 0.0  ;;  %v1149_v12 = vmax.f32 %v1049_v6, 0.0  ;;  %v1000_v13 = vadd.f32 %v2081_v63, %v893_v7  ;;  %v1050_v14 = vadd.f32 %v2081_v63, %v943_v8 }
 0x133   :  { %1200 = vst.msk [vmem:[%s2697_s4 + $0x30] sm:$0xff] %vm1193_vm0, %v1099_v11  ;;  %1250 = vst.msk [vmem:[%s2697_s4 + $0x1c0] sm:$0xff] %vm1193_vm0, %v1149_v12  ;;  %v1100_v15 = vmax.f32 %v1000_v13, 0.0  ;;  %v1150_v16 = vmax.f32 %v1050_v14, 0.0 }
 0x134   :  { %v512_v17 = vpop.f32.mrb[16].mxu0  ;;  %v712_v18 = vpop.f32.mrb[16].mxu1 }
 0x135   :  { %1201 = vst.msk [vmem:[%s2697_s4 + $0x38] sm:$0xff] %vm1193_vm0, %v1100_v15  ;;  %1251 = vst.msk [vmem:[%s2697_s4 + $0x1c8] sm:$0xff] %vm1193_vm0, %v1150_v16  ;;  %v894_v19 = vmul.f32 %v2076_v61, %v512_v17  ;;  %v944_v20 = vmul.f32 %v2076_v61, %v712_v18  ;;  %v514_v21 = vpop.f32.mrb[17].mxu0  ;;  %v714_v22 = vpop.f32.mrb[17].mxu1 }
 0x136   :  { %v515_v23 = vpop.f32.mrb[18].mxu0  ;;  %v715_v24 = vpop.f32.mrb[18].mxu1 }
 0x137   :  { %v1001_v25 = vadd.f32 %v2081_v63, %v894_v19  ;;  %v1051_v26 = vadd.f32 %v2081_v63, %v944_v20  ;;  %v895_v27 = vmul.f32 %v2076_v61, %v515_v23  ;;  %v945_v28 = vmul.f32 %v2076_v61, %v715_v24  ;;  %v517_v29 = vpop.f32.mrb[19].mxu0  ;;  %v717_v30 = vpop.f32.mrb[19].mxu1 }
 0x139   :  { %v1101_v31 = vmax.f32 %v1001_v25, 0.0  ;;  %v1151_v32 = vmax.f32 %v1051_v26, 0.0  ;;  %v1002_v33 = vadd.f32 %v2081_v63, %v895_v27  ;;  %v1052_v34 = vadd.f32 %v2081_v63, %v945_v28 }
 0x13b   :  { %1202 = vst.msk [vmem:[%s2697_s4 + $0x40] sm:$0xff] %vm1193_vm0, %v1101_v31  ;;  %1252 = vst.msk [vmem:[%s2697_s4 + $0x1d0] sm:$0xff] %vm1193_vm0, %v1151_v32  ;;  %v1102_v35 = vmax.f32 %v1002_v33, 0.0  ;;  %v1152_v36 = vmax.f32 %v1052_v34, 0.0 }
 0x13c   :  { %v520_v37 = vpop.f32.mrb[20].mxu0  ;;  %v720_v38 = vpop.f32.mrb[20].mxu1 }
 0x13d   :  { %1203 = vst.msk [vmem:[%s2697_s4 + $0x48] sm:$0xff] %vm1193_vm0, %v1102_v35  ;;  %1253 = vst.msk [vmem:[%s2697_s4 + $0x1d8] sm:$0xff] %vm1193_vm0, %v1152_v36  ;;  %v896_v39 = vmul.f32 %v2076_v61, %v520_v37  ;;  %v946_v40 = vmul.f32 %v2076_v61, %v720_v38  ;;  %v522_v41 = vpop.f32.mrb[21].mxu0  ;;  %v722_v42 = vpop.f32.mrb[21].mxu1 }
 0x13e   :  { %v523_v43 = vpop.f32.mrb[22].mxu0  ;;  %v723_v44 = vpop.f32.mrb[22].mxu1 }
 0x13f   :  { %v1003_v45 = vadd.f32 %v2081_v63, %v896_v39  ;;  %v1053_v46 = vadd.f32 %v2081_v63, %v946_v40  ;;  %v897_v47 = vmul.f32 %v2076_v61, %v523_v43  ;;  %v947_v48 = vmul.f32 %v2076_v61, %v723_v44  ;;  %v525_v49 = vpop.f32.mrb[23].mxu0  ;;  %v725_v50 = vpop.f32.mrb[23].mxu1 }
 0x141   :  { %v1103_v51 = vmax.f32 %v1003_v45, 0.0  ;;  %v1153_v52 = vmax.f32 %v1053_v46, 0.0  ;;  %v1004_v53 = vadd.f32 %v2081_v63, %v897_v47  ;;  %v1054_v54 = vadd.f32 %v2081_v63, %v947_v48 }
 0x143   :  { %1204 = vst.msk [vmem:[%s2697_s4 + $0x50] sm:$0xff] %vm1193_vm0, %v1103_v51  ;;  %1254 = vst.msk [vmem:[%s2697_s4 + $0x1e0] sm:$0xff] %vm1193_vm0, %v1153_v52  ;;  %v1104_v55 = vmax.f32 %v1004_v53, 0.0  ;;  %v1154_v56 = vmax.f32 %v1054_v54, 0.0 }
 0x144   :  { %v528_v57 = vpop.f32.mrb[24].mxu0  ;;  %v728_v58 = vpop.f32.mrb[24].mxu1 }
 0x145   :  { %1205 = vst.msk [vmem:[%s2697_s4 + $0x58] sm:$0xff] %vm1193_vm0, %v1104_v55  ;;  %1255 = vst.msk [vmem:[%s2697_s4 + $0x1e8] sm:$0xff] %vm1193_vm0, %v1154_v56  ;;  %v898_v59 = vmul.f32 %v2076_v61, %v528_v57  ;;  %v948_v60 = vmul.f32 %v2076_v61, %v728_v58  ;;  %v530_v62 = vpop.f32.mrb[25].mxu0  ;;  %v730_v0 = vpop.f32.mrb[25].mxu1 }
 0x146   :  { %v531_v1 = vpop.f32.mrb[26].mxu0  ;;  %v731_v2 = vpop.f32.mrb[26].mxu1 }
 0x147   :  { %v1005_v3 = vadd.f32 %v2081_v63, %v898_v59  ;;  %v1055_v4 = vadd.f32 %v2081_v63, %v948_v60  ;;  %v899_v5 = vmul.f32 %v2076_v61, %v531_v1  ;;  %v949_v6 = vmul.f32 %v2076_v61, %v731_v2  ;;  %v533_v7 = vpop.f32.mrb[27].mxu0  ;;  %v733_v8 = vpop.f32.mrb[27].mxu1 }
 0x149   :  { %v1105_v9 = vmax.f32 %v1005_v3, 0.0  ;;  %v1155_v10 = vmax.f32 %v1055_v4, 0.0  ;;  %v1006_v11 = vadd.f32 %v2081_v63, %v899_v5  ;;  %v1056_v12 = vadd.f32 %v2081_v63, %v949_v6 }
 0x14b   :  { %1206 = vst.msk [vmem:[%s2697_s4 + $0x60] sm:$0xff] %vm1193_vm0, %v1105_v9  ;;  %1256 = vst.msk [vmem:[%s2697_s4 + $0x1f0] sm:$0xff] %vm1193_vm0, %v1155_v10  ;;  %v1106_v13 = vmax.f32 %v1006_v11, 0.0  ;;  %v1156_v14 = vmax.f32 %v1056_v12, 0.0 }
 0x14c   :  { %v536_v15 = vpop.f32.mrb[28].mxu0  ;;  %v736_v16 = vpop.f32.mrb[28].mxu1 }
 0x14d   :  { %1207 = vst.msk [vmem:[%s2697_s4 + $0x68] sm:$0xff] %vm1193_vm0, %v1106_v13  ;;  %1257 = vst.msk [vmem:[%s2697_s4 + $0x1f8] sm:$0xff] %vm1193_vm0, %v1156_v14  ;;  %v900_v17 = vmul.f32 %v2076_v61, %v536_v15  ;;  %v950_v18 = vmul.f32 %v2076_v61, %v736_v16  ;;  %v538_v19 = vpop.f32.mrb[29].mxu0  ;;  %v738_v20 = vpop.f32.mrb[29].mxu1 }
 0x14e   :  { %v539_v21 = vpop.f32.mrb[30].mxu0  ;;  %v739_v22 = vpop.f32.mrb[30].mxu1 }
 0x14f   :  { %v1007_v23 = vadd.f32 %v2081_v63, %v900_v17  ;;  %v1057_v24 = vadd.f32 %v2081_v63, %v950_v18  ;;  %v901_v25 = vmul.f32 %v2076_v61, %v539_v21  ;;  %v951_v26 = vmul.f32 %v2076_v61, %v739_v22  ;;  %v541_v27 = vpop.f32.mrb[31].mxu0  ;;  %v741_v28 = vpop.f32.mrb[31].mxu1 }
 0x151   :  { %v1107_v29 = vmax.f32 %v1007_v23, 0.0  ;;  %v1157_v30 = vmax.f32 %v1057_v24, 0.0  ;;  %v1008_v31 = vadd.f32 %v2081_v63, %v901_v25  ;;  %v1058_v32 = vadd.f32 %v2081_v63, %v951_v26 }
 0x153   :  { %1208 = vst.msk [vmem:[%s2697_s4 + $0x70] sm:$0xff] %vm1193_vm0, %v1107_v29  ;;  %1258 = vst.msk [vmem:[%s2697_s4 + $0x200] sm:$0xff] %vm1193_vm0, %v1157_v30  ;;  %v1108_v33 = vmax.f32 %v1008_v31, 0.0  ;;  %v1158_v34 = vmax.f32 %v1058_v32, 0.0 }
 0x154   :  { %v544_v35 = vpop.f32.mrb[32].mxu0  ;;  %v744_v36 = vpop.f32.mrb[32].mxu1 }
 0x155   :  { %1209 = vst.msk [vmem:[%s2697_s4 + $0x78] sm:$0xff] %vm1193_vm0, %v1108_v33  ;;  %1259 = vst.msk [vmem:[%s2697_s4 + $0x208] sm:$0xff] %vm1193_vm0, %v1158_v34  ;;  %v902_v37 = vmul.f32 %v2076_v61, %v544_v35  ;;  %v952_v38 = vmul.f32 %v2076_v61, %v744_v36  ;;  %v546_v39 = vpop.f32.mrb[33].mxu0  ;;  %v746_v40 = vpop.f32.mrb[33].mxu1 }
 0x156   :  { %v547_v41 = vpop.f32.mrb[34].mxu0  ;;  %v747_v42 = vpop.f32.mrb[34].mxu1 }
 0x157   :  { %v1009_v43 = vadd.f32 %v2081_v63, %v902_v37  ;;  %v1059_v44 = vadd.f32 %v2081_v63, %v952_v38  ;;  %v903_v45 = vmul.f32 %v2076_v61, %v547_v41  ;;  %v953_v46 = vmul.f32 %v2076_v61, %v747_v42  ;;  %v549_v47 = vpop.f32.mrb[35].mxu0  ;;  %v749_v48 = vpop.f32.mrb[35].mxu1 }
 0x159   :  { %v1109_v49 = vmax.f32 %v1009_v43, 0.0  ;;  %v1159_v50 = vmax.f32 %v1059_v44, 0.0  ;;  %v1010_v51 = vadd.f32 %v2081_v63, %v903_v45  ;;  %v1060_v52 = vadd.f32 %v2081_v63, %v953_v46 }
 0x15b   :  { %1210 = vst.msk [vmem:[%s2697_s4 + $0x80] sm:$0xff] %vm1193_vm0, %v1109_v49  ;;  %1260 = vst.msk [vmem:[%s2697_s4 + $0x210] sm:$0xff] %vm1193_vm0, %v1159_v50  ;;  %v1110_v53 = vmax.f32 %v1010_v51, 0.0  ;;  %v1160_v54 = vmax.f32 %v1060_v52, 0.0 }
 0x15c   :  { %v552_v55 = vpop.f32.mrb[36].mxu0  ;;  %v752_v56 = vpop.f32.mrb[36].mxu1 }
 0x15d   :  { %1211 = vst.msk [vmem:[%s2697_s4 + $0x88] sm:$0xff] %vm1193_vm0, %v1110_v53  ;;  %1261 = vst.msk [vmem:[%s2697_s4 + $0x218] sm:$0xff] %vm1193_vm0, %v1160_v54  ;;  %v904_v57 = vmul.f32 %v2076_v61, %v552_v55  ;;  %v954_v58 = vmul.f32 %v2076_v61, %v752_v56  ;;  %v554_v59 = vpop.f32.mrb[37].mxu0  ;;  %v754_v60 = vpop.f32.mrb[37].mxu1 }
 0x15e   :  { %v555_v62 = vpop.f32.mrb[38].mxu0  ;;  %v755_v0 = vpop.f32.mrb[38].mxu1 }
 0x15f   :  { %v1011_v1 = vadd.f32 %v2081_v63, %v904_v57  ;;  %v1061_v2 = vadd.f32 %v2081_v63, %v954_v58  ;;  %v905_v3 = vmul.f32 %v2076_v61, %v555_v62  ;;  %v955_v4 = vmul.f32 %v2076_v61, %v755_v0  ;;  %v557_v5 = vpop.f32.mrb[39].mxu0  ;;  %v757_v6 = vpop.f32.mrb[39].mxu1 }
 0x161   :  { %v1111_v7 = vmax.f32 %v1011_v1, 0.0  ;;  %v1161_v8 = vmax.f32 %v1061_v2, 0.0  ;;  %v1012_v9 = vadd.f32 %v2081_v63, %v905_v3  ;;  %v1062_v10 = vadd.f32 %v2081_v63, %v955_v4 }
 0x163   :  { %1212 = vst.msk [vmem:[%s2697_s4 + $0x90] sm:$0xff] %vm1193_vm0, %v1111_v7  ;;  %1262 = vst.msk [vmem:[%s2697_s4 + $0x220] sm:$0xff] %vm1193_vm0, %v1161_v8  ;;  %v1112_v11 = vmax.f32 %v1012_v9, 0.0  ;;  %v1162_v12 = vmax.f32 %v1062_v10, 0.0 }
 0x164   :  { %v560_v13 = vpop.f32.mrb[40].mxu0  ;;  %v760_v14 = vpop.f32.mrb[40].mxu1 }
 0x165   :  { %1213 = vst.msk [vmem:[%s2697_s4 + $0x98] sm:$0xff] %vm1193_vm0, %v1112_v11  ;;  %1263 = vst.msk [vmem:[%s2697_s4 + $0x228] sm:$0xff] %vm1193_vm0, %v1162_v12  ;;  %v906_v15 = vmul.f32 %v2076_v61, %v560_v13  ;;  %v956_v16 = vmul.f32 %v2076_v61, %v760_v14  ;;  %v562_v17 = vpop.f32.mrb[41].mxu0  ;;  %v762_v18 = vpop.f32.mrb[41].mxu1 }
 0x166   :  { %v563_v19 = vpop.f32.mrb[42].mxu0  ;;  %v763_v20 = vpop.f32.mrb[42].mxu1 }
 0x167   :  { %v1013_v21 = vadd.f32 %v2081_v63, %v906_v15  ;;  %v1063_v22 = vadd.f32 %v2081_v63, %v956_v16  ;;  %v907_v23 = vmul.f32 %v2076_v61, %v563_v19  ;;  %v957_v24 = vmul.f32 %v2076_v61, %v763_v20  ;;  %v565_v25 = vpop.f32.mrb[43].mxu0  ;;  %v765_v26 = vpop.f32.mrb[43].mxu1 }
 0x169   :  { %v1113_v27 = vmax.f32 %v1013_v21, 0.0  ;;  %v1163_v28 = vmax.f32 %v1063_v22, 0.0  ;;  %v1014_v29 = vadd.f32 %v2081_v63, %v907_v23  ;;  %v1064_v30 = vadd.f32 %v2081_v63, %v957_v24 }
 0x16b   :  { %1214 = vst.msk [vmem:[%s2697_s4 + $0xa0] sm:$0xff] %vm1193_vm0, %v1113_v27  ;;  %1264 = vst.msk [vmem:[%s2697_s4 + $0x230] sm:$0xff] %vm1193_vm0, %v1163_v28  ;;  %v1114_v31 = vmax.f32 %v1014_v29, 0.0  ;;  %v1164_v32 = vmax.f32 %v1064_v30, 0.0 }
 0x16c   :  { %v568_v33 = vpop.f32.mrb[44].mxu0  ;;  %v768_v34 = vpop.f32.mrb[44].mxu1 }
 0x16d   :  { %1215 = vst.msk [vmem:[%s2697_s4 + $0xa8] sm:$0xff] %vm1193_vm0, %v1114_v31  ;;  %1265 = vst.msk [vmem:[%s2697_s4 + $0x238] sm:$0xff] %vm1193_vm0, %v1164_v32  ;;  %v908_v35 = vmul.f32 %v2076_v61, %v568_v33  ;;  %v958_v36 = vmul.f32 %v2076_v61, %v768_v34  ;;  %v570_v37 = vpop.f32.mrb[45].mxu0  ;;  %v770_v38 = vpop.f32.mrb[45].mxu1 }
 0x16e   :  { %v571_v39 = vpop.f32.mrb[46].mxu0  ;;  %v771_v40 = vpop.f32.mrb[46].mxu1 }
 0x16f   :  { %v1015_v41 = vadd.f32 %v2081_v63, %v908_v35  ;;  %v1065_v42 = vadd.f32 %v2081_v63, %v958_v36  ;;  %v909_v43 = vmul.f32 %v2076_v61, %v571_v39  ;;  %v959_v44 = vmul.f32 %v2076_v61, %v771_v40  ;;  %v573_v45 = vpop.f32.mrb[47].mxu0  ;;  %v773_v46 = vpop.f32.mrb[47].mxu1 }
 0x171   :  { %v1115_v47 = vmax.f32 %v1015_v41, 0.0  ;;  %v1165_v48 = vmax.f32 %v1065_v42, 0.0  ;;  %v1016_v49 = vadd.f32 %v2081_v63, %v909_v43  ;;  %v1066_v50 = vadd.f32 %v2081_v63, %v959_v44 }
 0x173   :  { %1216 = vst.msk [vmem:[%s2697_s4 + $0xb0] sm:$0xff] %vm1193_vm0, %v1115_v47  ;;  %1266 = vst.msk [vmem:[%s2697_s4 + $0x240] sm:$0xff] %vm1193_vm0, %v1165_v48  ;;  %v1116_v51 = vmax.f32 %v1016_v49, 0.0  ;;  %v1166_v52 = vmax.f32 %v1066_v50, 0.0 }
 0x174   :  { %v576_v53 = vpop.f32.mrb[48].mxu0  ;;  %v776_v54 = vpop.f32.mrb[48].mxu1 }
 0x175   :  { %1217 = vst.msk [vmem:[%s2697_s4 + $0xb8] sm:$0xff] %vm1193_vm0, %v1116_v51  ;;  %1267 = vst.msk [vmem:[%s2697_s4 + $0x248] sm:$0xff] %vm1193_vm0, %v1166_v52  ;;  %v910_v55 = vmul.f32 %v2076_v61, %v576_v53  ;;  %v960_v56 = vmul.f32 %v2076_v61, %v776_v54  ;;  %v578_v57 = vpop.f32.mrb[49].mxu0  ;;  %v778_v58 = vpop.f32.mrb[49].mxu1 }
 0x176   :  { %v579_v59 = vpop.f32.mrb[50].mxu0  ;;  %v779_v60 = vpop.f32.mrb[50].mxu1 }
 0x177   :  { %v1017_v62 = vadd.f32 %v2081_v63, %v910_v55  ;;  %v1067_v0 = vadd.f32 %v2081_v63, %v960_v56  ;;  %v911_v1 = vmul.f32 %v2076_v61, %v579_v59  ;;  %v961_v2 = vmul.f32 %v2076_v61, %v779_v60  ;;  %v581_v3 = vpop.f32.mrb[51].mxu0  ;;  %v781_v4 = vpop.f32.mrb[51].mxu1 }
 0x179   :  { %v1117_v5 = vmax.f32 %v1017_v62, 0.0  ;;  %v1167_v6 = vmax.f32 %v1067_v0, 0.0  ;;  %v1018_v7 = vadd.f32 %v2081_v63, %v911_v1  ;;  %v1068_v8 = vadd.f32 %v2081_v63, %v961_v2 }
 0x17b   :  { %1218 = vst.msk [vmem:[%s2697_s4 + $0xc0] sm:$0xff] %vm1193_vm0, %v1117_v5  ;;  %1268 = vst.msk [vmem:[%s2697_s4 + $0x250] sm:$0xff] %vm1193_vm0, %v1167_v6  ;;  %v1118_v9 = vmax.f32 %v1018_v7, 0.0  ;;  %v1168_v10 = vmax.f32 %v1068_v8, 0.0 }
 0x17c   :  { %v584_v11 = vpop.f32.mrb[52].mxu0  ;;  %v784_v12 = vpop.f32.mrb[52].mxu1 }
 0x17d   :  { %1219 = vst.msk [vmem:[%s2697_s4 + $0xc8] sm:$0xff] %vm1193_vm0, %v1118_v9  ;;  %1269 = vst.msk [vmem:[%s2697_s4 + $0x258] sm:$0xff] %vm1193_vm0, %v1168_v10  ;;  %v912_v13 = vmul.f32 %v2076_v61, %v584_v11  ;;  %v962_v14 = vmul.f32 %v2076_v61, %v784_v12  ;;  %v586_v15 = vpop.f32.mrb[53].mxu0  ;;  %v786_v16 = vpop.f32.mrb[53].mxu1 }
 0x17e   :  { %v587_v17 = vpop.f32.mrb[54].mxu0  ;;  %v787_v18 = vpop.f32.mrb[54].mxu1 }
 0x17f   :  { %v1019_v19 = vadd.f32 %v2081_v63, %v912_v13  ;;  %v1069_v20 = vadd.f32 %v2081_v63, %v962_v14  ;;  %v913_v21 = vmul.f32 %v2076_v61, %v587_v17  ;;  %v963_v22 = vmul.f32 %v2076_v61, %v787_v18  ;;  %v589_v23 = vpop.f32.mrb[55].mxu0  ;;  %v789_v24 = vpop.f32.mrb[55].mxu1 }
 0x181   :  { %v1119_v25 = vmax.f32 %v1019_v19, 0.0  ;;  %v1169_v26 = vmax.f32 %v1069_v20, 0.0  ;;  %v1020_v27 = vadd.f32 %v2081_v63, %v913_v21  ;;  %v1070_v28 = vadd.f32 %v2081_v63, %v963_v22 }
 0x183   :  { %1220 = vst.msk [vmem:[%s2697_s4 + $0xd0] sm:$0xff] %vm1193_vm0, %v1119_v25  ;;  %1270 = vst.msk [vmem:[%s2697_s4 + $0x260] sm:$0xff] %vm1193_vm0, %v1169_v26  ;;  %v1120_v29 = vmax.f32 %v1020_v27, 0.0  ;;  %v1170_v30 = vmax.f32 %v1070_v28, 0.0 }
 0x184   :  { %v592_v31 = vpop.f32.mrb[56].mxu0  ;;  %v792_v32 = vpop.f32.mrb[56].mxu1 }
 0x185   :  { %1221 = vst.msk [vmem:[%s2697_s4 + $0xd8] sm:$0xff] %vm1193_vm0, %v1120_v29  ;;  %1271 = vst.msk [vmem:[%s2697_s4 + $0x268] sm:$0xff] %vm1193_vm0, %v1170_v30  ;;  %v914_v33 = vmul.f32 %v2076_v61, %v592_v31  ;;  %v964_v34 = vmul.f32 %v2076_v61, %v792_v32  ;;  %v594_v35 = vpop.f32.mrb[57].mxu0  ;;  %v794_v36 = vpop.f32.mrb[57].mxu1 }
 0x186   :  { %v595_v37 = vpop.f32.mrb[58].mxu0  ;;  %v795_v38 = vpop.f32.mrb[58].mxu1 }
 0x187   :  { %v1021_v39 = vadd.f32 %v2081_v63, %v914_v33  ;;  %v1071_v40 = vadd.f32 %v2081_v63, %v964_v34  ;;  %v915_v41 = vmul.f32 %v2076_v61, %v595_v37  ;;  %v965_v42 = vmul.f32 %v2076_v61, %v795_v38  ;;  %v597_v43 = vpop.f32.mrb[59].mxu0  ;;  %v797_v44 = vpop.f32.mrb[59].mxu1 }
 0x189   :  { %v1121_v45 = vmax.f32 %v1021_v39, 0.0  ;;  %v1171_v46 = vmax.f32 %v1071_v40, 0.0  ;;  %v1022_v47 = vadd.f32 %v2081_v63, %v915_v41  ;;  %v1072_v48 = vadd.f32 %v2081_v63, %v965_v42 }
 0x18b   :  { %1222 = vst.msk [vmem:[%s2697_s4 + $0xe0] sm:$0xff] %vm1193_vm0, %v1121_v45  ;;  %1272 = vst.msk [vmem:[%s2697_s4 + $0x270] sm:$0xff] %vm1193_vm0, %v1171_v46  ;;  %v1122_v49 = vmax.f32 %v1022_v47, 0.0  ;;  %v1172_v50 = vmax.f32 %v1072_v48, 0.0 }
 0x18c   :  { %v600_v51 = vpop.f32.mrb[60].mxu0  ;;  %v800_v52 = vpop.f32.mrb[60].mxu1 }
 0x18d   :  { %1223 = vst.msk [vmem:[%s2697_s4 + $0xe8] sm:$0xff] %vm1193_vm0, %v1122_v49  ;;  %1273 = vst.msk [vmem:[%s2697_s4 + $0x278] sm:$0xff] %vm1193_vm0, %v1172_v50  ;;  %v916_v53 = vmul.f32 %v2076_v61, %v600_v51  ;;  %v966_v54 = vmul.f32 %v2076_v61, %v800_v52  ;;  %v602_v55 = vpop.f32.mrb[61].mxu0  ;;  %v802_v56 = vpop.f32.mrb[61].mxu1 }
 0x18e   :  { %v603_v57 = vpop.f32.mrb[62].mxu0  ;;  %v803_v58 = vpop.f32.mrb[62].mxu1 }
 0x18f   :  { %v1023_v59 = vadd.f32 %v2081_v63, %v916_v53  ;;  %v1073_v60 = vadd.f32 %v2081_v63, %v966_v54  ;;  %v917_v62 = vmul.f32 %v2076_v61, %v603_v57  ;;  %v967_v0 = vmul.f32 %v2076_v61, %v803_v58  ;;  %v605_v1 = vpop.f32.mrb[63].mxu0  ;;  %v805_v2 = vpop.f32.mrb[63].mxu1 }
 0x191   :  { %v1123_v3 = vmax.f32 %v1023_v59, 0.0  ;;  %v1173_v4 = vmax.f32 %v1073_v60, 0.0  ;;  %v1024_v5 = vadd.f32 %v2081_v63, %v917_v62  ;;  %v1074_v6 = vadd.f32 %v2081_v63, %v967_v0 }
 0x193   :  { %1224 = vst.msk [vmem:[%s2697_s4 + $0xf0] sm:$0xff] %vm1193_vm0, %v1123_v3  ;;  %1274 = vst.msk [vmem:[%s2697_s4 + $0x280] sm:$0xff] %vm1193_vm0, %v1173_v4  ;;  %v1124_v7 = vmax.f32 %v1024_v5, 0.0  ;;  %v1174_v8 = vmax.f32 %v1074_v6, 0.0 }
 0x194   :  { %v608_v9 = vpop.f32.mrb[64].mxu0  ;;  %v808_v10 = vpop.f32.mrb[64].mxu1 }
 0x195   :  { %1225 = vst.msk [vmem:[%s2697_s4 + $0xf8] sm:$0xff] %vm1193_vm0, %v1124_v7  ;;  %1275 = vst.msk [vmem:[%s2697_s4 + $0x288] sm:$0xff] %vm1193_vm0, %v1174_v8  ;;  %v918_v11 = vmul.f32 %v2076_v61, %v608_v9  ;;  %v968_v12 = vmul.f32 %v2076_v61, %v808_v10  ;;  %v610_v13 = vpop.f32.mrb[65].mxu0  ;;  %v810_v14 = vpop.f32.mrb[65].mxu1 }
 0x196   :  { %v611_v15 = vpop.f32.mrb[66].mxu0  ;;  %v811_v16 = vpop.f32.mrb[66].mxu1 }
 0x197   :  { %v1025_v17 = vadd.f32 %v2081_v63, %v918_v11  ;;  %v1075_v18 = vadd.f32 %v2081_v63, %v968_v12  ;;  %v919_v19 = vmul.f32 %v2076_v61, %v611_v15  ;;  %v969_v20 = vmul.f32 %v2076_v61, %v811_v16  ;;  %v613_v21 = vpop.f32.mrb[67].mxu0  ;;  %v813_v22 = vpop.f32.mrb[67].mxu1 }
 0x199   :  { %v1125_v23 = vmax.f32 %v1025_v17, 0.0  ;;  %v1175_v24 = vmax.f32 %v1075_v18, 0.0  ;;  %v1026_v25 = vadd.f32 %v2081_v63, %v919_v19  ;;  %v1076_v26 = vadd.f32 %v2081_v63, %v969_v20 }
 0x19b   :  { %1226 = vst.msk [vmem:[%s2697_s4 + $0x100] sm:$0xff] %vm1193_vm0, %v1125_v23  ;;  %1276 = vst.msk [vmem:[%s2697_s4 + $0x290] sm:$0xff] %vm1193_vm0, %v1175_v24  ;;  %v1126_v27 = vmax.f32 %v1026_v25, 0.0  ;;  %v1176_v28 = vmax.f32 %v1076_v26, 0.0 }
 0x19c   :  { %v616_v29 = vpop.f32.mrb[68].mxu0  ;;  %v816_v30 = vpop.f32.mrb[68].mxu1 }
 0x19d   :  { %1227 = vst.msk [vmem:[%s2697_s4 + $0x108] sm:$0xff] %vm1193_vm0, %v1126_v27  ;;  %1277 = vst.msk [vmem:[%s2697_s4 + $0x298] sm:$0xff] %vm1193_vm0, %v1176_v28  ;;  %v920_v31 = vmul.f32 %v2076_v61, %v616_v29  ;;  %v970_v32 = vmul.f32 %v2076_v61, %v816_v30  ;;  %v618_v33 = vpop.f32.mrb[69].mxu0  ;;  %v818_v34 = vpop.f32.mrb[69].mxu1 }
 0x19e   :  { %v619_v35 = vpop.f32.mrb[70].mxu0  ;;  %v819_v36 = vpop.f32.mrb[70].mxu1 }
 0x19f   :  { %v1027_v37 = vadd.f32 %v2081_v63, %v920_v31  ;;  %v1077_v38 = vadd.f32 %v2081_v63, %v970_v32  ;;  %v921_v39 = vmul.f32 %v2076_v61, %v619_v35  ;;  %v971_v40 = vmul.f32 %v2076_v61, %v819_v36  ;;  %v621_v41 = vpop.f32.mrb[71].mxu0  ;;  %v821_v42 = vpop.f32.mrb[71].mxu1 }
 0x1a1   :  { %v1127_v43 = vmax.f32 %v1027_v37, 0.0  ;;  %v1177_v44 = vmax.f32 %v1077_v38, 0.0  ;;  %v1028_v45 = vadd.f32 %v2081_v63, %v921_v39  ;;  %v1078_v46 = vadd.f32 %v2081_v63, %v971_v40 }
 0x1a3   :  { %1228 = vst.msk [vmem:[%s2697_s4 + $0x110] sm:$0xff] %vm1193_vm0, %v1127_v43  ;;  %1278 = vst.msk [vmem:[%s2697_s4 + $0x2a0] sm:$0xff] %vm1193_vm0, %v1177_v44  ;;  %v1128_v47 = vmax.f32 %v1028_v45, 0.0  ;;  %v1178_v48 = vmax.f32 %v1078_v46, 0.0 }
 0x1a4   :  { %v624_v49 = vpop.f32.mrb[72].mxu0  ;;  %v824_v50 = vpop.f32.mrb[72].mxu1 }
 0x1a5   :  { %1229 = vst.msk [vmem:[%s2697_s4 + $0x118] sm:$0xff] %vm1193_vm0, %v1128_v47  ;;  %1279 = vst.msk [vmem:[%s2697_s4 + $0x2a8] sm:$0xff] %vm1193_vm0, %v1178_v48  ;;  %v922_v51 = vmul.f32 %v2076_v61, %v624_v49  ;;  %v972_v52 = vmul.f32 %v2076_v61, %v824_v50  ;;  %v626_v53 = vpop.f32.mrb[73].mxu0  ;;  %v826_v54 = vpop.f32.mrb[73].mxu1 }
 0x1a6   :  { %v627_v55 = vpop.f32.mrb[74].mxu0  ;;  %v827_v56 = vpop.f32.mrb[74].mxu1  ;;  %v2592_v54 = vld [vmem:[%s2696_s3] ss:$0 sm:$0xff] }
 0x1a7   :  { %v1029_v57 = vadd.f32 %v2081_v63, %v922_v51  ;;  %v1079_v58 = vadd.f32 %v2081_v63, %v972_v52  ;;  %v923_v59 = vmul.f32 %v2076_v61, %v627_v55  ;;  %v973_v60 = vmul.f32 %v2076_v61, %v827_v56  ;;  %v629_v62 = vpop.f32.mrb[75].mxu0  ;;  %v829_v0 = vpop.f32.mrb[75].mxu1 }
 0x1a9   :  { %v1129_v1 = vmax.f32 %v1029_v57, 0.0  ;;  %v1179_v2 = vmax.f32 %v1079_v58, 0.0  ;;  %v1030_v3 = vadd.f32 %v2081_v63, %v923_v59  ;;  %v1080_v4 = vadd.f32 %v2081_v63, %v973_v60  ;;  %v2599_v57 = vld [vmem:[%s2695_s2] ss:$0 sm:$0xff] }
 0x1ab   :  { %1230 = vst.msk [vmem:[%s2697_s4 + $0x120] sm:$0xff] %vm1193_vm0, %v1129_v1  ;;  %1280 = vst.msk [vmem:[%s2697_s4 + $0x2b0] sm:$0xff] %vm1193_vm0, %v1179_v2  ;;  %v1130_v5 = vmax.f32 %v1030_v3, 0.0  ;;  %v1180_v6 = vmax.f32 %v1080_v4, 0.0 }
 0x1ac   :  { %v632_v7 = vpop.f32.mrb[76].mxu0  ;;  %v832_v8 = vpop.f32.mrb[76].mxu1 }
 0x1ad   :  { %1231 = vst.msk [vmem:[%s2697_s4 + $0x128] sm:$0xff] %vm1193_vm0, %v1130_v5  ;;  %1281 = vst.msk [vmem:[%s2697_s4 + $0x2b8] sm:$0xff] %vm1193_vm0, %v1180_v6  ;;  %v924_v9 = vmul.f32 %v2076_v61, %v632_v7  ;;  %v974_v10 = vmul.f32 %v2076_v61, %v832_v8  ;;  %v634_v11 = vpop.f32.mrb[77].mxu0  ;;  %v834_v12 = vpop.f32.mrb[77].mxu1 }
 0x1ae   :  { %v635_v13 = vpop.f32.mrb[78].mxu0  ;;  %v835_v14 = vpop.f32.mrb[78].mxu1 }
 0x1af   :  { %v1031_v15 = vadd.f32 %v2081_v63, %v924_v9  ;;  %v1081_v16 = vadd.f32 %v2081_v63, %v974_v10  ;;  %v925_v17 = vmul.f32 %v2076_v61, %v635_v13  ;;  %v975_v18 = vmul.f32 %v2076_v61, %v835_v14  ;;  %v637_v19 = vpop.f32.mrb[79].mxu0  ;;  %v837_v20 = vpop.f32.mrb[79].mxu1 }
 0x1b1   :  { %v1131_v21 = vmax.f32 %v1031_v15, 0.0  ;;  %v1181_v22 = vmax.f32 %v1081_v16, 0.0  ;;  %v1032_v23 = vadd.f32 %v2081_v63, %v925_v17  ;;  %v1082_v24 = vadd.f32 %v2081_v63, %v975_v18 }
 0x1b3   :  { %1232 = vst.msk [vmem:[%s2697_s4 + $0x130] sm:$0xff] %vm1193_vm0, %v1131_v21  ;;  %1282 = vst.msk [vmem:[%s2697_s4 + $0x2c0] sm:$0xff] %vm1193_vm0, %v1181_v22  ;;  %v1132_v25 = vmax.f32 %v1032_v23, 0.0  ;;  %v1182_v26 = vmax.f32 %v1082_v24, 0.0 }
 0x1b4   :  { %v640_v27 = vpop.f32.mrb[80].mxu0  ;;  %v840_v28 = vpop.f32.mrb[80].mxu1 }
 0x1b5   :  { %1233 = vst.msk [vmem:[%s2697_s4 + $0x138] sm:$0xff] %vm1193_vm0, %v1132_v25  ;;  %1283 = vst.msk [vmem:[%s2697_s4 + $0x2c8] sm:$0xff] %vm1193_vm0, %v1182_v26  ;;  %v926_v29 = vmul.f32 %v2076_v61, %v640_v27  ;;  %v976_v30 = vmul.f32 %v2076_v61, %v840_v28  ;;  %v642_v31 = vpop.f32.mrb[81].mxu0  ;;  %v842_v32 = vpop.f32.mrb[81].mxu1 }
 0x1b6   :  { %v643_v33 = vpop.f32.mrb[82].mxu0  ;;  %v843_v34 = vpop.f32.mrb[82].mxu1 }
 0x1b7   :  { %v1033_v35 = vadd.f32 %v2081_v63, %v926_v29  ;;  %v1083_v36 = vadd.f32 %v2081_v63, %v976_v30  ;;  %v927_v37 = vmul.f32 %v2076_v61, %v643_v33  ;;  %v977_v38 = vmul.f32 %v2076_v61, %v843_v34  ;;  %v645_v39 = vpop.f32.mrb[83].mxu0  ;;  %v845_v40 = vpop.f32.mrb[83].mxu1 }
 0x1b9   :  { %v1133_v41 = vmax.f32 %v1033_v35, 0.0  ;;  %v1183_v42 = vmax.f32 %v1083_v36, 0.0  ;;  %v1034_v43 = vadd.f32 %v2081_v63, %v927_v37  ;;  %v1084_v44 = vadd.f32 %v2081_v63, %v977_v38 }
 0x1bb   :  { %1234 = vst.msk [vmem:[%s2697_s4 + $0x140] sm:$0xff] %vm1193_vm0, %v1133_v41  ;;  %1284 = vst.msk [vmem:[%s2697_s4 + $0x2d0] sm:$0xff] %vm1193_vm0, %v1183_v42  ;;  %v1134_v45 = vmax.f32 %v1034_v43, 0.0  ;;  %v1184_v46 = vmax.f32 %v1084_v44, 0.0 }
 0x1bc   :  { %v648_v47 = vpop.f32.mrb[84].mxu0  ;;  %v848_v48 = vpop.f32.mrb[84].mxu1 }
 0x1bd   :  { %1235 = vst.msk [vmem:[%s2697_s4 + $0x148] sm:$0xff] %vm1193_vm0, %v1134_v45  ;;  %1285 = vst.msk [vmem:[%s2697_s4 + $0x2d8] sm:$0xff] %vm1193_vm0, %v1184_v46  ;;  %v928_v63 = vmul.f32 %v2076_v61, %v648_v47  ;;  %v978_v49 = vmul.f32 %v2076_v61, %v848_v48  ;;  %v650_v50 = vpop.f32.mrb[85].mxu0  ;;  %v850_v51 = vpop.f32.mrb[85].mxu1 }
 0x1be   :  { %v651_v52 = vpop.f32.mrb[86].mxu0  ;;  %v851_v53 = vpop.f32.mrb[86].mxu1 }
 0x1bf   :  { %v1035_v55 = vadd.f32 %v2592_v54, %v928_v63  ;;  %v1085_v56 = vadd.f32 %v2592_v54, %v978_v49  ;;  %v929_v61 = vmul.f32 %v2599_v57, %v651_v52  ;;  %v979_v58 = vmul.f32 %v2599_v57, %v851_v53  ;;  %v653_v59 = vpop.f32.mrb[87].mxu0  ;;  %v853_v60 = vpop.f32.mrb[87].mxu1 }
 0x1c1   :  { %v1135_v62 = vmax.f32 %v1035_v55, 0.0  ;;  %v1185_v0 = vmax.f32 %v1085_v56, 0.0  ;;  %v1036_v1 = vadd.f32 %v2592_v54, %v929_v61  ;;  %v1086_v2 = vadd.f32 %v2592_v54, %v979_v58 }
 0x1c3   :  { %1236 = vst.msk [vmem:[%s2697_s4 + $0x150] sm:$0xff] %vm1193_vm0, %v1135_v62  ;;  %1286 = vst.msk [vmem:[%s2697_s4 + $0x2e0] sm:$0xff] %vm1193_vm0, %v1185_v0  ;;  %v1136_v3 = vmax.f32 %v1036_v1, 0.0  ;;  %v1186_v4 = vmax.f32 %v1086_v2, 0.0 }
 0x1c4   :  { %v656_v5 = vpop.f32.mrb[88].mxu0  ;;  %v856_v6 = vpop.f32.mrb[88].mxu1 }
 0x1c5   :  { %1237 = vst.msk [vmem:[%s2697_s4 + $0x158] sm:$0xff] %vm1193_vm0, %v1136_v3  ;;  %1287 = vst.msk [vmem:[%s2697_s4 + $0x2e8] sm:$0xff] %vm1193_vm0, %v1186_v4  ;;  %v930_v7 = vmul.f32 %v2599_v57, %v656_v5  ;;  %v980_v8 = vmul.f32 %v2599_v57, %v856_v6  ;;  %v658_v9 = vpop.f32.mrb[89].mxu0  ;;  %v858_v10 = vpop.f32.mrb[89].mxu1 }
 0x1c6   :  { %v659_v11 = vpop.f32.mrb[90].mxu0  ;;  %v859_v12 = vpop.f32.mrb[90].mxu1 }
 0x1c7   :  { %v1037_v13 = vadd.f32 %v2592_v54, %v930_v7  ;;  %v1087_v14 = vadd.f32 %v2592_v54, %v980_v8  ;;  %v931_v15 = vmul.f32 %v2599_v57, %v659_v11  ;;  %v981_v16 = vmul.f32 %v2599_v57, %v859_v12  ;;  %v661_v17 = vpop.f32.mrb[91].mxu0  ;;  %v861_v18 = vpop.f32.mrb[91].mxu1 }
 0x1c9   :  { %v1137_v19 = vmax.f32 %v1037_v13, 0.0  ;;  %v1187_v20 = vmax.f32 %v1087_v14, 0.0  ;;  %v1038_v21 = vadd.f32 %v2592_v54, %v931_v15  ;;  %v1088_v22 = vadd.f32 %v2592_v54, %v981_v16 }
 0x1cb   :  { %1238 = vst.msk [vmem:[%s2697_s4 + $0x160] sm:$0xff] %vm1193_vm0, %v1137_v19  ;;  %1288 = vst.msk [vmem:[%s2697_s4 + $0x2f0] sm:$0xff] %vm1193_vm0, %v1187_v20  ;;  %v1138_v23 = vmax.f32 %v1038_v21, 0.0  ;;  %v1188_v24 = vmax.f32 %v1088_v22, 0.0 }
 0x1cc   :  { %v664_v25 = vpop.f32.mrb[92].mxu0  ;;  %v864_v26 = vpop.f32.mrb[92].mxu1 }
 0x1cd   :  { %1239 = vst.msk [vmem:[%s2697_s4 + $0x168] sm:$0xff] %vm1193_vm0, %v1138_v23  ;;  %1289 = vst.msk [vmem:[%s2697_s4 + $0x2f8] sm:$0xff] %vm1193_vm0, %v1188_v24  ;;  %v932_v27 = vmul.f32 %v2599_v57, %v664_v25  ;;  %v982_v28 = vmul.f32 %v2599_v57, %v864_v26  ;;  %v666_v29 = vpop.f32.mrb[93].mxu0  ;;  %v866_v30 = vpop.f32.mrb[93].mxu1 }
 0x1ce   :  { %v667_v31 = vpop.f32.mrb[94].mxu0  ;;  %v867_v32 = vpop.f32.mrb[94].mxu1 }
 0x1cf   :  { %v1039_v33 = vadd.f32 %v2592_v54, %v932_v27  ;;  %v1089_v34 = vadd.f32 %v2592_v54, %v982_v28  ;;  %v933_v35 = vmul.f32 %v2599_v57, %v667_v31  ;;  %v983_v36 = vmul.f32 %v2599_v57, %v867_v32  ;;  %v669_v37 = vpop.f32.mrb[95].mxu0  ;;  %v869_v38 = vpop.f32.mrb[95].mxu1 }
 0x1d1   :  { %v1139_v39 = vmax.f32 %v1039_v33, 0.0  ;;  %v1189_v40 = vmax.f32 %v1089_v34, 0.0  ;;  %v1040_v41 = vadd.f32 %v2592_v54, %v933_v35  ;;  %v1090_v42 = vadd.f32 %v2592_v54, %v983_v36 }
 0x1d3   :  { %1240 = vst.msk [vmem:[%s2697_s4 + $0x170] sm:$0xff] %vm1193_vm0, %v1139_v39  ;;  %1290 = vst.msk [vmem:[%s2697_s4 + $0x300] sm:$0xff] %vm1193_vm0, %v1189_v40  ;;  %v1140_v43 = vmax.f32 %v1040_v41, 0.0  ;;  %v1190_v44 = vmax.f32 %v1090_v42, 0.0 }
 0x1d4   :  { %v672_v45 = vpop.f32.mrb[96].mxu0  ;;  %v872_v46 = vpop.f32.mrb[96].mxu1 }
 0x1d5   :  { %1241 = vst.msk [vmem:[%s2697_s4 + $0x178] sm:$0xff] %vm1193_vm0, %v1140_v43  ;;  %1291 = vst.msk [vmem:[%s2697_s4 + $0x308] sm:$0xff] %vm1193_vm0, %v1190_v44  ;;  %v934_v47 = vmul.f32 %v2599_v57, %v672_v45  ;;  %v984_v48 = vmul.f32 %v2599_v57, %v872_v46  ;;  %v674_v63 = vpop.f32.mrb[97].mxu0  ;;  %v874_v49 = vpop.f32.mrb[97].mxu1 }
 0x1d6   :  { %v675_v50 = vpop.f32.mrb[98].mxu0  ;;  %v875_v51 = vpop.f32.mrb[98].mxu1 }
 0x1d7   :  { %v1041_v52 = vadd.f32 %v2592_v54, %v934_v47  ;;  %v1091_v53 = vadd.f32 %v2592_v54, %v984_v48  ;;  %v935_v55 = vmul.f32 %v2599_v57, %v675_v50  ;;  %v985_v56 = vmul.f32 %v2599_v57, %v875_v51  ;;  %v677_v61 = vpop.f32.mrb[99].mxu0  ;;  %v877_v58 = vpop.f32.mrb[99].mxu1 }
 0x1d9   :  { %v1141_v59 = vmax.f32 %v1041_v52, 0.0  ;;  %v1191_v60 = vmax.f32 %v1091_v53, 0.0  ;;  %v1042_v62 = vadd.f32 %v2592_v54, %v935_v55  ;;  %v1092_v0 = vadd.f32 %v2592_v54, %v985_v56 }
 0x1db   :  { %1242 = vst.msk [vmem:[%s2697_s4 + $0x180] sm:$0xff] %vm1193_vm0, %v1141_v59  ;;  %1292 = vst.msk [vmem:[%s2697_s4 + $0x310] sm:$0xff] %vm1193_vm0, %v1191_v60  ;;  %v1142_v1 = vmax.f32 %v1042_v62, 0.0  ;;  %v1192_v57 = vmax.f32 %v1092_v0, 0.0 }
 0x1dd   :  { %1243 = vst.msk [vmem:[%s2697_s4 + $0x188] sm:$0xff] %vm1193_vm0, %v1142_v1  ;;  %1293 = vst.msk [vmem:[%s2697_s4 + $0x318] sm:$0xff] %vm1193_vm0, %v1192_v57 }

// kernel: forward.5
= control target key start
LH: loop header
LB: loop body
LE: loop exit
PB: predicated region body
PF: predicated region fallthrough
CT: control target
= control target key end

     0   :  { %vm719_vm0 = vcmask 523264   ;;  %vm740_vm1 = vcmask 517120   ;;  %s1484_s1 = inlined_call_operand.vmem [shape: bf16[512,64], index: 1, kind: input, shape index: {}]   ;;  %s1485_s0 = inlined_call_operand.vmem [shape: f32[162,512], index: 0, kind: input, shape index: {}]   ;;  %s1486_s2 = inlined_call_operand.vmem [shape: f32[1,64], index: 2, kind: input, shape index: {}]   ;;  %s1487_s3 = inlined_call_operand.vmem [shape: f32[1,64], index: 3, kind: input, shape index: {}]   ;;  %s1488_s4 = inlined_call_operand.vmem [shape: f32[162,64], index: 4, kind: output, shape index: {}]  }
   0x1   :  { %v944_v0 = vld [vmem:[%s1484_s1 + $0x40] sm:$0xff]   ;;  %v948_v4 = vld [vmem:[%s1484_s1 + $0x48] sm:$0xff]   ;;  %v952_v8 = vld [vmem:[%s1484_s1 + $0x50] sm:$0xff]  }
   0x2   :  { %v945_v1 = vld [vmem:[%s1484_s1 + $0xc0] sm:$0xff]   ;;  %780 = vmatprep.subr.bf16.mxu0 %v944_v0  ;;  %v949_v5 = vld [vmem:[%s1484_s1 + $0xc8] sm:$0xff]   ;;  %v953_v9 = vld [vmem:[%s1484_s1 + $0xd0] sm:$0xff]  }
   0x3   :  { %v946_v2 = vld [vmem:[%s1484_s1] sm:$0xff]   ;;  %862 = vmatprep.subr.bf16.mxu1 %v945_v1  ;;  %v950_v6 = vld [vmem:[%s1484_s1 + $0x8] sm:$0xff]   ;;  %v954_v10 = vld [vmem:[%s1484_s1 + $0x10] sm:$0xff]  }
   0x4   :  { %v947_v3 = vld [vmem:[%s1484_s1 + $0x80] sm:$0xff]   ;;  %781 = vmatpush3.bf16.msra.mxu0 %v946_v2  ;;  %v951_v7 = vld [vmem:[%s1484_s1 + $0x88] sm:$0xff]   ;;  %v955_v11 = vld [vmem:[%s1484_s1 + $0x90] sm:$0xff]  }
   0x5   :  { %863 = vmatpush3.bf16.msra.mxu1 %v947_v3  ;;  %782 = vmatprep.subr.bf16.mxu0 %v948_v4  ;;  %v956_v12 = vld [vmem:[%s1484_s1 + $0x58] sm:$0xff]   ;;  %v960_v16 = vld [vmem:[%s1484_s1 + $0x60] sm:$0xff]   ;;  %v964_v20 = vld [vmem:[%s1484_s1 + $0x68] sm:$0xff]  }
   0x6   :  { %864 = vmatprep.subr.bf16.mxu1 %v949_v5  ;;  %v957_v13 = vld [vmem:[%s1484_s1 + $0xd8] sm:$0xff]   ;;  %v961_v17 = vld [vmem:[%s1484_s1 + $0xe0] sm:$0xff]   ;;  %v965_v21 = vld [vmem:[%s1484_s1 + $0xe8] sm:$0xff]  }
   0x7   :  { %v958_v14 = vld [vmem:[%s1484_s1 + $0x18] sm:$0xff]   ;;  %v962_v18 = vld [vmem:[%s1484_s1 + $0x20] sm:$0xff]   ;;  %v966_v22 = vld [vmem:[%s1484_s1 + $0x28] sm:$0xff]  }
   0x8   :  { %783 = vmatpush3.bf16.msra.mxu0 %v950_v6  ;;  %v959_v15 = vld [vmem:[%s1484_s1 + $0x98] sm:$0xff]   ;;  %v963_v19 = vld [vmem:[%s1484_s1 + $0xa0] sm:$0xff]   ;;  %v967_v23 = vld [vmem:[%s1484_s1 + $0xa8] sm:$0xff]  }
   0x9   :  { %865 = vmatpush3.bf16.msra.mxu1 %v951_v7  ;;  %784 = vmatprep.subr.bf16.mxu0 %v952_v8  ;;  %v968_v24 = vld [vmem:[%s1484_s1 + $0x70] sm:$0xff]   ;;  %v972_v28 = vld [vmem:[%s1484_s1 + $0x78] sm:$0xff]   ;;  %v19_v32 = vld [vmem:[%s1485_s0 + $0x8] sm:$0xff] }
   0xa   :  { %866 = vmatprep.subr.bf16.mxu1 %v953_v9  ;;  %v969_v25 = vld [vmem:[%s1484_s1 + $0xf0] sm:$0xff]   ;;  %v973_v29 = vld [vmem:[%s1484_s1 + $0xf8] sm:$0xff]   ;;  %v23_v33 = vld [vmem:[%s1485_s0 + $0x28] sm:$0xff] }
   0xb   :  { %v970_v26 = vld [vmem:[%s1484_s1 + $0x30] sm:$0xff]   ;;  %v974_v30 = vld [vmem:[%s1484_s1 + $0x38] sm:$0xff]   ;;  %v103_v35 = vpack.c.bf16 %v23_v33, %v19_v32  ;;  %v18_v37 = vld [vmem:[%s1485_s0] sm:$0xff] }
   0xc   :  { %785 = vmatpush3.bf16.msra.mxu0 %v954_v10  ;;  %v971_v27 = vld [vmem:[%s1484_s1 + $0xb0] sm:$0xff]   ;;  %v975_v31 = vld [vmem:[%s1484_s1 + $0xb8] sm:$0xff]   ;;  %v22_v38 = vld [vmem:[%s1485_s0 + $0x20] sm:$0xff] }
   0xd   :  { %867 = vmatpush3.bf16.msra.mxu1 %v955_v11  ;;  %786 = vmatprep.subr.bf16.mxu0 %v956_v12  ;;  %v21_v34 = vld [vmem:[%s1485_s0 + $0x18] sm:$0xff]  ;;  %v102_v40 = vpack.c.bf16 %v22_v38, %v18_v37  ;;  %v20_v41 = vld [vmem:[%s1485_s0 + $0x10] sm:$0xff]  ;;  %v27_v43 = vld [vmem:[%s1485_s0 + $0x48] sm:$0xff] }
   0xe   :  { %868 = vmatprep.subr.bf16.mxu1 %v957_v13  ;;  %v25_v36 = vld [vmem:[%s1485_s0 + $0x38] sm:$0xff]  ;;  %v24_v42 = vld [vmem:[%s1485_s0 + $0x30] sm:$0xff]  ;;  %434 = vmatprep.mubr.bf16.mxu0 %v103_v35  ;;  %v31_v45 = vld [vmem:[%s1485_s0 + $0x68] sm:$0xff] }
   0xf   :  { %v105_v39 = vpack.c.bf16 %v25_v36, %v21_v34  ;;  %v104_v44 = vpack.c.bf16 %v24_v42, %v20_v41  ;;  %v29_v46 = vld [vmem:[%s1485_s0 + $0x58] sm:$0xff]  ;;  %v107_v48 = vpack.c.bf16 %v31_v45, %v27_v43  ;;  %v26_v50 = vld [vmem:[%s1485_s0 + $0x40] sm:$0xff]  ;;  %v28_v52 = vld [vmem:[%s1485_s0 + $0x50] sm:$0xff] }
  0x10   :  { %787 = vmatpush3.bf16.msra.mxu0 %v958_v14  ;;  %v33_v47 = vld [vmem:[%s1485_s0 + $0x78] sm:$0xff]  ;;  %v30_v51 = vld [vmem:[%s1485_s0 + $0x60] sm:$0xff]  ;;  %v32_v53 = vld [vmem:[%s1485_s0 + $0x70] sm:$0xff] }
  0x11   :  { %869 = vmatpush3.bf16.msra.mxu1 %v959_v15  ;;  %788 = vmatprep.subr.bf16.mxu0 %v960_v16  ;;  %v109_v49 = vpack.c.bf16 %v33_v47, %v29_v46  ;;  %v35_v54 = vld [vmem:[%s1485_s0 + $0x88] sm:$0xff]  ;;  %v37_v56 = vld [vmem:[%s1485_s0 + $0x98] sm:$0xff]  ;;  %v106_v58 = vpack.c.bf16 %v30_v51, %v26_v50  ;;  %v108_v59 = vpack.c.bf16 %v32_v53, %v28_v52  ;;  %v34_v62 = vld [vmem:[%s1485_s0 + $0x80] sm:$0xff] }
  0x12   :  { %870 = vmatprep.subr.bf16.mxu1 %v961_v17  ;;  %554 = vmatprep.mubr.bf16.mxu1 %v105_v39  ;;  %v39_v55 = vld [vmem:[%s1485_s0 + $0xa8] sm:$0xff]  ;;  %v41_v57 = vld [vmem:[%s1485_s0 + $0xb8] sm:$0xff]  ;;  %v38_v63 = vld [vmem:[%s1485_s0 + $0xa0] sm:$0xff] }
  0x13   :  { %v111_v60 = vpack.c.bf16 %v39_v55, %v35_v54  ;;  %v113_v61 = vpack.c.bf16 %v41_v57, %v37_v56  ;;  %v36_v0 = vld [vmem:[%s1485_s0 + $0x90] sm:$0xff]  ;;  %v43_v2 = vld [vmem:[%s1485_s0 + $0xc8] sm:$0xff]  ;;  %v45_v4 = vld [vmem:[%s1485_s0 + $0xd8] sm:$0xff]  ;;  %v110_v6 = vpack.c.bf16 %v38_v63, %v34_v62 }
  0x14   :  { %789 = vmatpush3.bf16.msra.mxu0 %v962_v18  ;;  %v40_v1 = vld [vmem:[%s1485_s0 + $0xb0] sm:$0xff]  ;;  %v47_v3 = vld [vmem:[%s1485_s0 + $0xe8] sm:$0xff]  ;;  %v49_v5 = vld [vmem:[%s1485_s0 + $0xf8] sm:$0xff] }
  0x15   :  { %871 = vmatpush3.bf16.msra.mxu1 %v963_v19  ;;  %790 = vmatprep.subr.bf16.mxu0 %v964_v20  ;;  %v112_v7 = vpack.c.bf16 %v40_v1, %v36_v0  ;;  %v115_v8 = vpack.c.bf16 %v47_v3, %v43_v2  ;;  %v117_v9 = vpack.c.bf16 %v49_v5, %v45_v4  ;;  %v42_v10 = vld [vmem:[%s1485_s0 + $0xc0] sm:$0xff]  ;;  %v44_v12 = vld [vmem:[%s1485_s0 + $0xd0] sm:$0xff]  ;;  %v51_v14 = vld [vmem:[%s1485_s0 + $0x108] sm:$0xff] }
  0x16   :  { %872 = vmatprep.subr.bf16.mxu1 %v965_v21  ;;  %v46_v11 = vld [vmem:[%s1485_s0 + $0xe0] sm:$0xff]  ;;  %v48_v13 = vld [vmem:[%s1485_s0 + $0xf0] sm:$0xff]  ;;  %v55_v15 = vld [vmem:[%s1485_s0 + $0x128] sm:$0xff] }
  0x17   :  { %v53_v16 = vld [vmem:[%s1485_s0 + $0x118] sm:$0xff]  ;;  %v114_v18 = vpack.c.bf16 %v46_v11, %v42_v10  ;;  %v116_v19 = vpack.c.bf16 %v48_v13, %v44_v12  ;;  %v119_v20 = vpack.c.bf16 %v55_v15, %v51_v14  ;;  %v58_v34 = vld [vmem:[%s1485_s0 + $0x140] sm:$0xff]  ;;  %v60_v36 = vld [vmem:[%s1485_s0 + $0x150] sm:$0xff] }
  0x18   :  { %791 = vmatpush3.bf16.msra.mxu0 %v966_v22  ;;  %v57_v17 = vld [vmem:[%s1485_s0 + $0x138] sm:$0xff]  ;;  %v50_v22 = vld [vmem:[%s1485_s0 + $0x100] sm:$0xff]  ;;  %v64_v37 = vld [vmem:[%s1485_s0 + $0x170] sm:$0xff] }
  0x19   :  { %873 = vmatpush3.bf16.msra.mxu1 %v967_v23  ;;  %792 = vmatprep.subr.bf16.mxu0 %v968_v24  ;;  %v121_v21 = vpack.c.bf16 %v57_v17, %v53_v16  ;;  %v54_v23 = vld [vmem:[%s1485_s0 + $0x120] sm:$0xff]  ;;  %v52_v24 = vld [vmem:[%s1485_s0 + $0x110] sm:$0xff]  ;;  %v67_v38 = vld [vmem:[%s1485_s0 + $0x188] sm:$0xff]  ;;  %v124_v43 = vpack.c.bf16 %v64_v37, %v60_v36 }
  0x1a   :  { %874 = vmatprep.subr.bf16.mxu1 %v969_v25  ;;  %v56_v25 = vld [vmem:[%s1485_s0 + $0x130] sm:$0xff]  ;;  %v62_v35 = vld [vmem:[%s1485_s0 + $0x160] sm:$0xff]  ;;  %v71_v39 = vld [vmem:[%s1485_s0 + $0x1a8] sm:$0xff] }
  0x1b   :  { %v73_v41 = vld [vmem:[%s1485_s0 + $0x1b8] sm:$0xff]  ;;  %v122_v42 = vpack.c.bf16 %v62_v35, %v58_v34  ;;  %v66_v46 = vld [vmem:[%s1485_s0 + $0x180] sm:$0xff]  ;;  %v75_v50 = vld [vmem:[%s1485_s0 + $0x1c8] sm:$0xff] }
  0x1c   :  { %793 = vmatpush3.bf16.msra.mxu0 %v970_v26  ;;  %v59_v26 = vld [vmem:[%s1485_s0 + $0x148] sm:$0xff]  ;;  %v70_v47 = vld [vmem:[%s1485_s0 + $0x1a0] sm:$0xff]  ;;  %v77_v52 = vld [vmem:[%s1485_s0 + $0x1d8] sm:$0xff] }
  0x1d   :  { %875 = vmatpush3.bf16.msra.mxu1 %v971_v27  ;;  %794 = vmatprep.subr.bf16.mxu0 %v972_v28  ;;  %v63_v27 = vld [vmem:[%s1485_s0 + $0x168] sm:$0xff]  ;;  %v61_v28 = vld [vmem:[%s1485_s0 + $0x158] sm:$0xff]  ;;  %v126_v54 = vpack.c.bf16 %v70_v47, %v66_v46  ;;  %v1357_v46 = vld [vmem:[%s1487_s3] ss:$0 sm:$0xff] }
  0x1e   :  { %876 = vmatprep.subr.bf16.mxu1 %v973_v29  ;;  %v65_v29 = vld [vmem:[%s1485_s0 + $0x178] sm:$0xff]  ;;  %v123_v32 = vpack.c.bf16 %v63_v27, %v59_v26  ;;  %v79_v51 = vld [vmem:[%s1485_s0 + $0x1e8] sm:$0xff] }
  0x1f   :  { %v125_v33 = vpack.c.bf16 %v65_v29, %v61_v28  ;;  %v81_v53 = vld [vmem:[%s1485_s0 + $0x1f8] sm:$0xff]  ;;  %v131_v56 = vpack.c.bf16 %v79_v51, %v75_v50  ;;  %v83_v62 = vld [vmem:[%s1485_s0 + $0x208] sm:$0xff]  ;;  %v98_v28 = vld [vmem:[%s1485_s0 + $0x280] sm:$0x3] }
  0x20   :  { %795 = vmatpush3.bf16.msra.mxu0 %v974_v30  ;;  %v118_v30 = vpack.c.bf16 %v54_v23, %v50_v22  ;;  %v133_v57 = vpack.c.bf16 %v81_v53, %v77_v52  ;;  %v87_v63 = vld [vmem:[%s1485_s0 + $0x228] sm:$0xff]  ;;  %v85_v0 = vld [vmem:[%s1485_s0 + $0x218] sm:$0xff]  ;;  %v100_v29 = vld [vmem:[%s1485_s0 + $0x290] sm:$0x3] }
  0x21   :  { %877 = vmatpush3.bf16.msra.mxu1 %v975_v31  ;;  %v120_v31 = vpack.c.bf16 %v56_v25, %v52_v24  ;;  %v89_v1 = vld [vmem:[%s1485_s0 + $0x238] sm:$0xff]  ;;  %v135_v4 = vpack.c.bf16 %v87_v63, %v83_v62  ;;  %v91_v10 = vld [vmem:[%s1485_s0 + $0x248] sm:$0xff] }
  0x22   :  { %v137_v5 = vpack.c.bf16 %v89_v1, %v85_v0  ;;  %v95_v11 = vld [vmem:[%s1485_s0 + $0x268] sm:$0xff]  ;;  %v93_v12 = vld [vmem:[%s1485_s0 + $0x258] sm:$0xff] }
  0x23   :  { %435 = vmatmul.mubr.bf16.vlgmr.msra.gmra.mrb[0].mxu0 %v102_v40  ;;  %v69_v40 = vld [vmem:[%s1485_s0 + $0x198] sm:$0xff]  ;;  %v139_v16 = vpack.c.bf16 %v95_v11, %v91_v10  ;;  %v99_v22 = vld [vmem:[%s1485_s0 + $0x288] sm:$0x3] }
  0x24   :  { %555 = vmatmul.mubr.bf16.vlgmr.msra.gmra.mrb[0].mxu1 %v104_v44  ;;  %442 = vmatprep.mubr.bf16.mxu0 %v107_v48  ;;  %v127_v44 = vpack.c.bf16 %v71_v39, %v67_v38  ;;  %v129_v45 = vpack.c.bf16 %v73_v41, %v69_v40  ;;  %v68_v48 = vld [vmem:[%s1485_s0 + $0x190] sm:$0xff]  ;;  %v97_v13 = vld [vmem:[%s1485_s0 + $0x278] sm:$0xff]  ;;  %v143_v26 = vpack.c.bf16 %v99_v22, %v99_v22  ;;  %v1352_v41 = vld [vmem:[%s1486_s2] ss:$0 sm:$0xff] }
  0x25   :  { %562 = vmatprep.mubr.bf16.mxu1 %v109_v49  ;;  %v72_v49 = vld [vmem:[%s1485_s0 + $0x1b0] sm:$0xff]  ;;  %v141_v17 = vpack.c.bf16 %v97_v13, %v93_v12  ;;  %v101_v23 = vld [vmem:[%s1485_s0 + $0x298] sm:$0x3] }
  0x26   :  { %v128_v55 = vpack.c.bf16 %v72_v49, %v68_v48  ;;  %v145_v27 = vpack.c.bf16 %v101_v23, %v101_v23 }
  0x2b   :  { %443 = vmatmul.mubr.bf16.gmra.mrb[4].mxu0 %v106_v58  ;;  %v74_v58 = vld [vmem:[%s1485_s0 + $0x1c0] sm:$0xff] }
  0x2c   :  { %563 = vmatmul.mubr.bf16.gmra.mrb[4].mxu1 %v108_v59  ;;  %450 = vmatprep.mubr.bf16.mxu0 %v111_v60  ;;  %v78_v59 = vld [vmem:[%s1485_s0 + $0x1e0] sm:$0xff]  ;;  %v76_v60 = vld [vmem:[%s1485_s0 + $0x1d0] sm:$0xff] }
  0x2d   :  { %570 = vmatprep.mubr.bf16.mxu1 %v113_v61  ;;  %v80_v61 = vld [vmem:[%s1485_s0 + $0x1f0] sm:$0xff]  ;;  %v130_v2 = vpack.c.bf16 %v78_v59, %v74_v58 }
  0x2e   :  { %v132_v3 = vpack.c.bf16 %v80_v61, %v76_v60 }
  0x33   :  { %451 = vmatmul.mubr.bf16.gmra.mrb[8].mxu0 %v110_v6  ;;  %v82_v6 = vld [vmem:[%s1485_s0 + $0x200] sm:$0xff] }
  0x34   :  { %571 = vmatmul.mubr.bf16.gmra.mrb[8].mxu1 %v112_v7  ;;  %458 = vmatprep.mubr.bf16.mxu0 %v115_v8  ;;  %v86_v7 = vld [vmem:[%s1485_s0 + $0x220] sm:$0xff]  ;;  %v84_v8 = vld [vmem:[%s1485_s0 + $0x210] sm:$0xff] }
  0x35   :  { %578 = vmatprep.mubr.bf16.mxu1 %v117_v9  ;;  %v88_v9 = vld [vmem:[%s1485_s0 + $0x230] sm:$0xff]  ;;  %v134_v14 = vpack.c.bf16 %v86_v7, %v82_v6 }
  0x36   :  { %v136_v15 = vpack.c.bf16 %v88_v9, %v84_v8 }
  0x3b   :  { %459 = vmatmul.mubr.bf16.gmra.mrb[12].mxu0 %v114_v18  ;;  %v90_v18 = vld [vmem:[%s1485_s0 + $0x240] sm:$0xff] }
  0x3c   :  { %579 = vmatmul.mubr.bf16.gmra.mrb[12].mxu1 %v116_v19  ;;  %466 = vmatprep.mubr.bf16.mxu0 %v119_v20  ;;  %v94_v19 = vld [vmem:[%s1485_s0 + $0x260] sm:$0xff]  ;;  %v92_v20 = vld [vmem:[%s1485_s0 + $0x250] sm:$0xff] }
  0x3d   :  { %586 = vmatprep.mubr.bf16.mxu1 %v121_v21  ;;  %v96_v21 = vld [vmem:[%s1485_s0 + $0x270] sm:$0xff]  ;;  %v138_v24 = vpack.c.bf16 %v94_v19, %v90_v18 }
  0x3e   :  { %v140_v25 = vpack.c.bf16 %v96_v21, %v92_v20 }
  0x43   :  { %467 = vmatmul.mubr.bf16.gmra.mrb[16].mxu0 %v118_v30  ;;  %v142_v30 = vpack.c.bf16 %v98_v28, %v98_v28 }
  0x44   :  { %587 = vmatmul.mubr.bf16.gmra.mrb[16].mxu1 %v120_v31  ;;  %474 = vmatprep.mubr.bf16.mxu0 %v123_v32  ;;  %v144_v31 = vpack.c.bf16 %v100_v29, %v100_v29 }
  0x45   :  { %594 = vmatprep.mubr.bf16.mxu1 %v125_v33 }
  0x4b   :  { %475 = vmatmul.mubr.bf16.gmra.mrb[20].mxu0 %v122_v42 }
  0x4c   :  { %595 = vmatmul.mubr.bf16.gmra.mrb[20].mxu1 %v124_v43  ;;  %482 = vmatprep.mubr.bf16.mxu0 %v127_v44 }
  0x4d   :  { %602 = vmatprep.mubr.bf16.mxu1 %v129_v45 }
  0x53   :  { %483 = vmatmul.mubr.bf16.gmra.mrb[24].mxu0 %v126_v54 }
  0x54   :  { %603 = vmatmul.mubr.bf16.gmra.mrb[24].mxu1 %v128_v55  ;;  %490 = vmatprep.mubr.bf16.mxu0 %v131_v56 }
  0x55   :  { %610 = vmatprep.mubr.bf16.mxu1 %v133_v57 }
  0x5b   :  { %491 = vmatmul.mubr.bf16.gmra.mrb[28].mxu0 %v130_v2 }
  0x5c   :  { %611 = vmatmul.mubr.bf16.gmra.mrb[28].mxu1 %v132_v3  ;;  %498 = vmatprep.mubr.bf16.mxu0 %v135_v4 }
  0x5d   :  { %618 = vmatprep.mubr.bf16.mxu1 %v137_v5 }
  0x63   :  { %499 = vmatmul.mubr.bf16.gmra.mrb[32].mxu0 %v134_v14 }
  0x64   :  { %619 = vmatmul.mubr.bf16.gmra.mrb[32].mxu1 %v136_v15  ;;  %506 = vmatprep.mubr.bf16.mxu0 %v139_v16 }
  0x65   :  { %626 = vmatprep.mubr.bf16.mxu1 %v141_v17 }
  0x6b   :  { %507 = vmatmul.mubr.bf16.gmra.mrb[36].mxu0 %v138_v24 }
  0x6c   :  { %627 = vmatmul.mubr.bf16.gmra.mrb[36].mxu1 %v140_v25  ;;  %514 = vmatprep.mubr.bf16.mxu0 %v143_v26 }
  0x6d   :  { %634 = vmatprep.mubr.bf16.mxu1 %v145_v27 }
  0x73   :  { %515 = vmatmul.mubr.bf16.gmra.mrb[40].mxu0 %v142_v30 }
  0x74   :  { %635 = vmatmul.mubr.bf16.gmra.mrb[40].mxu1 %v144_v31 }
  0xf6   :  { %v796_v32 = vpop.f32.mrb[0].mxu0 }
  0xf7   :  { %v878_v33 = vpop.f32.mrb[0].mxu1  ;;  %v797_v34 = vpop.f32.mrb[1].mxu0 }
  0xf8   :  { %v798_v35 = vadd.f32 %v797_v34, %v796_v32  ;;  %v879_v36 = vpop.f32.mrb[1].mxu1  ;;  %v799_v37 = vpop.f32.mrb[2].mxu0 }
  0xf9   :  { %v880_v38 = vadd.f32 %v879_v36, %v878_v33  ;;  %v881_v39 = vpop.f32.mrb[2].mxu1  ;;  %v800_v40 = vpop.f32.mrb[3].mxu0 }
  0xfa   :  { %v801_v42 = vadd.f32 %v800_v40, %v799_v37  ;;  %v882_v43 = vpop.f32.mrb[3].mxu1 }
  0xfb   :  { %v557_v44 = vadd.f32 %v880_v38, %v798_v35  ;;  %v883_v45 = vadd.f32 %v882_v43, %v881_v39 }
  0xfd   :  { %v649_v47 = vmul.f32 %v1352_v41, %v557_v44  ;;  %v560_v48 = vadd.f32 %v883_v45, %v801_v42 }
  0xfe   :  { %v802_v49 = vpop.f32.mrb[4].mxu0 }
  0xff   :  { %v677_v50 = vadd.f32 %v1357_v46, %v649_v47  ;;  %v650_v51 = vmul.f32 %v1352_v41, %v560_v48  ;;  %v884_v52 = vpop.f32.mrb[4].mxu1  ;;  %v803_v53 = vpop.f32.mrb[5].mxu0 }
 0x100   :  { %v804_v54 = vadd.f32 %v803_v53, %v802_v49  ;;  %v885_v55 = vpop.f32.mrb[5].mxu1  ;;  %v805_v56 = vpop.f32.mrb[6].mxu0 }
 0x101   :  { %v698_v57 = vmax.f32 %v677_v50, 0.0  ;;  %v678_v58 = vadd.f32 %v1357_v46, %v650_v51  ;;  %v886_v59 = vadd.f32 %v885_v55, %v884_v52  ;;  %v887_v60 = vpop.f32.mrb[6].mxu1  ;;  %v806_v61 = vpop.f32.mrb[7].mxu0 }
 0x102   :  { %v807_v62 = vadd.f32 %v806_v61, %v805_v56  ;;  %v888_v63 = vpop.f32.mrb[7].mxu1 }
 0x103   :  { %720 = vst.msk [vmem:[%s1488_s4] sm:$0xff] %vm719_vm0, %v698_v57  ;;  %v699_v0 = vmax.f32 %v678_v58, 0.0  ;;  %v565_v1 = vadd.f32 %v886_v59, %v804_v54  ;;  %v889_v2 = vadd.f32 %v888_v63, %v887_v60 }
 0x105   :  { %721 = vst.msk [vmem:[%s1488_s4 + $0x8] sm:$0xff] %vm719_vm0, %v699_v0  ;;  %v651_v3 = vmul.f32 %v1352_v41, %v565_v1  ;;  %v568_v4 = vadd.f32 %v889_v2, %v807_v62 }
 0x106   :  { %v808_v5 = vpop.f32.mrb[8].mxu0 }
 0x107   :  { %v679_v6 = vadd.f32 %v1357_v46, %v651_v3  ;;  %v652_v7 = vmul.f32 %v1352_v41, %v568_v4  ;;  %v890_v8 = vpop.f32.mrb[8].mxu1  ;;  %v809_v9 = vpop.f32.mrb[9].mxu0 }
 0x108   :  { %v810_v10 = vadd.f32 %v809_v9, %v808_v5  ;;  %v891_v11 = vpop.f32.mrb[9].mxu1  ;;  %v811_v12 = vpop.f32.mrb[10].mxu0 }
 0x109   :  { %v700_v13 = vmax.f32 %v679_v6, 0.0  ;;  %v680_v14 = vadd.f32 %v1357_v46, %v652_v7  ;;  %v892_v15 = vadd.f32 %v891_v11, %v890_v8  ;;  %v893_v16 = vpop.f32.mrb[10].mxu1  ;;  %v812_v17 = vpop.f32.mrb[11].mxu0 }
 0x10a   :  { %v813_v18 = vadd.f32 %v812_v17, %v811_v12  ;;  %v894_v19 = vpop.f32.mrb[11].mxu1 }
 0x10b   :  { %722 = vst.msk [vmem:[%s1488_s4 + $0x10] sm:$0xff] %vm719_vm0, %v700_v13  ;;  %v701_v20 = vmax.f32 %v680_v14, 0.0  ;;  %v573_v21 = vadd.f32 %v892_v15, %v810_v10  ;;  %v895_v22 = vadd.f32 %v894_v19, %v893_v16 }
 0x10d   :  { %723 = vst.msk [vmem:[%s1488_s4 + $0x18] sm:$0xff] %vm719_vm0, %v701_v20  ;;  %v653_v23 = vmul.f32 %v1352_v41, %v573_v21  ;;  %v576_v24 = vadd.f32 %v895_v22, %v813_v18 }
 0x10e   :  { %v814_v25 = vpop.f32.mrb[12].mxu0 }
 0x10f   :  { %v681_v26 = vadd.f32 %v1357_v46, %v653_v23  ;;  %v654_v27 = vmul.f32 %v1352_v41, %v576_v24  ;;  %v896_v28 = vpop.f32.mrb[12].mxu1  ;;  %v815_v29 = vpop.f32.mrb[13].mxu0 }
 0x110   :  { %v816_v30 = vadd.f32 %v815_v29, %v814_v25  ;;  %v897_v31 = vpop.f32.mrb[13].mxu1  ;;  %v817_v32 = vpop.f32.mrb[14].mxu0 }
 0x111   :  { %v702_v33 = vmax.f32 %v681_v26, 0.0  ;;  %v682_v34 = vadd.f32 %v1357_v46, %v654_v27  ;;  %v898_v35 = vadd.f32 %v897_v31, %v896_v28  ;;  %v899_v36 = vpop.f32.mrb[14].mxu1  ;;  %v818_v37 = vpop.f32.mrb[15].mxu0 }
 0x112   :  { %v819_v38 = vadd.f32 %v818_v37, %v817_v32  ;;  %v900_v39 = vpop.f32.mrb[15].mxu1 }
 0x113   :  { %724 = vst.msk [vmem:[%s1488_s4 + $0x20] sm:$0xff] %vm719_vm0, %v702_v33  ;;  %v703_v40 = vmax.f32 %v682_v34, 0.0  ;;  %v581_v42 = vadd.f32 %v898_v35, %v816_v30  ;;  %v901_v43 = vadd.f32 %v900_v39, %v899_v36 }
 0x115   :  { %725 = vst.msk [vmem:[%s1488_s4 + $0x28] sm:$0xff] %vm719_vm0, %v703_v40  ;;  %v655_v44 = vmul.f32 %v1352_v41, %v581_v42  ;;  %v584_v45 = vadd.f32 %v901_v43, %v819_v38 }
 0x116   :  { %v820_v47 = vpop.f32.mrb[16].mxu0 }
 0x117   :  { %v683_v48 = vadd.f32 %v1357_v46, %v655_v44  ;;  %v656_v49 = vmul.f32 %v1352_v41, %v584_v45  ;;  %v902_v50 = vpop.f32.mrb[16].mxu1  ;;  %v821_v51 = vpop.f32.mrb[17].mxu0 }
 0x118   :  { %v822_v52 = vadd.f32 %v821_v51, %v820_v47  ;;  %v903_v53 = vpop.f32.mrb[17].mxu1  ;;  %v823_v54 = vpop.f32.mrb[18].mxu0 }
 0x119   :  { %v704_v55 = vmax.f32 %v683_v48, 0.0  ;;  %v684_v56 = vadd.f32 %v1357_v46, %v656_v49  ;;  %v904_v57 = vadd.f32 %v903_v53, %v902_v50  ;;  %v905_v58 = vpop.f32.mrb[18].mxu1  ;;  %v824_v59 = vpop.f32.mrb[19].mxu0 }
 0x11a   :  { %v825_v60 = vadd.f32 %v824_v59, %v823_v54  ;;  %v906_v61 = vpop.f32.mrb[19].mxu1 }
 0x11b   :  { %726 = vst.msk [vmem:[%s1488_s4 + $0x30] sm:$0xff] %vm719_vm0, %v704_v55  ;;  %v705_v62 = vmax.f32 %v684_v56, 0.0  ;;  %v589_v63 = vadd.f32 %v904_v57, %v822_v52  ;;  %v907_v0 = vadd.f32 %v906_v61, %v905_v58 }
 0x11d   :  { %727 = vst.msk [vmem:[%s1488_s4 + $0x38] sm:$0xff] %vm719_vm0, %v705_v62  ;;  %v657_v1 = vmul.f32 %v1352_v41, %v589_v63  ;;  %v592_v2 = vadd.f32 %v907_v0, %v825_v60 }
 0x11e   :  { %v826_v3 = vpop.f32.mrb[20].mxu0 }
 0x11f   :  { %v685_v4 = vadd.f32 %v1357_v46, %v657_v1  ;;  %v658_v5 = vmul.f32 %v1352_v41, %v592_v2  ;;  %v908_v6 = vpop.f32.mrb[20].mxu1  ;;  %v827_v7 = vpop.f32.mrb[21].mxu0 }
 0x120   :  { %v828_v8 = vadd.f32 %v827_v7, %v826_v3  ;;  %v909_v9 = vpop.f32.mrb[21].mxu1  ;;  %v829_v10 = vpop.f32.mrb[22].mxu0 }
 0x121   :  { %v706_v11 = vmax.f32 %v685_v4, 0.0  ;;  %v686_v12 = vadd.f32 %v1357_v46, %v658_v5  ;;  %v910_v13 = vadd.f32 %v909_v9, %v908_v6  ;;  %v911_v14 = vpop.f32.mrb[22].mxu1  ;;  %v830_v15 = vpop.f32.mrb[23].mxu0 }
 0x122   :  { %v831_v16 = vadd.f32 %v830_v15, %v829_v10  ;;  %v912_v17 = vpop.f32.mrb[23].mxu1 }
 0x123   :  { %728 = vst.msk [vmem:[%s1488_s4 + $0x40] sm:$0xff] %vm719_vm0, %v706_v11  ;;  %v707_v18 = vmax.f32 %v686_v12, 0.0  ;;  %v597_v19 = vadd.f32 %v910_v13, %v828_v8  ;;  %v913_v20 = vadd.f32 %v912_v17, %v911_v14 }
 0x125   :  { %729 = vst.msk [vmem:[%s1488_s4 + $0x48] sm:$0xff] %vm719_vm0, %v707_v18  ;;  %v659_v21 = vmul.f32 %v1352_v41, %v597_v19  ;;  %v600_v22 = vadd.f32 %v913_v20, %v831_v16 }
 0x126   :  { %v832_v23 = vpop.f32.mrb[24].mxu0 }
 0x127   :  { %v687_v24 = vadd.f32 %v1357_v46, %v659_v21  ;;  %v660_v25 = vmul.f32 %v1352_v41, %v600_v22  ;;  %v914_v26 = vpop.f32.mrb[24].mxu1  ;;  %v833_v27 = vpop.f32.mrb[25].mxu0 }
 0x128   :  { %v834_v28 = vadd.f32 %v833_v27, %v832_v23  ;;  %v915_v29 = vpop.f32.mrb[25].mxu1  ;;  %v835_v30 = vpop.f32.mrb[26].mxu0 }
 0x129   :  { %v708_v31 = vmax.f32 %v687_v24, 0.0  ;;  %v688_v32 = vadd.f32 %v1357_v46, %v660_v25  ;;  %v916_v33 = vadd.f32 %v915_v29, %v914_v26  ;;  %v917_v34 = vpop.f32.mrb[26].mxu1  ;;  %v836_v35 = vpop.f32.mrb[27].mxu0 }
 0x12a   :  { %v837_v36 = vadd.f32 %v836_v35, %v835_v30  ;;  %v918_v37 = vpop.f32.mrb[27].mxu1 }
 0x12b   :  { %730 = vst.msk [vmem:[%s1488_s4 + $0x50] sm:$0xff] %vm719_vm0, %v708_v31  ;;  %v709_v38 = vmax.f32 %v688_v32, 0.0  ;;  %v605_v39 = vadd.f32 %v916_v33, %v834_v28  ;;  %v919_v40 = vadd.f32 %v918_v37, %v917_v34 }
 0x12d   :  { %731 = vst.msk [vmem:[%s1488_s4 + $0x58] sm:$0xff] %vm719_vm0, %v709_v38  ;;  %v661_v42 = vmul.f32 %v1352_v41, %v605_v39  ;;  %v608_v43 = vadd.f32 %v919_v40, %v837_v36 }
 0x12e   :  { %v838_v44 = vpop.f32.mrb[28].mxu0 }
 0x12f   :  { %v689_v45 = vadd.f32 %v1357_v46, %v661_v42  ;;  %v662_v47 = vmul.f32 %v1352_v41, %v608_v43  ;;  %v920_v48 = vpop.f32.mrb[28].mxu1  ;;  %v839_v49 = vpop.f32.mrb[29].mxu0 }
 0x130   :  { %v840_v50 = vadd.f32 %v839_v49, %v838_v44  ;;  %v921_v51 = vpop.f32.mrb[29].mxu1  ;;  %v841_v52 = vpop.f32.mrb[30].mxu0 }
 0x131   :  { %v710_v53 = vmax.f32 %v689_v45, 0.0  ;;  %v690_v54 = vadd.f32 %v1357_v46, %v662_v47  ;;  %v922_v55 = vadd.f32 %v921_v51, %v920_v48  ;;  %v923_v56 = vpop.f32.mrb[30].mxu1  ;;  %v842_v57 = vpop.f32.mrb[31].mxu0 }
 0x132   :  { %v843_v58 = vadd.f32 %v842_v57, %v841_v52  ;;  %v924_v59 = vpop.f32.mrb[31].mxu1 }
 0x133   :  { %732 = vst.msk [vmem:[%s1488_s4 + $0x60] sm:$0xff] %vm719_vm0, %v710_v53  ;;  %v711_v60 = vmax.f32 %v690_v54, 0.0  ;;  %v613_v61 = vadd.f32 %v922_v55, %v840_v50  ;;  %v925_v62 = vadd.f32 %v924_v59, %v923_v56 }
 0x135   :  { %733 = vst.msk [vmem:[%s1488_s4 + $0x68] sm:$0xff] %vm719_vm0, %v711_v60  ;;  %v663_v63 = vmul.f32 %v1352_v41, %v613_v61  ;;  %v616_v0 = vadd.f32 %v925_v62, %v843_v58 }
 0x136   :  { %v844_v1 = vpop.f32.mrb[32].mxu0 }
 0x137   :  { %v691_v2 = vadd.f32 %v1357_v46, %v663_v63  ;;  %v664_v3 = vmul.f32 %v1352_v41, %v616_v0  ;;  %v926_v4 = vpop.f32.mrb[32].mxu1  ;;  %v845_v5 = vpop.f32.mrb[33].mxu0 }
 0x138   :  { %v846_v6 = vadd.f32 %v845_v5, %v844_v1  ;;  %v927_v7 = vpop.f32.mrb[33].mxu1  ;;  %v847_v8 = vpop.f32.mrb[34].mxu0 }
 0x139   :  { %v712_v9 = vmax.f32 %v691_v2, 0.0  ;;  %v692_v10 = vadd.f32 %v1357_v46, %v664_v3  ;;  %v928_v11 = vadd.f32 %v927_v7, %v926_v4  ;;  %v929_v12 = vpop.f32.mrb[34].mxu1  ;;  %v848_v13 = vpop.f32.mrb[35].mxu0 }
 0x13a   :  { %v849_v14 = vadd.f32 %v848_v13, %v847_v8  ;;  %v930_v15 = vpop.f32.mrb[35].mxu1 }
 0x13b   :  { %734 = vst.msk [vmem:[%s1488_s4 + $0x70] sm:$0xff] %vm719_vm0, %v712_v9  ;;  %v713_v16 = vmax.f32 %v692_v10, 0.0  ;;  %v621_v17 = vadd.f32 %v928_v11, %v846_v6  ;;  %v931_v18 = vadd.f32 %v930_v15, %v929_v12 }
 0x13d   :  { %735 = vst.msk [vmem:[%s1488_s4 + $0x78] sm:$0xff] %vm719_vm0, %v713_v16  ;;  %v665_v19 = vmul.f32 %v1352_v41, %v621_v17  ;;  %v624_v20 = vadd.f32 %v931_v18, %v849_v14 }
 0x13e   :  { %v850_v21 = vpop.f32.mrb[36].mxu0 }
 0x13f   :  { %v693_v22 = vadd.f32 %v1357_v46, %v665_v19  ;;  %v666_v23 = vmul.f32 %v1352_v41, %v624_v20  ;;  %v932_v24 = vpop.f32.mrb[36].mxu1  ;;  %v851_v25 = vpop.f32.mrb[37].mxu0 }
 0x140   :  { %v852_v26 = vadd.f32 %v851_v25, %v850_v21  ;;  %v933_v27 = vpop.f32.mrb[37].mxu1  ;;  %v853_v28 = vpop.f32.mrb[38].mxu0 }
 0x141   :  { %v714_v29 = vmax.f32 %v693_v22, 0.0  ;;  %v694_v30 = vadd.f32 %v1357_v46, %v666_v23  ;;  %v934_v31 = vadd.f32 %v933_v27, %v932_v24  ;;  %v935_v32 = vpop.f32.mrb[38].mxu1  ;;  %v854_v33 = vpop.f32.mrb[39].mxu0 }
 0x142   :  { %v855_v34 = vadd.f32 %v854_v33, %v853_v28  ;;  %v936_v35 = vpop.f32.mrb[39].mxu1 }
 0x143   :  { %736 = vst.msk [vmem:[%s1488_s4 + $0x80] sm:$0xff] %vm719_vm0, %v714_v29  ;;  %v715_v36 = vmax.f32 %v694_v30, 0.0  ;;  %v629_v37 = vadd.f32 %v934_v31, %v852_v26  ;;  %v937_v38 = vadd.f32 %v936_v35, %v935_v32 }
 0x145   :  { %737 = vst.msk [vmem:[%s1488_s4 + $0x88] sm:$0xff] %vm719_vm0, %v715_v36  ;;  %v667_v39 = vmul.f32 %v1352_v41, %v629_v37  ;;  %v632_v40 = vadd.f32 %v937_v38, %v855_v34 }
 0x146   :  { %v856_v42 = vpop.f32.mrb[40].mxu0 }
 0x147   :  { %v695_v43 = vadd.f32 %v1357_v46, %v667_v39  ;;  %v668_v44 = vmul.f32 %v1352_v41, %v632_v40  ;;  %v938_v45 = vpop.f32.mrb[40].mxu1  ;;  %v857_v47 = vpop.f32.mrb[41].mxu0 }
 0x148   :  { %v858_v48 = vadd.f32 %v857_v47, %v856_v42  ;;  %v939_v49 = vpop.f32.mrb[41].mxu1  ;;  %v859_v50 = vpop.f32.mrb[42].mxu0 }
 0x149   :  { %v716_v51 = vmax.f32 %v695_v43, 0.0  ;;  %v696_v52 = vadd.f32 %v1357_v46, %v668_v44  ;;  %v940_v53 = vadd.f32 %v939_v49, %v938_v45  ;;  %v941_v54 = vpop.f32.mrb[42].mxu1  ;;  %v860_v55 = vpop.f32.mrb[43].mxu0 }
 0x14a   :  { %v942_v56 = vpop.f32.mrb[43].mxu1 }
 0x14b   :  { %738 = vst.msk [vmem:[%s1488_s4 + $0x90] sm:$0xff] %vm719_vm0, %v716_v51  ;;  %v717_v57 = vmax.f32 %v696_v52, 0.0  ;;  %v637_v58 = vadd.f32 %v940_v53, %v858_v48 }
 0x14d   :  { %739 = vst.msk [vmem:[%s1488_s4 + $0x98] sm:$0xff] %vm719_vm0, %v717_v57  ;;  %v669_v59 = vmul.f32 %v1352_v41, %v637_v58 }
 0x14f   :  { %v697_v60 = vadd.f32 %v1357_v46, %v669_v59 }
 0x151   :  { %v718_v61 = vmax.f32 %v697_v60, 0.0 }
 0x153   :  { %741 = vst.msk [vmem:[%s1488_s4 + $0xa0] sm:$0x3] %vm740_vm1, %v718_v61 }

// kernel: forward.6
= control target key start
LH: loop header
LB: loop body
LE: loop exit
PB: predicated region body
PF: predicated region fallthrough
CT: control target
= control target key end

     0   :  { %v1017_v39 = vmov 0.0   ;;  %vm1018_vm0 = vmmov 0   ;;  %vm406_vm1 = vcmask 523264   ;;  %vm757_vm2 = vcmask 517120   ;;  %s1490_s1 = inlined_call_operand.vmem [shape: bf16[576,64], index: 1, kind: input, shape index: {}]   ;;  %s1491_s0 = inlined_call_operand.vmem [shape: f32[98,576], index: 0, kind: input, shape index: {}]   ;;  %s1492_s2 = inlined_call_operand.vmem [shape: f32[1,64], index: 2, kind: input, shape index: {}]   ;;  %s1493_s3 = inlined_call_operand.vmem [shape: f32[1,64], index: 3, kind: input, shape index: {}]   ;;  %s1494_s4 = inlined_call_operand.vmem [shape: f32[98,64], index: 4, kind: output, shape index: {}]  }
   0x1   :  { %v981_v0 = vld [vmem:[%s1490_s1 + $0x40] sm:$0xff]   ;;  %v985_v4 = vld [vmem:[%s1490_s1 + $0x48] sm:$0xff]   ;;  %v989_v8 = vld [vmem:[%s1490_s1 + $0x50] sm:$0xff]  }
   0x2   :  { %v982_v1 = vld [vmem:[%s1490_s1 + $0xc0] sm:$0xff]   ;;  %808 = vmatprep.subr.bf16.mxu0 %v981_v0  ;;  %v986_v5 = vld [vmem:[%s1490_s1 + $0xc8] sm:$0xff]   ;;  %v990_v9 = vld [vmem:[%s1490_s1 + $0xd0] sm:$0xff]  }
   0x3   :  { %v983_v2 = vld [vmem:[%s1490_s1] sm:$0xff]   ;;  %866 = vmatprep.subr.bf16.mxu1 %v982_v1  ;;  %v987_v6 = vld [vmem:[%s1490_s1 + $0x8] sm:$0xff]   ;;  %v991_v10 = vld [vmem:[%s1490_s1 + $0x10] sm:$0xff]  }
   0x4   :  { %v984_v3 = vld [vmem:[%s1490_s1 + $0x80] sm:$0xff]   ;;  %809 = vmatpush3.bf16.msra.mxu0 %v983_v2  ;;  %v988_v7 = vld [vmem:[%s1490_s1 + $0x88] sm:$0xff]   ;;  %v992_v11 = vld [vmem:[%s1490_s1 + $0x90] sm:$0xff]  }
   0x5   :  { %867 = vmatpush3.bf16.msra.mxu1 %v984_v3  ;;  %810 = vmatprep.subr.bf16.mxu0 %v985_v4  ;;  %v993_v12 = vld [vmem:[%s1490_s1 + $0x58] sm:$0xff]   ;;  %v997_v16 = vld [vmem:[%s1490_s1 + $0x60] sm:$0xff]   ;;  %v1001_v20 = vld [vmem:[%s1490_s1 + $0x68] sm:$0xff]  }
   0x6   :  { %868 = vmatprep.subr.bf16.mxu1 %v986_v5  ;;  %v994_v13 = vld [vmem:[%s1490_s1 + $0xd8] sm:$0xff]   ;;  %v998_v17 = vld [vmem:[%s1490_s1 + $0xe0] sm:$0xff]   ;;  %v1002_v21 = vld [vmem:[%s1490_s1 + $0xe8] sm:$0xff]  }
   0x7   :  { %v995_v14 = vld [vmem:[%s1490_s1 + $0x18] sm:$0xff]   ;;  %v999_v18 = vld [vmem:[%s1490_s1 + $0x20] sm:$0xff]   ;;  %v1003_v22 = vld [vmem:[%s1490_s1 + $0x28] sm:$0xff]  }
   0x8   :  { %811 = vmatpush3.bf16.msra.mxu0 %v987_v6  ;;  %v996_v15 = vld [vmem:[%s1490_s1 + $0x98] sm:$0xff]   ;;  %v1000_v19 = vld [vmem:[%s1490_s1 + $0xa0] sm:$0xff]   ;;  %v1004_v23 = vld [vmem:[%s1490_s1 + $0xa8] sm:$0xff]  }
   0x9   :  { %869 = vmatpush3.bf16.msra.mxu1 %v988_v7  ;;  %812 = vmatprep.subr.bf16.mxu0 %v989_v8  ;;  %v1005_v24 = vld [vmem:[%s1490_s1 + $0x70] sm:$0xff]   ;;  %v1009_v28 = vld [vmem:[%s1490_s1 + $0x78] sm:$0xff]   ;;  %v19_v32 = vld [vmem:[%s1491_s0 + $0x8] sm:$0xff] }
   0xa   :  { %870 = vmatprep.subr.bf16.mxu1 %v990_v9  ;;  %v1006_v25 = vld [vmem:[%s1490_s1 + $0xf0] sm:$0xff]   ;;  %v1010_v29 = vld [vmem:[%s1490_s1 + $0xf8] sm:$0xff]   ;;  %v26_v36 = vld [vmem:[%s1491_s0 + $0x40] sm:$0xff] }
   0xb   :  { %v1007_v26 = vld [vmem:[%s1490_s1 + $0x30] sm:$0xff]   ;;  %v1011_v30 = vld [vmem:[%s1490_s1 + $0x38] sm:$0xff]   ;;  %v18_v37 = vld [vmem:[%s1491_s0] sm:$0xff] }
   0xc   :  { %813 = vmatpush3.bf16.msra.mxu0 %v991_v10  ;;  %v1008_v27 = vld [vmem:[%s1490_s1 + $0xb0] sm:$0xff]   ;;  %v1012_v31 = vld [vmem:[%s1490_s1 + $0xb8] sm:$0xff]   ;;  %v23_v38 = vld [vmem:[%s1491_s0 + $0x28] sm:$0xff] }
   0xd   :  { %871 = vmatpush3.bf16.msra.mxu1 %v992_v11  ;;  %814 = vmatprep.subr.bf16.mxu0 %v993_v12  ;;  %v24_v33 = vld [vmem:[%s1491_s0 + $0x30] sm:$0xff]  ;;  %v21_v34 = vld [vmem:[%s1491_s0 + $0x18] sm:$0xff]  ;;  %v83_v41 = vpack.c.bf16 %v23_v38, %v18_v37  ;;  %v1013_v45 = vld [vmem:[%s1490_s1 + $0x100] sm:$0xff]  }
   0xe   :  { %872 = vmatprep.subr.bf16.mxu1 %v994_v13  ;;  %v84_v35 = vpack.c.bf16 %v24_v33, %v19_v32  ;;  %v86_v40 = vpack.c.bf16 %v26_v36, %v21_v34  ;;  %v20_v42 = vld [vmem:[%s1491_s0 + $0x10] sm:$0xff]  ;;  %v25_v43 = vld [vmem:[%s1491_s0 + $0x38] sm:$0xff]  ;;  %v34_v47 = vld [vmem:[%s1491_s0 + $0x80] sm:$0xff] }
   0xf   :  { %v85_v44 = vpack.c.bf16 %v25_v43, %v20_v42  ;;  %v29_v46 = vld [vmem:[%s1491_s0 + $0x58] sm:$0xff]  ;;  %v31_v48 = vld [vmem:[%s1491_s0 + $0x68] sm:$0xff]  ;;  %v36_v49 = vld [vmem:[%s1491_s0 + $0x90] sm:$0xff] }
  0x10   :  { %815 = vmatpush3.bf16.msra.mxu0 %v995_v14  ;;  %460 = vmatprep.mubr.bf16.mxu0 %v84_v35  ;;  %v89_v50 = vpack.c.bf16 %v34_v47, %v29_v46  ;;  %v91_v51 = vpack.c.bf16 %v36_v49, %v31_v48  ;;  %v28_v52 = vld [vmem:[%s1491_s0 + $0x50] sm:$0xff]  ;;  %v33_v53 = vld [vmem:[%s1491_s0 + $0x78] sm:$0xff]  ;;  %v30_v54 = vld [vmem:[%s1491_s0 + $0x60] sm:$0xff] }
  0x11   :  { %873 = vmatpush3.bf16.msra.mxu1 %v996_v15  ;;  %816 = vmatprep.subr.bf16.mxu0 %v997_v16  ;;  %v35_v55 = vld [vmem:[%s1491_s0 + $0x88] sm:$0xff]  ;;  %v44_v57 = vld [vmem:[%s1491_s0 + $0xd0] sm:$0xff]  ;;  %v41_v58 = vld [vmem:[%s1491_s0 + $0xb8] sm:$0xff]  ;;  %v88_v60 = vpack.c.bf16 %v33_v53, %v28_v52 }
  0x12   :  { %874 = vmatprep.subr.bf16.mxu1 %v998_v17  ;;  %548 = vmatprep.mubr.bf16.mxu1 %v86_v40  ;;  %v39_v56 = vld [vmem:[%s1491_s0 + $0xa8] sm:$0xff]  ;;  %v46_v59 = vld [vmem:[%s1491_s0 + $0xe0] sm:$0xff]  ;;  %v90_v62 = vpack.c.bf16 %v35_v55, %v30_v54  ;;  %v40_v3 = vld [vmem:[%s1491_s0 + $0xb0] sm:$0xff] }
  0x13   :  { %v1014_v61 = vld [vmem:[%s1490_s1 + $0x108] sm:$0xff]   ;;  %v94_v63 = vpack.c.bf16 %v44_v57, %v39_v56  ;;  %v96_v0 = vpack.c.bf16 %v46_v59, %v41_v58  ;;  %v38_v1 = vld [vmem:[%s1491_s0 + $0xa0] sm:$0xff]  ;;  %v1015_v4 = vld [vmem:[%s1490_s1 + $0x110] sm:$0xff]  }
  0x14   :  { %817 = vmatpush3.bf16.msra.mxu0 %v999_v18  ;;  %v43_v2 = vld [vmem:[%s1491_s0 + $0xc8] sm:$0xff]  ;;  %v45_v5 = vld [vmem:[%s1491_s0 + $0xd8] sm:$0xff]  ;;  %v54_v7 = vld [vmem:[%s1491_s0 + $0x120] sm:$0xff] }
  0x15   :  { %875 = vmatpush3.bf16.msra.mxu1 %v1000_v19  ;;  %818 = vmatprep.subr.bf16.mxu0 %v1001_v20  ;;  %v49_v6 = vld [vmem:[%s1491_s0 + $0xf8] sm:$0xff]  ;;  %v51_v8 = vld [vmem:[%s1491_s0 + $0x108] sm:$0xff]  ;;  %v56_v9 = vld [vmem:[%s1491_s0 + $0x130] sm:$0xff]  ;;  %v93_v10 = vpack.c.bf16 %v43_v2, %v38_v1  ;;  %v95_v11 = vpack.c.bf16 %v45_v5, %v40_v3 }
  0x16   :  { %876 = vmatprep.subr.bf16.mxu1 %v1002_v21  ;;  %v99_v12 = vpack.c.bf16 %v54_v7, %v49_v6  ;;  %v101_v13 = vpack.c.bf16 %v56_v9, %v51_v8  ;;  %v1016_v14 = vld [vmem:[%s1490_s1 + $0x118] sm:$0xff]   ;;  %v48_v15 = vld [vmem:[%s1491_s0 + $0xf0] sm:$0xff]  ;;  %v50_v17 = vld [vmem:[%s1491_s0 + $0x100] sm:$0xff] }
  0x17   :  { %v53_v16 = vld [vmem:[%s1491_s0 + $0x118] sm:$0xff]  ;;  %v55_v18 = vld [vmem:[%s1491_s0 + $0x128] sm:$0xff]  ;;  %v64_v20 = vld [vmem:[%s1491_s0 + $0x170] sm:$0xff] }
  0x18   :  { %819 = vmatpush3.bf16.msra.mxu0 %v1003_v22  ;;  %v59_v19 = vld [vmem:[%s1491_s0 + $0x148] sm:$0xff]  ;;  %v61_v21 = vld [vmem:[%s1491_s0 + $0x158] sm:$0xff]  ;;  %v66_v22 = vld [vmem:[%s1491_s0 + $0x180] sm:$0xff] }
  0x19   :  { %877 = vmatpush3.bf16.msra.mxu1 %v1004_v23  ;;  %820 = vmatprep.subr.bf16.mxu0 %v1005_v24  ;;  %v98_v23 = vpack.c.bf16 %v53_v16, %v48_v15  ;;  %v100_v24 = vpack.c.bf16 %v55_v18, %v50_v17  ;;  %v74_v32 = vld [vmem:[%s1491_s0 + $0x1c0] sm:$0xff]  ;;  %v71_v33 = vld [vmem:[%s1491_s0 + $0x1a8] sm:$0xff]  ;;  %v76_v34 = vld [vmem:[%s1491_s0 + $0x1d0] sm:$0xff] }
  0x1a   :  { %878 = vmatprep.subr.bf16.mxu1 %v1006_v25  ;;  %v104_v25 = vpack.c.bf16 %v64_v20, %v59_v19  ;;  %v111_v38 = vpack.c.bf16 %v76_v34, %v71_v33  ;;  %v68_v40 = vld [vmem:[%s1491_s0 + $0x190] sm:$0xff]  ;;  %v70_v42 = vld [vmem:[%s1491_s0 + $0x1a0] sm:$0xff]  ;;  %v75_v43 = vld [vmem:[%s1491_s0 + $0x1c8] sm:$0xff] }
  0x1b   :  { %v110_v47 = vpack.c.bf16 %v75_v43, %v70_v42  ;;  %v22_v54 = vld [vmem:[%s1491_s0 + $0x20] sm:$0xff]  ;;  %v27_v55 = vld [vmem:[%s1491_s0 + $0x48] sm:$0xff]  ;;  %v52_v7 = vld [vmem:[%s1491_s0 + $0x110] sm:$0xff] }
  0x1c   :  { %821 = vmatpush3.bf16.msra.mxu0 %v1007_v26  ;;  %v106_v26 = vpack.c.bf16 %v66_v22, %v61_v21  ;;  %v62_v56 = vld [vmem:[%s1491_s0 + $0x160] sm:$0xff]  ;;  %v67_v57 = vld [vmem:[%s1491_s0 + $0x188] sm:$0xff]  ;;  %v87_v58 = vpack.c.bf16 %v27_v55, %v22_v54  ;;  %v57_v8 = vld [vmem:[%s1491_s0 + $0x138] sm:$0xff] }
  0x1d   :  { %879 = vmatpush3.bf16.msra.mxu1 %v1008_v27  ;;  %822 = vmatprep.subr.bf16.mxu0 %v1009_v28  ;;  %v58_v27 = vld [vmem:[%s1491_s0 + $0x140] sm:$0xff]  ;;  %v63_v28 = vld [vmem:[%s1491_s0 + $0x168] sm:$0xff]  ;;  %v107_v59 = vpack.c.bf16 %v67_v57, %v62_v56  ;;  %v102_v9 = vpack.c.bf16 %v57_v8, %v52_v7 }
  0x1e   :  { %880 = vmatprep.subr.bf16.mxu1 %v1010_v29  ;;  %v60_v29 = vld [vmem:[%s1491_s0 + $0x150] sm:$0xff]  ;;  %v103_v35 = vpack.c.bf16 %v63_v28, %v58_v27  ;;  %v42_v2 = vld [vmem:[%s1491_s0 + $0xc0] sm:$0xff]  ;;  %v47_v3 = vld [vmem:[%s1491_s0 + $0xe8] sm:$0xff] }
  0x1f   :  { %v97_v5 = vpack.c.bf16 %v47_v3, %v42_v2 }
  0x20   :  { %823 = vmatpush3.bf16.msra.mxu0 %v1011_v30  ;;  %v65_v30 = vld [vmem:[%s1491_s0 + $0x178] sm:$0xff] }
  0x21   :  { %881 = vmatpush3.bf16.msra.mxu1 %v1012_v31  ;;  %935 = vmatprep.subr.bf16.mxu0 %v1017_v39  ;;  %v69_v31 = vld [vmem:[%s1491_s0 + $0x198] sm:$0xff]  ;;  %v105_v36 = vpack.c.bf16 %v65_v30, %v60_v29 }
  0x22   :  { %971 = vmatprep.subr.bf16.mxu1 %v1017_v39  ;;  %v109_v37 = vpack.c.bf16 %v74_v32, %v69_v31 }
  0x23   :  { %461 = vmatmul.mubr.bf16.vlgmr.msra.gmra.mrb[0].mxu0 %v83_v41  ;;  %v73_v41 = vld [vmem:[%s1491_s0 + $0x1b8] sm:$0xff] }
  0x24   :  { %549 = vmatmul.mubr.bf16.vlgmr.msra.gmra.mrb[0].mxu1 %v85_v44  ;;  %936 = vmatpush3.bf16.msra.mxu0 %v1013_v45  ;;  %v79_v44 = vld [vmem:[%s1491_s0 + $0x1e8] sm:$0x3]  ;;  %v108_v46 = vpack.c.bf16 %v73_v41, %v68_v40 }
  0x25   :  { %975 = vmatpush3.bf16.msra.mxu1 %v1013_v45  ;;  %937 = vmatprep.subr.bf16.mxu0 %v1017_v39  ;;  %v81_v45 = vld [vmem:[%s1491_s0 + $0x1f8] sm:$0x3]  ;;  %v114_v48 = vpack.c.bf16 %v79_v44, %v79_v44 }
  0x26   :  { %468 = vmatprep.mubr.bf16.mxu0 %v89_v50  ;;  %556 = vmatprep.mubr.bf16.mxu1 %v91_v51  ;;  %v116_v49 = vpack.c.bf16 %v81_v45, %v81_v45  ;;  %v78_v50 = vld [vmem:[%s1491_s0 + $0x1e0] sm:$0x3]  ;;  %v80_v51 = vld [vmem:[%s1491_s0 + $0x1f0] sm:$0x3] }
  0x27   :  { %972 = vmatprep.subr.bf16.mxu1 %v1017_v39  ;;  %v113_v52 = vpack.c.bf16 %v78_v50, %v78_v50  ;;  %v115_v53 = vpack.c.bf16 %v80_v51, %v80_v51 }
  0x28   :  { %938 = vmatpush3.bf16.msra.mxu0 %v1014_v61 }
  0x29   :  { %976 = vmatpush3.bf16.msra.mxu1 %v1014_v61  ;;  %939 = vmatprep.subr.bf16.mxu0 %v1017_v39  ;;  %v37_v61 = vld [vmem:[%s1491_s0 + $0x98] sm:$0xff] }
  0x2a   :  { %973 = vmatprep.subr.bf16.mxu1 %v1017_v39 }
  0x2b   :  { %469 = vmatmul.mubr.bf16.gmra.mrb[4].mxu0 %v88_v60  ;;  %v32_v60 = vld [vmem:[%s1491_s0 + $0x70] sm:$0xff] }
  0x2c   :  { %557 = vmatmul.mubr.bf16.gmra.mrb[4].mxu1 %v90_v62  ;;  %476 = vmatprep.mubr.bf16.mxu0 %v94_v63  ;;  %v72_v62 = vld [vmem:[%s1491_s0 + $0x1b0] sm:$0xff]  ;;  %v77_v63 = vld [vmem:[%s1491_s0 + $0x1d8] sm:$0xff] }
  0x2d   :  { %564 = vmatprep.mubr.bf16.mxu1 %v96_v0  ;;  %940 = vmatpush3.bf16.msra.mxu0 %v1015_v4  ;;  %v92_v0 = vpack.c.bf16 %v37_v61, %v32_v60  ;;  %v112_v1 = vpack.c.bf16 %v77_v63, %v72_v62 }
  0x2e   :  { %977 = vmatpush3.bf16.msra.mxu1 %v1015_v4  ;;  %941 = vmatprep.subr.bf16.mxu0 %v1017_v39  ;;  %v82_v4 = vld [vmem:[%s1491_s0 + $0x200] sm:$0x3] }
  0x2f   :  { %974 = vmatprep.subr.bf16.mxu1 %v1017_v39  ;;  %v117_v6 = vpack.c.bf16 %v82_v4, %v82_v4 }
  0x31   :  { %942 = vmatpush3.bf16.msra.mxu0 %v1016_v14 }
  0x32   :  { %978 = vmatpush3.bf16.msra.mxu1 %v1016_v14 }
  0x33   :  { %477 = vmatmul.mubr.bf16.gmra.mrb[8].mxu0 %v93_v10 }
  0x34   :  { %565 = vmatmul.mubr.bf16.gmra.mrb[8].mxu1 %v95_v11  ;;  %484 = vmatprep.mubr.bf16.mxu0 %v99_v12 }
  0x35   :  { %572 = vmatprep.mubr.bf16.mxu1 %v101_v13 }
  0x3b   :  { %485 = vmatmul.mubr.bf16.gmra.mrb[12].mxu0 %v98_v23 }
  0x3c   :  { %573 = vmatmul.mubr.bf16.gmra.mrb[12].mxu1 %v100_v24  ;;  %492 = vmatprep.mubr.bf16.mxu0 %v104_v25 }
  0x3d   :  { %580 = vmatprep.mubr.bf16.mxu1 %v106_v26 }
  0x43   :  { %493 = vmatmul.mubr.bf16.gmra.mrb[16].mxu0 %v103_v35 }
  0x44   :  { %581 = vmatmul.mubr.bf16.gmra.mrb[16].mxu1 %v105_v36  ;;  %500 = vmatprep.mubr.bf16.mxu0 %v109_v37 }
  0x45   :  { %588 = vmatprep.mubr.bf16.mxu1 %v111_v38 }
  0x4b   :  { %501 = vmatmul.mubr.bf16.gmra.mrb[20].mxu0 %v108_v46 }
  0x4c   :  { %589 = vmatmul.mubr.bf16.gmra.mrb[20].mxu1 %v110_v47  ;;  %508 = vmatprep.mubr.bf16.mxu0 %v114_v48 }
  0x4d   :  { %596 = vmatprep.mubr.bf16.mxu1 %v116_v49 }
  0x53   :  { %509 = vmatmul.mubr.bf16.gmra.mrb[24].mxu0 %v113_v52 }
  0x54   :  { %597 = vmatmul.mubr.bf16.gmra.mrb[24].mxu1 %v115_v53  ;;  %943 = vmatprep.mubr.msk.bf16.mxu0 %vm1018_vm0, %v1017_v39 }
  0x55   :  { %959 = vmatprep.mubr.msk.bf16.mxu1 %vm1018_vm0, %v1017_v39 }
  0x5b   :  { %944 = vmatmul.mubr.msk.bf16.vlgmr.msra.gmra.mrb[28].mxu0 %vm406_vm1, %v87_v58 }
  0x5c   :  { %960 = vmatmul.mubr.msk.bf16.vlgmr.msra.gmra.mrb[28].mxu1 %vm406_vm1, %v107_v59  ;;  %947 = vmatprep.mubr.msk.bf16.mxu0 %vm1018_vm0, %v1017_v39 }
  0x5d   :  { %963 = vmatprep.mubr.msk.bf16.mxu1 %vm1018_vm0, %v1017_v39 }
  0x63   :  { %948 = vmatmul.mubr.msk.bf16.gmra.mrb[32].mxu0 %vm406_vm1, %v92_v0 }
  0x64   :  { %964 = vmatmul.mubr.msk.bf16.gmra.mrb[32].mxu1 %vm406_vm1, %v112_v1  ;;  %951 = vmatprep.mubr.msk.bf16.mxu0 %vm1018_vm0, %v1017_v39 }
  0x65   :  { %967 = vmatprep.mubr.msk.bf16.mxu1 %vm1018_vm0, %v1017_v39 }
  0x6b   :  { %952 = vmatmul.mubr.msk.bf16.gmra.mrb[36].mxu0 %vm406_vm1, %v97_v5 }
  0x6c   :  { %968 = vmatmul.mubr.msk.bf16.gmra.mrb[36].mxu1 %vm406_vm1, %v117_v6  ;;  %955 = vmatprep.mubr.msk.bf16.mxu0 %vm1018_vm0, %v1017_v39 }
  0x73   :  { %956 = vmatmul.mubr.msk.bf16.gmra.mrb[40].mxu0 %vm406_vm1, %v102_v9 }
  0xf6   :  { %v824_v10 = vpop.f32.mrb[0].mxu0 }
  0xf7   :  { %v882_v11 = vpop.f32.mrb[0].mxu1  ;;  %v825_v12 = vpop.f32.mrb[1].mxu0 }
  0xf8   :  { %v826_v13 = vadd.f32 %v825_v12, %v824_v10  ;;  %v883_v14 = vpop.f32.mrb[1].mxu1  ;;  %v827_v15 = vpop.f32.mrb[2].mxu0 }
  0xf9   :  { %v884_v16 = vadd.f32 %v883_v14, %v882_v11  ;;  %v885_v17 = vpop.f32.mrb[2].mxu1  ;;  %v828_v39 = vpop.f32.mrb[3].mxu0 }
  0xfa   :  { %v829_v18 = vadd.f32 %v828_v39, %v827_v15  ;;  %v886_v19 = vpop.f32.mrb[3].mxu1 }
  0xfb   :  { %v887_v20 = vadd.f32 %v886_v19, %v885_v17  ;;  %v1376_v21 = vadd.f32 %v884_v16, %v826_v13 }
  0xfd   :  { %v1378_v22 = vadd.f32 %v887_v20, %v829_v18 }
  0xfe   :  { %v830_v23 = vpop.f32.mrb[4].mxu0 }
  0xff   :  { %v888_v24 = vpop.f32.mrb[4].mxu1  ;;  %v831_v25 = vpop.f32.mrb[5].mxu0 }
 0x100   :  { %v832_v26 = vadd.f32 %v831_v25, %v830_v23  ;;  %v889_v27 = vpop.f32.mrb[5].mxu1  ;;  %v833_v28 = vpop.f32.mrb[6].mxu0 }
 0x101   :  { %v890_v29 = vadd.f32 %v889_v27, %v888_v24  ;;  %v891_v30 = vpop.f32.mrb[6].mxu1  ;;  %v834_v31 = vpop.f32.mrb[7].mxu0 }
 0x102   :  { %v835_v32 = vadd.f32 %v834_v31, %v833_v28  ;;  %v892_v33 = vpop.f32.mrb[7].mxu1 }
 0x103   :  { %v893_v34 = vadd.f32 %v892_v33, %v891_v30  ;;  %v1380_v35 = vadd.f32 %v890_v29, %v832_v26 }
 0x105   :  { %v1382_v36 = vadd.f32 %v893_v34, %v835_v32 }
 0x106   :  { %v836_v37 = vpop.f32.mrb[8].mxu0 }
 0x107   :  { %v894_v38 = vpop.f32.mrb[8].mxu1  ;;  %v837_v40 = vpop.f32.mrb[9].mxu0 }
 0x108   :  { %v838_v41 = vadd.f32 %v837_v40, %v836_v37  ;;  %v895_v42 = vpop.f32.mrb[9].mxu1  ;;  %v839_v43 = vpop.f32.mrb[10].mxu0 }
 0x109   :  { %v896_v44 = vadd.f32 %v895_v42, %v894_v38  ;;  %v897_v45 = vpop.f32.mrb[10].mxu1  ;;  %v840_v46 = vpop.f32.mrb[11].mxu0 }
 0x10a   :  { %v841_v47 = vadd.f32 %v840_v46, %v839_v43  ;;  %v898_v48 = vpop.f32.mrb[11].mxu1  ;;  %v1397_v46 = vld [vmem:[%s1492_s2] ss:$0 sm:$0xff] }
 0x10b   :  { %v899_v49 = vadd.f32 %v898_v48, %v897_v45  ;;  %v1384_v50 = vadd.f32 %v896_v44, %v838_v41 }
 0x10d   :  { %v1386_v51 = vadd.f32 %v899_v49, %v841_v47 }
 0x10e   :  { %v842_v52 = vpop.f32.mrb[12].mxu0 }
 0x10f   :  { %v900_v53 = vpop.f32.mrb[12].mxu1  ;;  %v843_v54 = vpop.f32.mrb[13].mxu0 }
 0x110   :  { %v844_v55 = vadd.f32 %v843_v54, %v842_v52  ;;  %v901_v56 = vpop.f32.mrb[13].mxu1  ;;  %v845_v57 = vpop.f32.mrb[14].mxu0  ;;  %v1403_v52 = vld [vmem:[%s1493_s3] ss:$0 sm:$0xff] }
 0x111   :  { %v902_v58 = vadd.f32 %v901_v56, %v900_v53  ;;  %v903_v59 = vpop.f32.mrb[14].mxu1  ;;  %v846_v60 = vpop.f32.mrb[15].mxu0 }
 0x112   :  { %v847_v61 = vadd.f32 %v846_v60, %v845_v57  ;;  %v904_v62 = vpop.f32.mrb[15].mxu1 }
 0x113   :  { %v905_v63 = vadd.f32 %v904_v62, %v903_v59  ;;  %v1388_v0 = vadd.f32 %v902_v58, %v844_v55 }
 0x115   :  { %v1390_v1 = vadd.f32 %v905_v63, %v847_v61 }
 0x116   :  { %v848_v2 = vpop.f32.mrb[16].mxu0 }
 0x117   :  { %v906_v3 = vpop.f32.mrb[16].mxu1  ;;  %v849_v4 = vpop.f32.mrb[17].mxu0 }
 0x118   :  { %v850_v5 = vadd.f32 %v849_v4, %v848_v2  ;;  %v907_v6 = vpop.f32.mrb[17].mxu1  ;;  %v851_v7 = vpop.f32.mrb[18].mxu0 }
 0x119   :  { %v908_v8 = vadd.f32 %v907_v6, %v906_v3  ;;  %v909_v9 = vpop.f32.mrb[18].mxu1  ;;  %v852_v10 = vpop.f32.mrb[19].mxu0 }
 0x11a   :  { %v853_v11 = vadd.f32 %v852_v10, %v851_v7  ;;  %v910_v12 = vpop.f32.mrb[19].mxu1 }
 0x11b   :  { %v911_v13 = vadd.f32 %v910_v12, %v909_v9  ;;  %v583_v14 = vadd.f32 %v908_v8, %v850_v5 }
 0x11d   :  { %v586_v15 = vadd.f32 %v911_v13, %v853_v11 }
 0x11e   :  { %v854_v16 = vpop.f32.mrb[20].mxu0 }
 0x11f   :  { %v912_v17 = vpop.f32.mrb[20].mxu1  ;;  %v855_v39 = vpop.f32.mrb[21].mxu0 }
 0x120   :  { %v856_v18 = vadd.f32 %v855_v39, %v854_v16  ;;  %v913_v19 = vpop.f32.mrb[21].mxu1  ;;  %v857_v20 = vpop.f32.mrb[22].mxu0 }
 0x121   :  { %v914_v23 = vadd.f32 %v913_v19, %v912_v17  ;;  %v915_v24 = vpop.f32.mrb[22].mxu1  ;;  %v858_v25 = vpop.f32.mrb[23].mxu0 }
 0x122   :  { %v859_v26 = vadd.f32 %v858_v25, %v857_v20  ;;  %v916_v27 = vpop.f32.mrb[23].mxu1 }
 0x123   :  { %v917_v28 = vadd.f32 %v916_v27, %v915_v24  ;;  %v591_v29 = vadd.f32 %v914_v23, %v856_v18 }
 0x125   :  { %v594_v30 = vadd.f32 %v917_v28, %v859_v26 }
 0x126   :  { %v860_v31 = vpop.f32.mrb[24].mxu0 }
 0x127   :  { %v918_v32 = vpop.f32.mrb[24].mxu1  ;;  %v861_v33 = vpop.f32.mrb[25].mxu0 }
 0x128   :  { %v862_v34 = vadd.f32 %v861_v33, %v860_v31  ;;  %v919_v37 = vpop.f32.mrb[25].mxu1  ;;  %v863_v38 = vpop.f32.mrb[26].mxu0 }
 0x129   :  { %v920_v40 = vadd.f32 %v919_v37, %v918_v32  ;;  %v864_v41 = vpop.f32.mrb[27].mxu0  ;;  %v921_v42 = vpop.f32.mrb[26].mxu1 }
 0x12a   :  { %v922_v43 = vpop.f32.mrb[27].mxu1 }
 0x12b   :  { %v1392_v44 = vadd.f32 %v920_v40, %v862_v34 }
 0x12e   :  { %v638_v45 = vpop.f32.mrb[28].mxu0 }
 0x12f   :  { %v639_v47 = vadd.f32 %v638_v45, %v1376_v21  ;;  %v670_v48 = vpop.f32.mrb[28].mxu1  ;;  %v945_v49 = vpop.f32.mrb[29].mxu0 }
 0x130   :  { %v671_v53 = vadd.f32 %v670_v48, %v583_v14  ;;  %v961_v54 = vpop.f32.mrb[29].mxu1  ;;  %v641_v55 = vpop.f32.mrb[30].mxu0 }
 0x131   :  { %v699_v56 = vmul.f32 %v1397_v46, %v639_v47  ;;  %v642_v57 = vadd.f32 %v641_v55, %v1378_v22  ;;  %v673_v58 = vpop.f32.mrb[30].mxu1  ;;  %v946_v59 = vpop.f32.mrb[31].mxu0 }
 0x132   :  { %v707_v60 = vmul.f32 %v1397_v46, %v671_v53  ;;  %v674_v61 = vadd.f32 %v673_v58, %v586_v15  ;;  %v962_v21 = vpop.f32.mrb[31].mxu1 }
 0x133   :  { %v719_v62 = vadd.f32 %v1403_v52, %v699_v56  ;;  %v700_v63 = vmul.f32 %v1397_v46, %v642_v57 }
 0x134   :  { %v727_v2 = vadd.f32 %v1403_v52, %v707_v60  ;;  %v708_v3 = vmul.f32 %v1397_v46, %v674_v61 }
 0x135   :  { %v732_v4 = vmax.f32 %v719_v62, 0.0  ;;  %v720_v5 = vadd.f32 %v1403_v52, %v700_v63 }
 0x136   :  { %v740_v6 = vmax.f32 %v727_v2, 0.0  ;;  %v728_v22 = vadd.f32 %v1403_v52, %v708_v3  ;;  %v646_v7 = vpop.f32.mrb[32].mxu0 }
 0x137   :  { %745 = vst.msk [vmem:[%s1494_s4] sm:$0xff] %vm406_vm1, %v732_v4  ;;  %v733_v8 = vmax.f32 %v720_v5, 0.0  ;;  %v647_v9 = vadd.f32 %v646_v7, %v1380_v35  ;;  %v678_v10 = vpop.f32.mrb[32].mxu1  ;;  %v949_v11 = vpop.f32.mrb[33].mxu0 }
 0x138   :  { %753 = vst.msk [vmem:[%s1494_s4 + $0x40] sm:$0xff] %vm406_vm1, %v740_v6  ;;  %v741_v12 = vmax.f32 %v728_v22, 0.0  ;;  %v679_v13 = vadd.f32 %v678_v10, %v591_v29  ;;  %v965_v14 = vpop.f32.mrb[33].mxu1  ;;  %v649_v15 = vpop.f32.mrb[34].mxu0 }
 0x139   :  { %746 = vst.msk [vmem:[%s1494_s4 + $0x8] sm:$0xff] %vm406_vm1, %v733_v8  ;;  %v701_v16 = vmul.f32 %v1397_v46, %v647_v9  ;;  %v650_v35 = vadd.f32 %v649_v15, %v1382_v36  ;;  %v681_v17 = vpop.f32.mrb[34].mxu1  ;;  %v950_v39 = vpop.f32.mrb[35].mxu0 }
 0x13a   :  { %754 = vst.msk [vmem:[%s1494_s4 + $0x48] sm:$0xff] %vm406_vm1, %v741_v12  ;;  %v709_v18 = vmul.f32 %v1397_v46, %v679_v13  ;;  %v682_v19 = vadd.f32 %v681_v17, %v594_v30  ;;  %v966_v20 = vpop.f32.mrb[35].mxu1 }
 0x13b   :  { %v721_v23 = vadd.f32 %v1403_v52, %v701_v16  ;;  %v702_v24 = vmul.f32 %v1397_v46, %v650_v35 }
 0x13c   :  { %v729_v25 = vadd.f32 %v1403_v52, %v709_v18  ;;  %v710_v26 = vmul.f32 %v1397_v46, %v682_v19 }
 0x13d   :  { %v734_v36 = vmax.f32 %v721_v23, 0.0  ;;  %v722_v27 = vadd.f32 %v1403_v52, %v702_v24 }
 0x13e   :  { %v742_v28 = vmax.f32 %v729_v25, 0.0  ;;  %v730_v29 = vadd.f32 %v1403_v52, %v710_v26  ;;  %v654_v31 = vpop.f32.mrb[36].mxu0 }
 0x13f   :  { %747 = vst.msk [vmem:[%s1494_s4 + $0x10] sm:$0xff] %vm406_vm1, %v734_v36  ;;  %v735_v30 = vmax.f32 %v722_v27, 0.0  ;;  %v655_v32 = vadd.f32 %v654_v31, %v1384_v50  ;;  %v686_v33 = vpop.f32.mrb[36].mxu1  ;;  %v953_v34 = vpop.f32.mrb[37].mxu0 }
 0x140   :  { %755 = vst.msk [vmem:[%s1494_s4 + $0x50] sm:$0xff] %vm406_vm1, %v742_v28  ;;  %v743_v37 = vmax.f32 %v730_v29, 0.0  ;;  %v687_v38 = vadd.f32 %v686_v33, %v1392_v44  ;;  %v657_v40 = vpop.f32.mrb[38].mxu0  ;;  %v969_v41 = vpop.f32.mrb[37].mxu1 }
 0x141   :  { %748 = vst.msk [vmem:[%s1494_s4 + $0x18] sm:$0xff] %vm406_vm1, %v735_v30  ;;  %v703_v42 = vmul.f32 %v1397_v46, %v655_v32  ;;  %v658_v50 = vadd.f32 %v657_v40, %v1386_v51  ;;  %v954_v43 = vpop.f32.mrb[39].mxu0  ;;  %v689_v45 = vpop.f32.mrb[38].mxu1 }
 0x142   :  { %756 = vst.msk [vmem:[%s1494_s4 + $0x58] sm:$0xff] %vm406_vm1, %v743_v37  ;;  %v711_v44 = vmul.f32 %v1397_v46, %v687_v38  ;;  %v970_v47 = vpop.f32.mrb[39].mxu1 }
 0x143   :  { %v723_v48 = vadd.f32 %v1403_v52, %v703_v42  ;;  %v704_v49 = vmul.f32 %v1397_v46, %v658_v50 }
 0x144   :  { %v731_v53 = vadd.f32 %v1403_v52, %v711_v44 }
 0x145   :  { %v736_v54 = vmax.f32 %v723_v48, 0.0  ;;  %v724_v51 = vadd.f32 %v1403_v52, %v704_v49 }
 0x146   :  { %v744_v55 = vmax.f32 %v731_v53, 0.0  ;;  %v662_v56 = vpop.f32.mrb[40].mxu0 }
 0x147   :  { %749 = vst.msk [vmem:[%s1494_s4 + $0x20] sm:$0xff] %vm406_vm1, %v736_v54  ;;  %v737_v57 = vmax.f32 %v724_v51, 0.0  ;;  %v663_v58 = vadd.f32 %v662_v56, %v1388_v0  ;;  %v957_v59 = vpop.f32.mrb[41].mxu0 }
 0x148   :  { %758 = vst.msk [vmem:[%s1494_s4 + $0x60] sm:$0x3] %vm757_vm2, %v744_v55  ;;  %v665_v60 = vpop.f32.mrb[42].mxu0 }
 0x149   :  { %750 = vst.msk [vmem:[%s1494_s4 + $0x28] sm:$0xff] %vm406_vm1, %v737_v57  ;;  %v705_v61 = vmul.f32 %v1397_v46, %v663_v58  ;;  %v666_v21 = vadd.f32 %v665_v60, %v1390_v1  ;;  %v958_v62 = vpop.f32.mrb[43].mxu0 }
 0x14b   :  { %v725_v63 = vadd.f32 %v1403_v52, %v705_v61  ;;  %v706_v0 = vmul.f32 %v1397_v46, %v666_v21 }
 0x14d   :  { %v738_v2 = vmax.f32 %v725_v63, 0.0  ;;  %v726_v3 = vadd.f32 %v1403_v52, %v706_v0 }
 0x14f   :  { %751 = vst.msk [vmem:[%s1494_s4 + $0x30] sm:$0xff] %vm406_vm1, %v738_v2  ;;  %v739_v4 = vmax.f32 %v726_v3, 0.0 }
 0x151   :  { %752 = vst.msk [vmem:[%s1494_s4 + $0x38] sm:$0xff] %vm406_vm1, %v739_v4 }

// kernel: forward.7
= control target key start
LH: loop header
LB: loop body
LE: loop exit
PB: predicated region body
PF: predicated region fallthrough
CT: control target
= control target key end

     0   :  { %s12803_s6 = smov 1   ;;  %s12804_s10 = smov 2   ;;  %s14435_s0 = inlined_call_operand.smem [shape: u32[32], index: -1, kind: input, shape index: {}] }
   0x1   :  { %s12847_s5 = sld [smem:[%s14435_s0]]   ;;  %s12805_s14 = smov 3  }
   0x2   :  { %s12852_s9 = sld [smem:[%s14435_s0 + %s12803_s6]]   ;;  %s12806_s18 = smov 4  }
   0x3   :  { %s12857_s13 = sld [smem:[%s14435_s0 + %s12804_s10]]   ;;  %s12807_s22 = smov 5  }
   0x4   :  { %s12862_s17 = sld [smem:[%s14435_s0 + %s12805_s14]]   ;;  %s12808_s26 = smov 6  }
   0x5   :  { %s12867_s21 = sld [smem:[%s14435_s0 + %s12806_s18]]   ;;  %s12809_s30 = smov 7  }
   0x6   :  { %s12872_s25 = sld [smem:[%s14435_s0 + %s12807_s22]]   ;;  %s12810_s4 = smov 8  }
   0x7   :  { %s12877_s29 = sld [smem:[%s14435_s0 + %s12808_s26]]   ;;  %s12811_s10 = smov 9  }
   0x8   :  { %s12882_s3 = sld [smem:[%s14435_s0 + %s12809_s30]]   ;;  %s12812_s15 = smov 10  }
   0x9   :  { %s12887_s8 = sld [smem:[%s14435_s0 + %s12810_s4]]   ;;  %s12813_s20 = smov 11  }
   0xa   :  { %s12892_s14 = sld [smem:[%s14435_s0 + %s12811_s10]]   ;;  %s12814_s26 = smov 12  }
   0xb   :  { %s12897_s19 = sld [smem:[%s14435_s0 + %s12812_s15]]   ;;  %s12815_s1 = smov 13  }
   0xc   :  { %s12902_s24 = sld [smem:[%s14435_s0 + %s12813_s20]]   ;;  %s12816_s7 = smov 14  }
   0xd   :  { %s12907_s30 = sld [smem:[%s14435_s0 + %s12814_s26]]   ;;  %s12817_s15 = smov 15  }
   0xe   :  { %s12912_s6 = sld [smem:[%s14435_s0 + %s12815_s1]]   ;;  %s12818_s22 = smov 16  }
   0xf   :  { %s12917_s12 = sld [smem:[%s14435_s0 + %s12816_s7]]   ;;  %s12819_s28 = smov 17  }
  0x10   :  { %s12922_s20 = sld [smem:[%s14435_s0 + %s12817_s15]]   ;;  %s12820_s7 = smov 18  }
  0x11   :  { %s12927_s27 = sld [smem:[%s14435_s0 + %s12818_s22]]   ;;  %s12821_s15 = smov 19  }
  0x12   :  { %s12932_s4 = sld [smem:[%s14435_s0 + %s12819_s28]]   ;;  %s12822_s22 = smov 20  }
  0x13   :  { %s12823_s28 = smov 21  }
  0x15   :  { %14439 = sst [smem:[#allocation5_spill]] %s12917_s12 }
  0x16   :  { %14440 = sst [smem:[#allocation6_spill]] %s12922_s20 }
  0x17   :  { %14441 = sst [smem:[#allocation7_spill]] %s12927_s27 }
  0x18   :  { %14442 = sst [smem:[#allocation8_spill]] %s12932_s4 }
  0x19   :  { %s12937_s12 = sld [smem:[%s14435_s0 + %s12820_s7]]   ;;  %s12824_s7 = smov 22  }
  0x1a   :  { %s12942_s20 = sld [smem:[%s14435_s0 + %s12821_s15]]   ;;  %s12825_s15 = smov 23  }
  0x1b   :  { %s12947_s27 = sld [smem:[%s14435_s0 + %s12822_s22]]   ;;  %s12826_s22 = smov 24  }
  0x1c   :  { %s12952_s4 = sld [smem:[%s14435_s0 + %s12823_s28]]   ;;  %s12827_s28 = smov 25  }
  0x1f   :  { %14443 = sst [smem:[#allocation9_spill]] %s12937_s12 }
  0x20   :  { %14444 = sst [smem:[#allocation10_spill]] %s12942_s20 }
  0x21   :  { %14445 = sst [smem:[#allocation11_spill]] %s12947_s27 }
  0x22   :  { %14446 = sst [smem:[#allocation12_spill]] %s12952_s4 }
  0x23   :  { %s12957_s12 = sld [smem:[%s14435_s0 + %s12824_s7]]   ;;  %s12828_s7 = smov 26  }
  0x24   :  { %s12962_s20 = sld [smem:[%s14435_s0 + %s12825_s15]]   ;;  %s12829_s15 = smov 27  }
  0x25   :  { %s12967_s27 = sld [smem:[%s14435_s0 + %s12826_s22]]   ;;  %s12830_s22 = smov 28  }
  0x26   :  { %s12972_s4 = sld [smem:[%s14435_s0 + %s12827_s28]]   ;;  %s12831_s28 = smov 29  }
  0x29   :  { %14447 = sst [smem:[#allocation13_spill]] %s12957_s12 }
  0x2a   :  { %14448 = sst [smem:[#allocation14_spill]] %s12962_s20 }
  0x2b   :  { %14449 = sst [smem:[#allocation15_spill]] %s12967_s27 }
  0x2c   :  { %14450 = sst [smem:[#allocation16_spill]] %s12972_s4 }
  0x2d   :  { %s12977_s12 = sld [smem:[%s14435_s0 + %s12828_s7]]   ;;  %s12832_s7 = smov 30  }
  0x2e   :  { %s12982_s20 = sld [smem:[%s14435_s0 + %s12829_s15]]   ;;  %s12833_s15 = smov 31  }
  0x2f   :  { %s12987_s27 = sld [smem:[%s14435_s0 + %s12830_s22]]  }
  0x30   :  { %s12992_s4 = sld [smem:[%s14435_s0 + %s12831_s28]]  }
  0x33   :  { %14451 = sst [smem:[#allocation17_spill]] %s12977_s12 }
  0x34   :  { %14452 = sst [smem:[#allocation18_spill]] %s12982_s20 }
  0x35   :  { %s12997_s12 = sld [smem:[%s14435_s0 + %s12832_s7]]  }
  0x36   :  { %s13002_s20 = sld [smem:[%s14435_s0 + %s12833_s15]]  }
  0x37   :  { %v11037_v0 = vld [vmem:[%s12862_s17 + $0x4] ss:$16 sps:$4 sm:$0xff]   ;;  %v11039_v1 = vld [vmem:[%s12862_s17 + $0xc] ss:$16 sps:$4 sm:$0xff]   ;;  %v11041_v2 = vld [vmem:[%s12862_s17] ss:$16 sps:$4 sm:$0xff]   ;;  %v150_v38 = vlaneseq }
  0x38   :  { %5035 = vmatprep.subr.bf16.mxu0 %v11037_v0  ;;  %v11042_v3 = vld [vmem:[%s12862_s17 + $0x8] ss:$16 sps:$4 sm:$0xff]   ;;  %5568 = vmatprep.subr.bf16.mxu1 %v11039_v1  ;;  %v11043_v4 = vld [vmem:[%s12862_s17 + $0x24] ss:$16 sps:$4 sm:$0xff]   ;;  %v11045_v5 = vld [vmem:[%s12862_s17 + $0x2c] ss:$16 sps:$4 sm:$0xff]  }
  0x39   :  { %5036 = vmatpush1.bf16.msra.mxu0 %v11041_v2  ;;  %5569 = vmatpush1.bf16.msra.mxu1 %v11042_v3  ;;  %v11047_v6 = vld [vmem:[%s12862_s17 + $0x20] ss:$16 sps:$4 sm:$0xff]   ;;  %v11048_v7 = vld [vmem:[%s12862_s17 + $0x28] ss:$16 sps:$4 sm:$0xff]   ;;  %v11049_v8 = vld [vmem:[%s12862_s17 + $0x44] ss:$16 sps:$4 sm:$0xff]  }
  0x3a   :  { %5037 = vmatprep.subr.bf16.mxu0 %v11043_v4  ;;  %5570 = vmatprep.subr.bf16.mxu1 %v11045_v5  ;;  %v11051_v9 = vld [vmem:[%s12862_s17 + $0x4c] ss:$16 sps:$4 sm:$0xff]   ;;  %v11053_v10 = vld [vmem:[%s12862_s17 + $0x40] ss:$16 sps:$4 sm:$0xff]   ;;  %v11054_v11 = vld [vmem:[%s12862_s17 + $0x48] ss:$16 sps:$4 sm:$0xff]  }
  0x3b   :  { %v11055_v12 = vld [vmem:[%s12862_s17 + $0x64] ss:$16 sps:$4 sm:$0xff]   ;;  %v11057_v13 = vld [vmem:[%s12862_s17 + $0x6c] ss:$16 sps:$4 sm:$0xff]   ;;  %v11059_v14 = vld [vmem:[%s12862_s17 + $0x60] ss:$16 sps:$4 sm:$0xff]  }
  0x3c   :  { %v11060_v15 = vld [vmem:[%s12862_s17 + $0x68] ss:$16 sps:$4 sm:$0xff]   ;;  %v11061_v16 = vld [vmem:[%s12862_s17 + $0x84] ss:$16 sps:$4 sm:$0xff]   ;;  %v11063_v17 = vld [vmem:[%s12862_s17 + $0x8c] ss:$16 sps:$4 sm:$0xff]  }
  0x3d   :  { %5038 = vmatpush1.bf16.msra.mxu0 %v11047_v6  ;;  %5571 = vmatpush1.bf16.msra.mxu1 %v11048_v7  ;;  %v11065_v18 = vld [vmem:[%s12862_s17 + $0x80] ss:$16 sps:$4 sm:$0xff]   ;;  %v11066_v19 = vld [vmem:[%s12862_s17 + $0x88] ss:$16 sps:$4 sm:$0xff]   ;;  %v11067_v20 = vld [vmem:[%s12862_s17 + $0xa4] ss:$16 sps:$4 sm:$0xff]  }
  0x3e   :  { %5039 = vmatprep.subr.bf16.mxu0 %v11049_v8  ;;  %5572 = vmatprep.subr.bf16.mxu1 %v11051_v9  ;;  %v11069_v21 = vld [vmem:[%s12862_s17 + $0xac] ss:$16 sps:$4 sm:$0xff]   ;;  %v11071_v22 = vld [vmem:[%s12862_s17 + $0xa0] ss:$16 sps:$4 sm:$0xff]   ;;  %v11072_v23 = vld [vmem:[%s12862_s17 + $0xa8] ss:$16 sps:$4 sm:$0xff]  }
  0x3f   :  { %v11073_v24 = vld [vmem:[%s12862_s17 + $0xc4] ss:$16 sps:$4 sm:$0xff]   ;;  %v11075_v25 = vld [vmem:[%s12862_s17 + $0xcc] ss:$16 sps:$4 sm:$0xff]   ;;  %v11077_v26 = vld [vmem:[%s12862_s17 + $0xc0] ss:$16 sps:$4 sm:$0xff]  }
  0x40   :  { %v11078_v27 = vld [vmem:[%s12862_s17 + $0xc8] ss:$16 sps:$4 sm:$0xff]   ;;  %v11079_v28 = vld [vmem:[%s12862_s17 + $0xe4] ss:$16 sps:$4 sm:$0xff]   ;;  %v11081_v29 = vld [vmem:[%s12862_s17 + $0xec] ss:$16 sps:$4 sm:$0xff]  }
  0x41   :  { %5040 = vmatpush1.bf16.msra.mxu0 %v11053_v10  ;;  %5573 = vmatpush1.bf16.msra.mxu1 %v11054_v11  ;;  %v11083_v30 = vld [vmem:[%s12862_s17 + $0xe0] ss:$16 sps:$4 sm:$0xff]   ;;  %v11084_v31 = vld [vmem:[%s12862_s17 + $0xe8] ss:$16 sps:$4 sm:$0xff]   ;;  %v11085_v32 = vld [vmem:[%s12862_s17 + $0x104] ss:$16 sps:$4 sm:$0xff]  }
  0x42   :  { %5041 = vmatprep.subr.bf16.mxu0 %v11055_v12  ;;  %5574 = vmatprep.subr.bf16.mxu1 %v11057_v13  ;;  %v11087_v33 = vld [vmem:[%s12862_s17 + $0x10c] ss:$16 sps:$4 sm:$0xff]   ;;  %v11089_v34 = vld [vmem:[%s12862_s17 + $0x100] ss:$16 sps:$4 sm:$0xff]   ;;  %v11090_v35 = vld [vmem:[%s12862_s17 + $0x108] ss:$16 sps:$4 sm:$0xff]  }
  0x43   :  { %v12834_v36 = vmov 1983009808   ;;  %v11091_v39 = vld [vmem:[%s12862_s17 + $0x124] ss:$16 sps:$4 sm:$0xff]   ;;  %v11093_v40 = vld [vmem:[%s12862_s17 + $0x12c] ss:$16 sps:$4 sm:$0xff]  }
  0x44   :  { %v148_v37 = vunpack.c.l.s4 %v12834_v36  ;;  %v11095_v41 = vld [vmem:[%s12862_s17 + $0x120] ss:$16 sps:$4 sm:$0xff]   ;;  %v13043_v43 = vshrl.u32 %v150_v38, 7  ;;  %v11096_v44 = vld [vmem:[%s12862_s17 + $0x128] ss:$16 sps:$4 sm:$0xff]  }
  0x45   :  { %5042 = vmatpush1.bf16.msra.mxu0 %v11059_v14  ;;  %5575 = vmatpush1.bf16.msra.mxu1 %v11060_v15  ;;  %v11097_v45 = vld [vmem:[%s12862_s17 + $0x144] ss:$16 sps:$4 sm:$0xff]   ;;  %v11099_v46 = vld [vmem:[%s12862_s17 + $0x14c] ss:$16 sps:$4 sm:$0xff]   ;;  %v11101_v47 = vld [vmem:[%s12862_s17 + $0x140] ss:$16 sps:$4 sm:$0xff]  }
  0x46   :  { %5043 = vmatprep.subr.bf16.mxu0 %v11061_v16  ;;  %5576 = vmatprep.subr.bf16.mxu1 %v11063_v17  ;;  %v149_v42 = vunpack.c.0.s8 %v148_v37  ;;  %v11102_v48 = vld [vmem:[%s12862_s17 + $0x148] ss:$16 sps:$4 sm:$0xff]   ;;  %v11103_v50 = vld [vmem:[%s12862_s17 + $0x164] ss:$16 sps:$4 sm:$0xff]   ;;  %v11105_v51 = vld [vmem:[%s12862_s17 + $0x16c] ss:$16 sps:$4 sm:$0xff]  }
  0x47   :  { %v132_v52 = vld [vmem:[%s12847_s5] sm:$0xff]  ;;  %v11108_v55 = vld [vmem:[%s12862_s17 + $0x168] ss:$16 sps:$4 sm:$0xff]   ;;  %v11111_v57 = vld [vmem:[%s12862_s17 + $0x18c] ss:$16 sps:$4 sm:$0xff]  }
  0x48   :  { %v13051_v49 = vsub.s32 %v149_v42, %v13043_v43  ;;  %v11107_v53 = vld [vmem:[%s12862_s17 + $0x160] ss:$16 sps:$4 sm:$0xff]   ;;  %v11109_v56 = vld [vmem:[%s12862_s17 + $0x184] ss:$16 sps:$4 sm:$0xff]   ;;  %v11114_v61 = vld [vmem:[%s12862_s17 + $0x188] ss:$16 sps:$4 sm:$0xff]   ;;  %v146_v4 = vcombine.high %v132_v52, %v132_v52 }
  0x49   :  { %5044 = vmatpush1.bf16.msra.mxu0 %v11065_v18  ;;  %5577 = vmatpush1.bf16.msra.mxu1 %v11066_v19  ;;  %v11113_v59 = vld [vmem:[%s12862_s17 + $0x180] ss:$16 sps:$4 sm:$0xff]   ;;  %v11115_v62 = vld [vmem:[%s12862_s17 + $0x1a4] ss:$16 sps:$4 sm:$0xff]   ;;  %v11117_v63 = vld [vmem:[%s12862_s17 + $0x1ac] ss:$16 sps:$4 sm:$0xff]  }
  0x4a   :  { %5045 = vmatprep.subr.bf16.mxu0 %v11067_v20  ;;  %5578 = vmatprep.subr.bf16.mxu1 %v11069_v21  ;;  %v153_v54 = vrot.slane %v132_v52, %v13051_v49  ;;  %v11119_v0 = vld [vmem:[%s12862_s17 + $0x1a0] ss:$16 sps:$4 sm:$0xff]   ;;  %v11120_v1 = vld [vmem:[%s12862_s17 + $0x1a8] ss:$16 sps:$4 sm:$0xff]   ;;  %v11121_v2 = vld [vmem:[%s12862_s17 + $0x1c4] ss:$16 sps:$4 sm:$0xff]   ;;  %v13074_v9 = vrot.slane %v146_v4, %v13051_v49 }
  0x4b   :  { %v11123_v3 = vld [vmem:[%s12862_s17 + $0x1cc] ss:$16 sps:$4 sm:$0xff]   ;;  %v11125_v5 = vld [vmem:[%s12862_s17 + $0x1c0] ss:$16 sps:$4 sm:$0xff]   ;;  %v11126_v6 = vld [vmem:[%s12862_s17 + $0x1c8] ss:$16 sps:$4 sm:$0xff]  }
  0x4c   :  { %v161_v58 = vcombine.high %v153_v54, %v153_v54  ;;  %v11127_v7 = vld [vmem:[%s12862_s17 + $0x1e4] ss:$16 sps:$4 sm:$0xff]   ;;  %v11129_v8 = vld [vmem:[%s12862_s17 + $0x1ec] ss:$16 sps:$4 sm:$0xff]   ;;  %v11131_v10 = vld [vmem:[%s12862_s17 + $0x1e0] ss:$16 sps:$4 sm:$0xff]   ;;  %v162_v14 = vcombine.high %v13074_v9, %v13074_v9  ;;  %v280_v16 = vpack.c.bf16 %v153_v54, %v153_v54 }
  0x4d   :  { %5046 = vmatpush1.bf16.msra.mxu0 %v11071_v22  ;;  %5579 = vmatpush1.bf16.msra.mxu1 %v11072_v23  ;;  %v11132_v11 = vld [vmem:[%s12862_s17 + $0x1e8] ss:$16 sps:$4 sm:$0xff]   ;;  %v11136_v12 = vld [vmem:[%s12862_s17 + $0x204] ss:$16 sps:$4 sm:$0xff]   ;;  %v11139_v13 = vld [vmem:[%s12862_s17 + $0x20c] ss:$16 sps:$4 sm:$0xff]  }
  0x4e   :  { %5047 = vmatprep.subr.bf16.mxu0 %v11073_v24  ;;  %5580 = vmatprep.subr.bf16.mxu1 %v11075_v25  ;;  %v281_v60 = vpack.c.bf16 %v161_v58, %v161_v58  ;;  %v11134_v15 = vld [vmem:[%s12862_s17 + $0x200] ss:$16 sps:$4 sm:$0xff]   ;;  %v11137_v17 = vld [vmem:[%s12862_s17 + $0x208] ss:$16 sps:$4 sm:$0xff]   ;;  %v11142_v18 = vld [vmem:[%s12862_s17 + $0x224] ss:$16 sps:$4 sm:$0xff]   ;;  %v283_v20 = vpack.c.bf16 %v162_v14, %v162_v14 }
  0x4f   :  { %v11145_v19 = vld [vmem:[%s12862_s17 + $0x22c] ss:$16 sps:$4 sm:$0xff]   ;;  %v11140_v21 = vld [vmem:[%s12862_s17 + $0x220] ss:$16 sps:$4 sm:$0xff]   ;;  %v11143_v22 = vld [vmem:[%s12862_s17 + $0x228] ss:$16 sps:$4 sm:$0xff]  }
  0x50   :  { %5067 = vmatprep.mubr.bf16.mxu0 %v281_v60  ;;  %5600 = vmatprep.mubr.bf16.mxu1 %v281_v60  ;;  %v11148_v23 = vld [vmem:[%s12862_s17 + $0x244] ss:$16 sps:$4 sm:$0xff]   ;;  %v11151_v24 = vld [vmem:[%s12862_s17 + $0x24c] ss:$16 sps:$4 sm:$0xff]   ;;  %v11146_v25 = vld [vmem:[%s12862_s17 + $0x240] ss:$16 sps:$4 sm:$0xff]  }
  0x51   :  { %5048 = vmatpush1.bf16.msra.mxu0 %v11077_v26  ;;  %5581 = vmatpush1.bf16.msra.mxu1 %v11078_v27  ;;  %v11149_v26 = vld [vmem:[%s12862_s17 + $0x248] ss:$16 sps:$4 sm:$0xff]   ;;  %v11154_v27 = vld [vmem:[%s12862_s17 + $0x264] ss:$16 sps:$4 sm:$0xff]   ;;  %v11169_v36 = vld [vmem:[%s12862_s17 + $0x2ac] ss:$16 sps:$4 sm:$0xff]  }
  0x52   :  { %5049 = vmatprep.subr.bf16.mxu0 %v11079_v28  ;;  %5582 = vmatprep.subr.bf16.mxu1 %v11081_v29  ;;  %v11157_v28 = vld [vmem:[%s12862_s17 + $0x26c] ss:$16 sps:$4 sm:$0xff]   ;;  %v11152_v29 = vld [vmem:[%s12862_s17 + $0x260] ss:$16 sps:$4 sm:$0xff]   ;;  %v11167_v38 = vld [vmem:[%s12862_s17 + $0x2a8] ss:$16 sps:$4 sm:$0xff]  }
  0x53   :  { %v11164_v37 = vld [vmem:[%s12862_s17 + $0x2a0] ss:$16 sps:$4 sm:$0xff]   ;;  %v11173_v42 = vld [vmem:[%s12862_s17 + $0x2c8] ss:$16 sps:$4 sm:$0xff]   ;;  %v11193_v54 = vld [vmem:[%s12862_s17 + $0x32c] ss:$16 sps:$4 sm:$0xff]  }
  0x54   :  { %v11185_v52 = vld [vmem:[%s12862_s17 + $0x308] ss:$16 sps:$4 sm:$0xff]   ;;  %v11199_v58 = vld [vmem:[%s12862_s17 + $0x34c] ss:$16 sps:$4 sm:$0xff]   ;;  %v11226_v14 = vld [vmem:[%s12862_s17 + $0x3e4] ss:$16 sps:$4 sm:$0xff]  }
  0x55   :  { %5050 = vmatpush1.bf16.msra.mxu0 %v11083_v30  ;;  %5583 = vmatpush1.bf16.msra.mxu1 %v11084_v31  ;;  %v11155_v30 = vld [vmem:[%s12862_s17 + $0x268] ss:$16 sps:$4 sm:$0xff]   ;;  %v11160_v31 = vld [vmem:[%s12862_s17 + $0x284] ss:$16 sps:$4 sm:$0xff]  }
  0x56   :  { %5051 = vmatprep.subr.bf16.mxu0 %v11085_v32  ;;  %5584 = vmatprep.subr.bf16.mxu1 %v11087_v33  ;;  %v11163_v32 = vld [vmem:[%s12862_s17 + $0x28c] ss:$16 sps:$4 sm:$0xff]   ;;  %v11158_v33 = vld [vmem:[%s12862_s17 + $0x280] ss:$16 sps:$4 sm:$0xff]   ;;  %v11197_v60 = vld [vmem:[%s12862_s17 + $0x348] ss:$16 sps:$4 sm:$0xff]  }
  0x57   :  { %v11209_v4 = vld [vmem:[%s12862_s17 + $0x388] ss:$16 sps:$4 sm:$0xff]  }
  0x59   :  { %5052 = vmatpush1.bf16.msra.mxu0 %v11089_v34  ;;  %5585 = vmatpush1.bf16.msra.mxu1 %v11090_v35  ;;  %v11161_v34 = vld [vmem:[%s12862_s17 + $0x288] ss:$16 sps:$4 sm:$0xff]   ;;  %v11166_v35 = vld [vmem:[%s12862_s17 + $0x2a4] ss:$16 sps:$4 sm:$0xff]  }
  0x5a   :  { %5053 = vmatprep.subr.bf16.mxu0 %v11091_v39  ;;  %5586 = vmatprep.subr.bf16.mxu1 %v11093_v40  ;;  %v11172_v39 = vld [vmem:[%s12862_s17 + $0x2c4] ss:$16 sps:$4 sm:$0xff]   ;;  %v11175_v40 = vld [vmem:[%s12862_s17 + $0x2cc] ss:$16 sps:$4 sm:$0xff]  }
  0x5d   :  { %5054 = vmatpush1.bf16.msra.mxu0 %v11095_v41  ;;  %5587 = vmatpush1.bf16.msra.mxu1 %v11096_v44  ;;  %v11170_v41 = vld [vmem:[%s12862_s17 + $0x2c0] ss:$16 sps:$4 sm:$0xff]   ;;  %v11178_v44 = vld [vmem:[%s12862_s17 + $0x2e4] ss:$16 sps:$4 sm:$0xff]  }
  0x5e   :  { %5055 = vmatprep.subr.bf16.mxu0 %v11097_v45  ;;  %5588 = vmatprep.subr.bf16.mxu1 %v11099_v46  ;;  %v11181_v45 = vld [vmem:[%s12862_s17 + $0x2ec] ss:$16 sps:$4 sm:$0xff]   ;;  %v11176_v46 = vld [vmem:[%s12862_s17 + $0x2e0] ss:$16 sps:$4 sm:$0xff]  }
  0x61   :  { %5056 = vmatpush1.bf16.msra.mxu0 %v11101_v47  ;;  %5589 = vmatpush1.bf16.msra.mxu1 %v11102_v48  ;;  %v11179_v47 = vld [vmem:[%s12862_s17 + $0x2e8] ss:$16 sps:$4 sm:$0xff]   ;;  %v11184_v48 = vld [vmem:[%s12862_s17 + $0x304] ss:$16 sps:$4 sm:$0xff]  }
  0x62   :  { %5057 = vmatprep.subr.bf16.mxu0 %v11103_v50  ;;  %5590 = vmatprep.subr.bf16.mxu1 %v11105_v51  ;;  %v11187_v50 = vld [vmem:[%s12862_s17 + $0x30c] ss:$16 sps:$4 sm:$0xff]   ;;  %v11182_v51 = vld [vmem:[%s12862_s17 + $0x300] ss:$16 sps:$4 sm:$0xff]  }
  0x65   :  { %5058 = vmatpush1.bf16.msra.mxu0 %v11107_v53  ;;  %5591 = vmatpush1.bf16.msra.mxu1 %v11108_v55  ;;  %v11190_v53 = vld [vmem:[%s12862_s17 + $0x324] ss:$16 sps:$4 sm:$0xff]   ;;  %v11188_v55 = vld [vmem:[%s12862_s17 + $0x320] ss:$16 sps:$4 sm:$0xff]  }
  0x66   :  { %5059 = vmatprep.subr.bf16.mxu0 %v11109_v56  ;;  %5592 = vmatprep.subr.bf16.mxu1 %v11111_v57  ;;  %v11191_v56 = vld [vmem:[%s12862_s17 + $0x328] ss:$16 sps:$4 sm:$0xff]   ;;  %v11196_v57 = vld [vmem:[%s12862_s17 + $0x344] ss:$16 sps:$4 sm:$0xff]  }
  0x69   :  { %5060 = vmatpush1.bf16.msra.mxu0 %v11113_v59  ;;  %5593 = vmatpush1.bf16.msra.mxu1 %v11114_v61  ;;  %v11194_v59 = vld [vmem:[%s12862_s17 + $0x340] ss:$16 sps:$4 sm:$0xff]   ;;  %v11202_v61 = vld [vmem:[%s12862_s17 + $0x364] ss:$16 sps:$4 sm:$0xff]  }
  0x6a   :  { %5061 = vmatprep.subr.bf16.mxu0 %v11115_v62  ;;  %5594 = vmatprep.subr.bf16.mxu1 %v11117_v63  ;;  %v11205_v62 = vld [vmem:[%s12862_s17 + $0x36c] ss:$16 sps:$4 sm:$0xff]   ;;  %v11200_v63 = vld [vmem:[%s12862_s17 + $0x360] ss:$16 sps:$4 sm:$0xff]  }
  0x6d   :  { %5062 = vmatpush1.bf16.msra.mxu0 %v11119_v0  ;;  %5595 = vmatpush1.bf16.msra.mxu1 %v11120_v1  ;;  %v11203_v0 = vld [vmem:[%s12862_s17 + $0x368] ss:$16 sps:$4 sm:$0xff]   ;;  %v11208_v1 = vld [vmem:[%s12862_s17 + $0x384] ss:$16 sps:$4 sm:$0xff]  }
  0x6e   :  { %5063 = vmatprep.subr.bf16.mxu0 %v11121_v2  ;;  %5596 = vmatprep.subr.bf16.mxu1 %v11123_v3  ;;  %v11211_v2 = vld [vmem:[%s12862_s17 + $0x38c] ss:$16 sps:$4 sm:$0xff]   ;;  %v11206_v3 = vld [vmem:[%s12862_s17 + $0x380] ss:$16 sps:$4 sm:$0xff]  }
  0x71   :  { %5064 = vmatpush1.bf16.msra.mxu0 %v11125_v5  ;;  %5597 = vmatpush1.bf16.msra.mxu1 %v11126_v6  ;;  %v11214_v5 = vld [vmem:[%s12862_s17 + $0x3a4] ss:$16 sps:$4 sm:$0xff]   ;;  %v11217_v6 = vld [vmem:[%s12862_s17 + $0x3ac] ss:$16 sps:$4 sm:$0xff]  }
  0x72   :  { %5065 = vmatprep.subr.bf16.mxu0 %v11127_v7  ;;  %5598 = vmatprep.subr.bf16.mxu1 %v11129_v8  ;;  %v11212_v7 = vld [vmem:[%s12862_s17 + $0x3a0] ss:$16 sps:$4 sm:$0xff]   ;;  %v11215_v8 = vld [vmem:[%s12862_s17 + $0x3a8] ss:$16 sps:$4 sm:$0xff]  }
  0x75   :  { %5066 = vmatpush1.bf16.msra.mxu0 %v11131_v10  ;;  %5599 = vmatpush1.bf16.msra.mxu1 %v11132_v11  ;;  %v11220_v10 = vld [vmem:[%s12862_s17 + $0x3c4] ss:$16 sps:$4 sm:$0xff]   ;;  %v11223_v11 = vld [vmem:[%s12862_s17 + $0x3cc] ss:$16 sps:$4 sm:$0xff]  }
  0x76   :  { %5076 = vmatprep.subr.bf16.mxu0 %v11136_v12  ;;  %5609 = vmatprep.subr.bf16.mxu1 %v11139_v13  ;;  %v11218_v12 = vld [vmem:[%s12862_s17 + $0x3c0] ss:$16 sps:$4 sm:$0xff]   ;;  %v11221_v13 = vld [vmem:[%s12862_s17 + $0x3c8] ss:$16 sps:$4 sm:$0xff]  }
  0x78   :  { %5068 = vmatmul.mubr.bf16.vlgmr.msra.gmra.mrb[0].mxu0 %v280_v16  ;;  %5601 = vmatmul.mubr.bf16.vlgmr.msra.gmra.mrb[0].mxu1 %v280_v16  ;;  %v11224_v16 = vld [vmem:[%s12862_s17 + $0x3e0] ss:$16 sps:$4 sm:$0xff]  }
  0x79   :  { %5077 = vmatpush1.bf16.msra.mxu0 %v11134_v15  ;;  %5610 = vmatpush1.bf16.msra.mxu1 %v11137_v17  ;;  %v11229_v15 = vld [vmem:[%s12862_s17 + $0x3ec] ss:$16 sps:$4 sm:$0xff]   ;;  %v11227_v17 = vld [vmem:[%s12862_s17 + $0x3e8] ss:$16 sps:$4 sm:$0xff]  }
  0x7a   :  { %5078 = vmatprep.subr.bf16.mxu0 %v11142_v18  ;;  %5611 = vmatprep.subr.bf16.mxu1 %v11145_v19  ;;  %v11232_v18 = vld [vmem:[%s12862_s17 + $0x404] ss:$16 sps:$4 sm:$0xff]   ;;  %v11235_v19 = vld [vmem:[%s12862_s17 + $0x40c] ss:$16 sps:$4 sm:$0xff]  }
  0x7b   :  { %5108 = vmatprep.mubr.bf16.mxu0 %v283_v20  ;;  %5641 = vmatprep.mubr.bf16.mxu1 %v283_v20  ;;  %v11230_v20 = vld [vmem:[%s12862_s17 + $0x400] ss:$16 sps:$4 sm:$0xff]  }
  0x7d   :  { %5079 = vmatpush1.bf16.msra.mxu0 %v11140_v21  ;;  %5612 = vmatpush1.bf16.msra.mxu1 %v11143_v22  ;;  %v282_v21 = vpack.c.bf16 %v13074_v9, %v13074_v9  ;;  %v11233_v22 = vld [vmem:[%s12862_s17 + $0x408] ss:$16 sps:$4 sm:$0xff]  }
  0x7e   :  { %5080 = vmatprep.subr.bf16.mxu0 %v11148_v23  ;;  %5613 = vmatprep.subr.bf16.mxu1 %v11151_v24  ;;  %v13151_v23 = vld [vmem:[%s12847_s5 + $0x8] sm:$0xff]  ;;  %v11238_v24 = vld [vmem:[%s12862_s17 + $0x424] ss:$16 sps:$4 sm:$0xff]  }
  0x81   :  { %5081 = vmatpush1.bf16.msra.mxu0 %v11146_v25  ;;  %5614 = vmatpush1.bf16.msra.mxu1 %v11149_v26  ;;  %v11241_v25 = vld [vmem:[%s12862_s17 + $0x42c] ss:$16 sps:$4 sm:$0xff]   ;;  %v13157_v26 = vrot.slane %v13151_v23, %v13051_v49 }
  0x82   :  { %5082 = vmatprep.subr.bf16.mxu0 %v11154_v27  ;;  %5615 = vmatprep.subr.bf16.mxu1 %v11157_v28  ;;  %v11236_v27 = vld [vmem:[%s12862_s17 + $0x420] ss:$16 sps:$4 sm:$0xff]   ;;  %v11239_v28 = vld [vmem:[%s12862_s17 + $0x428] ss:$16 sps:$4 sm:$0xff]  }
  0x83   :  { %v178_v9 = vcombine.high %v13157_v26, %v13157_v26 }
  0x85   :  { %5083 = vmatpush1.bf16.msra.mxu0 %v11152_v29  ;;  %5616 = vmatpush1.bf16.msra.mxu1 %v11155_v30  ;;  %v11244_v29 = vld [vmem:[%s12862_s17 + $0x444] ss:$16 sps:$4 sm:$0xff]   ;;  %v11247_v30 = vld [vmem:[%s12862_s17 + $0x44c] ss:$16 sps:$4 sm:$0xff]  }
  0x86   :  { %5084 = vmatprep.subr.bf16.mxu0 %v11160_v31  ;;  %5617 = vmatprep.subr.bf16.mxu1 %v11163_v32  ;;  %v285_v31 = vpack.c.bf16 %v178_v9, %v178_v9  ;;  %v11242_v32 = vld [vmem:[%s12862_s17 + $0x440] ss:$16 sps:$4 sm:$0xff]   ;;  %v11323_v9 = vld [vmem:[%s12862_s17 + $0x5e8] ss:$16 sps:$4 sm:$0xff]  }
  0x89   :  { %5085 = vmatpush1.bf16.msra.mxu0 %v11158_v33  ;;  %5618 = vmatpush1.bf16.msra.mxu1 %v11161_v34  ;;  %v11245_v33 = vld [vmem:[%s12862_s17 + $0x448] ss:$16 sps:$4 sm:$0xff]   ;;  %v11250_v34 = vld [vmem:[%s12862_s17 + $0x464] ss:$16 sps:$4 sm:$0xff]  }
  0x8a   :  { %5086 = vmatprep.subr.bf16.mxu0 %v11166_v35  ;;  %5619 = vmatprep.subr.bf16.mxu1 %v11169_v36  ;;  %v11253_v35 = vld [vmem:[%s12862_s17 + $0x46c] ss:$16 sps:$4 sm:$0xff]   ;;  %v11248_v36 = vld [vmem:[%s12862_s17 + $0x460] ss:$16 sps:$4 sm:$0xff]  }
  0x8d   :  { %5087 = vmatpush1.bf16.msra.mxu0 %v11164_v37  ;;  %5620 = vmatpush1.bf16.msra.mxu1 %v11167_v38  ;;  %v11251_v37 = vld [vmem:[%s12862_s17 + $0x468] ss:$16 sps:$4 sm:$0xff]   ;;  %v11256_v38 = vld [vmem:[%s12862_s17 + $0x484] ss:$16 sps:$4 sm:$0xff]  }
  0x8e   :  { %5088 = vmatprep.subr.bf16.mxu0 %v11172_v39  ;;  %5621 = vmatprep.subr.bf16.mxu1 %v11175_v40  ;;  %v11259_v39 = vld [vmem:[%s12862_s17 + $0x48c] ss:$16 sps:$4 sm:$0xff]   ;;  %v11254_v40 = vld [vmem:[%s12862_s17 + $0x480] ss:$16 sps:$4 sm:$0xff]  }
  0x91   :  { %5089 = vmatpush1.bf16.msra.mxu0 %v11170_v41  ;;  %5622 = vmatpush1.bf16.msra.mxu1 %v11173_v42  ;;  %v11257_v41 = vld [vmem:[%s12862_s17 + $0x488] ss:$16 sps:$4 sm:$0xff]   ;;  %v11262_v42 = vld [vmem:[%s12862_s17 + $0x4a4] ss:$16 sps:$4 sm:$0xff]  }
  0x92   :  { %5090 = vmatprep.subr.bf16.mxu0 %v11178_v44  ;;  %5623 = vmatprep.subr.bf16.mxu1 %v11181_v45  ;;  %v11265_v44 = vld [vmem:[%s12862_s17 + $0x4ac] ss:$16 sps:$4 sm:$0xff]   ;;  %v11260_v45 = vld [vmem:[%s12862_s17 + $0x4a0] ss:$16 sps:$4 sm:$0xff]  }
  0x95   :  { %5091 = vmatpush1.bf16.msra.mxu0 %v11176_v46  ;;  %5624 = vmatpush1.bf16.msra.mxu1 %v11179_v47  ;;  %v11263_v46 = vld [vmem:[%s12862_s17 + $0x4a8] ss:$16 sps:$4 sm:$0xff]   ;;  %v11268_v47 = vld [vmem:[%s12862_s17 + $0x4c4] ss:$16 sps:$4 sm:$0xff]  }
  0x96   :  { %5092 = vmatprep.subr.bf16.mxu0 %v11184_v48  ;;  %5625 = vmatprep.subr.bf16.mxu1 %v11187_v50  ;;  %v11271_v48 = vld [vmem:[%s12862_s17 + $0x4cc] ss:$16 sps:$4 sm:$0xff]   ;;  %v11266_v50 = vld [vmem:[%s12862_s17 + $0x4c0] ss:$16 sps:$4 sm:$0xff]  }
  0x99   :  { %5093 = vmatpush1.bf16.msra.mxu0 %v11182_v51  ;;  %5626 = vmatpush1.bf16.msra.mxu1 %v11185_v52  ;;  %v11269_v51 = vld [vmem:[%s12862_s17 + $0x4c8] ss:$16 sps:$4 sm:$0xff]   ;;  %v11274_v52 = vld [vmem:[%s12862_s17 + $0x4e4] ss:$16 sps:$4 sm:$0xff]  }
  0x9a   :  { %5094 = vmatprep.subr.bf16.mxu0 %v11190_v53  ;;  %5627 = vmatprep.subr.bf16.mxu1 %v11193_v54  ;;  %v11277_v53 = vld [vmem:[%s12862_s17 + $0x4ec] ss:$16 sps:$4 sm:$0xff]   ;;  %v11272_v54 = vld [vmem:[%s12862_s17 + $0x4e0] ss:$16 sps:$4 sm:$0xff]  }
  0x9d   :  { %5095 = vmatpush1.bf16.msra.mxu0 %v11188_v55  ;;  %5628 = vmatpush1.bf16.msra.mxu1 %v11191_v56  ;;  %v11275_v55 = vld [vmem:[%s12862_s17 + $0x4e8] ss:$16 sps:$4 sm:$0xff]   ;;  %v11280_v56 = vld [vmem:[%s12862_s17 + $0x504] ss:$16 sps:$4 sm:$0xff]  }
  0x9e   :  { %5096 = vmatprep.subr.bf16.mxu0 %v11196_v57  ;;  %5629 = vmatprep.subr.bf16.mxu1 %v11199_v58  ;;  %v11283_v57 = vld [vmem:[%s12862_s17 + $0x50c] ss:$16 sps:$4 sm:$0xff]   ;;  %v11278_v58 = vld [vmem:[%s12862_s17 + $0x500] ss:$16 sps:$4 sm:$0xff]  }
  0xa1   :  { %5097 = vmatpush1.bf16.msra.mxu0 %v11194_v59  ;;  %5630 = vmatpush1.bf16.msra.mxu1 %v11197_v60  ;;  %v11281_v59 = vld [vmem:[%s12862_s17 + $0x508] ss:$16 sps:$4 sm:$0xff]   ;;  %v11286_v60 = vld [vmem:[%s12862_s17 + $0x524] ss:$16 sps:$4 sm:$0xff]  }
  0xa2   :  { %5098 = vmatprep.subr.bf16.mxu0 %v11202_v61  ;;  %5631 = vmatprep.subr.bf16.mxu1 %v11205_v62  ;;  %v11289_v61 = vld [vmem:[%s12862_s17 + $0x52c] ss:$16 sps:$4 sm:$0xff]   ;;  %v11284_v62 = vld [vmem:[%s12862_s17 + $0x520] ss:$16 sps:$4 sm:$0xff]  }
  0xa5   :  { %5099 = vmatpush1.bf16.msra.mxu0 %v11200_v63  ;;  %5632 = vmatpush1.bf16.msra.mxu1 %v11203_v0  ;;  %v11287_v63 = vld [vmem:[%s12862_s17 + $0x528] ss:$16 sps:$4 sm:$0xff]   ;;  %v11292_v0 = vld [vmem:[%s12862_s17 + $0x544] ss:$16 sps:$4 sm:$0xff]  }
  0xa6   :  { %5100 = vmatprep.subr.bf16.mxu0 %v11208_v1  ;;  %5633 = vmatprep.subr.bf16.mxu1 %v11211_v2  ;;  %v11295_v1 = vld [vmem:[%s12862_s17 + $0x54c] ss:$16 sps:$4 sm:$0xff]   ;;  %v11290_v2 = vld [vmem:[%s12862_s17 + $0x540] ss:$16 sps:$4 sm:$0xff]  }
  0xa9   :  { %5101 = vmatpush1.bf16.msra.mxu0 %v11206_v3  ;;  %5634 = vmatpush1.bf16.msra.mxu1 %v11209_v4  ;;  %v11293_v3 = vld [vmem:[%s12862_s17 + $0x548] ss:$16 sps:$4 sm:$0xff]   ;;  %v11298_v4 = vld [vmem:[%s12862_s17 + $0x564] ss:$16 sps:$4 sm:$0xff]  }
  0xaa   :  { %5102 = vmatprep.subr.bf16.mxu0 %v11214_v5  ;;  %5635 = vmatprep.subr.bf16.mxu1 %v11217_v6  ;;  %v11301_v5 = vld [vmem:[%s12862_s17 + $0x56c] ss:$16 sps:$4 sm:$0xff]   ;;  %v11296_v6 = vld [vmem:[%s12862_s17 + $0x560] ss:$16 sps:$4 sm:$0xff]  }
  0xad   :  { %5103 = vmatpush1.bf16.msra.mxu0 %v11212_v7  ;;  %5636 = vmatpush1.bf16.msra.mxu1 %v11215_v8  ;;  %v11299_v7 = vld [vmem:[%s12862_s17 + $0x568] ss:$16 sps:$4 sm:$0xff]   ;;  %v11304_v8 = vld [vmem:[%s12862_s17 + $0x584] ss:$16 sps:$4 sm:$0xff]  }
  0xae   :  { %5104 = vmatprep.subr.bf16.mxu0 %v11220_v10  ;;  %5637 = vmatprep.subr.bf16.mxu1 %v11223_v11  ;;  %v11307_v10 = vld [vmem:[%s12862_s17 + $0x58c] ss:$16 sps:$4 sm:$0xff]   ;;  %v11302_v11 = vld [vmem:[%s12862_s17 + $0x580] ss:$16 sps:$4 sm:$0xff]  }
  0xb1   :  { %5105 = vmatpush1.bf16.msra.mxu0 %v11218_v12  ;;  %5638 = vmatpush1.bf16.msra.mxu1 %v11221_v13  ;;  %v11305_v12 = vld [vmem:[%s12862_s17 + $0x588] ss:$16 sps:$4 sm:$0xff]   ;;  %v11310_v13 = vld [vmem:[%s12862_s17 + $0x5a4] ss:$16 sps:$4 sm:$0xff]  }
  0xb2   :  { %5106 = vmatprep.subr.bf16.mxu0 %v11226_v14  ;;  %5639 = vmatprep.subr.bf16.mxu1 %v11229_v15  ;;  %v11313_v14 = vld [vmem:[%s12862_s17 + $0x5ac] ss:$16 sps:$4 sm:$0xff]   ;;  %v11308_v15 = vld [vmem:[%s12862_s17 + $0x5a0] ss:$16 sps:$4 sm:$0xff]  }
  0xb5   :  { %5107 = vmatpush1.bf16.msra.mxu0 %v11224_v16  ;;  %5640 = vmatpush1.bf16.msra.mxu1 %v11227_v17  ;;  %v11311_v16 = vld [vmem:[%s12862_s17 + $0x5a8] ss:$16 sps:$4 sm:$0xff]   ;;  %v11316_v17 = vld [vmem:[%s12862_s17 + $0x5c4] ss:$16 sps:$4 sm:$0xff]  }
  0xb6   :  { %5117 = vmatprep.subr.bf16.mxu0 %v11232_v18  ;;  %5650 = vmatprep.subr.bf16.mxu1 %v11235_v19  ;;  %v11319_v18 = vld [vmem:[%s12862_s17 + $0x5cc] ss:$16 sps:$4 sm:$0xff]   ;;  %v163_v19 = vcombine.high %v13151_v23, %v13151_v23  ;;  %v11320_v23 = vld [vmem:[%s12862_s17 + $0x5e0] ss:$16 sps:$4 sm:$0xff]  }
  0xb8   :  { %5109 = vmatmul.mubr.bf16.vlgmr.msra.gmra.mrb[0].mxu0 %v282_v21  ;;  %5642 = vmatmul.mubr.bf16.vlgmr.msra.gmra.mrb[0].mxu1 %v282_v21  ;;  %v11317_v21 = vld [vmem:[%s12862_s17 + $0x5c8] ss:$16 sps:$4 sm:$0xff]  }
  0xb9   :  { %5118 = vmatpush1.bf16.msra.mxu0 %v11230_v20  ;;  %5651 = vmatpush1.bf16.msra.mxu1 %v11233_v22  ;;  %v11314_v20 = vld [vmem:[%s12862_s17 + $0x5c0] ss:$16 sps:$4 sm:$0xff]   ;;  %v11322_v22 = vld [vmem:[%s12862_s17 + $0x5e4] ss:$16 sps:$4 sm:$0xff]  }
  0xba   :  { %5119 = vmatprep.subr.bf16.mxu0 %v11238_v24  ;;  %5652 = vmatprep.subr.bf16.mxu1 %v11241_v25  ;;  %v11325_v24 = vld [vmem:[%s12862_s17 + $0x5ec] ss:$16 sps:$4 sm:$0xff]   ;;  %v13220_v25 = vrot.slane %v163_v19, %v13051_v49  ;;  %v11401_v19 = vld [vmem:[%s12862_s17 + $0x788] ss:$16 sps:$4 sm:$0xff]  }
  0xbb   :  { %5149 = vmatprep.mubr.bf16.mxu0 %v285_v31  ;;  %5682 = vmatprep.mubr.bf16.mxu1 %v285_v31  ;;  %v11326_v31 = vld [vmem:[%s12862_s17 + $0x600] ss:$16 sps:$4 sm:$0xff]  }
  0xbd   :  { %5120 = vmatpush1.bf16.msra.mxu0 %v11236_v27  ;;  %5653 = vmatpush1.bf16.msra.mxu1 %v11239_v28  ;;  %v11328_v27 = vld [vmem:[%s12862_s17 + $0x604] ss:$16 sps:$4 sm:$0xff]   ;;  %v11331_v28 = vld [vmem:[%s12862_s17 + $0x60c] ss:$16 sps:$4 sm:$0xff]  }
  0xbe   :  { %5121 = vmatprep.subr.bf16.mxu0 %v11244_v29  ;;  %5654 = vmatprep.subr.bf16.mxu1 %v11247_v30  ;;  %v179_v29 = vcombine.high %v13220_v25, %v13220_v25  ;;  %v284_v30 = vpack.c.bf16 %v13157_v26, %v13157_v26  ;;  %v11332_v26 = vld [vmem:[%s12862_s17 + $0x620] ss:$16 sps:$4 sm:$0xff]  }
  0xc1   :  { %5122 = vmatpush1.bf16.msra.mxu0 %v11242_v32  ;;  %5655 = vmatpush1.bf16.msra.mxu1 %v11245_v33  ;;  %v11329_v32 = vld [vmem:[%s12862_s17 + $0x608] ss:$16 sps:$4 sm:$0xff]   ;;  %v11334_v33 = vld [vmem:[%s12862_s17 + $0x624] ss:$16 sps:$4 sm:$0xff]  }
  0xc2   :  { %5123 = vmatprep.subr.bf16.mxu0 %v11250_v34  ;;  %5656 = vmatprep.subr.bf16.mxu1 %v11253_v35  ;;  %v11337_v34 = vld [vmem:[%s12862_s17 + $0x62c] ss:$16 sps:$4 sm:$0xff]   ;;  %v287_v35 = vpack.c.bf16 %v179_v29, %v179_v29  ;;  %v11413_v29 = vld [vmem:[%s12862_s17 + $0x7c8] ss:$16 sps:$4 sm:$0xff]  }
  0xc5   :  { %5124 = vmatpush1.bf16.msra.mxu0 %v11248_v36  ;;  %5657 = vmatpush1.bf16.msra.mxu1 %v11251_v37  ;;  %v11335_v36 = vld [vmem:[%s12862_s17 + $0x628] ss:$16 sps:$4 sm:$0xff]   ;;  %v11340_v37 = vld [vmem:[%s12862_s17 + $0x644] ss:$16 sps:$4 sm:$0xff]  }
  0xc6   :  { %5125 = vmatprep.subr.bf16.mxu0 %v11256_v38  ;;  %5658 = vmatprep.subr.bf16.mxu1 %v11259_v39  ;;  %v11343_v38 = vld [vmem:[%s12862_s17 + $0x64c] ss:$16 sps:$4 sm:$0xff]   ;;  %v11338_v39 = vld [vmem:[%s12862_s17 + $0x640] ss:$16 sps:$4 sm:$0xff]  }
  0xc9   :  { %5126 = vmatpush1.bf16.msra.mxu0 %v11254_v40  ;;  %5659 = vmatpush1.bf16.msra.mxu1 %v11257_v41  ;;  %v11341_v40 = vld [vmem:[%s12862_s17 + $0x648] ss:$16 sps:$4 sm:$0xff]   ;;  %v11346_v41 = vld [vmem:[%s12862_s17 + $0x664] ss:$16 sps:$4 sm:$0xff]  }
  0xca   :  { %5127 = vmatprep.subr.bf16.mxu0 %v11262_v42  ;;  %5660 = vmatprep.subr.bf16.mxu1 %v11265_v44  ;;  %v11349_v42 = vld [vmem:[%s12862_s17 + $0x66c] ss:$16 sps:$4 sm:$0xff]   ;;  %v11344_v44 = vld [vmem:[%s12862_s17 + $0x660] ss:$16 sps:$4 sm:$0xff]  }
  0xcd   :  { %5128 = vmatpush1.bf16.msra.mxu0 %v11260_v45  ;;  %5661 = vmatpush1.bf16.msra.mxu1 %v11263_v46  ;;  %v11347_v45 = vld [vmem:[%s12862_s17 + $0x668] ss:$16 sps:$4 sm:$0xff]   ;;  %v11352_v46 = vld [vmem:[%s12862_s17 + $0x684] ss:$16 sps:$4 sm:$0xff]  }
  0xce   :  { %5129 = vmatprep.subr.bf16.mxu0 %v11268_v47  ;;  %5662 = vmatprep.subr.bf16.mxu1 %v11271_v48  ;;  %v11355_v47 = vld [vmem:[%s12862_s17 + $0x68c] ss:$16 sps:$4 sm:$0xff]   ;;  %v11350_v48 = vld [vmem:[%s12862_s17 + $0x680] ss:$16 sps:$4 sm:$0xff]  }
  0xd1   :  { %5130 = vmatpush1.bf16.msra.mxu0 %v11266_v50  ;;  %5663 = vmatpush1.bf16.msra.mxu1 %v11269_v51  ;;  %v11353_v50 = vld [vmem:[%s12862_s17 + $0x688] ss:$16 sps:$4 sm:$0xff]   ;;  %v11358_v51 = vld [vmem:[%s12862_s17 + $0x6a4] ss:$16 sps:$4 sm:$0xff]  }
  0xd2   :  { %5131 = vmatprep.subr.bf16.mxu0 %v11274_v52  ;;  %5664 = vmatprep.subr.bf16.mxu1 %v11277_v53  ;;  %v11361_v52 = vld [vmem:[%s12862_s17 + $0x6ac] ss:$16 sps:$4 sm:$0xff]   ;;  %v11356_v53 = vld [vmem:[%s12862_s17 + $0x6a0] ss:$16 sps:$4 sm:$0xff]  }
  0xd5   :  { %5132 = vmatpush1.bf16.msra.mxu0 %v11272_v54  ;;  %5665 = vmatpush1.bf16.msra.mxu1 %v11275_v55  ;;  %v11359_v54 = vld [vmem:[%s12862_s17 + $0x6a8] ss:$16 sps:$4 sm:$0xff]   ;;  %v11364_v55 = vld [vmem:[%s12862_s17 + $0x6c4] ss:$16 sps:$4 sm:$0xff]  }
  0xd6   :  { %5133 = vmatprep.subr.bf16.mxu0 %v11280_v56  ;;  %5666 = vmatprep.subr.bf16.mxu1 %v11283_v57  ;;  %v11367_v56 = vld [vmem:[%s12862_s17 + $0x6cc] ss:$16 sps:$4 sm:$0xff]   ;;  %v11362_v57 = vld [vmem:[%s12862_s17 + $0x6c0] ss:$16 sps:$4 sm:$0xff]  }
  0xd9   :  { %5134 = vmatpush1.bf16.msra.mxu0 %v11278_v58  ;;  %5667 = vmatpush1.bf16.msra.mxu1 %v11281_v59  ;;  %v11365_v58 = vld [vmem:[%s12862_s17 + $0x6c8] ss:$16 sps:$4 sm:$0xff]   ;;  %v11370_v59 = vld [vmem:[%s12862_s17 + $0x6e4] ss:$16 sps:$4 sm:$0xff]  }
  0xda   :  { %5135 = vmatprep.subr.bf16.mxu0 %v11286_v60  ;;  %5668 = vmatprep.subr.bf16.mxu1 %v11289_v61  ;;  %v11373_v60 = vld [vmem:[%s12862_s17 + $0x6ec] ss:$16 sps:$4 sm:$0xff]   ;;  %v11368_v61 = vld [vmem:[%s12862_s17 + $0x6e0] ss:$16 sps:$4 sm:$0xff]  }
  0xdd   :  { %5136 = vmatpush1.bf16.msra.mxu0 %v11284_v62  ;;  %5669 = vmatpush1.bf16.msra.mxu1 %v11287_v63  ;;  %v11371_v62 = vld [vmem:[%s12862_s17 + $0x6e8] ss:$16 sps:$4 sm:$0xff]   ;;  %v11376_v63 = vld [vmem:[%s12862_s17 + $0x704] ss:$16 sps:$4 sm:$0xff]  }
  0xde   :  { %5137 = vmatprep.subr.bf16.mxu0 %v11292_v0  ;;  %5670 = vmatprep.subr.bf16.mxu1 %v11295_v1  ;;  %v11379_v0 = vld [vmem:[%s12862_s17 + $0x70c] ss:$16 sps:$4 sm:$0xff]   ;;  %v11374_v1 = vld [vmem:[%s12862_s17 + $0x700] ss:$16 sps:$4 sm:$0xff]  }
  0xe1   :  { %5138 = vmatpush1.bf16.msra.mxu0 %v11290_v2  ;;  %5671 = vmatpush1.bf16.msra.mxu1 %v11293_v3  ;;  %v11377_v2 = vld [vmem:[%s12862_s17 + $0x708] ss:$16 sps:$4 sm:$0xff]   ;;  %v11382_v3 = vld [vmem:[%s12862_s17 + $0x724] ss:$16 sps:$4 sm:$0xff]  }
  0xe2   :  { %5139 = vmatprep.subr.bf16.mxu0 %v11298_v4  ;;  %5672 = vmatprep.subr.bf16.mxu1 %v11301_v5  ;;  %v11385_v4 = vld [vmem:[%s12862_s17 + $0x72c] ss:$16 sps:$4 sm:$0xff]   ;;  %v11380_v5 = vld [vmem:[%s12862_s17 + $0x720] ss:$16 sps:$4 sm:$0xff]  }
  0xe5   :  { %5140 = vmatpush1.bf16.msra.mxu0 %v11296_v6  ;;  %5673 = vmatpush1.bf16.msra.mxu1 %v11299_v7  ;;  %v11383_v6 = vld [vmem:[%s12862_s17 + $0x728] ss:$16 sps:$4 sm:$0xff]   ;;  %v11388_v7 = vld [vmem:[%s12862_s17 + $0x744] ss:$16 sps:$4 sm:$0xff]  }
  0xe6   :  { %5141 = vmatprep.subr.bf16.mxu0 %v11304_v8  ;;  %5674 = vmatprep.subr.bf16.mxu1 %v11307_v10  ;;  %v11391_v8 = vld [vmem:[%s12862_s17 + $0x74c] ss:$16 sps:$4 sm:$0xff]   ;;  %v11386_v10 = vld [vmem:[%s12862_s17 + $0x740] ss:$16 sps:$4 sm:$0xff]  }
  0xe9   :  { %5142 = vmatpush1.bf16.msra.mxu0 %v11302_v11  ;;  %5675 = vmatpush1.bf16.msra.mxu1 %v11305_v12  ;;  %v11389_v11 = vld [vmem:[%s12862_s17 + $0x748] ss:$16 sps:$4 sm:$0xff]   ;;  %v11394_v12 = vld [vmem:[%s12862_s17 + $0x764] ss:$16 sps:$4 sm:$0xff]  }
  0xea   :  { %5143 = vmatprep.subr.bf16.mxu0 %v11310_v13  ;;  %5676 = vmatprep.subr.bf16.mxu1 %v11313_v14  ;;  %v11397_v13 = vld [vmem:[%s12862_s17 + $0x76c] ss:$16 sps:$4 sm:$0xff]   ;;  %v11392_v14 = vld [vmem:[%s12862_s17 + $0x760] ss:$16 sps:$4 sm:$0xff]  }
  0xed   :  { %5144 = vmatpush1.bf16.msra.mxu0 %v11308_v15  ;;  %5677 = vmatpush1.bf16.msra.mxu1 %v11311_v16  ;;  %v11395_v15 = vld [vmem:[%s12862_s17 + $0x768] ss:$16 sps:$4 sm:$0xff]   ;;  %v11400_v16 = vld [vmem:[%s12862_s17 + $0x784] ss:$16 sps:$4 sm:$0xff]  }
  0xee   :  { %5145 = vmatprep.subr.bf16.mxu0 %v11316_v17  ;;  %5678 = vmatprep.subr.bf16.mxu1 %v11319_v18  ;;  %v11403_v17 = vld [vmem:[%s12862_s17 + $0x78c] ss:$16 sps:$4 sm:$0xff]   ;;  %v11398_v18 = vld [vmem:[%s12862_s17 + $0x780] ss:$16 sps:$4 sm:$0xff]  }
  0xf1   :  { %5146 = vmatpush1.bf16.msra.mxu0 %v11314_v20  ;;  %5679 = vmatpush1.bf16.msra.mxu1 %v11317_v21  ;;  %v11406_v20 = vld [vmem:[%s12862_s17 + $0x7a4] ss:$16 sps:$4 sm:$0xff]   ;;  %v11409_v21 = vld [vmem:[%s12862_s17 + $0x7ac] ss:$16 sps:$4 sm:$0xff]  }
  0xf2   :  { %5147 = vmatprep.subr.bf16.mxu0 %v11322_v22  ;;  %5680 = vmatprep.subr.bf16.mxu1 %v11325_v24  ;;  %v11404_v22 = vld [vmem:[%s12862_s17 + $0x7a0] ss:$16 sps:$4 sm:$0xff]   ;;  %v11407_v24 = vld [vmem:[%s12862_s17 + $0x7a8] ss:$16 sps:$4 sm:$0xff]  }
  0xf5   :  { %5148 = vmatpush1.bf16.msra.mxu0 %v11320_v23  ;;  %5681 = vmatpush1.bf16.msra.mxu1 %v11323_v9  ;;  %v11412_v23 = vld [vmem:[%s12862_s17 + $0x7c4] ss:$16 sps:$4 sm:$0xff]   ;;  %v11415_v9 = vld [vmem:[%s12862_s17 + $0x7cc] ss:$16 sps:$4 sm:$0xff]  }
  0xf6   :  { %5158 = vmatprep.subr.bf16.mxu0 %v11328_v27  ;;  %5691 = vmatprep.subr.bf16.mxu1 %v11331_v28  ;;  %v11410_v27 = vld [vmem:[%s12862_s17 + $0x7c0] ss:$16 sps:$4 sm:$0xff]  }
  0xf7   :  { %v13288_v28 = vld [vmem:[%s12847_s5 + $0x10] sm:$0xff] }
  0xf8   :  { %5150 = vmatmul.mubr.bf16.vlgmr.msra.gmra.mrb[0].mxu0 %v284_v30  ;;  %5683 = vmatmul.mubr.bf16.vlgmr.msra.gmra.mrb[0].mxu1 %v284_v30  ;;  %v11418_v30 = vld [vmem:[%s12862_s17 + $0x7e4] ss:$16 sps:$4 sm:$0xff]  }
  0xf9   :  { %5159 = vmatpush1.bf16.msra.mxu0 %v11326_v31  ;;  %5692 = vmatpush1.bf16.msra.mxu1 %v11329_v32  ;;  %v11421_v31 = vld [vmem:[%s12862_s17 + $0x7ec] ss:$16 sps:$4 sm:$0xff]   ;;  %v13295_v32 = vrot.slane %v13288_v28, %v13051_v49 }
  0xfa   :  { %5160 = vmatprep.subr.bf16.mxu0 %v11334_v33  ;;  %5693 = vmatprep.subr.bf16.mxu1 %v11337_v34  ;;  %v11416_v33 = vld [vmem:[%s12862_s17 + $0x7e0] ss:$16 sps:$4 sm:$0xff]   ;;  %v11419_v34 = vld [vmem:[%s12862_s17 + $0x7e8] ss:$16 sps:$4 sm:$0xff]  }
  0xfb   :  { %5190 = vmatprep.mubr.bf16.mxu0 %v287_v35  ;;  %5723 = vmatprep.mubr.bf16.mxu1 %v287_v35  ;;  %v11425_v35 = vld [vmem:[%s12862_s17 + $0x804] ss:$16 sps:$4 sm:$0xff]  }
  0xfd   :  { %5161 = vmatpush1.bf16.msra.mxu0 %v11332_v26  ;;  %5694 = vmatpush1.bf16.msra.mxu1 %v11335_v36  ;;  %v11428_v26 = vld [vmem:[%s12862_s17 + $0x80c] ss:$16 sps:$4 sm:$0xff]   ;;  %v195_v36 = vcombine.high %v13295_v32, %v13295_v32 }
  0xfe   :  { %5162 = vmatprep.subr.bf16.mxu0 %v11340_v37  ;;  %5695 = vmatprep.subr.bf16.mxu1 %v11343_v38  ;;  %v11423_v37 = vld [vmem:[%s12862_s17 + $0x800] ss:$16 sps:$4 sm:$0xff]   ;;  %v286_v38 = vpack.c.bf16 %v13220_v25, %v13220_v25  ;;  %v11437_v25 = vld [vmem:[%s12862_s17 + $0x844] ss:$16 sps:$4 sm:$0xff]  }
 0x101   :  { %5163 = vmatpush1.bf16.msra.mxu0 %v11338_v39  ;;  %5696 = vmatpush1.bf16.msra.mxu1 %v11341_v40  ;;  %v11426_v39 = vld [vmem:[%s12862_s17 + $0x808] ss:$16 sps:$4 sm:$0xff]   ;;  %v11431_v40 = vld [vmem:[%s12862_s17 + $0x824] ss:$16 sps:$4 sm:$0xff]  }
 0x102   :  { %5164 = vmatprep.subr.bf16.mxu0 %v11346_v41  ;;  %5697 = vmatprep.subr.bf16.mxu1 %v11349_v42  ;;  %v11434_v41 = vld [vmem:[%s12862_s17 + $0x82c] ss:$16 sps:$4 sm:$0xff]   ;;  %v289_v42 = vpack.c.bf16 %v195_v36, %v195_v36  ;;  %v11507_v36 = vld [vmem:[%s12862_s17 + $0x9c0] ss:$16 sps:$4 sm:$0xff]  }
 0x105   :  { %5165 = vmatpush1.bf16.msra.mxu0 %v11344_v44  ;;  %5698 = vmatpush1.bf16.msra.mxu1 %v11347_v45  ;;  %v11429_v44 = vld [vmem:[%s12862_s17 + $0x820] ss:$16 sps:$4 sm:$0xff]   ;;  %v11432_v45 = vld [vmem:[%s12862_s17 + $0x828] ss:$16 sps:$4 sm:$0xff]  }
 0x106   :  { %5166 = vmatprep.subr.bf16.mxu0 %v11352_v46  ;;  %5699 = vmatprep.subr.bf16.mxu1 %v11355_v47  ;;  %v11440_v46 = vld [vmem:[%s12862_s17 + $0x84c] ss:$16 sps:$4 sm:$0xff]   ;;  %v11435_v47 = vld [vmem:[%s12862_s17 + $0x840] ss:$16 sps:$4 sm:$0xff]  }
 0x109   :  { %5167 = vmatpush1.bf16.msra.mxu0 %v11350_v48  ;;  %5700 = vmatpush1.bf16.msra.mxu1 %v11353_v50  ;;  %v11438_v48 = vld [vmem:[%s12862_s17 + $0x848] ss:$16 sps:$4 sm:$0xff]   ;;  %v11443_v50 = vld [vmem:[%s12862_s17 + $0x864] ss:$16 sps:$4 sm:$0xff]  }
 0x10a   :  { %5168 = vmatprep.subr.bf16.mxu0 %v11358_v51  ;;  %5701 = vmatprep.subr.bf16.mxu1 %v11361_v52  ;;  %v11446_v51 = vld [vmem:[%s12862_s17 + $0x86c] ss:$16 sps:$4 sm:$0xff]   ;;  %v11441_v52 = vld [vmem:[%s12862_s17 + $0x860] ss:$16 sps:$4 sm:$0xff]  }
 0x10d   :  { %5169 = vmatpush1.bf16.msra.mxu0 %v11356_v53  ;;  %5702 = vmatpush1.bf16.msra.mxu1 %v11359_v54  ;;  %v11444_v53 = vld [vmem:[%s12862_s17 + $0x868] ss:$16 sps:$4 sm:$0xff]   ;;  %v11449_v54 = vld [vmem:[%s12862_s17 + $0x884] ss:$16 sps:$4 sm:$0xff]  }
 0x10e   :  { %5170 = vmatprep.subr.bf16.mxu0 %v11364_v55  ;;  %5703 = vmatprep.subr.bf16.mxu1 %v11367_v56  ;;  %v11452_v55 = vld [vmem:[%s12862_s17 + $0x88c] ss:$16 sps:$4 sm:$0xff]   ;;  %v11447_v56 = vld [vmem:[%s12862_s17 + $0x880] ss:$16 sps:$4 sm:$0xff]  }
 0x111   :  { %5171 = vmatpush1.bf16.msra.mxu0 %v11362_v57  ;;  %5704 = vmatpush1.bf16.msra.mxu1 %v11365_v58  ;;  %v11450_v57 = vld [vmem:[%s12862_s17 + $0x888] ss:$16 sps:$4 sm:$0xff]   ;;  %v11455_v58 = vld [vmem:[%s12862_s17 + $0x8a4] ss:$16 sps:$4 sm:$0xff]  }
 0x112   :  { %5172 = vmatprep.subr.bf16.mxu0 %v11370_v59  ;;  %5705 = vmatprep.subr.bf16.mxu1 %v11373_v60  ;;  %v11458_v59 = vld [vmem:[%s12862_s17 + $0x8ac] ss:$16 sps:$4 sm:$0xff]   ;;  %v11453_v60 = vld [vmem:[%s12862_s17 + $0x8a0] ss:$16 sps:$4 sm:$0xff]  }
 0x115   :  { %5173 = vmatpush1.bf16.msra.mxu0 %v11368_v61  ;;  %5706 = vmatpush1.bf16.msra.mxu1 %v11371_v62  ;;  %v11456_v61 = vld [vmem:[%s12862_s17 + $0x8a8] ss:$16 sps:$4 sm:$0xff]   ;;  %v11461_v62 = vld [vmem:[%s12862_s17 + $0x8c4] ss:$16 sps:$4 sm:$0xff]  }
 0x116   :  { %5174 = vmatprep.subr.bf16.mxu0 %v11376_v63  ;;  %5707 = vmatprep.subr.bf16.mxu1 %v11379_v0  ;;  %v11464_v63 = vld [vmem:[%s12862_s17 + $0x8cc] ss:$16 sps:$4 sm:$0xff]   ;;  %v11459_v0 = vld [vmem:[%s12862_s17 + $0x8c0] ss:$16 sps:$4 sm:$0xff]  }
 0x119   :  { %5175 = vmatpush1.bf16.msra.mxu0 %v11374_v1  ;;  %5708 = vmatpush1.bf16.msra.mxu1 %v11377_v2  ;;  %v11462_v1 = vld [vmem:[%s12862_s17 + $0x8c8] ss:$16 sps:$4 sm:$0xff]   ;;  %v11467_v2 = vld [vmem:[%s12862_s17 + $0x8e4] ss:$16 sps:$4 sm:$0xff]  }
 0x11a   :  { %5176 = vmatprep.subr.bf16.mxu0 %v11382_v3  ;;  %5709 = vmatprep.subr.bf16.mxu1 %v11385_v4  ;;  %v11470_v3 = vld [vmem:[%s12862_s17 + $0x8ec] ss:$16 sps:$4 sm:$0xff]   ;;  %v11465_v4 = vld [vmem:[%s12862_s17 + $0x8e0] ss:$16 sps:$4 sm:$0xff]  }
 0x11d   :  { %5177 = vmatpush1.bf16.msra.mxu0 %v11380_v5  ;;  %5710 = vmatpush1.bf16.msra.mxu1 %v11383_v6  ;;  %v11468_v5 = vld [vmem:[%s12862_s17 + $0x8e8] ss:$16 sps:$4 sm:$0xff]   ;;  %v11473_v6 = vld [vmem:[%s12862_s17 + $0x904] ss:$16 sps:$4 sm:$0xff]  }
 0x11e   :  { %5178 = vmatprep.subr.bf16.mxu0 %v11388_v7  ;;  %5711 = vmatprep.subr.bf16.mxu1 %v11391_v8  ;;  %v11476_v7 = vld [vmem:[%s12862_s17 + $0x90c] ss:$16 sps:$4 sm:$0xff]   ;;  %v11471_v8 = vld [vmem:[%s12862_s17 + $0x900] ss:$16 sps:$4 sm:$0xff]  }
 0x121   :  { %5179 = vmatpush1.bf16.msra.mxu0 %v11386_v10  ;;  %5712 = vmatpush1.bf16.msra.mxu1 %v11389_v11  ;;  %v11474_v10 = vld [vmem:[%s12862_s17 + $0x908] ss:$16 sps:$4 sm:$0xff]   ;;  %v11479_v11 = vld [vmem:[%s12862_s17 + $0x924] ss:$16 sps:$4 sm:$0xff]  }
 0x122   :  { %5180 = vmatprep.subr.bf16.mxu0 %v11394_v12  ;;  %5713 = vmatprep.subr.bf16.mxu1 %v11397_v13  ;;  %v11482_v12 = vld [vmem:[%s12862_s17 + $0x92c] ss:$16 sps:$4 sm:$0xff]   ;;  %v11477_v13 = vld [vmem:[%s12862_s17 + $0x920] ss:$16 sps:$4 sm:$0xff]  }
 0x125   :  { %5181 = vmatpush1.bf16.msra.mxu0 %v11392_v14  ;;  %5714 = vmatpush1.bf16.msra.mxu1 %v11395_v15  ;;  %v11480_v14 = vld [vmem:[%s12862_s17 + $0x928] ss:$16 sps:$4 sm:$0xff]   ;;  %v11485_v15 = vld [vmem:[%s12862_s17 + $0x944] ss:$16 sps:$4 sm:$0xff]  }
 0x126   :  { %5182 = vmatprep.subr.bf16.mxu0 %v11400_v16  ;;  %5715 = vmatprep.subr.bf16.mxu1 %v11403_v17  ;;  %v11488_v16 = vld [vmem:[%s12862_s17 + $0x94c] ss:$16 sps:$4 sm:$0xff]   ;;  %v11483_v17 = vld [vmem:[%s12862_s17 + $0x940] ss:$16 sps:$4 sm:$0xff]  }
 0x129   :  { %5183 = vmatpush1.bf16.msra.mxu0 %v11398_v18  ;;  %5716 = vmatpush1.bf16.msra.mxu1 %v11401_v19  ;;  %v11486_v18 = vld [vmem:[%s12862_s17 + $0x948] ss:$16 sps:$4 sm:$0xff]   ;;  %v11491_v19 = vld [vmem:[%s12862_s17 + $0x964] ss:$16 sps:$4 sm:$0xff]  }
 0x12a   :  { %5184 = vmatprep.subr.bf16.mxu0 %v11406_v20  ;;  %5717 = vmatprep.subr.bf16.mxu1 %v11409_v21  ;;  %v11494_v20 = vld [vmem:[%s12862_s17 + $0x96c] ss:$16 sps:$4 sm:$0xff]   ;;  %v11489_v21 = vld [vmem:[%s12862_s17 + $0x960] ss:$16 sps:$4 sm:$0xff]  }
 0x12d   :  { %5185 = vmatpush1.bf16.msra.mxu0 %v11404_v22  ;;  %5718 = vmatpush1.bf16.msra.mxu1 %v11407_v24  ;;  %v11492_v22 = vld [vmem:[%s12862_s17 + $0x968] ss:$16 sps:$4 sm:$0xff]   ;;  %v11497_v24 = vld [vmem:[%s12862_s17 + $0x984] ss:$16 sps:$4 sm:$0xff]  }
 0x12e   :  { %5186 = vmatprep.subr.bf16.mxu0 %v11412_v23  ;;  %5719 = vmatprep.subr.bf16.mxu1 %v11415_v9  ;;  %v11500_v23 = vld [vmem:[%s12862_s17 + $0x98c] ss:$16 sps:$4 sm:$0xff]   ;;  %v11495_v9 = vld [vmem:[%s12862_s17 + $0x980] ss:$16 sps:$4 sm:$0xff]  }
 0x131   :  { %5187 = vmatpush1.bf16.msra.mxu0 %v11410_v27  ;;  %5720 = vmatpush1.bf16.msra.mxu1 %v11413_v29  ;;  %v11498_v27 = vld [vmem:[%s12862_s17 + $0x988] ss:$16 sps:$4 sm:$0xff]   ;;  %v11503_v29 = vld [vmem:[%s12862_s17 + $0x9a4] ss:$16 sps:$4 sm:$0xff]  }
 0x132   :  { %5188 = vmatprep.subr.bf16.mxu0 %v11418_v30  ;;  %5721 = vmatprep.subr.bf16.mxu1 %v11421_v31  ;;  %v11506_v30 = vld [vmem:[%s12862_s17 + $0x9ac] ss:$16 sps:$4 sm:$0xff]   ;;  %v11501_v31 = vld [vmem:[%s12862_s17 + $0x9a0] ss:$16 sps:$4 sm:$0xff]  }
 0x135   :  { %5189 = vmatpush1.bf16.msra.mxu0 %v11416_v33  ;;  %5722 = vmatpush1.bf16.msra.mxu1 %v11419_v34  ;;  %v11504_v33 = vld [vmem:[%s12862_s17 + $0x9a8] ss:$16 sps:$4 sm:$0xff]   ;;  %v11509_v34 = vld [vmem:[%s12862_s17 + $0x9c4] ss:$16 sps:$4 sm:$0xff]  }
 0x136   :  { %5199 = vmatprep.subr.bf16.mxu0 %v11425_v35  ;;  %5732 = vmatprep.subr.bf16.mxu1 %v11428_v26  ;;  %v11512_v35 = vld [vmem:[%s12862_s17 + $0x9cc] ss:$16 sps:$4 sm:$0xff]   ;;  %v180_v26 = vcombine.high %v13288_v28, %v13288_v28  ;;  %v11513_v28 = vld [vmem:[%s12862_s17 + $0x9e0] ss:$16 sps:$4 sm:$0xff]  }
 0x138   :  { %5191 = vmatmul.mubr.bf16.vlgmr.msra.gmra.mrb[0].mxu0 %v286_v38  ;;  %5724 = vmatmul.mubr.bf16.vlgmr.msra.gmra.mrb[0].mxu1 %v286_v38  ;;  %v11515_v38 = vld [vmem:[%s12862_s17 + $0x9e4] ss:$16 sps:$4 sm:$0xff]  }
 0x139   :  { %5200 = vmatpush1.bf16.msra.mxu0 %v11423_v37  ;;  %5733 = vmatpush1.bf16.msra.mxu1 %v11426_v39  ;;  %v11510_v37 = vld [vmem:[%s12862_s17 + $0x9c8] ss:$16 sps:$4 sm:$0xff]   ;;  %v11518_v39 = vld [vmem:[%s12862_s17 + $0x9ec] ss:$16 sps:$4 sm:$0xff]  }
 0x13a   :  { %5201 = vmatprep.subr.bf16.mxu0 %v11431_v40  ;;  %5734 = vmatprep.subr.bf16.mxu1 %v11434_v41  ;;  %v13368_v40 = vrot.slane %v180_v26, %v13051_v49  ;;  %v11516_v41 = vld [vmem:[%s12862_s17 + $0x9e8] ss:$16 sps:$4 sm:$0xff]  }
 0x13b   :  { %5231 = vmatprep.mubr.bf16.mxu0 %v289_v42  ;;  %5764 = vmatprep.mubr.bf16.mxu1 %v289_v42  ;;  %v11521_v42 = vld [vmem:[%s12862_s17 + $0xa04] ss:$16 sps:$4 sm:$0xff]   ;;  %v11594_v26 = vld [vmem:[%s12862_s17 + $0xb88] ss:$16 sps:$4 sm:$0xff]  }
 0x13d   :  { %5202 = vmatpush1.bf16.msra.mxu0 %v11429_v44  ;;  %5735 = vmatpush1.bf16.msra.mxu1 %v11432_v45  ;;  %v11524_v44 = vld [vmem:[%s12862_s17 + $0xa0c] ss:$16 sps:$4 sm:$0xff]   ;;  %v196_v45 = vcombine.high %v13368_v40, %v13368_v40 }
 0x13e   :  { %5203 = vmatprep.subr.bf16.mxu0 %v11437_v25  ;;  %5736 = vmatprep.subr.bf16.mxu1 %v11440_v46  ;;  %v288_v25 = vpack.c.bf16 %v13295_v32, %v13295_v32  ;;  %v11519_v46 = vld [vmem:[%s12862_s17 + $0xa00] ss:$16 sps:$4 sm:$0xff]  }
 0x13f   :  { %v11525_v32 = vld [vmem:[%s12862_s17 + $0xa20] ss:$16 sps:$4 sm:$0xff]  }
 0x141   :  { %5204 = vmatpush1.bf16.msra.mxu0 %v11435_v47  ;;  %5737 = vmatpush1.bf16.msra.mxu1 %v11438_v48  ;;  %v11522_v47 = vld [vmem:[%s12862_s17 + $0xa08] ss:$16 sps:$4 sm:$0xff]   ;;  %v11527_v48 = vld [vmem:[%s12862_s17 + $0xa24] ss:$16 sps:$4 sm:$0xff]  }
 0x142   :  { %5205 = vmatprep.subr.bf16.mxu0 %v11443_v50  ;;  %5738 = vmatprep.subr.bf16.mxu1 %v11446_v51  ;;  %v11530_v50 = vld [vmem:[%s12862_s17 + $0xa2c] ss:$16 sps:$4 sm:$0xff]   ;;  %v291_v51 = vpack.c.bf16 %v196_v45, %v196_v45  ;;  %v11606_v45 = vld [vmem:[%s12862_s17 + $0xbc8] ss:$16 sps:$4 sm:$0xff]  }
 0x145   :  { %5206 = vmatpush1.bf16.msra.mxu0 %v11441_v52  ;;  %5739 = vmatpush1.bf16.msra.mxu1 %v11444_v53  ;;  %v11528_v52 = vld [vmem:[%s12862_s17 + $0xa28] ss:$16 sps:$4 sm:$0xff]   ;;  %v11533_v53 = vld [vmem:[%s12862_s17 + $0xa44] ss:$16 sps:$4 sm:$0xff]  }
 0x146   :  { %5207 = vmatprep.subr.bf16.mxu0 %v11449_v54  ;;  %5740 = vmatprep.subr.bf16.mxu1 %v11452_v55  ;;  %v11536_v54 = vld [vmem:[%s12862_s17 + $0xa4c] ss:$16 sps:$4 sm:$0xff]   ;;  %v11531_v55 = vld [vmem:[%s12862_s17 + $0xa40] ss:$16 sps:$4 sm:$0xff]  }
 0x149   :  { %5208 = vmatpush1.bf16.msra.mxu0 %v11447_v56  ;;  %5741 = vmatpush1.bf16.msra.mxu1 %v11450_v57  ;;  %v11534_v56 = vld [vmem:[%s12862_s17 + $0xa48] ss:$16 sps:$4 sm:$0xff]   ;;  %v11539_v57 = vld [vmem:[%s12862_s17 + $0xa64] ss:$16 sps:$4 sm:$0xff]  }
 0x14a   :  { %5209 = vmatprep.subr.bf16.mxu0 %v11455_v58  ;;  %5742 = vmatprep.subr.bf16.mxu1 %v11458_v59  ;;  %v11542_v58 = vld [vmem:[%s12862_s17 + $0xa6c] ss:$16 sps:$4 sm:$0xff]   ;;  %v11537_v59 = vld [vmem:[%s12862_s17 + $0xa60] ss:$16 sps:$4 sm:$0xff]  }
 0x14d   :  { %5210 = vmatpush1.bf16.msra.mxu0 %v11453_v60  ;;  %5743 = vmatpush1.bf16.msra.mxu1 %v11456_v61  ;;  %v11540_v60 = vld [vmem:[%s12862_s17 + $0xa68] ss:$16 sps:$4 sm:$0xff]   ;;  %v11545_v61 = vld [vmem:[%s12862_s17 + $0xa84] ss:$16 sps:$4 sm:$0xff]  }
 0x14e   :  { %5211 = vmatprep.subr.bf16.mxu0 %v11461_v62  ;;  %5744 = vmatprep.subr.bf16.mxu1 %v11464_v63  ;;  %v11548_v62 = vld [vmem:[%s12862_s17 + $0xa8c] ss:$16 sps:$4 sm:$0xff]   ;;  %v11543_v63 = vld [vmem:[%s12862_s17 + $0xa80] ss:$16 sps:$4 sm:$0xff]  }
 0x151   :  { %5212 = vmatpush1.bf16.msra.mxu0 %v11459_v0  ;;  %5745 = vmatpush1.bf16.msra.mxu1 %v11462_v1  ;;  %v11546_v0 = vld [vmem:[%s12862_s17 + $0xa88] ss:$16 sps:$4 sm:$0xff]   ;;  %v11551_v1 = vld [vmem:[%s12862_s17 + $0xaa4] ss:$16 sps:$4 sm:$0xff]  }
 0x152   :  { %5213 = vmatprep.subr.bf16.mxu0 %v11467_v2  ;;  %5746 = vmatprep.subr.bf16.mxu1 %v11470_v3  ;;  %v11554_v2 = vld [vmem:[%s12862_s17 + $0xaac] ss:$16 sps:$4 sm:$0xff]   ;;  %v11549_v3 = vld [vmem:[%s12862_s17 + $0xaa0] ss:$16 sps:$4 sm:$0xff]  }
 0x155   :  { %5214 = vmatpush1.bf16.msra.mxu0 %v11465_v4  ;;  %5747 = vmatpush1.bf16.msra.mxu1 %v11468_v5  ;;  %v11552_v4 = vld [vmem:[%s12862_s17 + $0xaa8] ss:$16 sps:$4 sm:$0xff]   ;;  %v11557_v5 = vld [vmem:[%s12862_s17 + $0xac4] ss:$16 sps:$4 sm:$0xff]  }
 0x156   :  { %5215 = vmatprep.subr.bf16.mxu0 %v11473_v6  ;;  %5748 = vmatprep.subr.bf16.mxu1 %v11476_v7  ;;  %v11560_v6 = vld [vmem:[%s12862_s17 + $0xacc] ss:$16 sps:$4 sm:$0xff]   ;;  %v11555_v7 = vld [vmem:[%s12862_s17 + $0xac0] ss:$16 sps:$4 sm:$0xff]  }
 0x159   :  { %5216 = vmatpush1.bf16.msra.mxu0 %v11471_v8  ;;  %5749 = vmatpush1.bf16.msra.mxu1 %v11474_v10  ;;  %v11558_v8 = vld [vmem:[%s12862_s17 + $0xac8] ss:$16 sps:$4 sm:$0xff]   ;;  %v11563_v10 = vld [vmem:[%s12862_s17 + $0xae4] ss:$16 sps:$4 sm:$0xff]  }
 0x15a   :  { %5217 = vmatprep.subr.bf16.mxu0 %v11479_v11  ;;  %5750 = vmatprep.subr.bf16.mxu1 %v11482_v12  ;;  %v11566_v11 = vld [vmem:[%s12862_s17 + $0xaec] ss:$16 sps:$4 sm:$0xff]   ;;  %v11561_v12 = vld [vmem:[%s12862_s17 + $0xae0] ss:$16 sps:$4 sm:$0xff]  }
 0x15d   :  { %5218 = vmatpush1.bf16.msra.mxu0 %v11477_v13  ;;  %5751 = vmatpush1.bf16.msra.mxu1 %v11480_v14  ;;  %v11564_v13 = vld [vmem:[%s12862_s17 + $0xae8] ss:$16 sps:$4 sm:$0xff]   ;;  %v11569_v14 = vld [vmem:[%s12862_s17 + $0xb04] ss:$16 sps:$4 sm:$0xff]  }
 0x15e   :  { %5219 = vmatprep.subr.bf16.mxu0 %v11485_v15  ;;  %5752 = vmatprep.subr.bf16.mxu1 %v11488_v16  ;;  %v11572_v15 = vld [vmem:[%s12862_s17 + $0xb0c] ss:$16 sps:$4 sm:$0xff]   ;;  %v11567_v16 = vld [vmem:[%s12862_s17 + $0xb00] ss:$16 sps:$4 sm:$0xff]  }
 0x161   :  { %5220 = vmatpush1.bf16.msra.mxu0 %v11483_v17  ;;  %5753 = vmatpush1.bf16.msra.mxu1 %v11486_v18  ;;  %v11570_v17 = vld [vmem:[%s12862_s17 + $0xb08] ss:$16 sps:$4 sm:$0xff]   ;;  %v11575_v18 = vld [vmem:[%s12862_s17 + $0xb24] ss:$16 sps:$4 sm:$0xff]  }
 0x162   :  { %5221 = vmatprep.subr.bf16.mxu0 %v11491_v19  ;;  %5754 = vmatprep.subr.bf16.mxu1 %v11494_v20  ;;  %v11578_v19 = vld [vmem:[%s12862_s17 + $0xb2c] ss:$16 sps:$4 sm:$0xff]   ;;  %v11573_v20 = vld [vmem:[%s12862_s17 + $0xb20] ss:$16 sps:$4 sm:$0xff]  }
 0x165   :  { %5222 = vmatpush1.bf16.msra.mxu0 %v11489_v21  ;;  %5755 = vmatpush1.bf16.msra.mxu1 %v11492_v22  ;;  %v11576_v21 = vld [vmem:[%s12862_s17 + $0xb28] ss:$16 sps:$4 sm:$0xff]   ;;  %v11581_v22 = vld [vmem:[%s12862_s17 + $0xb44] ss:$16 sps:$4 sm:$0xff]  }
 0x166   :  { %5223 = vmatprep.subr.bf16.mxu0 %v11497_v24  ;;  %5756 = vmatprep.subr.bf16.mxu1 %v11500_v23  ;;  %v11584_v24 = vld [vmem:[%s12862_s17 + $0xb4c] ss:$16 sps:$4 sm:$0xff]   ;;  %v11579_v23 = vld [vmem:[%s12862_s17 + $0xb40] ss:$16 sps:$4 sm:$0xff]  }
 0x169   :  { %5224 = vmatpush1.bf16.msra.mxu0 %v11495_v9  ;;  %5757 = vmatpush1.bf16.msra.mxu1 %v11498_v27  ;;  %v11582_v9 = vld [vmem:[%s12862_s17 + $0xb48] ss:$16 sps:$4 sm:$0xff]   ;;  %v11587_v27 = vld [vmem:[%s12862_s17 + $0xb64] ss:$16 sps:$4 sm:$0xff]  }
 0x16a   :  { %5225 = vmatprep.subr.bf16.mxu0 %v11503_v29  ;;  %5758 = vmatprep.subr.bf16.mxu1 %v11506_v30  ;;  %v11590_v29 = vld [vmem:[%s12862_s17 + $0xb6c] ss:$16 sps:$4 sm:$0xff]   ;;  %v11585_v30 = vld [vmem:[%s12862_s17 + $0xb60] ss:$16 sps:$4 sm:$0xff]  }
 0x16d   :  { %5226 = vmatpush1.bf16.msra.mxu0 %v11501_v31  ;;  %5759 = vmatpush1.bf16.msra.mxu1 %v11504_v33  ;;  %v11588_v31 = vld [vmem:[%s12862_s17 + $0xb68] ss:$16 sps:$4 sm:$0xff]   ;;  %v11593_v33 = vld [vmem:[%s12862_s17 + $0xb84] ss:$16 sps:$4 sm:$0xff]  }
 0x16e   :  { %5227 = vmatprep.subr.bf16.mxu0 %v11509_v34  ;;  %5760 = vmatprep.subr.bf16.mxu1 %v11512_v35  ;;  %v11596_v34 = vld [vmem:[%s12862_s17 + $0xb8c] ss:$16 sps:$4 sm:$0xff]   ;;  %v11591_v35 = vld [vmem:[%s12862_s17 + $0xb80] ss:$16 sps:$4 sm:$0xff]  }
 0x171   :  { %5228 = vmatpush1.bf16.msra.mxu0 %v11507_v36  ;;  %5761 = vmatpush1.bf16.msra.mxu1 %v11510_v37  ;;  %v11599_v36 = vld [vmem:[%s12862_s17 + $0xba4] ss:$16 sps:$4 sm:$0xff]   ;;  %v11602_v37 = vld [vmem:[%s12862_s17 + $0xbac] ss:$16 sps:$4 sm:$0xff]  }
 0x172   :  { %5229 = vmatprep.subr.bf16.mxu0 %v11515_v38  ;;  %5762 = vmatprep.subr.bf16.mxu1 %v11518_v39  ;;  %v11597_v38 = vld [vmem:[%s12862_s17 + $0xba0] ss:$16 sps:$4 sm:$0xff]   ;;  %v11600_v39 = vld [vmem:[%s12862_s17 + $0xba8] ss:$16 sps:$4 sm:$0xff]  }
 0x175   :  { %5230 = vmatpush1.bf16.msra.mxu0 %v11513_v28  ;;  %5763 = vmatpush1.bf16.msra.mxu1 %v11516_v41  ;;  %v11605_v28 = vld [vmem:[%s12862_s17 + $0xbc4] ss:$16 sps:$4 sm:$0xff]   ;;  %v11608_v41 = vld [vmem:[%s12862_s17 + $0xbcc] ss:$16 sps:$4 sm:$0xff]  }
 0x176   :  { %5240 = vmatprep.subr.bf16.mxu0 %v11521_v42  ;;  %5773 = vmatprep.subr.bf16.mxu1 %v11524_v44  ;;  %v13435_v42 = vld [vmem:[%s12847_s5 + $0x18] sm:$0xff]  ;;  %v11603_v44 = vld [vmem:[%s12862_s17 + $0xbc0] ss:$16 sps:$4 sm:$0xff]  }
 0x178   :  { %5232 = vmatmul.mubr.bf16.vlgmr.msra.gmra.mrb[0].mxu0 %v288_v25  ;;  %5765 = vmatmul.mubr.bf16.vlgmr.msra.gmra.mrb[0].mxu1 %v288_v25  ;;  %v11611_v25 = vld [vmem:[%s12862_s17 + $0xbe4] ss:$16 sps:$4 sm:$0xff]  }
 0x179   :  { %5241 = vmatpush1.bf16.msra.mxu0 %v11519_v46  ;;  %5774 = vmatpush1.bf16.msra.mxu1 %v11522_v47  ;;  %v11614_v46 = vld [vmem:[%s12862_s17 + $0xbec] ss:$16 sps:$4 sm:$0xff]   ;;  %v13443_v47 = vrot.slane %v13435_v42, %v13051_v49 }
 0x17a   :  { %5242 = vmatprep.subr.bf16.mxu0 %v11527_v48  ;;  %5775 = vmatprep.subr.bf16.mxu1 %v11530_v50  ;;  %v11609_v48 = vld [vmem:[%s12862_s17 + $0xbe0] ss:$16 sps:$4 sm:$0xff]   ;;  %v11612_v50 = vld [vmem:[%s12862_s17 + $0xbe8] ss:$16 sps:$4 sm:$0xff]  }
 0x17b   :  { %5272 = vmatprep.mubr.bf16.mxu0 %v291_v51  ;;  %5805 = vmatprep.mubr.bf16.mxu1 %v291_v51  ;;  %v11618_v51 = vld [vmem:[%s12862_s17 + $0xc04] ss:$16 sps:$4 sm:$0xff]  }
 0x17d   :  { %5243 = vmatpush1.bf16.msra.mxu0 %v11525_v32  ;;  %5776 = vmatpush1.bf16.msra.mxu1 %v11528_v52  ;;  %v11621_v32 = vld [vmem:[%s12862_s17 + $0xc0c] ss:$16 sps:$4 sm:$0xff]   ;;  %v212_v52 = vcombine.high %v13443_v47, %v13443_v47 }
 0x17e   :  { %5244 = vmatprep.subr.bf16.mxu0 %v11533_v53  ;;  %5777 = vmatprep.subr.bf16.mxu1 %v11536_v54  ;;  %v290_v53 = vpack.c.bf16 %v13368_v40, %v13368_v40  ;;  %v11616_v54 = vld [vmem:[%s12862_s17 + $0xc00] ss:$16 sps:$4 sm:$0xff]  }
 0x17f   :  { %v11622_v40 = vld [vmem:[%s12862_s17 + $0xc20] ss:$16 sps:$4 sm:$0xff]  }
 0x181   :  { %5245 = vmatpush1.bf16.msra.mxu0 %v11531_v55  ;;  %5778 = vmatpush1.bf16.msra.mxu1 %v11534_v56  ;;  %v11619_v55 = vld [vmem:[%s12862_s17 + $0xc08] ss:$16 sps:$4 sm:$0xff]   ;;  %v11624_v56 = vld [vmem:[%s12862_s17 + $0xc24] ss:$16 sps:$4 sm:$0xff]  }
 0x182   :  { %5246 = vmatprep.subr.bf16.mxu0 %v11539_v57  ;;  %5779 = vmatprep.subr.bf16.mxu1 %v11542_v58  ;;  %v11627_v57 = vld [vmem:[%s12862_s17 + $0xc2c] ss:$16 sps:$4 sm:$0xff]   ;;  %v293_v58 = vpack.c.bf16 %v212_v52, %v212_v52  ;;  %v11700_v52 = vld [vmem:[%s12862_s17 + $0xdc0] ss:$16 sps:$4 sm:$0xff]  }
 0x185   :  { %5247 = vmatpush1.bf16.msra.mxu0 %v11537_v59  ;;  %5780 = vmatpush1.bf16.msra.mxu1 %v11540_v60  ;;  %v11625_v59 = vld [vmem:[%s12862_s17 + $0xc28] ss:$16 sps:$4 sm:$0xff]   ;;  %v11630_v60 = vld [vmem:[%s12862_s17 + $0xc44] ss:$16 sps:$4 sm:$0xff]  }
 0x186   :  { %5248 = vmatprep.subr.bf16.mxu0 %v11545_v61  ;;  %5781 = vmatprep.subr.bf16.mxu1 %v11548_v62  ;;  %v11633_v61 = vld [vmem:[%s12862_s17 + $0xc4c] ss:$16 sps:$4 sm:$0xff]   ;;  %v11628_v62 = vld [vmem:[%s12862_s17 + $0xc40] ss:$16 sps:$4 sm:$0xff]  }
 0x189   :  { %5249 = vmatpush1.bf16.msra.mxu0 %v11543_v63  ;;  %5782 = vmatpush1.bf16.msra.mxu1 %v11546_v0  ;;  %v11631_v63 = vld [vmem:[%s12862_s17 + $0xc48] ss:$16 sps:$4 sm:$0xff]   ;;  %v11636_v0 = vld [vmem:[%s12862_s17 + $0xc64] ss:$16 sps:$4 sm:$0xff]  }
 0x18a   :  { %5250 = vmatprep.subr.bf16.mxu0 %v11551_v1  ;;  %5783 = vmatprep.subr.bf16.mxu1 %v11554_v2  ;;  %v11639_v1 = vld [vmem:[%s12862_s17 + $0xc6c] ss:$16 sps:$4 sm:$0xff]   ;;  %v11634_v2 = vld [vmem:[%s12862_s17 + $0xc60] ss:$16 sps:$4 sm:$0xff]  }
 0x18d   :  { %5251 = vmatpush1.bf16.msra.mxu0 %v11549_v3  ;;  %5784 = vmatpush1.bf16.msra.mxu1 %v11552_v4  ;;  %v11637_v3 = vld [vmem:[%s12862_s17 + $0xc68] ss:$16 sps:$4 sm:$0xff]   ;;  %v11642_v4 = vld [vmem:[%s12862_s17 + $0xc84] ss:$16 sps:$4 sm:$0xff]  }
 0x18e   :  { %5252 = vmatprep.subr.bf16.mxu0 %v11557_v5  ;;  %5785 = vmatprep.subr.bf16.mxu1 %v11560_v6  ;;  %v11645_v5 = vld [vmem:[%s12862_s17 + $0xc8c] ss:$16 sps:$4 sm:$0xff]   ;;  %v11640_v6 = vld [vmem:[%s12862_s17 + $0xc80] ss:$16 sps:$4 sm:$0xff]  }
 0x191   :  { %5253 = vmatpush1.bf16.msra.mxu0 %v11555_v7  ;;  %5786 = vmatpush1.bf16.msra.mxu1 %v11558_v8  ;;  %v11643_v7 = vld [vmem:[%s12862_s17 + $0xc88] ss:$16 sps:$4 sm:$0xff]   ;;  %v11648_v8 = vld [vmem:[%s12862_s17 + $0xca4] ss:$16 sps:$4 sm:$0xff]  }
 0x192   :  { %5254 = vmatprep.subr.bf16.mxu0 %v11563_v10  ;;  %5787 = vmatprep.subr.bf16.mxu1 %v11566_v11  ;;  %v11651_v10 = vld [vmem:[%s12862_s17 + $0xcac] ss:$16 sps:$4 sm:$0xff]   ;;  %v11646_v11 = vld [vmem:[%s12862_s17 + $0xca0] ss:$16 sps:$4 sm:$0xff]  }
 0x195   :  { %5255 = vmatpush1.bf16.msra.mxu0 %v11561_v12  ;;  %5788 = vmatpush1.bf16.msra.mxu1 %v11564_v13  ;;  %v11649_v12 = vld [vmem:[%s12862_s17 + $0xca8] ss:$16 sps:$4 sm:$0xff]   ;;  %v11654_v13 = vld [vmem:[%s12862_s17 + $0xcc4] ss:$16 sps:$4 sm:$0xff]  }
 0x196   :  { %5256 = vmatprep.subr.bf16.mxu0 %v11569_v14  ;;  %5789 = vmatprep.subr.bf16.mxu1 %v11572_v15  ;;  %v11657_v14 = vld [vmem:[%s12862_s17 + $0xccc] ss:$16 sps:$4 sm:$0xff]   ;;  %v11652_v15 = vld [vmem:[%s12862_s17 + $0xcc0] ss:$16 sps:$4 sm:$0xff]  }
 0x199   :  { %5257 = vmatpush1.bf16.msra.mxu0 %v11567_v16  ;;  %5790 = vmatpush1.bf16.msra.mxu1 %v11570_v17  ;;  %v11655_v16 = vld [vmem:[%s12862_s17 + $0xcc8] ss:$16 sps:$4 sm:$0xff]   ;;  %v11660_v17 = vld [vmem:[%s12862_s17 + $0xce4] ss:$16 sps:$4 sm:$0xff]  }
 0x19a   :  { %5258 = vmatprep.subr.bf16.mxu0 %v11575_v18  ;;  %5791 = vmatprep.subr.bf16.mxu1 %v11578_v19  ;;  %v11663_v18 = vld [vmem:[%s12862_s17 + $0xcec] ss:$16 sps:$4 sm:$0xff]   ;;  %v11658_v19 = vld [vmem:[%s12862_s17 + $0xce0] ss:$16 sps:$4 sm:$0xff]  }
 0x19d   :  { %5259 = vmatpush1.bf16.msra.mxu0 %v11573_v20  ;;  %5792 = vmatpush1.bf16.msra.mxu1 %v11576_v21  ;;  %v11661_v20 = vld [vmem:[%s12862_s17 + $0xce8] ss:$16 sps:$4 sm:$0xff]   ;;  %v11666_v21 = vld [vmem:[%s12862_s17 + $0xd04] ss:$16 sps:$4 sm:$0xff]  }
 0x19e   :  { %5260 = vmatprep.subr.bf16.mxu0 %v11581_v22  ;;  %5793 = vmatprep.subr.bf16.mxu1 %v11584_v24  ;;  %v11669_v22 = vld [vmem:[%s12862_s17 + $0xd0c] ss:$16 sps:$4 sm:$0xff]   ;;  %v11664_v24 = vld [vmem:[%s12862_s17 + $0xd00] ss:$16 sps:$4 sm:$0xff]  }
 0x1a1   :  { %5261 = vmatpush1.bf16.msra.mxu0 %v11579_v23  ;;  %5794 = vmatpush1.bf16.msra.mxu1 %v11582_v9  ;;  %v11667_v23 = vld [vmem:[%s12862_s17 + $0xd08] ss:$16 sps:$4 sm:$0xff]   ;;  %v11672_v9 = vld [vmem:[%s12862_s17 + $0xd24] ss:$16 sps:$4 sm:$0xff]  }
 0x1a2   :  { %5262 = vmatprep.subr.bf16.mxu0 %v11587_v27  ;;  %5795 = vmatprep.subr.bf16.mxu1 %v11590_v29  ;;  %v11675_v27 = vld [vmem:[%s12862_s17 + $0xd2c] ss:$16 sps:$4 sm:$0xff]   ;;  %v11670_v29 = vld [vmem:[%s12862_s17 + $0xd20] ss:$16 sps:$4 sm:$0xff]  }
 0x1a5   :  { %5263 = vmatpush1.bf16.msra.mxu0 %v11585_v30  ;;  %5796 = vmatpush1.bf16.msra.mxu1 %v11588_v31  ;;  %v11673_v30 = vld [vmem:[%s12862_s17 + $0xd28] ss:$16 sps:$4 sm:$0xff]   ;;  %v11678_v31 = vld [vmem:[%s12862_s17 + $0xd44] ss:$16 sps:$4 sm:$0xff]  }
 0x1a6   :  { %5264 = vmatprep.subr.bf16.mxu0 %v11593_v33  ;;  %5797 = vmatprep.subr.bf16.mxu1 %v11596_v34  ;;  %v11681_v33 = vld [vmem:[%s12862_s17 + $0xd4c] ss:$16 sps:$4 sm:$0xff]   ;;  %v11676_v34 = vld [vmem:[%s12862_s17 + $0xd40] ss:$16 sps:$4 sm:$0xff]  }
 0x1a9   :  { %5265 = vmatpush1.bf16.msra.mxu0 %v11591_v35  ;;  %5798 = vmatpush1.bf16.msra.mxu1 %v11594_v26  ;;  %v11679_v35 = vld [vmem:[%s12862_s17 + $0xd48] ss:$16 sps:$4 sm:$0xff]   ;;  %v11684_v26 = vld [vmem:[%s12862_s17 + $0xd64] ss:$16 sps:$4 sm:$0xff]  }
 0x1aa   :  { %5266 = vmatprep.subr.bf16.mxu0 %v11599_v36  ;;  %5799 = vmatprep.subr.bf16.mxu1 %v11602_v37  ;;  %v11687_v36 = vld [vmem:[%s12862_s17 + $0xd6c] ss:$16 sps:$4 sm:$0xff]   ;;  %v11682_v37 = vld [vmem:[%s12862_s17 + $0xd60] ss:$16 sps:$4 sm:$0xff]  }
 0x1ad   :  { %5267 = vmatpush1.bf16.msra.mxu0 %v11597_v38  ;;  %5800 = vmatpush1.bf16.msra.mxu1 %v11600_v39  ;;  %v11685_v38 = vld [vmem:[%s12862_s17 + $0xd68] ss:$16 sps:$4 sm:$0xff]   ;;  %v11690_v39 = vld [vmem:[%s12862_s17 + $0xd84] ss:$16 sps:$4 sm:$0xff]  }
 0x1ae   :  { %5268 = vmatprep.subr.bf16.mxu0 %v11605_v28  ;;  %5801 = vmatprep.subr.bf16.mxu1 %v11608_v41  ;;  %v11693_v28 = vld [vmem:[%s12862_s17 + $0xd8c] ss:$16 sps:$4 sm:$0xff]   ;;  %v11688_v41 = vld [vmem:[%s12862_s17 + $0xd80] ss:$16 sps:$4 sm:$0xff]  }
 0x1b1   :  { %5269 = vmatpush1.bf16.msra.mxu0 %v11603_v44  ;;  %5802 = vmatpush1.bf16.msra.mxu1 %v11606_v45  ;;  %v11691_v44 = vld [vmem:[%s12862_s17 + $0xd88] ss:$16 sps:$4 sm:$0xff]   ;;  %v11696_v45 = vld [vmem:[%s12862_s17 + $0xda4] ss:$16 sps:$4 sm:$0xff]  }
 0x1b2   :  { %5270 = vmatprep.subr.bf16.mxu0 %v11611_v25  ;;  %5803 = vmatprep.subr.bf16.mxu1 %v11614_v46  ;;  %v11699_v25 = vld [vmem:[%s12862_s17 + $0xdac] ss:$16 sps:$4 sm:$0xff]   ;;  %v11694_v46 = vld [vmem:[%s12862_s17 + $0xda0] ss:$16 sps:$4 sm:$0xff]  }
 0x1b5   :  { %5271 = vmatpush1.bf16.msra.mxu0 %v11609_v48  ;;  %5804 = vmatpush1.bf16.msra.mxu1 %v11612_v50  ;;  %v11697_v48 = vld [vmem:[%s12862_s17 + $0xda8] ss:$16 sps:$4 sm:$0xff]   ;;  %v11702_v50 = vld [vmem:[%s12862_s17 + $0xdc4] ss:$16 sps:$4 sm:$0xff]  }
 0x1b6   :  { %5281 = vmatprep.subr.bf16.mxu0 %v11618_v51  ;;  %5814 = vmatprep.subr.bf16.mxu1 %v11621_v32  ;;  %v11705_v51 = vld [vmem:[%s12862_s17 + $0xdcc] ss:$16 sps:$4 sm:$0xff]   ;;  %v197_v32 = vcombine.high %v13435_v42, %v13435_v42  ;;  %v11706_v42 = vld [vmem:[%s12862_s17 + $0xde0] ss:$16 sps:$4 sm:$0xff]  }
 0x1b8   :  { %5273 = vmatmul.mubr.bf16.vlgmr.msra.gmra.mrb[0].mxu0 %v290_v53  ;;  %5806 = vmatmul.mubr.bf16.vlgmr.msra.gmra.mrb[0].mxu1 %v290_v53  ;;  %v11703_v53 = vld [vmem:[%s12862_s17 + $0xdc8] ss:$16 sps:$4 sm:$0xff]  }
 0x1b9   :  { %5282 = vmatpush1.bf16.msra.mxu0 %v11616_v54  ;;  %5815 = vmatpush1.bf16.msra.mxu1 %v11619_v55  ;;  %v11708_v54 = vld [vmem:[%s12862_s17 + $0xde4] ss:$16 sps:$4 sm:$0xff]   ;;  %v11711_v55 = vld [vmem:[%s12862_s17 + $0xdec] ss:$16 sps:$4 sm:$0xff]  }
 0x1ba   :  { %5283 = vmatprep.subr.bf16.mxu0 %v11624_v56  ;;  %5816 = vmatprep.subr.bf16.mxu1 %v11627_v57  ;;  %v13516_v56 = vrot.slane %v197_v32, %v13051_v49  ;;  %v11709_v57 = vld [vmem:[%s12862_s17 + $0xde8] ss:$16 sps:$4 sm:$0xff]  }
 0x1bb   :  { %5313 = vmatprep.mubr.bf16.mxu0 %v293_v58  ;;  %5846 = vmatprep.mubr.bf16.mxu1 %v293_v58  ;;  %v11714_v58 = vld [vmem:[%s12862_s17 + $0xe04] ss:$16 sps:$4 sm:$0xff]   ;;  %v11787_v32 = vld [vmem:[%s12862_s17 + $0xf88] ss:$16 sps:$4 sm:$0xff]  }
 0x1bd   :  { %5284 = vmatpush1.bf16.msra.mxu0 %v11622_v40  ;;  %5817 = vmatpush1.bf16.msra.mxu1 %v11625_v59  ;;  %v11717_v40 = vld [vmem:[%s12862_s17 + $0xe0c] ss:$16 sps:$4 sm:$0xff]   ;;  %v213_v59 = vcombine.high %v13516_v56, %v13516_v56 }
 0x1be   :  { %5285 = vmatprep.subr.bf16.mxu0 %v11630_v60  ;;  %5818 = vmatprep.subr.bf16.mxu1 %v11633_v61  ;;  %v292_v60 = vpack.c.bf16 %v13443_v47, %v13443_v47  ;;  %v11712_v61 = vld [vmem:[%s12862_s17 + $0xe00] ss:$16 sps:$4 sm:$0xff]  }
 0x1bf   :  { %v11718_v47 = vld [vmem:[%s12862_s17 + $0xe20] ss:$16 sps:$4 sm:$0xff]  }
 0x1c1   :  { %5286 = vmatpush1.bf16.msra.mxu0 %v11628_v62  ;;  %5819 = vmatpush1.bf16.msra.mxu1 %v11631_v63  ;;  %v11715_v62 = vld [vmem:[%s12862_s17 + $0xe08] ss:$16 sps:$4 sm:$0xff]   ;;  %v11720_v63 = vld [vmem:[%s12862_s17 + $0xe24] ss:$16 sps:$4 sm:$0xff]  }
 0x1c2   :  { %5287 = vmatprep.subr.bf16.mxu0 %v11636_v0  ;;  %5820 = vmatprep.subr.bf16.mxu1 %v11639_v1  ;;  %v11723_v0 = vld [vmem:[%s12862_s17 + $0xe2c] ss:$16 sps:$4 sm:$0xff]   ;;  %v295_v1 = vpack.c.bf16 %v213_v59, %v213_v59  ;;  %v11799_v59 = vld [vmem:[%s12862_s17 + $0xfc8] ss:$16 sps:$4 sm:$0xff]  }
 0x1c5   :  { %5288 = vmatpush1.bf16.msra.mxu0 %v11634_v2  ;;  %5821 = vmatpush1.bf16.msra.mxu1 %v11637_v3  ;;  %v11721_v2 = vld [vmem:[%s12862_s17 + $0xe28] ss:$16 sps:$4 sm:$0xff]   ;;  %v11726_v3 = vld [vmem:[%s12862_s17 + $0xe44] ss:$16 sps:$4 sm:$0xff]  }
 0x1c6   :  { %5289 = vmatprep.subr.bf16.mxu0 %v11642_v4  ;;  %5822 = vmatprep.subr.bf16.mxu1 %v11645_v5  ;;  %v11729_v4 = vld [vmem:[%s12862_s17 + $0xe4c] ss:$16 sps:$4 sm:$0xff]   ;;  %v11724_v5 = vld [vmem:[%s12862_s17 + $0xe40] ss:$16 sps:$4 sm:$0xff]  }
 0x1c9   :  { %5290 = vmatpush1.bf16.msra.mxu0 %v11640_v6  ;;  %5823 = vmatpush1.bf16.msra.mxu1 %v11643_v7  ;;  %v11727_v6 = vld [vmem:[%s12862_s17 + $0xe48] ss:$16 sps:$4 sm:$0xff]   ;;  %v11732_v7 = vld [vmem:[%s12862_s17 + $0xe64] ss:$16 sps:$4 sm:$0xff]  }
 0x1ca   :  { %5291 = vmatprep.subr.bf16.mxu0 %v11648_v8  ;;  %5824 = vmatprep.subr.bf16.mxu1 %v11651_v10  ;;  %v11735_v8 = vld [vmem:[%s12862_s17 + $0xe6c] ss:$16 sps:$4 sm:$0xff]   ;;  %v11730_v10 = vld [vmem:[%s12862_s17 + $0xe60] ss:$16 sps:$4 sm:$0xff]  }
 0x1cd   :  { %5292 = vmatpush1.bf16.msra.mxu0 %v11646_v11  ;;  %5825 = vmatpush1.bf16.msra.mxu1 %v11649_v12  ;;  %v11733_v11 = vld [vmem:[%s12862_s17 + $0xe68] ss:$16 sps:$4 sm:$0xff]   ;;  %v11738_v12 = vld [vmem:[%s12862_s17 + $0xe84] ss:$16 sps:$4 sm:$0xff]  }
 0x1ce   :  { %5293 = vmatprep.subr.bf16.mxu0 %v11654_v13  ;;  %5826 = vmatprep.subr.bf16.mxu1 %v11657_v14  ;;  %v11741_v13 = vld [vmem:[%s12862_s17 + $0xe8c] ss:$16 sps:$4 sm:$0xff]   ;;  %v11736_v14 = vld [vmem:[%s12862_s17 + $0xe80] ss:$16 sps:$4 sm:$0xff]  }
 0x1d1   :  { %5294 = vmatpush1.bf16.msra.mxu0 %v11652_v15  ;;  %5827 = vmatpush1.bf16.msra.mxu1 %v11655_v16  ;;  %v11739_v15 = vld [vmem:[%s12862_s17 + $0xe88] ss:$16 sps:$4 sm:$0xff]   ;;  %v11744_v16 = vld [vmem:[%s12862_s17 + $0xea4] ss:$16 sps:$4 sm:$0xff]  }
 0x1d2   :  { %5295 = vmatprep.subr.bf16.mxu0 %v11660_v17  ;;  %5828 = vmatprep.subr.bf16.mxu1 %v11663_v18  ;;  %v11747_v17 = vld [vmem:[%s12862_s17 + $0xeac] ss:$16 sps:$4 sm:$0xff]   ;;  %v11742_v18 = vld [vmem:[%s12862_s17 + $0xea0] ss:$16 sps:$4 sm:$0xff]  }
 0x1d5   :  { %5296 = vmatpush1.bf16.msra.mxu0 %v11658_v19  ;;  %5829 = vmatpush1.bf16.msra.mxu1 %v11661_v20  ;;  %v11745_v19 = vld [vmem:[%s12862_s17 + $0xea8] ss:$16 sps:$4 sm:$0xff]   ;;  %v11750_v20 = vld [vmem:[%s12862_s17 + $0xec4] ss:$16 sps:$4 sm:$0xff]  }
 0x1d6   :  { %5297 = vmatprep.subr.bf16.mxu0 %v11666_v21  ;;  %5830 = vmatprep.subr.bf16.mxu1 %v11669_v22  ;;  %v11753_v21 = vld [vmem:[%s12862_s17 + $0xecc] ss:$16 sps:$4 sm:$0xff]   ;;  %v11748_v22 = vld [vmem:[%s12862_s17 + $0xec0] ss:$16 sps:$4 sm:$0xff]  }
 0x1d9   :  { %5298 = vmatpush1.bf16.msra.mxu0 %v11664_v24  ;;  %5831 = vmatpush1.bf16.msra.mxu1 %v11667_v23  ;;  %v11751_v24 = vld [vmem:[%s12862_s17 + $0xec8] ss:$16 sps:$4 sm:$0xff]   ;;  %v11756_v23 = vld [vmem:[%s12862_s17 + $0xee4] ss:$16 sps:$4 sm:$0xff]  }
 0x1da   :  { %5299 = vmatprep.subr.bf16.mxu0 %v11672_v9  ;;  %5832 = vmatprep.subr.bf16.mxu1 %v11675_v27  ;;  %v11759_v9 = vld [vmem:[%s12862_s17 + $0xeec] ss:$16 sps:$4 sm:$0xff]   ;;  %v11754_v27 = vld [vmem:[%s12862_s17 + $0xee0] ss:$16 sps:$4 sm:$0xff]  }
 0x1dd   :  { %5300 = vmatpush1.bf16.msra.mxu0 %v11670_v29  ;;  %5833 = vmatpush1.bf16.msra.mxu1 %v11673_v30  ;;  %v11757_v29 = vld [vmem:[%s12862_s17 + $0xee8] ss:$16 sps:$4 sm:$0xff]   ;;  %v11762_v30 = vld [vmem:[%s12862_s17 + $0xf04] ss:$16 sps:$4 sm:$0xff]  }
 0x1de   :  { %5301 = vmatprep.subr.bf16.mxu0 %v11678_v31  ;;  %5834 = vmatprep.subr.bf16.mxu1 %v11681_v33  ;;  %v11765_v31 = vld [vmem:[%s12862_s17 + $0xf0c] ss:$16 sps:$4 sm:$0xff]   ;;  %v11760_v33 = vld [vmem:[%s12862_s17 + $0xf00] ss:$16 sps:$4 sm:$0xff]  }
 0x1e1   :  { %5302 = vmatpush1.bf16.msra.mxu0 %v11676_v34  ;;  %5835 = vmatpush1.bf16.msra.mxu1 %v11679_v35  ;;  %v11763_v34 = vld [vmem:[%s12862_s17 + $0xf08] ss:$16 sps:$4 sm:$0xff]   ;;  %v11768_v35 = vld [vmem:[%s12862_s17 + $0xf24] ss:$16 sps:$4 sm:$0xff]  }
 0x1e2   :  { %5303 = vmatprep.subr.bf16.mxu0 %v11684_v26  ;;  %5836 = vmatprep.subr.bf16.mxu1 %v11687_v36  ;;  %v11771_v26 = vld [vmem:[%s12862_s17 + $0xf2c] ss:$16 sps:$4 sm:$0xff]   ;;  %v11766_v36 = vld [vmem:[%s12862_s17 + $0xf20] ss:$16 sps:$4 sm:$0xff]  }
 0x1e5   :  { %5304 = vmatpush1.bf16.msra.mxu0 %v11682_v37  ;;  %5837 = vmatpush1.bf16.msra.mxu1 %v11685_v38  ;;  %v11769_v37 = vld [vmem:[%s12862_s17 + $0xf28] ss:$16 sps:$4 sm:$0xff]   ;;  %v11774_v38 = vld [vmem:[%s12862_s17 + $0xf44] ss:$16 sps:$4 sm:$0xff]  }
 0x1e6   :  { %5305 = vmatprep.subr.bf16.mxu0 %v11690_v39  ;;  %5838 = vmatprep.subr.bf16.mxu1 %v11693_v28  ;;  %v11777_v39 = vld [vmem:[%s12862_s17 + $0xf4c] ss:$16 sps:$4 sm:$0xff]   ;;  %v11772_v28 = vld [vmem:[%s12862_s17 + $0xf40] ss:$16 sps:$4 sm:$0xff]  }
 0x1e9   :  { %5306 = vmatpush1.bf16.msra.mxu0 %v11688_v41  ;;  %5839 = vmatpush1.bf16.msra.mxu1 %v11691_v44  ;;  %v11775_v41 = vld [vmem:[%s12862_s17 + $0xf48] ss:$16 sps:$4 sm:$0xff]   ;;  %v11780_v44 = vld [vmem:[%s12862_s17 + $0xf64] ss:$16 sps:$4 sm:$0xff]  }
 0x1ea   :  { %5307 = vmatprep.subr.bf16.mxu0 %v11696_v45  ;;  %5840 = vmatprep.subr.bf16.mxu1 %v11699_v25  ;;  %v11783_v45 = vld [vmem:[%s12862_s17 + $0xf6c] ss:$16 sps:$4 sm:$0xff]   ;;  %v11778_v25 = vld [vmem:[%s12862_s17 + $0xf60] ss:$16 sps:$4 sm:$0xff]  }
 0x1ed   :  { %5308 = vmatpush1.bf16.msra.mxu0 %v11694_v46  ;;  %5841 = vmatpush1.bf16.msra.mxu1 %v11697_v48  ;;  %v11781_v46 = vld [vmem:[%s12862_s17 + $0xf68] ss:$16 sps:$4 sm:$0xff]   ;;  %v11786_v48 = vld [vmem:[%s12862_s17 + $0xf84] ss:$16 sps:$4 sm:$0xff]  }
 0x1ee   :  { %5309 = vmatprep.subr.bf16.mxu0 %v11702_v50  ;;  %5842 = vmatprep.subr.bf16.mxu1 %v11705_v51  ;;  %v11789_v50 = vld [vmem:[%s12862_s17 + $0xf8c] ss:$16 sps:$4 sm:$0xff]   ;;  %v11784_v51 = vld [vmem:[%s12862_s17 + $0xf80] ss:$16 sps:$4 sm:$0xff]  }
 0x1f1   :  { %5310 = vmatpush1.bf16.msra.mxu0 %v11700_v52  ;;  %5843 = vmatpush1.bf16.msra.mxu1 %v11703_v53  ;;  %v11792_v52 = vld [vmem:[%s12862_s17 + $0xfa4] ss:$16 sps:$4 sm:$0xff]   ;;  %v11795_v53 = vld [vmem:[%s12862_s17 + $0xfac] ss:$16 sps:$4 sm:$0xff]  }
 0x1f2   :  { %5311 = vmatprep.subr.bf16.mxu0 %v11708_v54  ;;  %5844 = vmatprep.subr.bf16.mxu1 %v11711_v55  ;;  %v11790_v54 = vld [vmem:[%s12862_s17 + $0xfa0] ss:$16 sps:$4 sm:$0xff]   ;;  %v11793_v55 = vld [vmem:[%s12862_s17 + $0xfa8] ss:$16 sps:$4 sm:$0xff]  }
 0x1f5   :  { %5312 = vmatpush1.bf16.msra.mxu0 %v11706_v42  ;;  %5845 = vmatpush1.bf16.msra.mxu1 %v11709_v57  ;;  %v11798_v42 = vld [vmem:[%s12862_s17 + $0xfc4] ss:$16 sps:$4 sm:$0xff]   ;;  %v11801_v57 = vld [vmem:[%s12862_s17 + $0xfcc] ss:$16 sps:$4 sm:$0xff]  }
 0x1f6   :  { %5322 = vmatprep.subr.bf16.mxu0 %v11714_v58  ;;  %5855 = vmatprep.subr.bf16.mxu1 %v11717_v40  ;;  %v13583_v58 = vld [vmem:[%s12847_s5 + $0x20] sm:$0xff] }
 0x1f7   :  { %v11796_v40 = vld [vmem:[%s12862_s17 + $0xfc0] ss:$16 sps:$4 sm:$0xff]  }
 0x1f8   :  { %5314 = vmatmul.mubr.bf16.vlgmr.msra.gmra.mrb[0].mxu0 %v292_v60  ;;  %5847 = vmatmul.mubr.bf16.vlgmr.msra.gmra.mrb[0].mxu1 %v292_v60  ;;  %v11804_v60 = vld [vmem:[%s12862_s17 + $0xfe4] ss:$16 sps:$4 sm:$0xff]  }
 0x1f9   :  { %5323 = vmatpush1.bf16.msra.mxu0 %v11712_v61  ;;  %5856 = vmatpush1.bf16.msra.mxu1 %v11715_v62  ;;  %v11807_v61 = vld [vmem:[%s12862_s17 + $0xfec] ss:$16 sps:$4 sm:$0xff]   ;;  %v13591_v62 = vrot.slane %v13583_v58, %v13051_v49 }
 0x1fa   :  { %5324 = vmatprep.subr.bf16.mxu0 %v11720_v63  ;;  %5857 = vmatprep.subr.bf16.mxu1 %v11723_v0  ;;  %v11802_v63 = vld [vmem:[%s12862_s17 + $0xfe0] ss:$16 sps:$4 sm:$0xff]   ;;  %v11805_v0 = vld [vmem:[%s12862_s17 + $0xfe8] ss:$16 sps:$4 sm:$0xff]  }
 0x1fb   :  { %5354 = vmatprep.mubr.bf16.mxu0 %v295_v1  ;;  %5887 = vmatprep.mubr.bf16.mxu1 %v295_v1  ;;  %v11811_v1 = vld [vmem:[%s12862_s17 + $0x1004] ss:$16 sps:$4 sm:$0xff]  }
 0x1fd   :  { %5325 = vmatpush1.bf16.msra.mxu0 %v11718_v47  ;;  %5858 = vmatpush1.bf16.msra.mxu1 %v11721_v2  ;;  %v11814_v47 = vld [vmem:[%s12862_s17 + $0x100c] ss:$16 sps:$4 sm:$0xff]   ;;  %v229_v2 = vcombine.high %v13591_v62, %v13591_v62 }
 0x1fe   :  { %5326 = vmatprep.subr.bf16.mxu0 %v11726_v3  ;;  %5859 = vmatprep.subr.bf16.mxu1 %v11729_v4  ;;  %v294_v3 = vpack.c.bf16 %v13516_v56, %v13516_v56  ;;  %v11809_v4 = vld [vmem:[%s12862_s17 + $0x1000] ss:$16 sps:$4 sm:$0xff]  }
 0x1ff   :  { %v11815_v56 = vld [vmem:[%s12862_s17 + $0x1020] ss:$16 sps:$4 sm:$0xff]  }
 0x201   :  { %5327 = vmatpush1.bf16.msra.mxu0 %v11724_v5  ;;  %5860 = vmatpush1.bf16.msra.mxu1 %v11727_v6  ;;  %v11812_v5 = vld [vmem:[%s12862_s17 + $0x1008] ss:$16 sps:$4 sm:$0xff]   ;;  %v11817_v6 = vld [vmem:[%s12862_s17 + $0x1024] ss:$16 sps:$4 sm:$0xff]  }
 0x202   :  { %5328 = vmatprep.subr.bf16.mxu0 %v11732_v7  ;;  %5861 = vmatprep.subr.bf16.mxu1 %v11735_v8  ;;  %v11820_v7 = vld [vmem:[%s12862_s17 + $0x102c] ss:$16 sps:$4 sm:$0xff]   ;;  %v297_v8 = vpack.c.bf16 %v229_v2, %v229_v2  ;;  %v11893_v2 = vld [vmem:[%s12862_s17 + $0x11c0] ss:$16 sps:$4 sm:$0xff]  }
 0x205   :  { %5329 = vmatpush1.bf16.msra.mxu0 %v11730_v10  ;;  %5862 = vmatpush1.bf16.msra.mxu1 %v11733_v11  ;;  %v11818_v10 = vld [vmem:[%s12862_s17 + $0x1028] ss:$16 sps:$4 sm:$0xff]   ;;  %v11823_v11 = vld [vmem:[%s12862_s17 + $0x1044] ss:$16 sps:$4 sm:$0xff]  }
 0x206   :  { %5330 = vmatprep.subr.bf16.mxu0 %v11738_v12  ;;  %5863 = vmatprep.subr.bf16.mxu1 %v11741_v13  ;;  %v11826_v12 = vld [vmem:[%s12862_s17 + $0x104c] ss:$16 sps:$4 sm:$0xff]   ;;  %v11821_v13 = vld [vmem:[%s12862_s17 + $0x1040] ss:$16 sps:$4 sm:$0xff]  }
 0x209   :  { %5331 = vmatpush1.bf16.msra.mxu0 %v11736_v14  ;;  %5864 = vmatpush1.bf16.msra.mxu1 %v11739_v15  ;;  %v11824_v14 = vld [vmem:[%s12862_s17 + $0x1048] ss:$16 sps:$4 sm:$0xff]   ;;  %v11829_v15 = vld [vmem:[%s12862_s17 + $0x1064] ss:$16 sps:$4 sm:$0xff]  }
 0x20a   :  { %5332 = vmatprep.subr.bf16.mxu0 %v11744_v16  ;;  %5865 = vmatprep.subr.bf16.mxu1 %v11747_v17  ;;  %v11832_v16 = vld [vmem:[%s12862_s17 + $0x106c] ss:$16 sps:$4 sm:$0xff]   ;;  %v11827_v17 = vld [vmem:[%s12862_s17 + $0x1060] ss:$16 sps:$4 sm:$0xff]  }
 0x20d   :  { %5333 = vmatpush1.bf16.msra.mxu0 %v11742_v18  ;;  %5866 = vmatpush1.bf16.msra.mxu1 %v11745_v19  ;;  %v11830_v18 = vld [vmem:[%s12862_s17 + $0x1068] ss:$16 sps:$4 sm:$0xff]   ;;  %v11835_v19 = vld [vmem:[%s12862_s17 + $0x1084] ss:$16 sps:$4 sm:$0xff]  }
 0x20e   :  { %5334 = vmatprep.subr.bf16.mxu0 %v11750_v20  ;;  %5867 = vmatprep.subr.bf16.mxu1 %v11753_v21  ;;  %v11838_v20 = vld [vmem:[%s12862_s17 + $0x108c] ss:$16 sps:$4 sm:$0xff]   ;;  %v11833_v21 = vld [vmem:[%s12862_s17 + $0x1080] ss:$16 sps:$4 sm:$0xff]  }
 0x211   :  { %5335 = vmatpush1.bf16.msra.mxu0 %v11748_v22  ;;  %5868 = vmatpush1.bf16.msra.mxu1 %v11751_v24  ;;  %v11836_v22 = vld [vmem:[%s12862_s17 + $0x1088] ss:$16 sps:$4 sm:$0xff]   ;;  %v11841_v24 = vld [vmem:[%s12862_s17 + $0x10a4] ss:$16 sps:$4 sm:$0xff]  }
 0x212   :  { %5336 = vmatprep.subr.bf16.mxu0 %v11756_v23  ;;  %5869 = vmatprep.subr.bf16.mxu1 %v11759_v9  ;;  %v11844_v23 = vld [vmem:[%s12862_s17 + $0x10ac] ss:$16 sps:$4 sm:$0xff]   ;;  %v11839_v9 = vld [vmem:[%s12862_s17 + $0x10a0] ss:$16 sps:$4 sm:$0xff]  }
 0x215   :  { %5337 = vmatpush1.bf16.msra.mxu0 %v11754_v27  ;;  %5870 = vmatpush1.bf16.msra.mxu1 %v11757_v29  ;;  %v11842_v27 = vld [vmem:[%s12862_s17 + $0x10a8] ss:$16 sps:$4 sm:$0xff]   ;;  %v11847_v29 = vld [vmem:[%s12862_s17 + $0x10c4] ss:$16 sps:$4 sm:$0xff]  }
 0x216   :  { %5338 = vmatprep.subr.bf16.mxu0 %v11762_v30  ;;  %5871 = vmatprep.subr.bf16.mxu1 %v11765_v31  ;;  %v11850_v30 = vld [vmem:[%s12862_s17 + $0x10cc] ss:$16 sps:$4 sm:$0xff]   ;;  %v11845_v31 = vld [vmem:[%s12862_s17 + $0x10c0] ss:$16 sps:$4 sm:$0xff]  }
 0x219   :  { %5339 = vmatpush1.bf16.msra.mxu0 %v11760_v33  ;;  %5872 = vmatpush1.bf16.msra.mxu1 %v11763_v34  ;;  %v11848_v33 = vld [vmem:[%s12862_s17 + $0x10c8] ss:$16 sps:$4 sm:$0xff]   ;;  %v11853_v34 = vld [vmem:[%s12862_s17 + $0x10e4] ss:$16 sps:$4 sm:$0xff]  }
 0x21a   :  { %5340 = vmatprep.subr.bf16.mxu0 %v11768_v35  ;;  %5873 = vmatprep.subr.bf16.mxu1 %v11771_v26  ;;  %v11856_v35 = vld [vmem:[%s12862_s17 + $0x10ec] ss:$16 sps:$4 sm:$0xff]   ;;  %v11851_v26 = vld [vmem:[%s12862_s17 + $0x10e0] ss:$16 sps:$4 sm:$0xff]  }
 0x21d   :  { %5341 = vmatpush1.bf16.msra.mxu0 %v11766_v36  ;;  %5874 = vmatpush1.bf16.msra.mxu1 %v11769_v37  ;;  %v11854_v36 = vld [vmem:[%s12862_s17 + $0x10e8] ss:$16 sps:$4 sm:$0xff]   ;;  %v11859_v37 = vld [vmem:[%s12862_s17 + $0x1104] ss:$16 sps:$4 sm:$0xff]  }
 0x21e   :  { %5342 = vmatprep.subr.bf16.mxu0 %v11774_v38  ;;  %5875 = vmatprep.subr.bf16.mxu1 %v11777_v39  ;;  %v11862_v38 = vld [vmem:[%s12862_s17 + $0x110c] ss:$16 sps:$4 sm:$0xff]   ;;  %v11857_v39 = vld [vmem:[%s12862_s17 + $0x1100] ss:$16 sps:$4 sm:$0xff]  }
 0x221   :  { %5343 = vmatpush1.bf16.msra.mxu0 %v11772_v28  ;;  %5876 = vmatpush1.bf16.msra.mxu1 %v11775_v41  ;;  %v11860_v28 = vld [vmem:[%s12862_s17 + $0x1108] ss:$16 sps:$4 sm:$0xff]   ;;  %v11865_v41 = vld [vmem:[%s12862_s17 + $0x1124] ss:$16 sps:$4 sm:$0xff]  }
 0x222   :  { %5344 = vmatprep.subr.bf16.mxu0 %v11780_v44  ;;  %5877 = vmatprep.subr.bf16.mxu1 %v11783_v45  ;;  %v11868_v44 = vld [vmem:[%s12862_s17 + $0x112c] ss:$16 sps:$4 sm:$0xff]   ;;  %v11863_v45 = vld [vmem:[%s12862_s17 + $0x1120] ss:$16 sps:$4 sm:$0xff]  }
 0x225   :  { %5345 = vmatpush1.bf16.msra.mxu0 %v11778_v25  ;;  %5878 = vmatpush1.bf16.msra.mxu1 %v11781_v46  ;;  %v11866_v25 = vld [vmem:[%s12862_s17 + $0x1128] ss:$16 sps:$4 sm:$0xff]   ;;  %v11871_v46 = vld [vmem:[%s12862_s17 + $0x1144] ss:$16 sps:$4 sm:$0xff]  }
 0x226   :  { %5346 = vmatprep.subr.bf16.mxu0 %v11786_v48  ;;  %5879 = vmatprep.subr.bf16.mxu1 %v11789_v50  ;;  %v11874_v48 = vld [vmem:[%s12862_s17 + $0x114c] ss:$16 sps:$4 sm:$0xff]   ;;  %v11869_v50 = vld [vmem:[%s12862_s17 + $0x1140] ss:$16 sps:$4 sm:$0xff]  }
 0x229   :  { %5347 = vmatpush1.bf16.msra.mxu0 %v11784_v51  ;;  %5880 = vmatpush1.bf16.msra.mxu1 %v11787_v32  ;;  %v11872_v51 = vld [vmem:[%s12862_s17 + $0x1148] ss:$16 sps:$4 sm:$0xff]   ;;  %v11877_v32 = vld [vmem:[%s12862_s17 + $0x1164] ss:$16 sps:$4 sm:$0xff]  }
 0x22a   :  { %5348 = vmatprep.subr.bf16.mxu0 %v11792_v52  ;;  %5881 = vmatprep.subr.bf16.mxu1 %v11795_v53  ;;  %v11880_v52 = vld [vmem:[%s12862_s17 + $0x116c] ss:$16 sps:$4 sm:$0xff]   ;;  %v11875_v53 = vld [vmem:[%s12862_s17 + $0x1160] ss:$16 sps:$4 sm:$0xff]  }
 0x22d   :  { %5349 = vmatpush1.bf16.msra.mxu0 %v11790_v54  ;;  %5882 = vmatpush1.bf16.msra.mxu1 %v11793_v55  ;;  %v11878_v54 = vld [vmem:[%s12862_s17 + $0x1168] ss:$16 sps:$4 sm:$0xff]   ;;  %v11883_v55 = vld [vmem:[%s12862_s17 + $0x1184] ss:$16 sps:$4 sm:$0xff]  }
 0x22e   :  { %5350 = vmatprep.subr.bf16.mxu0 %v11798_v42  ;;  %5883 = vmatprep.subr.bf16.mxu1 %v11801_v57  ;;  %v11886_v42 = vld [vmem:[%s12862_s17 + $0x118c] ss:$16 sps:$4 sm:$0xff]   ;;  %v11881_v57 = vld [vmem:[%s12862_s17 + $0x1180] ss:$16 sps:$4 sm:$0xff]  }
 0x231   :  { %5351 = vmatpush1.bf16.msra.mxu0 %v11796_v40  ;;  %5884 = vmatpush1.bf16.msra.mxu1 %v11799_v59  ;;  %v11884_v40 = vld [vmem:[%s12862_s17 + $0x1188] ss:$16 sps:$4 sm:$0xff]   ;;  %v11889_v59 = vld [vmem:[%s12862_s17 + $0x11a4] ss:$16 sps:$4 sm:$0xff]  }
 0x232   :  { %5352 = vmatprep.subr.bf16.mxu0 %v11804_v60  ;;  %5885 = vmatprep.subr.bf16.mxu1 %v11807_v61  ;;  %v11892_v60 = vld [vmem:[%s12862_s17 + $0x11ac] ss:$16 sps:$4 sm:$0xff]   ;;  %v11887_v61 = vld [vmem:[%s12862_s17 + $0x11a0] ss:$16 sps:$4 sm:$0xff]  }
 0x235   :  { %5353 = vmatpush1.bf16.msra.mxu0 %v11802_v63  ;;  %5886 = vmatpush1.bf16.msra.mxu1 %v11805_v0  ;;  %v11890_v63 = vld [vmem:[%s12862_s17 + $0x11a8] ss:$16 sps:$4 sm:$0xff]   ;;  %v11895_v0 = vld [vmem:[%s12862_s17 + $0x11c4] ss:$16 sps:$4 sm:$0xff]  }
 0x236   :  { %5363 = vmatprep.subr.bf16.mxu0 %v11811_v1  ;;  %5896 = vmatprep.subr.bf16.mxu1 %v11814_v47  ;;  %v11898_v1 = vld [vmem:[%s12862_s17 + $0x11cc] ss:$16 sps:$4 sm:$0xff]   ;;  %v214_v47 = vcombine.high %v13583_v58, %v13583_v58  ;;  %v11899_v58 = vld [vmem:[%s12862_s17 + $0x11e0] ss:$16 sps:$4 sm:$0xff]  }
 0x238   :  { %5355 = vmatmul.mubr.bf16.vlgmr.msra.gmra.mrb[0].mxu0 %v294_v3  ;;  %5888 = vmatmul.mubr.bf16.vlgmr.msra.gmra.mrb[0].mxu1 %v294_v3  ;;  %v11896_v3 = vld [vmem:[%s12862_s17 + $0x11c8] ss:$16 sps:$4 sm:$0xff]  }
 0x239   :  { %5364 = vmatpush1.bf16.msra.mxu0 %v11809_v4  ;;  %5897 = vmatpush1.bf16.msra.mxu1 %v11812_v5  ;;  %v11901_v4 = vld [vmem:[%s12862_s17 + $0x11e4] ss:$16 sps:$4 sm:$0xff]   ;;  %v11904_v5 = vld [vmem:[%s12862_s17 + $0x11ec] ss:$16 sps:$4 sm:$0xff]  }
 0x23a   :  { %5365 = vmatprep.subr.bf16.mxu0 %v11817_v6  ;;  %5898 = vmatprep.subr.bf16.mxu1 %v11820_v7  ;;  %v13664_v6 = vrot.slane %v214_v47, %v13051_v49  ;;  %v11902_v7 = vld [vmem:[%s12862_s17 + $0x11e8] ss:$16 sps:$4 sm:$0xff]  }
 0x23b   :  { %5395 = vmatprep.mubr.bf16.mxu0 %v297_v8  ;;  %5928 = vmatprep.mubr.bf16.mxu1 %v297_v8  ;;  %v11907_v8 = vld [vmem:[%s12862_s17 + $0x1204] ss:$16 sps:$4 sm:$0xff]   ;;  %v11980_v47 = vld [vmem:[%s12862_s17 + $0x1388] ss:$16 sps:$4 sm:$0xff]  }
 0x23d   :  { %5366 = vmatpush1.bf16.msra.mxu0 %v11815_v56  ;;  %5899 = vmatpush1.bf16.msra.mxu1 %v11818_v10  ;;  %v11910_v56 = vld [vmem:[%s12862_s17 + $0x120c] ss:$16 sps:$4 sm:$0xff]   ;;  %v230_v10 = vcombine.high %v13664_v6, %v13664_v6 }
 0x23e   :  { %5367 = vmatprep.subr.bf16.mxu0 %v11823_v11  ;;  %5900 = vmatprep.subr.bf16.mxu1 %v11826_v12  ;;  %v296_v11 = vpack.c.bf16 %v13591_v62, %v13591_v62  ;;  %v11905_v12 = vld [vmem:[%s12862_s17 + $0x1200] ss:$16 sps:$4 sm:$0xff]  }
 0x23f   :  { %v11911_v62 = vld [vmem:[%s12862_s17 + $0x1220] ss:$16 sps:$4 sm:$0xff]  }
 0x241   :  { %5368 = vmatpush1.bf16.msra.mxu0 %v11821_v13  ;;  %5901 = vmatpush1.bf16.msra.mxu1 %v11824_v14  ;;  %v11908_v13 = vld [vmem:[%s12862_s17 + $0x1208] ss:$16 sps:$4 sm:$0xff]   ;;  %v11913_v14 = vld [vmem:[%s12862_s17 + $0x1224] ss:$16 sps:$4 sm:$0xff]  }
 0x242   :  { %5369 = vmatprep.subr.bf16.mxu0 %v11829_v15  ;;  %5902 = vmatprep.subr.bf16.mxu1 %v11832_v16  ;;  %v11916_v15 = vld [vmem:[%s12862_s17 + $0x122c] ss:$16 sps:$4 sm:$0xff]   ;;  %v299_v16 = vpack.c.bf16 %v230_v10, %v230_v10  ;;  %v11992_v10 = vld [vmem:[%s12862_s17 + $0x13c8] ss:$16 sps:$4 sm:$0xff]  }
 0x245   :  { %5370 = vmatpush1.bf16.msra.mxu0 %v11827_v17  ;;  %5903 = vmatpush1.bf16.msra.mxu1 %v11830_v18  ;;  %v11914_v17 = vld [vmem:[%s12862_s17 + $0x1228] ss:$16 sps:$4 sm:$0xff]   ;;  %v11919_v18 = vld [vmem:[%s12862_s17 + $0x1244] ss:$16 sps:$4 sm:$0xff]  }
 0x246   :  { %5371 = vmatprep.subr.bf16.mxu0 %v11835_v19  ;;  %5904 = vmatprep.subr.bf16.mxu1 %v11838_v20  ;;  %v11922_v19 = vld [vmem:[%s12862_s17 + $0x124c] ss:$16 sps:$4 sm:$0xff]   ;;  %v11917_v20 = vld [vmem:[%s12862_s17 + $0x1240] ss:$16 sps:$4 sm:$0xff]  }
 0x249   :  { %5372 = vmatpush1.bf16.msra.mxu0 %v11833_v21  ;;  %5905 = vmatpush1.bf16.msra.mxu1 %v11836_v22  ;;  %v11920_v21 = vld [vmem:[%s12862_s17 + $0x1248] ss:$16 sps:$4 sm:$0xff]   ;;  %v11925_v22 = vld [vmem:[%s12862_s17 + $0x1264] ss:$16 sps:$4 sm:$0xff]  }
 0x24a   :  { %5373 = vmatprep.subr.bf16.mxu0 %v11841_v24  ;;  %5906 = vmatprep.subr.bf16.mxu1 %v11844_v23  ;;  %v11928_v24 = vld [vmem:[%s12862_s17 + $0x126c] ss:$16 sps:$4 sm:$0xff]   ;;  %v11923_v23 = vld [vmem:[%s12862_s17 + $0x1260] ss:$16 sps:$4 sm:$0xff]  }
 0x24d   :  { %5374 = vmatpush1.bf16.msra.mxu0 %v11839_v9  ;;  %5907 = vmatpush1.bf16.msra.mxu1 %v11842_v27  ;;  %v11926_v9 = vld [vmem:[%s12862_s17 + $0x1268] ss:$16 sps:$4 sm:$0xff]   ;;  %v11931_v27 = vld [vmem:[%s12862_s17 + $0x1284] ss:$16 sps:$4 sm:$0xff]  }
 0x24e   :  { %5375 = vmatprep.subr.bf16.mxu0 %v11847_v29  ;;  %5908 = vmatprep.subr.bf16.mxu1 %v11850_v30  ;;  %v11934_v29 = vld [vmem:[%s12862_s17 + $0x128c] ss:$16 sps:$4 sm:$0xff]   ;;  %v11929_v30 = vld [vmem:[%s12862_s17 + $0x1280] ss:$16 sps:$4 sm:$0xff]  }
 0x251   :  { %5376 = vmatpush1.bf16.msra.mxu0 %v11845_v31  ;;  %5909 = vmatpush1.bf16.msra.mxu1 %v11848_v33  ;;  %v11932_v31 = vld [vmem:[%s12862_s17 + $0x1288] ss:$16 sps:$4 sm:$0xff]   ;;  %v11937_v33 = vld [vmem:[%s12862_s17 + $0x12a4] ss:$16 sps:$4 sm:$0xff]  }
 0x252   :  { %5377 = vmatprep.subr.bf16.mxu0 %v11853_v34  ;;  %5910 = vmatprep.subr.bf16.mxu1 %v11856_v35  ;;  %v11940_v34 = vld [vmem:[%s12862_s17 + $0x12ac] ss:$16 sps:$4 sm:$0xff]   ;;  %v11935_v35 = vld [vmem:[%s12862_s17 + $0x12a0] ss:$16 sps:$4 sm:$0xff]  }
 0x255   :  { %5378 = vmatpush1.bf16.msra.mxu0 %v11851_v26  ;;  %5911 = vmatpush1.bf16.msra.mxu1 %v11854_v36  ;;  %v11938_v26 = vld [vmem:[%s12862_s17 + $0x12a8] ss:$16 sps:$4 sm:$0xff]   ;;  %v11943_v36 = vld [vmem:[%s12862_s17 + $0x12c4] ss:$16 sps:$4 sm:$0xff]  }
 0x256   :  { %5379 = vmatprep.subr.bf16.mxu0 %v11859_v37  ;;  %5912 = vmatprep.subr.bf16.mxu1 %v11862_v38  ;;  %v11946_v37 = vld [vmem:[%s12862_s17 + $0x12cc] ss:$16 sps:$4 sm:$0xff]   ;;  %v11941_v38 = vld [vmem:[%s12862_s17 + $0x12c0] ss:$16 sps:$4 sm:$0xff]  }
 0x259   :  { %5380 = vmatpush1.bf16.msra.mxu0 %v11857_v39  ;;  %5913 = vmatpush1.bf16.msra.mxu1 %v11860_v28  ;;  %v11944_v39 = vld [vmem:[%s12862_s17 + $0x12c8] ss:$16 sps:$4 sm:$0xff]   ;;  %v11949_v28 = vld [vmem:[%s12862_s17 + $0x12e4] ss:$16 sps:$4 sm:$0xff]  }
 0x25a   :  { %5381 = vmatprep.subr.bf16.mxu0 %v11865_v41  ;;  %5914 = vmatprep.subr.bf16.mxu1 %v11868_v44  ;;  %v11952_v41 = vld [vmem:[%s12862_s17 + $0x12ec] ss:$16 sps:$4 sm:$0xff]   ;;  %v11947_v44 = vld [vmem:[%s12862_s17 + $0x12e0] ss:$16 sps:$4 sm:$0xff]  }
 0x25d   :  { %5382 = vmatpush1.bf16.msra.mxu0 %v11863_v45  ;;  %5915 = vmatpush1.bf16.msra.mxu1 %v11866_v25  ;;  %v11950_v45 = vld [vmem:[%s12862_s17 + $0x12e8] ss:$16 sps:$4 sm:$0xff]   ;;  %v11955_v25 = vld [vmem:[%s12862_s17 + $0x1304] ss:$16 sps:$4 sm:$0xff]  }
 0x25e   :  { %5383 = vmatprep.subr.bf16.mxu0 %v11871_v46  ;;  %5916 = vmatprep.subr.bf16.mxu1 %v11874_v48  ;;  %v11958_v46 = vld [vmem:[%s12862_s17 + $0x130c] ss:$16 sps:$4 sm:$0xff]   ;;  %v11953_v48 = vld [vmem:[%s12862_s17 + $0x1300] ss:$16 sps:$4 sm:$0xff]  }
 0x261   :  { %5384 = vmatpush1.bf16.msra.mxu0 %v11869_v50  ;;  %5917 = vmatpush1.bf16.msra.mxu1 %v11872_v51  ;;  %v11956_v50 = vld [vmem:[%s12862_s17 + $0x1308] ss:$16 sps:$4 sm:$0xff]   ;;  %v11961_v51 = vld [vmem:[%s12862_s17 + $0x1324] ss:$16 sps:$4 sm:$0xff]  }
 0x262   :  { %5385 = vmatprep.subr.bf16.mxu0 %v11877_v32  ;;  %5918 = vmatprep.subr.bf16.mxu1 %v11880_v52  ;;  %v11964_v32 = vld [vmem:[%s12862_s17 + $0x132c] ss:$16 sps:$4 sm:$0xff]   ;;  %v11959_v52 = vld [vmem:[%s12862_s17 + $0x1320] ss:$16 sps:$4 sm:$0xff]  }
 0x265   :  { %5386 = vmatpush1.bf16.msra.mxu0 %v11875_v53  ;;  %5919 = vmatpush1.bf16.msra.mxu1 %v11878_v54  ;;  %v11962_v53 = vld [vmem:[%s12862_s17 + $0x1328] ss:$16 sps:$4 sm:$0xff]   ;;  %v11967_v54 = vld [vmem:[%s12862_s17 + $0x1344] ss:$16 sps:$4 sm:$0xff]  }
 0x266   :  { %5387 = vmatprep.subr.bf16.mxu0 %v11883_v55  ;;  %5920 = vmatprep.subr.bf16.mxu1 %v11886_v42  ;;  %v11970_v55 = vld [vmem:[%s12862_s17 + $0x134c] ss:$16 sps:$4 sm:$0xff]   ;;  %v11965_v42 = vld [vmem:[%s12862_s17 + $0x1340] ss:$16 sps:$4 sm:$0xff]  }
 0x269   :  { %5388 = vmatpush1.bf16.msra.mxu0 %v11881_v57  ;;  %5921 = vmatpush1.bf16.msra.mxu1 %v11884_v40  ;;  %v11968_v57 = vld [vmem:[%s12862_s17 + $0x1348] ss:$16 sps:$4 sm:$0xff]   ;;  %v11973_v40 = vld [vmem:[%s12862_s17 + $0x1364] ss:$16 sps:$4 sm:$0xff]  }
 0x26a   :  { %5389 = vmatprep.subr.bf16.mxu0 %v11889_v59  ;;  %5922 = vmatprep.subr.bf16.mxu1 %v11892_v60  ;;  %v11976_v59 = vld [vmem:[%s12862_s17 + $0x136c] ss:$16 sps:$4 sm:$0xff]   ;;  %v11971_v60 = vld [vmem:[%s12862_s17 + $0x1360] ss:$16 sps:$4 sm:$0xff]  }
 0x26d   :  { %5390 = vmatpush1.bf16.msra.mxu0 %v11887_v61  ;;  %5923 = vmatpush1.bf16.msra.mxu1 %v11890_v63  ;;  %v11974_v61 = vld [vmem:[%s12862_s17 + $0x1368] ss:$16 sps:$4 sm:$0xff]   ;;  %v11979_v63 = vld [vmem:[%s12862_s17 + $0x1384] ss:$16 sps:$4 sm:$0xff]  }
 0x26e   :  { %5391 = vmatprep.subr.bf16.mxu0 %v11895_v0  ;;  %5924 = vmatprep.subr.bf16.mxu1 %v11898_v1  ;;  %v11982_v0 = vld [vmem:[%s12862_s17 + $0x138c] ss:$16 sps:$4 sm:$0xff]   ;;  %v11977_v1 = vld [vmem:[%s12862_s17 + $0x1380] ss:$16 sps:$4 sm:$0xff]  }
 0x271   :  { %5392 = vmatpush1.bf16.msra.mxu0 %v11893_v2  ;;  %5925 = vmatpush1.bf16.msra.mxu1 %v11896_v3  ;;  %v11985_v2 = vld [vmem:[%s12862_s17 + $0x13a4] ss:$16 sps:$4 sm:$0xff]   ;;  %v11988_v3 = vld [vmem:[%s12862_s17 + $0x13ac] ss:$16 sps:$4 sm:$0xff]  }
 0x272   :  { %5393 = vmatprep.subr.bf16.mxu0 %v11901_v4  ;;  %5926 = vmatprep.subr.bf16.mxu1 %v11904_v5  ;;  %v11983_v4 = vld [vmem:[%s12862_s17 + $0x13a0] ss:$16 sps:$4 sm:$0xff]   ;;  %v11986_v5 = vld [vmem:[%s12862_s17 + $0x13a8] ss:$16 sps:$4 sm:$0xff]  }
 0x275   :  { %5394 = vmatpush1.bf16.msra.mxu0 %v11899_v58  ;;  %5927 = vmatpush1.bf16.msra.mxu1 %v11902_v7  ;;  %v11991_v58 = vld [vmem:[%s12862_s17 + $0x13c4] ss:$16 sps:$4 sm:$0xff]   ;;  %v11994_v7 = vld [vmem:[%s12862_s17 + $0x13cc] ss:$16 sps:$4 sm:$0xff]  }
 0x276   :  { %5404 = vmatprep.subr.bf16.mxu0 %v11907_v8  ;;  %5937 = vmatprep.subr.bf16.mxu1 %v11910_v56  ;;  %v13731_v8 = vld [vmem:[%s12847_s5 + $0x28] sm:$0xff]  ;;  %v11989_v56 = vld [vmem:[%s12862_s17 + $0x13c0] ss:$16 sps:$4 sm:$0xff]  }
 0x278   :  { %5396 = vmatmul.mubr.bf16.vlgmr.msra.gmra.mrb[0].mxu0 %v296_v11  ;;  %5929 = vmatmul.mubr.bf16.vlgmr.msra.gmra.mrb[0].mxu1 %v296_v11  ;;  %v11997_v11 = vld [vmem:[%s12862_s17 + $0x13e4] ss:$16 sps:$4 sm:$0xff]  }
 0x279   :  { %5405 = vmatpush1.bf16.msra.mxu0 %v11905_v12  ;;  %5938 = vmatpush1.bf16.msra.mxu1 %v11908_v13  ;;  %v12000_v12 = vld [vmem:[%s12862_s17 + $0x13ec] ss:$16 sps:$4 sm:$0xff]   ;;  %v13739_v13 = vrot.slane %v13731_v8, %v13051_v49 }
 0x27a   :  { %5406 = vmatprep.subr.bf16.mxu0 %v11913_v14  ;;  %5939 = vmatprep.subr.bf16.mxu1 %v11916_v15  ;;  %v11995_v14 = vld [vmem:[%s12862_s17 + $0x13e0] ss:$16 sps:$4 sm:$0xff]   ;;  %v11998_v15 = vld [vmem:[%s12862_s17 + $0x13e8] ss:$16 sps:$4 sm:$0xff]  }
 0x27b   :  { %5436 = vmatprep.mubr.bf16.mxu0 %v299_v16  ;;  %5969 = vmatprep.mubr.bf16.mxu1 %v299_v16  ;;  %v12004_v16 = vld [vmem:[%s12862_s17 + $0x1404] ss:$16 sps:$4 sm:$0xff]  }
 0x27d   :  { %5407 = vmatpush1.bf16.msra.mxu0 %v11911_v62  ;;  %5940 = vmatpush1.bf16.msra.mxu1 %v11914_v17  ;;  %v12007_v62 = vld [vmem:[%s12862_s17 + $0x140c] ss:$16 sps:$4 sm:$0xff]   ;;  %v246_v17 = vcombine.high %v13739_v13, %v13739_v13 }
 0x27e   :  { %5408 = vmatprep.subr.bf16.mxu0 %v11919_v18  ;;  %5941 = vmatprep.subr.bf16.mxu1 %v11922_v19  ;;  %v298_v18 = vpack.c.bf16 %v13664_v6, %v13664_v6  ;;  %v12002_v19 = vld [vmem:[%s12862_s17 + $0x1400] ss:$16 sps:$4 sm:$0xff]  }
 0x27f   :  { %v12008_v6 = vld [vmem:[%s12862_s17 + $0x1420] ss:$16 sps:$4 sm:$0xff]  }
 0x281   :  { %5409 = vmatpush1.bf16.msra.mxu0 %v11917_v20  ;;  %5942 = vmatpush1.bf16.msra.mxu1 %v11920_v21  ;;  %v12005_v20 = vld [vmem:[%s12862_s17 + $0x1408] ss:$16 sps:$4 sm:$0xff]   ;;  %v12010_v21 = vld [vmem:[%s12862_s17 + $0x1424] ss:$16 sps:$4 sm:$0xff]  }
 0x282   :  { %5410 = vmatprep.subr.bf16.mxu0 %v11925_v22  ;;  %5943 = vmatprep.subr.bf16.mxu1 %v11928_v24  ;;  %v12013_v22 = vld [vmem:[%s12862_s17 + $0x142c] ss:$16 sps:$4 sm:$0xff]   ;;  %v301_v24 = vpack.c.bf16 %v246_v17, %v246_v17 }
 0x285   :  { %5411 = vmatpush1.bf16.msra.mxu0 %v11923_v23  ;;  %5944 = vmatpush1.bf16.msra.mxu1 %v11926_v9  ;;  %v12011_v23 = vld [vmem:[%s12862_s17 + $0x1428] ss:$16 sps:$4 sm:$0xff]   ;;  %v12016_v9 = vld [vmem:[%s12862_s17 + $0x1444] ss:$16 sps:$4 sm:$0xff]  }
 0x286   :  { %5412 = vmatprep.subr.bf16.mxu0 %v11931_v27  ;;  %5945 = vmatprep.subr.bf16.mxu1 %v11934_v29  ;;  %v12019_v27 = vld [vmem:[%s12862_s17 + $0x144c] ss:$16 sps:$4 sm:$0xff]   ;;  %v12014_v29 = vld [vmem:[%s12862_s17 + $0x1440] ss:$16 sps:$4 sm:$0xff]  }
 0x289   :  { %5413 = vmatpush1.bf16.msra.mxu0 %v11929_v30  ;;  %5946 = vmatpush1.bf16.msra.mxu1 %v11932_v31  ;;  %v12017_v30 = vld [vmem:[%s12862_s17 + $0x1448] ss:$16 sps:$4 sm:$0xff]   ;;  %v12022_v31 = vld [vmem:[%s12862_s17 + $0x1464] ss:$16 sps:$4 sm:$0xff]  }
 0x28a   :  { %5414 = vmatprep.subr.bf16.mxu0 %v11937_v33  ;;  %5947 = vmatprep.subr.bf16.mxu1 %v11940_v34  ;;  %v12025_v33 = vld [vmem:[%s12862_s17 + $0x146c] ss:$16 sps:$4 sm:$0xff]   ;;  %v12020_v34 = vld [vmem:[%s12862_s17 + $0x1460] ss:$16 sps:$4 sm:$0xff]  }
 0x28d   :  { %5415 = vmatpush1.bf16.msra.mxu0 %v11935_v35  ;;  %5948 = vmatpush1.bf16.msra.mxu1 %v11938_v26  ;;  %v12023_v35 = vld [vmem:[%s12862_s17 + $0x1468] ss:$16 sps:$4 sm:$0xff]   ;;  %v12028_v26 = vld [vmem:[%s12862_s17 + $0x1484] ss:$16 sps:$4 sm:$0xff]  }
 0x28e   :  { %5416 = vmatprep.subr.bf16.mxu0 %v11943_v36  ;;  %5949 = vmatprep.subr.bf16.mxu1 %v11946_v37  ;;  %v12031_v36 = vld [vmem:[%s12862_s17 + $0x148c] ss:$16 sps:$4 sm:$0xff]   ;;  %v12026_v37 = vld [vmem:[%s12862_s17 + $0x1480] ss:$16 sps:$4 sm:$0xff]  }
 0x291   :  { %5417 = vmatpush1.bf16.msra.mxu0 %v11941_v38  ;;  %5950 = vmatpush1.bf16.msra.mxu1 %v11944_v39  ;;  %v12029_v38 = vld [vmem:[%s12862_s17 + $0x1488] ss:$16 sps:$4 sm:$0xff]   ;;  %v12034_v39 = vld [vmem:[%s12862_s17 + $0x14a4] ss:$16 sps:$4 sm:$0xff]  }
 0x292   :  { %5418 = vmatprep.subr.bf16.mxu0 %v11949_v28  ;;  %5951 = vmatprep.subr.bf16.mxu1 %v11952_v41  ;;  %v12037_v28 = vld [vmem:[%s12862_s17 + $0x14ac] ss:$16 sps:$4 sm:$0xff]   ;;  %v12032_v41 = vld [vmem:[%s12862_s17 + $0x14a0] ss:$16 sps:$4 sm:$0xff]  }
 0x295   :  { %5419 = vmatpush1.bf16.msra.mxu0 %v11947_v44  ;;  %5952 = vmatpush1.bf16.msra.mxu1 %v11950_v45  ;;  %v12035_v44 = vld [vmem:[%s12862_s17 + $0x14a8] ss:$16 sps:$4 sm:$0xff]   ;;  %v12040_v45 = vld [vmem:[%s12862_s17 + $0x14c4] ss:$16 sps:$4 sm:$0xff]  }
 0x296   :  { %5420 = vmatprep.subr.bf16.mxu0 %v11955_v25  ;;  %5953 = vmatprep.subr.bf16.mxu1 %v11958_v46  ;;  %v12043_v25 = vld [vmem:[%s12862_s17 + $0x14cc] ss:$16 sps:$4 sm:$0xff]   ;;  %v12038_v46 = vld [vmem:[%s12862_s17 + $0x14c0] ss:$16 sps:$4 sm:$0xff]  }
 0x299   :  { %5421 = vmatpush1.bf16.msra.mxu0 %v11953_v48  ;;  %5954 = vmatpush1.bf16.msra.mxu1 %v11956_v50  ;;  %v12041_v48 = vld [vmem:[%s12862_s17 + $0x14c8] ss:$16 sps:$4 sm:$0xff]   ;;  %v12046_v50 = vld [vmem:[%s12862_s17 + $0x14e4] ss:$16 sps:$4 sm:$0xff]  }
 0x29a   :  { %5422 = vmatprep.subr.bf16.mxu0 %v11961_v51  ;;  %5955 = vmatprep.subr.bf16.mxu1 %v11964_v32  ;;  %v12049_v51 = vld [vmem:[%s12862_s17 + $0x14ec] ss:$16 sps:$4 sm:$0xff]   ;;  %v12044_v32 = vld [vmem:[%s12862_s17 + $0x14e0] ss:$16 sps:$4 sm:$0xff]  }
 0x29d   :  { %5423 = vmatpush1.bf16.msra.mxu0 %v11959_v52  ;;  %5956 = vmatpush1.bf16.msra.mxu1 %v11962_v53  ;;  %v12047_v52 = vld [vmem:[%s12862_s17 + $0x14e8] ss:$16 sps:$4 sm:$0xff]   ;;  %v12052_v53 = vld [vmem:[%s12862_s17 + $0x1504] ss:$16 sps:$4 sm:$0xff]  }
 0x29e   :  { %5424 = vmatprep.subr.bf16.mxu0 %v11967_v54  ;;  %5957 = vmatprep.subr.bf16.mxu1 %v11970_v55  ;;  %v12055_v54 = vld [vmem:[%s12862_s17 + $0x150c] ss:$16 sps:$4 sm:$0xff]   ;;  %v12050_v55 = vld [vmem:[%s12862_s17 + $0x1500] ss:$16 sps:$4 sm:$0xff]  }
 0x2a1   :  { %5425 = vmatpush1.bf16.msra.mxu0 %v11965_v42  ;;  %5958 = vmatpush1.bf16.msra.mxu1 %v11968_v57  ;;  %v12053_v42 = vld [vmem:[%s12862_s17 + $0x1508] ss:$16 sps:$4 sm:$0xff]   ;;  %v12058_v57 = vld [vmem:[%s12862_s17 + $0x1524] ss:$16 sps:$4 sm:$0xff]  }
 0x2a2   :  { %5426 = vmatprep.subr.bf16.mxu0 %v11973_v40  ;;  %5959 = vmatprep.subr.bf16.mxu1 %v11976_v59  ;;  %v12061_v40 = vld [vmem:[%s12862_s17 + $0x152c] ss:$16 sps:$4 sm:$0xff]  }
 0x2a5   :  { %5427 = vmatpush1.bf16.msra.mxu0 %v11971_v60  ;;  %5960 = vmatpush1.bf16.msra.mxu1 %v11974_v61 }
 0x2a6   :  { %5428 = vmatprep.subr.bf16.mxu0 %v11979_v63  ;;  %5961 = vmatprep.subr.bf16.mxu1 %v11982_v0 }
 0x2a9   :  { %5429 = vmatpush1.bf16.msra.mxu0 %v11977_v1  ;;  %5962 = vmatpush1.bf16.msra.mxu1 %v11980_v47 }
 0x2aa   :  { %5430 = vmatprep.subr.bf16.mxu0 %v11985_v2  ;;  %5963 = vmatprep.subr.bf16.mxu1 %v11988_v3 }
 0x2ad   :  { %5431 = vmatpush1.bf16.msra.mxu0 %v11983_v4  ;;  %5964 = vmatpush1.bf16.msra.mxu1 %v11986_v5 }
 0x2ae   :  { %5432 = vmatprep.subr.bf16.mxu0 %v11991_v58  ;;  %5965 = vmatprep.subr.bf16.mxu1 %v11994_v7 }
 0x2b1   :  { %5433 = vmatpush1.bf16.msra.mxu0 %v11989_v56  ;;  %5966 = vmatpush1.bf16.msra.mxu1 %v11992_v10 }
 0x2b2   :  { %5434 = vmatprep.subr.bf16.mxu0 %v11997_v11  ;;  %5967 = vmatprep.subr.bf16.mxu1 %v12000_v12 }
 0x2b5   :  { %5435 = vmatpush1.bf16.msra.mxu0 %v11995_v14  ;;  %5968 = vmatpush1.bf16.msra.mxu1 %v11998_v15 }
 0x2b6   :  { %5445 = vmatprep.subr.bf16.mxu0 %v12004_v16  ;;  %5978 = vmatprep.subr.bf16.mxu1 %v12007_v62 }
 0x2b8   :  { %5437 = vmatmul.mubr.bf16.vlgmr.msra.gmra.mrb[0].mxu0 %v298_v18  ;;  %5970 = vmatmul.mubr.bf16.vlgmr.msra.gmra.mrb[0].mxu1 %v298_v18 }
 0x2b9   :  { %5446 = vmatpush1.bf16.msra.mxu0 %v12002_v19  ;;  %5979 = vmatpush1.bf16.msra.mxu1 %v12005_v20 }
 0x2ba   :  { %5447 = vmatprep.subr.bf16.mxu0 %v12010_v21  ;;  %5980 = vmatprep.subr.bf16.mxu1 %v12013_v22 }
 0x2bb   :  { %5477 = vmatprep.mubr.bf16.mxu0 %v301_v24  ;;  %6010 = vmatprep.mubr.bf16.mxu1 %v301_v24 }
 0x2bd   :  { %5448 = vmatpush1.bf16.msra.mxu0 %v12008_v6  ;;  %5981 = vmatpush1.bf16.msra.mxu1 %v12011_v23 }
 0x2be   :  { %5449 = vmatprep.subr.bf16.mxu0 %v12016_v9  ;;  %5982 = vmatprep.subr.bf16.mxu1 %v12019_v27 }
 0x2c1   :  { %5450 = vmatpush1.bf16.msra.mxu0 %v12014_v29  ;;  %5983 = vmatpush1.bf16.msra.mxu1 %v12017_v30 }
 0x2c2   :  { %5451 = vmatprep.subr.bf16.mxu0 %v12022_v31  ;;  %5984 = vmatprep.subr.bf16.mxu1 %v12025_v33 }
 0x2c5   :  { %5452 = vmatpush1.bf16.msra.mxu0 %v12020_v34  ;;  %5985 = vmatpush1.bf16.msra.mxu1 %v12023_v35 }
 0x2c6   :  { %5453 = vmatprep.subr.bf16.mxu0 %v12028_v26  ;;  %5986 = vmatprep.subr.bf16.mxu1 %v12031_v36 }
 0x2c9   :  { %5454 = vmatpush1.bf16.msra.mxu0 %v12026_v37  ;;  %5987 = vmatpush1.bf16.msra.mxu1 %v12029_v38 }
 0x2ca   :  { %5455 = vmatprep.subr.bf16.mxu0 %v12034_v39  ;;  %5988 = vmatprep.subr.bf16.mxu1 %v12037_v28 }
 0x2cd   :  { %5456 = vmatpush1.bf16.msra.mxu0 %v12032_v41  ;;  %5989 = vmatpush1.bf16.msra.mxu1 %v12035_v44 }
 0x2ce   :  { %5457 = vmatprep.subr.bf16.mxu0 %v12040_v45  ;;  %5990 = vmatprep.subr.bf16.mxu1 %v12043_v25 }
 0x2d1   :  { %5458 = vmatpush1.bf16.msra.mxu0 %v12038_v46  ;;  %5991 = vmatpush1.bf16.msra.mxu1 %v12041_v48 }
 0x2d2   :  { %5459 = vmatprep.subr.bf16.mxu0 %v12046_v50  ;;  %5992 = vmatprep.subr.bf16.mxu1 %v12049_v51 }
 0x2d5   :  { %5460 = vmatpush1.bf16.msra.mxu0 %v12044_v32  ;;  %5993 = vmatpush1.bf16.msra.mxu1 %v12047_v52 }
 0x2d6   :  { %5461 = vmatprep.subr.bf16.mxu0 %v12052_v53  ;;  %5994 = vmatprep.subr.bf16.mxu1 %v12055_v54 }
 0x2d7   :  { %68 = vsyncpa [#allocation3], 0  ;;  %v12056_v59 = vld [vmem:[%s12862_s17 + $0x1520] ss:$16 sps:$4 sm:$0xff]   ;;  %v12059_v60 = vld [vmem:[%s12862_s17 + $0x1528] ss:$16 sps:$4 sm:$0xff]   ;;  %v231_v62 = vcombine.high %v13731_v8, %v13731_v8  ;;  %v300_v9 = vpack.c.bf16 %v13739_v13, %v13739_v13 }
 0x2d8   :  { %v12064_v61 = vld [vmem:[%s12862_s17 + $0x1544] ss:$16 sps:$4 sm:$0xff]   ;;  %v12067_v63 = vld [vmem:[%s12862_s17 + $0x154c] ss:$16 sps:$4 sm:$0xff]   ;;  %v12062_v0 = vld [vmem:[%s12862_s17 + $0x1540] ss:$16 sps:$4 sm:$0xff]  }
 0x2d9   :  { %5462 = vmatpush1.bf16.msra.mxu0 %v12050_v55  ;;  %5995 = vmatpush1.bf16.msra.mxu1 %v12053_v42  ;;  %v12065_v1 = vld [vmem:[%s12862_s17 + $0x1548] ss:$16 sps:$4 sm:$0xff]   ;;  %v12070_v47 = vld [vmem:[%s12862_s17 + $0x1564] ss:$16 sps:$4 sm:$0xff]   ;;  %v12073_v2 = vld [vmem:[%s12862_s17 + $0x156c] ss:$16 sps:$4 sm:$0xff]   ;;  %v13812_v21 = vrot.slane %v231_v62, %v13051_v49 }
 0x2da   :  { %5463 = vmatprep.subr.bf16.mxu0 %v12058_v57  ;;  %5996 = vmatprep.subr.bf16.mxu1 %v12061_v40  ;;  %v12068_v3 = vld [vmem:[%s12862_s17 + $0x1560] ss:$16 sps:$4 sm:$0xff]   ;;  %v12071_v4 = vld [vmem:[%s12862_s17 + $0x1568] ss:$16 sps:$4 sm:$0xff]   ;;  %v12076_v5 = vld [vmem:[%s12862_s17 + $0x1584] ss:$16 sps:$4 sm:$0xff]  }
 0x2db   :  { %v12079_v58 = vld [vmem:[%s12862_s17 + $0x158c] ss:$16 sps:$4 sm:$0xff]   ;;  %v12074_v7 = vld [vmem:[%s12862_s17 + $0x1580] ss:$16 sps:$4 sm:$0xff]   ;;  %v12077_v56 = vld [vmem:[%s12862_s17 + $0x1588] ss:$16 sps:$4 sm:$0xff]   ;;  %v247_v23 = vcombine.high %v13812_v21, %v13812_v21 }
 0x2dc   :  { %v12082_v10 = vld [vmem:[%s12862_s17 + $0x15a4] ss:$16 sps:$4 sm:$0xff]   ;;  %v12085_v11 = vld [vmem:[%s12862_s17 + $0x15ac] ss:$16 sps:$4 sm:$0xff]   ;;  %v12080_v12 = vld [vmem:[%s12862_s17 + $0x15a0] ss:$16 sps:$4 sm:$0xff]  }
 0x2dd   :  { %5464 = vmatpush1.bf16.msra.mxu0 %v12056_v59  ;;  %5997 = vmatpush1.bf16.msra.mxu1 %v12059_v60  ;;  %v12083_v14 = vld [vmem:[%s12862_s17 + $0x15a8] ss:$16 sps:$4 sm:$0xff]   ;;  %v12088_v15 = vld [vmem:[%s12862_s17 + $0x15c4] ss:$16 sps:$4 sm:$0xff]   ;;  %v12091_v16 = vld [vmem:[%s12862_s17 + $0x15cc] ss:$16 sps:$4 sm:$0xff]   ;;  %v303_v31 = vpack.c.bf16 %v247_v23, %v247_v23 }
 0x2de   :  { %5465 = vmatprep.subr.bf16.mxu0 %v12064_v61  ;;  %5998 = vmatprep.subr.bf16.mxu1 %v12067_v63  ;;  %v12086_v17 = vld [vmem:[%s12862_s17 + $0x15c0] ss:$16 sps:$4 sm:$0xff]   ;;  %v12089_v18 = vld [vmem:[%s12862_s17 + $0x15c8] ss:$16 sps:$4 sm:$0xff]   ;;  %v12094_v19 = vld [vmem:[%s12862_s17 + $0x15e4] ss:$16 sps:$4 sm:$0xff]  }
 0x2df   :  { %v12097_v20 = vld [vmem:[%s12862_s17 + $0x15ec] ss:$16 sps:$4 sm:$0xff]   ;;  %v12092_v8 = vld [vmem:[%s12862_s17 + $0x15e0] ss:$16 sps:$4 sm:$0xff]   ;;  %v12095_v22 = vld [vmem:[%s12862_s17 + $0x15e8] ss:$16 sps:$4 sm:$0xff]  }
 0x2e0   :  { %v12100_v24 = vld [vmem:[%s12862_s17 + $0x1604] ss:$16 sps:$4 sm:$0xff]   ;;  %v12103_v6 = vld [vmem:[%s12862_s17 + $0x160c] ss:$16 sps:$4 sm:$0xff]   ;;  %v12098_v49 = vld [vmem:[%s12862_s17 + $0x1600] ss:$16 sps:$4 sm:$0xff]  }
 0x2e1   :  { %5466 = vmatpush1.bf16.msra.mxu0 %v12062_v0  ;;  %5999 = vmatpush1.bf16.msra.mxu1 %v12065_v1  ;;  %v12101_v27 = vld [vmem:[%s12862_s17 + $0x1608] ss:$16 sps:$4 sm:$0xff]   ;;  %v12106_v29 = vld [vmem:[%s12862_s17 + $0x1624] ss:$16 sps:$4 sm:$0xff]   ;;  %v12109_v30 = vld [vmem:[%s12862_s17 + $0x162c] ss:$16 sps:$4 sm:$0xff]  }
 0x2e2   :  { %5467 = vmatprep.subr.bf16.mxu0 %v12070_v47  ;;  %6000 = vmatprep.subr.bf16.mxu1 %v12073_v2  ;;  %v12104_v13 = vld [vmem:[%s12862_s17 + $0x1620] ss:$16 sps:$4 sm:$0xff]   ;;  %v12107_v33 = vld [vmem:[%s12862_s17 + $0x1628] ss:$16 sps:$4 sm:$0xff]   ;;  %v12112_v34 = vld [vmem:[%s12862_s17 + $0x1644] ss:$16 sps:$4 sm:$0xff]  }
 0x2e3   :  { %v12115_v35 = vld [vmem:[%s12862_s17 + $0x164c] ss:$16 sps:$4 sm:$0xff]   ;;  %v12110_v26 = vld [vmem:[%s12862_s17 + $0x1640] ss:$16 sps:$4 sm:$0xff]   ;;  %v12113_v36 = vld [vmem:[%s12862_s17 + $0x1648] ss:$16 sps:$4 sm:$0xff]  }
 0x2e4   :  { %v12118_v37 = vld [vmem:[%s12862_s17 + $0x1664] ss:$16 sps:$4 sm:$0xff]   ;;  %v12121_v38 = vld [vmem:[%s12862_s17 + $0x166c] ss:$16 sps:$4 sm:$0xff]   ;;  %v12116_v39 = vld [vmem:[%s12862_s17 + $0x1660] ss:$16 sps:$4 sm:$0xff]  }
 0x2e5   :  { %5468 = vmatpush1.bf16.msra.mxu0 %v12068_v3  ;;  %6001 = vmatpush1.bf16.msra.mxu1 %v12071_v4  ;;  %v12119_v28 = vld [vmem:[%s12862_s17 + $0x1668] ss:$16 sps:$4 sm:$0xff]   ;;  %v12124_v41 = vld [vmem:[%s12862_s17 + $0x1684] ss:$16 sps:$4 sm:$0xff]   ;;  %v12127_v44 = vld [vmem:[%s12862_s17 + $0x168c] ss:$16 sps:$4 sm:$0xff]  }
 0x2e6   :  { %5469 = vmatprep.subr.bf16.mxu0 %v12076_v5  ;;  %6002 = vmatprep.subr.bf16.mxu1 %v12079_v58  ;;  %v12122_v45 = vld [vmem:[%s12862_s17 + $0x1680] ss:$16 sps:$4 sm:$0xff]   ;;  %v12125_v25 = vld [vmem:[%s12862_s17 + $0x1688] ss:$16 sps:$4 sm:$0xff]   ;;  %v12130_v46 = vld [vmem:[%s12862_s17 + $0x16a4] ss:$16 sps:$4 sm:$0xff]  }
 0x2e7   :  { %v12133_v48 = vld [vmem:[%s12862_s17 + $0x16ac] ss:$16 sps:$4 sm:$0xff]   ;;  %v12128_v50 = vld [vmem:[%s12862_s17 + $0x16a0] ss:$16 sps:$4 sm:$0xff]   ;;  %v12131_v51 = vld [vmem:[%s12862_s17 + $0x16a8] ss:$16 sps:$4 sm:$0xff]  }
 0x2e8   :  { %v12136_v32 = vld [vmem:[%s12862_s17 + $0x16c4] ss:$16 sps:$4 sm:$0xff]   ;;  %v12139_v52 = vld [vmem:[%s12862_s17 + $0x16cc] ss:$16 sps:$4 sm:$0xff]   ;;  %v12134_v53 = vld [vmem:[%s12862_s17 + $0x16c0] ss:$16 sps:$4 sm:$0xff]  }
 0x2e9   :  { %5470 = vmatpush1.bf16.msra.mxu0 %v12074_v7  ;;  %6003 = vmatpush1.bf16.msra.mxu1 %v12077_v56  ;;  %v12137_v54 = vld [vmem:[%s12862_s17 + $0x16c8] ss:$16 sps:$4 sm:$0xff]   ;;  %v12142_v55 = vld [vmem:[%s12862_s17 + $0x16e4] ss:$16 sps:$4 sm:$0xff]   ;;  %v12145_v42 = vld [vmem:[%s12862_s17 + $0x16ec] ss:$16 sps:$4 sm:$0xff]  }
 0x2ea   :  { %5471 = vmatprep.subr.bf16.mxu0 %v12082_v10  ;;  %6004 = vmatprep.subr.bf16.mxu1 %v12085_v11  ;;  %v12140_v57 = vld [vmem:[%s12862_s17 + $0x16e0] ss:$16 sps:$4 sm:$0xff]   ;;  %v12143_v40 = vld [vmem:[%s12862_s17 + $0x16e8] ss:$16 sps:$4 sm:$0xff]   ;;  %v12148_v59 = vld [vmem:[%s12862_s17 + $0x1704] ss:$16 sps:$4 sm:$0xff]  }
 0x2eb   :  { %v12151_v60 = vld [vmem:[%s12862_s17 + $0x170c] ss:$16 sps:$4 sm:$0xff]   ;;  %v12146_v61 = vld [vmem:[%s12862_s17 + $0x1700] ss:$16 sps:$4 sm:$0xff]   ;;  %v12149_v63 = vld [vmem:[%s12862_s17 + $0x1708] ss:$16 sps:$4 sm:$0xff]  }
 0x2ec   :  { %v12154_v0 = vld [vmem:[%s12862_s17 + $0x1724] ss:$16 sps:$4 sm:$0xff]   ;;  %v12157_v1 = vld [vmem:[%s12862_s17 + $0x172c] ss:$16 sps:$4 sm:$0xff]   ;;  %v12152_v47 = vld [vmem:[%s12862_s17 + $0x1720] ss:$16 sps:$4 sm:$0xff]  }
 0x2ed   :  { %5472 = vmatpush1.bf16.msra.mxu0 %v12080_v12  ;;  %6005 = vmatpush1.bf16.msra.mxu1 %v12083_v14  ;;  %v12155_v2 = vld [vmem:[%s12862_s17 + $0x1728] ss:$16 sps:$4 sm:$0xff]   ;;  %v12160_v3 = vld [vmem:[%s12862_s17 + $0x1744] ss:$16 sps:$4 sm:$0xff]   ;;  %v12163_v4 = vld [vmem:[%s12862_s17 + $0x174c] ss:$16 sps:$4 sm:$0xff]  }
 0x2ee   :  { %5473 = vmatprep.subr.bf16.mxu0 %v12088_v15  ;;  %6006 = vmatprep.subr.bf16.mxu1 %v12091_v16  ;;  %v12158_v5 = vld [vmem:[%s12862_s17 + $0x1740] ss:$16 sps:$4 sm:$0xff]   ;;  %v12161_v58 = vld [vmem:[%s12862_s17 + $0x1748] ss:$16 sps:$4 sm:$0xff]   ;;  %v12166_v7 = vld [vmem:[%s12862_s17 + $0x1764] ss:$16 sps:$4 sm:$0xff]  }
 0x2ef   :  { %v12169_v56 = vld [vmem:[%s12862_s17 + $0x176c] ss:$16 sps:$4 sm:$0xff]   ;;  %v12164_v10 = vld [vmem:[%s12862_s17 + $0x1760] ss:$16 sps:$4 sm:$0xff]   ;;  %v12167_v11 = vld [vmem:[%s12862_s17 + $0x1768] ss:$16 sps:$4 sm:$0xff]  }
 0x2f0   :  { %v12172_v12 = vld [vmem:[%s12862_s17 + $0x1784] ss:$16 sps:$4 sm:$0xff]   ;;  %v12175_v14 = vld [vmem:[%s12862_s17 + $0x178c] ss:$16 sps:$4 sm:$0xff]   ;;  %v12170_v15 = vld [vmem:[%s12862_s17 + $0x1780] ss:$16 sps:$4 sm:$0xff]  }
 0x2f1   :  { %5474 = vmatpush1.bf16.msra.mxu0 %v12086_v17  ;;  %6007 = vmatpush1.bf16.msra.mxu1 %v12089_v18  ;;  %v12173_v16 = vld [vmem:[%s12862_s17 + $0x1788] ss:$16 sps:$4 sm:$0xff]   ;;  %v12178_v62 = vld [vmem:[%s12862_s17 + $0x17a4] ss:$16 sps:$4 sm:$0xff]   ;;  %v12181_v17 = vld [vmem:[%s12862_s17 + $0x17ac] ss:$16 sps:$4 sm:$0xff]  }
 0x2f2   :  { %5475 = vmatprep.subr.bf16.mxu0 %v12094_v19  ;;  %6008 = vmatprep.subr.bf16.mxu1 %v12097_v20  ;;  %v12176_v18 = vld [vmem:[%s12862_s17 + $0x17a0] ss:$16 sps:$4 sm:$0xff]   ;;  %v12179_v19 = vld [vmem:[%s12862_s17 + $0x17a8] ss:$16 sps:$4 sm:$0xff]   ;;  %v12184_v20 = vld [vmem:[%s12862_s17 + $0x17c4] ss:$16 sps:$4 sm:$0xff]  }
 0x2f3   :  { %v12193_v23 = vld [vmem:[%s12862_s17 + $0x17ec] ss:$16 sps:$4 sm:$0xff]   ;;  %vm6119_vm0 = vcmask 1041408   ;;  %vm5031_vm1 = vcmask 523264   ;;  %vm12837_vm2 = vmmov 0   ;;  %vm6115_vm3 = vcmask 31744  }
 0x2f4   :  { %vm8701_vm4 = vcmask 1044480   ;;  %vm8697_vm5 = vcmask 80896   ;;  %s14453_s0 = sld [smem:[#allocation8_spill]]  ;;  %vm9499_vm6 = vcmask 261120   ;;  %vm9543_vm7 = vcmask 9216  }
 0x2f5   :  { %5476 = vmatpush1.bf16.msra.mxu0 %v12092_v8  ;;  %6009 = vmatpush1.bf16.msra.mxu1 %v12095_v22  ;;  %v12187_v8 = vld [vmem:[%s12862_s17 + $0x17cc] ss:$16 sps:$4 sm:$0xff]   ;;  %v12182_v22 = vld [vmem:[%s12862_s17 + $0x17c0] ss:$16 sps:$4 sm:$0xff]  }
 0x2f6   :  { %5486 = vmatprep.subr.bf16.mxu0 %v12100_v24  ;;  %6019 = vmatprep.subr.bf16.mxu1 %v12103_v6  ;;  %v12185_v24 = vld [vmem:[%s12862_s17 + $0x17c8] ss:$16 sps:$4 sm:$0xff]   ;;  %v12190_v6 = vld [vmem:[%s12862_s17 + $0x17e4] ss:$16 sps:$4 sm:$0xff]  }
 0x2f8   :  { %5478 = vmatmul.mubr.bf16.vlgmr.msra.gmra.mrb[0].mxu0 %v300_v9  ;;  %6011 = vmatmul.mubr.bf16.vlgmr.msra.gmra.mrb[0].mxu1 %v300_v9  ;;  %v12188_v9 = vld [vmem:[%s12862_s17 + $0x17e0] ss:$16 sps:$4 sm:$0xff]  }
 0x2f9   :  { %5487 = vmatpush1.bf16.msra.mxu0 %v12098_v49  ;;  %6020 = vmatpush1.bf16.msra.mxu1 %v12101_v27  ;;  %v12191_v49 = vld [vmem:[%s12862_s17 + $0x17e8] ss:$16 sps:$4 sm:$0xff]   ;;  %v12197_v27 = vld [vmem:[%s12862_s17 + $0x1804] ss:$16 sps:$4 sm:$0xff]  }
 0x2fa   :  { %5488 = vmatprep.subr.bf16.mxu0 %v12106_v29  ;;  %6021 = vmatprep.subr.bf16.mxu1 %v12109_v30  ;;  %v12200_v29 = vld [vmem:[%s12862_s17 + $0x180c] ss:$16 sps:$4 sm:$0xff]   ;;  %v302_v30 = vpack.c.bf16 %v13812_v21, %v13812_v21  ;;  %v12204_v21 = vld [vmem:[%s12862_s17 + $0x1828] ss:$16 sps:$4 sm:$0xff]  }
 0x2fb   :  { %5518 = vmatprep.mubr.bf16.mxu0 %v303_v31  ;;  %6051 = vmatprep.mubr.bf16.mxu1 %v303_v31  ;;  %v12195_v31 = vld [vmem:[%s12862_s17 + $0x1800] ss:$16 sps:$4 sm:$0xff]  }
 0x2fd   :  { %5489 = vmatpush1.bf16.msra.mxu0 %v12104_v13  ;;  %6022 = vmatpush1.bf16.msra.mxu1 %v12107_v33  ;;  %v12198_v13 = vld [vmem:[%s12862_s17 + $0x1808] ss:$16 sps:$4 sm:$0xff]   ;;  %v12203_v33 = vld [vmem:[%s12862_s17 + $0x1824] ss:$16 sps:$4 sm:$0xff]  }
 0x2fe   :  { %5490 = vmatprep.subr.bf16.mxu0 %v12112_v34  ;;  %6023 = vmatprep.subr.bf16.mxu1 %v12115_v35  ;;  %v12206_v34 = vld [vmem:[%s12862_s17 + $0x182c] ss:$16 sps:$4 sm:$0xff]   ;;  %v12201_v35 = vld [vmem:[%s12862_s17 + $0x1820] ss:$16 sps:$4 sm:$0xff]  }
 0x301   :  { %5491 = vmatpush1.bf16.msra.mxu0 %v12110_v26  ;;  %6024 = vmatpush1.bf16.msra.mxu1 %v12113_v36  ;;  %v12209_v26 = vld [vmem:[%s12862_s17 + $0x1844] ss:$16 sps:$4 sm:$0xff]   ;;  %v12212_v36 = vld [vmem:[%s12862_s17 + $0x184c] ss:$16 sps:$4 sm:$0xff]  }
 0x302   :  { %5492 = vmatprep.subr.bf16.mxu0 %v12118_v37  ;;  %6025 = vmatprep.subr.bf16.mxu1 %v12121_v38  ;;  %v12835_v37 = vmov 0   ;;  %v12207_v38 = vld [vmem:[%s12862_s17 + $0x1840] ss:$16 sps:$4 sm:$0xff]  }
 0x305   :  { %5493 = vmatpush1.bf16.msra.mxu0 %v12116_v39  ;;  %6026 = vmatpush1.bf16.msra.mxu1 %v12119_v28  ;;  %v12210_v39 = vld [vmem:[%s12862_s17 + $0x1848] ss:$16 sps:$4 sm:$0xff]   ;;  %v12215_v28 = vld [vmem:[%s12862_s17 + $0x1864] ss:$16 sps:$4 sm:$0xff]  }
 0x306   :  { %5494 = vmatprep.subr.bf16.mxu0 %v12124_v41  ;;  %6027 = vmatprep.subr.bf16.mxu1 %v12127_v44  ;;  %v12218_v41 = vld [vmem:[%s12862_s17 + $0x186c] ss:$16 sps:$4 sm:$0xff]   ;;  %v12213_v44 = vld [vmem:[%s12862_s17 + $0x1860] ss:$16 sps:$4 sm:$0xff]  }
 0x309   :  { %5495 = vmatpush1.bf16.msra.mxu0 %v12122_v45  ;;  %6028 = vmatpush1.bf16.msra.mxu1 %v12125_v25  ;;  %v12216_v45 = vld [vmem:[%s12862_s17 + $0x1868] ss:$16 sps:$4 sm:$0xff]   ;;  %v9601_v25 = vld.sshfl [vmem:[%s12847_s5 + $0x30] sm:$0x3 pattern:$0x76325410] }
 0x30a   :  { %5496 = vmatprep.subr.bf16.mxu0 %v12130_v46  ;;  %6029 = vmatprep.subr.bf16.mxu1 %v12133_v48  ;;  %v12221_v46 = vld [vmem:[%s12882_s3 + $0x4] ss:$8 sps:$4 sm:$0xff]   ;;  %v6107_v48 = vld [vmem:[%s12872_s25] sm:$0x3]  ;;  %s14454_s5 = sld [smem:[#allocation5_spill]]  ;;  %s14457_s17 = sld [smem:[#allocation12_spill]] }
 0x30b   :  { %s14459_s25 = sld [smem:[#allocation9_spill]] }
 0x30d   :  { %5497 = vmatpush1.bf16.msra.mxu0 %v12128_v50  ;;  %6030 = vmatpush1.bf16.msra.mxu1 %v12131_v51  ;;  %v304_v50 = vpack.c.bf16 %v9601_v25, %v9601_v25  ;;  %v12836_v51 = vmov 0.0  }
 0x30e   :  { %5498 = vmatprep.subr.bf16.mxu0 %v12136_v32  ;;  %6031 = vmatprep.subr.bf16.mxu1 %v12139_v52  ;;  %v6121_v32 = vsel %vm6119_vm0, %v6107_v48, 0  ;;  %v12219_v52 = vld [vmem:[%s12882_s3] ss:$8 sps:$4 sm:$0xff]  }
 0x311   :  { %5499 = vmatpush1.bf16.msra.mxu0 %v12134_v53  ;;  %6032 = vmatpush1.bf16.msra.mxu1 %v12137_v54  ;;  %v12224_v53 = vld [vmem:[%s12882_s3 + $0x14] ss:$8 sps:$4 sm:$0xff]   ;;  %v6105_v54 = vld [vmem:[%s12852_s9] sm:$0x3]  ;;  %s14455_s9 = sld [smem:[#allocation6_spill]] }
 0x312   :  { %5500 = vmatprep.subr.bf16.mxu0 %v12142_v55  ;;  %6033 = vmatprep.subr.bf16.mxu1 %v12145_v42  ;;  %v12222_v55 = vld [vmem:[%s12882_s3 + $0x10] ss:$8 sps:$4 sm:$0xff]   ;;  %v12227_v42 = vld [vmem:[%s12882_s3 + $0x24] ss:$8 sps:$4 sm:$0xff]  }
 0x315   :  { %5501 = vmatpush1.bf16.msra.mxu0 %v12140_v57  ;;  %6034 = vmatpush1.bf16.msra.mxu1 %v12143_v40  ;;  %v6106_v57 = vpack.c.bf16 %v6105_v54, %v6105_v54  ;;  %v12225_v40 = vld [vmem:[%s12882_s3 + $0x20] ss:$8 sps:$4 sm:$0xff]  }
 0x316   :  { %5502 = vmatprep.subr.bf16.mxu0 %v12148_v59  ;;  %6035 = vmatprep.subr.bf16.mxu1 %v12151_v60  ;;  %v12230_v59 = vld [vmem:[%s12882_s3 + $0x34] ss:$8 sps:$4 sm:$0xff]   ;;  %v12228_v60 = vld [vmem:[%s12882_s3 + $0x30] ss:$8 sps:$4 sm:$0xff]  }
 0x319   :  { %5503 = vmatpush1.bf16.msra.mxu0 %v12146_v61  ;;  %6036 = vmatpush1.bf16.msra.mxu1 %v12149_v63  ;;  %v12233_v61 = vld [vmem:[%s12882_s3 + $0x44] ss:$8 sps:$4 sm:$0xff]   ;;  %v12231_v63 = vld [vmem:[%s12882_s3 + $0x40] ss:$8 sps:$4 sm:$0xff]  }
 0x31a   :  { %5504 = vmatprep.subr.bf16.mxu0 %v12154_v0  ;;  %6037 = vmatprep.subr.bf16.mxu1 %v12157_v1  ;;  %v12236_v0 = vld [vmem:[%s12882_s3 + $0x54] ss:$8 sps:$4 sm:$0xff]   ;;  %v12234_v1 = vld [vmem:[%s12882_s3 + $0x50] ss:$8 sps:$4 sm:$0xff]  }
 0x31d   :  { %5505 = vmatpush1.bf16.msra.mxu0 %v12152_v47  ;;  %6038 = vmatpush1.bf16.msra.mxu1 %v12155_v2  ;;  %v12239_v47 = vld [vmem:[%s12882_s3 + $0x64] ss:$8 sps:$4 sm:$0xff]   ;;  %v12237_v2 = vld [vmem:[%s12882_s3 + $0x60] ss:$8 sps:$4 sm:$0xff]  }
 0x31e   :  { %5506 = vmatprep.subr.bf16.mxu0 %v12160_v3  ;;  %6039 = vmatprep.subr.bf16.mxu1 %v12163_v4  ;;  %v12242_v3 = vld [vmem:[%s12882_s3 + $0x74] ss:$8 sps:$4 sm:$0xff]   ;;  %v12240_v4 = vld [vmem:[%s12882_s3 + $0x70] ss:$8 sps:$4 sm:$0xff]   ;;  %s14461_s3 = sld [smem:[#allocation11_spill]] }
 0x321   :  { %5507 = vmatpush1.bf16.msra.mxu0 %v12158_v5  ;;  %6040 = vmatpush1.bf16.msra.mxu1 %v12161_v58  ;;  %v12243_v5 = vld [vmem:[%s12892_s14] ss:$16 sps:$4 sm:$0xff]   ;;  %v12245_v58 = vld [vmem:[%s12892_s14 + $0x4] ss:$16 sps:$4 sm:$0xff]  }
 0x322   :  { %5508 = vmatprep.subr.bf16.mxu0 %v12166_v7  ;;  %6041 = vmatprep.subr.bf16.mxu1 %v12169_v56  ;;  %v12248_v7 = vld [vmem:[%s12892_s14 + $0xc] ss:$16 sps:$4 sm:$0xff]   ;;  %v12251_v56 = vld [vmem:[%s12892_s14 + $0x24] ss:$16 sps:$4 sm:$0xff]  }
 0x325   :  { %5509 = vmatpush1.bf16.msra.mxu0 %v12164_v10  ;;  %6042 = vmatpush1.bf16.msra.mxu1 %v12167_v11  ;;  %v12249_v10 = vld [vmem:[%s12892_s14 + $0x20] ss:$16 sps:$4 sm:$0xff]   ;;  %v12257_v11 = vld [vmem:[%s12892_s14 + $0x44] ss:$16 sps:$4 sm:$0xff]  }
 0x326   :  { %5510 = vmatprep.subr.bf16.mxu0 %v12172_v12  ;;  %6043 = vmatprep.subr.bf16.mxu1 %v12175_v14  ;;  %v12255_v12 = vld [vmem:[%s12892_s14 + $0x40] ss:$16 sps:$4 sm:$0xff]   ;;  %v12263_v14 = vld [vmem:[%s12892_s14 + $0x64] ss:$16 sps:$4 sm:$0xff]  }
 0x329   :  { %5511 = vmatpush1.bf16.msra.mxu0 %v12170_v15  ;;  %6044 = vmatpush1.bf16.msra.mxu1 %v12173_v16  ;;  %v12261_v15 = vld [vmem:[%s12892_s14 + $0x60] ss:$16 sps:$4 sm:$0xff]   ;;  %v12269_v16 = vld [vmem:[%s12892_s14 + $0x84] ss:$16 sps:$4 sm:$0xff]  }
 0x32a   :  { %5512 = vmatprep.subr.bf16.mxu0 %v12178_v62  ;;  %6045 = vmatprep.subr.bf16.mxu1 %v12181_v17  ;;  %v12267_v62 = vld [vmem:[%s12892_s14 + $0x80] ss:$16 sps:$4 sm:$0xff]   ;;  %v12275_v17 = vld [vmem:[%s12892_s14 + $0xa4] ss:$16 sps:$4 sm:$0xff]  }
 0x32d   :  { %5513 = vmatpush1.bf16.msra.mxu0 %v12176_v18  ;;  %6046 = vmatpush1.bf16.msra.mxu1 %v12179_v19  ;;  %v12273_v18 = vld [vmem:[%s12892_s14 + $0xa0] ss:$16 sps:$4 sm:$0xff]   ;;  %v12281_v19 = vld [vmem:[%s12892_s14 + $0xc4] ss:$16 sps:$4 sm:$0xff]  }
 0x32e   :  { %5514 = vmatprep.subr.bf16.mxu0 %v12184_v20  ;;  %6047 = vmatprep.subr.bf16.mxu1 %v12187_v8  ;;  %v12279_v20 = vld [vmem:[%s12892_s14 + $0xc0] ss:$16 sps:$4 sm:$0xff]   ;;  %v12287_v8 = vld [vmem:[%s12892_s14 + $0xe4] ss:$16 sps:$4 sm:$0xff]  }
 0x331   :  { %5515 = vmatpush1.bf16.msra.mxu0 %v12182_v22  ;;  %6048 = vmatpush1.bf16.msra.mxu1 %v12185_v24  ;;  %v12285_v22 = vld [vmem:[%s12892_s14 + $0xe0] ss:$16 sps:$4 sm:$0xff]   ;;  %v12293_v24 = vld [vmem:[%s12892_s14 + $0x104] ss:$16 sps:$4 sm:$0xff]  }
 0x332   :  { %5516 = vmatprep.subr.bf16.mxu0 %v12190_v6  ;;  %6049 = vmatprep.subr.bf16.mxu1 %v12193_v23  ;;  %v12291_v6 = vld [vmem:[%s12892_s14 + $0x100] ss:$16 sps:$4 sm:$0xff]   ;;  %v12299_v23 = vld [vmem:[%s12892_s14 + $0x124] ss:$16 sps:$4 sm:$0xff]  }
 0x335   :  { %5517 = vmatpush1.bf16.msra.mxu0 %v12188_v9  ;;  %6050 = vmatpush1.bf16.msra.mxu1 %v12191_v49  ;;  %v12297_v9 = vld [vmem:[%s12892_s14 + $0x120] ss:$16 sps:$4 sm:$0xff]   ;;  %v12305_v49 = vld [vmem:[%s12892_s14 + $0x144] ss:$16 sps:$4 sm:$0xff]  }
 0x336   :  { %5527 = vmatprep.subr.bf16.mxu0 %v12197_v27  ;;  %6060 = vmatprep.subr.bf16.mxu1 %v12200_v29  ;;  %v12303_v27 = vld [vmem:[%s12892_s14 + $0x140] ss:$16 sps:$4 sm:$0xff]   ;;  %v12311_v29 = vld [vmem:[%s12892_s14 + $0x164] ss:$16 sps:$4 sm:$0xff]  }
 0x338   :  { %5519 = vmatmul.mubr.bf16.vlgmr.msra.gmra.mrb[0].mxu0 %v302_v30  ;;  %6052 = vmatmul.mubr.bf16.vlgmr.msra.gmra.mrb[0].mxu1 %v302_v30  ;;  %v12309_v30 = vld [vmem:[%s12892_s14 + $0x160] ss:$16 sps:$4 sm:$0xff]  }
 0x339   :  { %5528 = vmatpush1.bf16.msra.mxu0 %v12195_v31  ;;  %6061 = vmatpush1.bf16.msra.mxu1 %v12198_v13  ;;  %v12317_v31 = vld [vmem:[%s12892_s14 + $0x184] ss:$16 sps:$4 sm:$0xff]   ;;  %v12315_v13 = vld [vmem:[%s12892_s14 + $0x180] ss:$16 sps:$4 sm:$0xff]  }
 0x33a   :  { %5529 = vmatprep.subr.bf16.mxu0 %v12203_v33  ;;  %6062 = vmatprep.subr.bf16.mxu1 %v12206_v34  ;;  %v12323_v33 = vld [vmem:[%s12892_s14 + $0x1a4] ss:$16 sps:$4 sm:$0xff]   ;;  %v12321_v34 = vld [vmem:[%s12892_s14 + $0x1a0] ss:$16 sps:$4 sm:$0xff]  }
 0x33b   :  { %5559 = vmatprep.mubr.bf16.mxu0 %v12835_v37  ;;  %6092 = vmatprep.mubr.bf16.mxu1 %v12835_v37 }
 0x33d   :  { %5530 = vmatpush1.bf16.msra.mxu0 %v12201_v35  ;;  %6063 = vmatpush1.bf16.msra.mxu1 %v12204_v21  ;;  %v12329_v35 = vld [vmem:[%s12892_s14 + $0x1c4] ss:$16 sps:$4 sm:$0xff]   ;;  %v12327_v21 = vld [vmem:[%s12892_s14 + $0x1c0] ss:$16 sps:$4 sm:$0xff]  }
 0x33e   :  { %5531 = vmatprep.subr.bf16.mxu0 %v12209_v26  ;;  %6064 = vmatprep.subr.bf16.mxu1 %v12212_v36  ;;  %v13961_v26 = vsub.s32 2, %v13043_v43  ;;  %v13964_v36 = vld [vmem:[%s12867_s21] sm:$0xf]  ;;  %s14458_s21 = sld [smem:[#allocation16_spill]] }
 0x341   :  { %5532 = vmatpush1.bf16.msra.mxu0 %v12207_v38  ;;  %6065 = vmatpush1.bf16.msra.mxu1 %v12210_v39  ;;  %v1102_v38 = vrot.slane %v13964_v36, %v13961_v26 }
 0x342   :  { %5533 = vmatprep.subr.bf16.mxu0 %v12215_v28  ;;  %6066 = vmatprep.subr.bf16.mxu1 %v12218_v41 }
 0x345   :  { %5534 = vmatpush1.bf16.msra.mxu0 %v12213_v44  ;;  %6067 = vmatpush1.bf16.msra.mxu1 %v12216_v45 }
 0x346   :  { %10855 = vmatprep.subr.bf16.mxu0 %v12836_v51  ;;  %6272 = vmatprep.subr.bf16.mxu1 %v12221_v46 }
 0x348   :  { %10386 = vmatmul.mubr.msk.bf16.vlgmr.msra.gmra.mrb[0].mxu0 %vm5031_vm1, %v304_v50  ;;  %10387 = vmatmul.mubr.msk.bf16.vlgmr.msra.gmra.mrb[0].mxu1 %vm5031_vm1, %v304_v50 }
 0x349   :  { %10856 = vmatpush3.bf16.msra.mxu0 %v6121_v32  ;;  %10857 = vmatprep.mubr.msk.bf16.mxu0 %vm12837_vm2, %v12836_v51  ;;  %v10388_v32 = vld [vmem:[%s12877_s29] ss:$0 sm:$0xff]  ;;  %s14460_s29 = sld [smem:[#allocation10_spill]] }
 0x34a   :  { %6273 = vmatpush1.bf16.msra.mxu1 %v12219_v52  ;;  %6304 = vmatprep.mubr.bf16.mxu1 %v12835_v37 }
 0x34b   :  { %6274 = vmatprep.subr.bf16.mxu1 %v12224_v53  ;;  %6721 = vmatprep.subr.bf16.mxu0 %v12245_v58  ;;  %v12282_v58 = vld [vmem:[%s12892_s14 + $0xc8] ss:$16 sps:$4 sm:$0xff]  }
 0x34e   :  { %6275 = vmatpush1.bf16.msra.mxu1 %v12222_v55 }
 0x34f   :  { %6276 = vmatprep.subr.bf16.mxu1 %v12227_v42  ;;  %v12246_v42 = vld [vmem:[%s12892_s14 + $0x8] ss:$16 sps:$4 sm:$0xff]  }
 0x350   :  { %10858 = vmatmul.mubr.msk.bf16.vlgmr.msra.gmra.mrb[4].mxu0 %vm6115_vm3, %v6106_v57 }
 0x351   :  { %6722 = vmatpush1.bf16.msra.mxu0 %v12243_v5  ;;  %v12284_v5 = vld [vmem:[%s12892_s14 + $0xcc] ss:$16 sps:$4 sm:$0xff]  }
 0x352   :  { %6277 = vmatpush1.bf16.msra.mxu1 %v12225_v40  ;;  %6723 = vmatprep.subr.bf16.mxu0 %v12251_v56  ;;  %v12288_v56 = vld [vmem:[%s12892_s14 + $0xe8] ss:$16 sps:$4 sm:$0xff]  }
 0x353   :  { %6278 = vmatprep.subr.bf16.mxu1 %v12230_v59  ;;  %v12254_v59 = vld [vmem:[%s12892_s14 + $0x2c] ss:$16 sps:$4 sm:$0xff]  }
 0x355   :  { %6724 = vmatpush1.bf16.msra.mxu0 %v12249_v10  ;;  %v12296_v10 = vld [vmem:[%s12892_s14 + $0x10c] ss:$16 sps:$4 sm:$0xff]  }
 0x356   :  { %6279 = vmatpush1.bf16.msra.mxu1 %v12228_v60  ;;  %6725 = vmatprep.subr.bf16.mxu0 %v12257_v11  ;;  %v12252_v60 = vld [vmem:[%s12892_s14 + $0x28] ss:$16 sps:$4 sm:$0xff]  }
 0x357   :  { %6280 = vmatprep.subr.bf16.mxu1 %v12233_v61  ;;  %v12260_v61 = vld [vmem:[%s12892_s14 + $0x4c] ss:$16 sps:$4 sm:$0xff]   ;;  %v12294_v11 = vld [vmem:[%s12892_s14 + $0x108] ss:$16 sps:$4 sm:$0xff]  }
 0x359   :  { %6726 = vmatpush1.bf16.msra.mxu0 %v12255_v12  ;;  %v12302_v12 = vld [vmem:[%s12892_s14 + $0x12c] ss:$16 sps:$4 sm:$0xff]  }
 0x35a   :  { %6281 = vmatpush1.bf16.msra.mxu1 %v12231_v63  ;;  %6727 = vmatprep.subr.bf16.mxu0 %v12263_v14  ;;  %v12258_v63 = vld [vmem:[%s12892_s14 + $0x48] ss:$16 sps:$4 sm:$0xff]  }
 0x35b   :  { %6282 = vmatprep.subr.bf16.mxu1 %v12236_v0  ;;  %v12266_v0 = vld [vmem:[%s12892_s14 + $0x6c] ss:$16 sps:$4 sm:$0xff]   ;;  %v12300_v14 = vld [vmem:[%s12892_s14 + $0x128] ss:$16 sps:$4 sm:$0xff]  }
 0x35d   :  { %6728 = vmatpush1.bf16.msra.mxu0 %v12261_v15  ;;  %v12308_v15 = vld [vmem:[%s12892_s14 + $0x14c] ss:$16 sps:$4 sm:$0xff]  }
 0x35e   :  { %6283 = vmatpush1.bf16.msra.mxu1 %v12234_v1  ;;  %6729 = vmatprep.subr.bf16.mxu0 %v12269_v16  ;;  %v12264_v1 = vld [vmem:[%s12892_s14 + $0x68] ss:$16 sps:$4 sm:$0xff]  }
 0x35f   :  { %6284 = vmatprep.subr.bf16.mxu1 %v12239_v47  ;;  %v12272_v47 = vld [vmem:[%s12892_s14 + $0x8c] ss:$16 sps:$4 sm:$0xff]   ;;  %v12306_v16 = vld [vmem:[%s12892_s14 + $0x148] ss:$16 sps:$4 sm:$0xff]  }
 0x361   :  { %6730 = vmatpush1.bf16.msra.mxu0 %v12267_v62  ;;  %v12314_v62 = vld [vmem:[%s12892_s14 + $0x16c] ss:$16 sps:$4 sm:$0xff]  }
 0x362   :  { %6285 = vmatpush1.bf16.msra.mxu1 %v12237_v2  ;;  %6731 = vmatprep.subr.bf16.mxu0 %v12275_v17  ;;  %v12270_v2 = vld [vmem:[%s12892_s14 + $0x88] ss:$16 sps:$4 sm:$0xff]  }
 0x363   :  { %6286 = vmatprep.subr.bf16.mxu1 %v12242_v3  ;;  %v12278_v3 = vld [vmem:[%s12892_s14 + $0xac] ss:$16 sps:$4 sm:$0xff]   ;;  %v12312_v17 = vld [vmem:[%s12892_s14 + $0x168] ss:$16 sps:$4 sm:$0xff]  }
 0x365   :  { %6732 = vmatpush1.bf16.msra.mxu0 %v12273_v18  ;;  %v12320_v18 = vld [vmem:[%s12892_s14 + $0x18c] ss:$16 sps:$4 sm:$0xff]  }
 0x366   :  { %6287 = vmatpush1.bf16.msra.mxu1 %v12240_v4  ;;  %6733 = vmatprep.subr.bf16.mxu0 %v12281_v19  ;;  %v12276_v4 = vld [vmem:[%s12892_s14 + $0xa8] ss:$16 sps:$4 sm:$0xff]  }
 0x367   :  { %6762 = vmatprep.subr.bf16.mxu1 %v12248_v7  ;;  %v12290_v7 = vld [vmem:[%s12892_s14 + $0xec] ss:$16 sps:$4 sm:$0xff]   ;;  %v12318_v19 = vld [vmem:[%s12892_s14 + $0x188] ss:$16 sps:$4 sm:$0xff]  }
 0x369   :  { %6734 = vmatpush1.bf16.msra.mxu0 %v12279_v20  ;;  %v12326_v20 = vld [vmem:[%s12892_s14 + $0x1ac] ss:$16 sps:$4 sm:$0xff]  }
 0x36a   :  { %6735 = vmatprep.subr.bf16.mxu0 %v12287_v8  ;;  %v12324_v8 = vld [vmem:[%s12892_s14 + $0x1a8] ss:$16 sps:$4 sm:$0xff]  }
 0x36d   :  { %6736 = vmatpush1.bf16.msra.mxu0 %v12285_v22  ;;  %v12332_v22 = vld [vmem:[%s12892_s14 + $0x1cc] ss:$16 sps:$4 sm:$0xff]  }
 0x36e   :  { %6737 = vmatprep.subr.bf16.mxu0 %v12293_v24  ;;  %v12330_v24 = vld [vmem:[%s12892_s14 + $0x1c8] ss:$16 sps:$4 sm:$0xff]  }
 0x371   :  { %6738 = vmatpush1.bf16.msra.mxu0 %v12291_v6  ;;  %v12335_v6 = vld [vmem:[%s12892_s14 + $0x1e4] ss:$16 sps:$4 sm:$0xff]  }
 0x372   :  { %6739 = vmatprep.subr.bf16.mxu0 %v12299_v23  ;;  %v12338_v23 = vld [vmem:[%s12892_s14 + $0x1ec] ss:$16 sps:$4 sm:$0xff]  }
 0x375   :  { %6740 = vmatpush1.bf16.msra.mxu0 %v12297_v9  ;;  %v12333_v9 = vld [vmem:[%s12892_s14 + $0x1e0] ss:$16 sps:$4 sm:$0xff]  }
 0x376   :  { %6741 = vmatprep.subr.bf16.mxu0 %v12305_v49  ;;  %v12336_v49 = vld [vmem:[%s12892_s14 + $0x1e8] ss:$16 sps:$4 sm:$0xff]   ;;  %s14463_s14 = sld [smem:[#allocation14_spill]] }
 0x379   :  { %6742 = vmatpush1.bf16.msra.mxu0 %v12303_v27  ;;  %v12341_v27 = vld [vmem:[%s12907_s30 + $0x4] ss:$16 sps:$4 sm:$0xff]  }
 0x37a   :  { %6743 = vmatprep.subr.bf16.mxu0 %v12311_v29  ;;  %v12344_v29 = vld [vmem:[%s12907_s30 + $0x204] ss:$16 sps:$4 sm:$0xff]  }
 0x37d   :  { %6744 = vmatpush1.bf16.msra.mxu0 %v12309_v30  ;;  %v6180_v30 = vld [vmem:[%s12887_s8] sm:$0x3]  ;;  %s14462_s8 = sld [smem:[#allocation13_spill]] }
 0x37e   :  { %6745 = vmatprep.subr.bf16.mxu0 %v12317_v31  ;;  %v14014_v31 = vsub.s32 0, %v13043_v43 }
 0x381   :  { %6746 = vmatpush1.bf16.msra.mxu0 %v12315_v13  ;;  %v14017_v13 = vsub.s32 1, %v13043_v43 }
 0x382   :  { %6747 = vmatprep.subr.bf16.mxu0 %v12323_v33  ;;  %v6185_v33 = vrot.slane %v6180_v30, %v14014_v31 }
 0x385   :  { %6748 = vmatpush1.bf16.msra.mxu0 %v12321_v34  ;;  %v6189_v34 = vrot.slane %v6180_v30, %v14017_v13  ;;  %v12407_v30 = vld [vmem:[%s12907_s30 + $0x164] ss:$16 sps:$4 sm:$0xff]  }
 0x386   :  { %6749 = vmatprep.subr.bf16.mxu0 %v12329_v35 }
 0x389   :  { %6750 = vmatpush1.bf16.msra.mxu0 %v12327_v21 }
 0x38a   :  { %6751 = vmatprep.subr.bf16.mxu0 %v12335_v6  ;;  %v12393_v6 = vld [vmem:[%s12907_s30 + $0x120] ss:$16 sps:$4 sm:$0xff]  }
 0x38d   :  { %6752 = vmatpush1.bf16.msra.mxu0 %v12333_v9  ;;  %v12401_v9 = vld [vmem:[%s12907_s30 + $0x144] ss:$16 sps:$4 sm:$0xff]  }
 0x38e   :  { %7707 = vmatprep.subr.bf16.mxu0 %v12341_v27  ;;  %v12399_v27 = vld [vmem:[%s12907_s30 + $0x140] ss:$16 sps:$4 sm:$0xff]  }
 0x41b   :  { %v13968_v39 = vpop.f32.mrb[0].mxu0  ;;  %v6094_v28 = vpop.f32.mrb[0].mxu1 }
 0x41c   :  { %v13970_v41 = vadd.f32 %v6094_v28, %v1102_v38  ;;  %v13972_v44 = vpop.f32.mrb[1].mxu0  ;;  %v13974_v45 = vpop.f32.mrb[1].mxu1 }
 0x41d   :  { %v5565_v25 = vpop.f32.mrb[2].mxu0  ;;  %v6098_v46 = vpop.f32.mrb[2].mxu1 }
 0x41e   :  { %v5566_v48 = vpop.f32.mrb[3].mxu0  ;;  %v6099_v50 = vpop.f32.mrb[3].mxu1 }
 0x41f   :  { %v12339_v50 = vld [vmem:[%s12907_s30] ss:$16 sps:$4 sm:$0xff]  }
 0x423   :  { %v6157_v52 = vpop.f32.mrb[4].mxu0 }
 0x424   :  { %v6158_v53 = vadd.f32 %v10388_v32, %v6157_v52  ;;  %v10859_v54 = vpop.f32.mrb[5].mxu0  ;;  %v12342_v32 = vld [vmem:[%s12907_s30 + $0x200] ss:$16 sps:$4 sm:$0xff]  }
 0x425   :  { %v6160_v55 = vpop.f32.mrb[6].mxu0  ;;  %v12350_v54 = vld [vmem:[%s12907_s30 + $0x224] ss:$16 sps:$4 sm:$0xff]  }
 0x426   :  { %v6163_v57 = vpack.c.bf16 %v6158_v53, %v6158_v53  ;;  %v10860_v40 = vpop.f32.mrb[7].mxu0  ;;  %v12347_v53 = vld [vmem:[%s12907_s30 + $0x24] ss:$16 sps:$4 sm:$0xff]   ;;  %v12345_v55 = vld [vmem:[%s12907_s30 + $0x20] ss:$16 sps:$4 sm:$0xff]  }
 0x427   :  { %v12356_v40 = vld [vmem:[%s12907_s30 + $0x244] ss:$16 sps:$4 sm:$0xff]  }
 0x428   :  { %6305 = vmatmul.mubr.bf16.vlgmr.msra.gmra.mrb[4].mxu1 %v6163_v57  ;;  %v12353_v57 = vld [vmem:[%s12907_s30 + $0x44] ss:$16 sps:$4 sm:$0xff]  }
 0x429   :  { %6763 = vmatpush1.bf16.msra.mxu1 %v12246_v42  ;;  %v12348_v42 = vld [vmem:[%s12907_s30 + $0x220] ss:$16 sps:$4 sm:$0xff]  }
 0x42a   :  { %6764 = vmatprep.subr.bf16.mxu1 %v12254_v59  ;;  %v12351_v59 = vld [vmem:[%s12907_s30 + $0x40] ss:$16 sps:$4 sm:$0xff]  }
 0x42d   :  { %6765 = vmatpush1.bf16.msra.mxu1 %v12252_v60  ;;  %v12354_v60 = vld [vmem:[%s12907_s30 + $0x240] ss:$16 sps:$4 sm:$0xff]  }
 0x42e   :  { %6766 = vmatprep.subr.bf16.mxu1 %v12260_v61  ;;  %v12359_v61 = vld [vmem:[%s12907_s30 + $0x64] ss:$16 sps:$4 sm:$0xff]  }
 0x431   :  { %6767 = vmatpush1.bf16.msra.mxu1 %v12258_v63  ;;  %v12362_v63 = vld [vmem:[%s12907_s30 + $0x264] ss:$16 sps:$4 sm:$0xff]  }
 0x432   :  { %6768 = vmatprep.subr.bf16.mxu1 %v12266_v0  ;;  %v12357_v0 = vld [vmem:[%s12907_s30 + $0x60] ss:$16 sps:$4 sm:$0xff]  }
 0x435   :  { %6769 = vmatpush1.bf16.msra.mxu1 %v12264_v1  ;;  %v12360_v1 = vld [vmem:[%s12907_s30 + $0x260] ss:$16 sps:$4 sm:$0xff]  }
 0x436   :  { %6770 = vmatprep.subr.bf16.mxu1 %v12272_v47  ;;  %v12365_v47 = vld [vmem:[%s12907_s30 + $0x84] ss:$16 sps:$4 sm:$0xff]  }
 0x439   :  { %6771 = vmatpush1.bf16.msra.mxu1 %v12270_v2  ;;  %v12368_v2 = vld [vmem:[%s12907_s30 + $0x284] ss:$16 sps:$4 sm:$0xff]  }
 0x43a   :  { %6772 = vmatprep.subr.bf16.mxu1 %v12278_v3  ;;  %v12363_v3 = vld [vmem:[%s12907_s30 + $0x80] ss:$16 sps:$4 sm:$0xff]  }
 0x43d   :  { %6773 = vmatpush1.bf16.msra.mxu1 %v12276_v4  ;;  %v12366_v4 = vld [vmem:[%s12907_s30 + $0x280] ss:$16 sps:$4 sm:$0xff]  }
 0x43e   :  { %6774 = vmatprep.subr.bf16.mxu1 %v12284_v5  ;;  %v12371_v5 = vld [vmem:[%s12907_s30 + $0xa4] ss:$16 sps:$4 sm:$0xff]  }
 0x441   :  { %6775 = vmatpush1.bf16.msra.mxu1 %v12282_v58  ;;  %v12374_v58 = vld [vmem:[%s12907_s30 + $0x2a4] ss:$16 sps:$4 sm:$0xff]  }
 0x442   :  { %6776 = vmatprep.subr.bf16.mxu1 %v12290_v7  ;;  %v12369_v7 = vld [vmem:[%s12907_s30 + $0xa0] ss:$16 sps:$4 sm:$0xff]  }
 0x445   :  { %6777 = vmatpush1.bf16.msra.mxu1 %v12288_v56  ;;  %v12372_v56 = vld [vmem:[%s12907_s30 + $0x2a0] ss:$16 sps:$4 sm:$0xff]  }
 0x446   :  { %6778 = vmatprep.subr.bf16.mxu1 %v12296_v10  ;;  %v12377_v10 = vld [vmem:[%s12907_s30 + $0xc4] ss:$16 sps:$4 sm:$0xff]  }
 0x449   :  { %6779 = vmatpush1.bf16.msra.mxu1 %v12294_v11  ;;  %v12380_v11 = vld [vmem:[%s12907_s30 + $0x2c4] ss:$16 sps:$4 sm:$0xff]  }
 0x44a   :  { %6780 = vmatprep.subr.bf16.mxu1 %v12302_v12  ;;  %v12375_v12 = vld [vmem:[%s12907_s30 + $0xc0] ss:$16 sps:$4 sm:$0xff]  }
 0x44d   :  { %6781 = vmatpush1.bf16.msra.mxu1 %v12300_v14  ;;  %v12378_v14 = vld [vmem:[%s12907_s30 + $0x2c0] ss:$16 sps:$4 sm:$0xff]  }
 0x44e   :  { %6782 = vmatprep.subr.bf16.mxu1 %v12308_v15  ;;  %v12383_v15 = vld [vmem:[%s12907_s30 + $0xe4] ss:$16 sps:$4 sm:$0xff]  }
 0x451   :  { %6783 = vmatpush1.bf16.msra.mxu1 %v12306_v16  ;;  %v12386_v16 = vld [vmem:[%s12907_s30 + $0x2e4] ss:$16 sps:$4 sm:$0xff]  }
 0x452   :  { %6784 = vmatprep.subr.bf16.mxu1 %v12314_v62  ;;  %v12381_v62 = vld [vmem:[%s12907_s30 + $0xe0] ss:$16 sps:$4 sm:$0xff]  }
 0x455   :  { %6785 = vmatpush1.bf16.msra.mxu1 %v12312_v17  ;;  %v12384_v17 = vld [vmem:[%s12907_s30 + $0x2e0] ss:$16 sps:$4 sm:$0xff]  }
 0x456   :  { %6786 = vmatprep.subr.bf16.mxu1 %v12320_v18  ;;  %v12389_v18 = vld [vmem:[%s12907_s30 + $0x104] ss:$16 sps:$4 sm:$0xff]  }
 0x459   :  { %6787 = vmatpush1.bf16.msra.mxu1 %v12318_v19  ;;  %v12392_v19 = vld [vmem:[%s12907_s30 + $0x304] ss:$16 sps:$4 sm:$0xff]  }
 0x45a   :  { %6788 = vmatprep.subr.bf16.mxu1 %v12326_v20  ;;  %v12387_v20 = vld [vmem:[%s12907_s30 + $0x100] ss:$16 sps:$4 sm:$0xff]  }
 0x45d   :  { %6789 = vmatpush1.bf16.msra.mxu1 %v12324_v8  ;;  %v12390_v8 = vld [vmem:[%s12907_s30 + $0x300] ss:$16 sps:$4 sm:$0xff]  }
 0x45e   :  { %6790 = vmatprep.subr.bf16.mxu1 %v12332_v22  ;;  %v12395_v22 = vld [vmem:[%s12907_s30 + $0x124] ss:$16 sps:$4 sm:$0xff]  }
 0x461   :  { %6791 = vmatpush1.bf16.msra.mxu1 %v12330_v24  ;;  %v12398_v24 = vld [vmem:[%s12907_s30 + $0x324] ss:$16 sps:$4 sm:$0xff]  }
 0x462   :  { %6792 = vmatprep.subr.bf16.mxu1 %v12338_v23  ;;  %v12396_v23 = vld [vmem:[%s12907_s30 + $0x320] ss:$16 sps:$4 sm:$0xff]  }
 0x465   :  { %6793 = vmatpush1.bf16.msra.mxu1 %v12336_v49  ;;  %v12404_v49 = vld [vmem:[%s12907_s30 + $0x344] ss:$16 sps:$4 sm:$0xff]  }
 0x466   :  { %7748 = vmatprep.subr.bf16.mxu1 %v12344_v29  ;;  %v12402_v29 = vld [vmem:[%s12907_s30 + $0x340] ss:$16 sps:$4 sm:$0xff]  }
 0x4fb   :  { %v6306_v35 = vpop.f32.mrb[4].mxu1 }
 0x4fc   :  { %v6307_v21 = vadd.f32 %v6306_v35, %v6185_v33  ;;  %v6308_v38 = vpop.f32.mrb[5].mxu1  ;;  %v12410_v33 = vld [vmem:[%s12907_s30 + $0x364] ss:$16 sps:$4 sm:$0xff]   ;;  %v12408_v35 = vld [vmem:[%s12907_s30 + $0x360] ss:$16 sps:$4 sm:$0xff]  }
 0x4fd   :  { %v6309_v28 = vadd.f32 %v6308_v38, %v6189_v34  ;;  %v6310_v25 = vpop.f32.mrb[6].mxu1  ;;  %v12405_v34 = vld [vmem:[%s12907_s30 + $0x160] ss:$16 sps:$4 sm:$0xff]   ;;  %v12416_v38 = vld [vmem:[%s12907_s30 + $0x384] ss:$16 sps:$4 sm:$0xff]  }
 0x4fe   :  { %v6311_v46 = vpop.f32.mrb[7].mxu1  ;;  %v6313_v52 = vpack.c.bf16 %v6307_v21, %v6307_v21  ;;  %v12413_v21 = vld [vmem:[%s12907_s30 + $0x184] ss:$16 sps:$4 sm:$0xff]   ;;  %v12414_v25 = vld [vmem:[%s12907_s30 + $0x380] ss:$16 sps:$4 sm:$0xff]  }
 0x4ff   :  { %v6314_v48 = vpack.c.bf16 %v6309_v28, %v6309_v28  ;;  %v12411_v28 = vld [vmem:[%s12907_s30 + $0x180] ss:$16 sps:$4 sm:$0xff]   ;;  %v12419_v46 = vld [vmem:[%s12907_s30 + $0x1a4] ss:$16 sps:$4 sm:$0xff]  }
 0x501   :  { %6753 = vmatprep.mubr.bf16.mxu0 %v6314_v48  ;;  %6794 = vmatprep.mubr.bf16.mxu1 %v6314_v48  ;;  %v12422_v48 = vld [vmem:[%s12907_s30 + $0x3a4] ss:$16 sps:$4 sm:$0xff]  }
 0x502   :  { %6754 = vmatmul.mubr.bf16.vlgmr.msra.gmra.mrb[8].mxu0 %v6313_v52  ;;  %6795 = vmatmul.mubr.bf16.vlgmr.msra.gmra.mrb[8].mxu1 %v6313_v52  ;;  %v12425_v52 = vld [vmem:[%s12907_s30 + $0x1c4] ss:$16 sps:$4 sm:$0xff]  }
 0x503   :  { %7708 = vmatpush1.bf16.msra.mxu0 %v12339_v50  ;;  %7749 = vmatpush1.bf16.msra.mxu1 %v12342_v32  ;;  %v12417_v50 = vld [vmem:[%s12907_s30 + $0x1a0] ss:$16 sps:$4 sm:$0xff]  }
 0x504   :  { %7709 = vmatprep.subr.bf16.mxu0 %v12347_v53  ;;  %7750 = vmatprep.subr.bf16.mxu1 %v12350_v54  ;;  %v12420_v32 = vld [vmem:[%s12907_s30 + $0x3a0] ss:$16 sps:$4 sm:$0xff]   ;;  %v12428_v53 = vld [vmem:[%s12907_s30 + $0x3c4] ss:$16 sps:$4 sm:$0xff]  }
 0x505   :  { %v12423_v54 = vld [vmem:[%s12907_s30 + $0x1c0] ss:$16 sps:$4 sm:$0xff]  }
 0x507   :  { %7710 = vmatpush1.bf16.msra.mxu0 %v12345_v55  ;;  %7751 = vmatpush1.bf16.msra.mxu1 %v12348_v42  ;;  %v12426_v55 = vld [vmem:[%s12907_s30 + $0x3c0] ss:$16 sps:$4 sm:$0xff]   ;;  %v12431_v42 = vld [vmem:[%s12907_s30 + $0x1e4] ss:$16 sps:$4 sm:$0xff]  }
 0x508   :  { %7711 = vmatprep.subr.bf16.mxu0 %v12353_v57  ;;  %7752 = vmatprep.subr.bf16.mxu1 %v12356_v40  ;;  %v12434_v57 = vld [vmem:[%s12907_s30 + $0x3e4] ss:$16 sps:$4 sm:$0xff]   ;;  %v12429_v40 = vld [vmem:[%s12907_s30 + $0x1e0] ss:$16 sps:$4 sm:$0xff]  }
 0x50b   :  { %7712 = vmatpush1.bf16.msra.mxu0 %v12351_v59  ;;  %7753 = vmatpush1.bf16.msra.mxu1 %v12354_v60  ;;  %v12432_v59 = vld [vmem:[%s12907_s30 + $0x3e0] ss:$16 sps:$4 sm:$0xff]   ;;  %v12437_v60 = vld [vmem:[%s12907_s30 + $0xc] ss:$16 sps:$4 sm:$0xff]  }
 0x50c   :  { %7713 = vmatprep.subr.bf16.mxu0 %v12359_v61  ;;  %7754 = vmatprep.subr.bf16.mxu1 %v12362_v63  ;;  %v12440_v61 = vld [vmem:[%s12907_s30 + $0x20c] ss:$16 sps:$4 sm:$0xff]   ;;  %v6379_v63 = vld [vmem:[%s12897_s19] sm:$0xf]  ;;  %s14464_s19 = sld [smem:[#allocation15_spill]] }
 0x50f   :  { %7714 = vmatpush1.bf16.msra.mxu0 %v12357_v0  ;;  %7755 = vmatpush1.bf16.msra.mxu1 %v12360_v1  ;;  %v14087_v0 = vsub.s32 3, %v13043_v43  ;;  %v6384_v1 = vrot.slane %v6379_v63, %v14014_v31 }
 0x510   :  { %7715 = vmatprep.subr.bf16.mxu0 %v12365_v47  ;;  %7756 = vmatprep.subr.bf16.mxu1 %v12368_v2  ;;  %v6392_v47 = vrot.slane %v6379_v63, %v13961_v26  ;;  %v6388_v2 = vrot.slane %v6379_v63, %v14017_v13 }
 0x513   :  { %7716 = vmatpush1.bf16.msra.mxu0 %v12363_v3  ;;  %7757 = vmatpush1.bf16.msra.mxu1 %v12366_v4  ;;  %v6396_v3 = vrot.slane %v6379_v63, %v14087_v0  ;;  %v12483_v63 = vld [vmem:[%s12907_s30 + $0x108] ss:$16 sps:$4 sm:$0xff]  }
 0x514   :  { %7717 = vmatprep.subr.bf16.mxu0 %v12371_v5  ;;  %7758 = vmatprep.subr.bf16.mxu1 %v12374_v58 }
 0x517   :  { %7718 = vmatpush1.bf16.msra.mxu0 %v12369_v7  ;;  %7759 = vmatpush1.bf16.msra.mxu1 %v12372_v56 }
 0x518   :  { %7719 = vmatprep.subr.bf16.mxu0 %v12377_v10  ;;  %7760 = vmatprep.subr.bf16.mxu1 %v12380_v11 }
 0x51b   :  { %7720 = vmatpush1.bf16.msra.mxu0 %v12375_v12  ;;  %7761 = vmatpush1.bf16.msra.mxu1 %v12378_v14 }
 0x51c   :  { %7721 = vmatprep.subr.bf16.mxu0 %v12383_v15  ;;  %7762 = vmatprep.subr.bf16.mxu1 %v12386_v16 }
 0x51f   :  { %7722 = vmatpush1.bf16.msra.mxu0 %v12381_v62  ;;  %7763 = vmatpush1.bf16.msra.mxu1 %v12384_v17 }
 0x520   :  { %7723 = vmatprep.subr.bf16.mxu0 %v12389_v18  ;;  %7764 = vmatprep.subr.bf16.mxu1 %v12392_v19  ;;  %v12435_v18 = vld [vmem:[%s12907_s30 + $0x8] ss:$16 sps:$4 sm:$0xff]  }
 0x521   :  { %v12438_v19 = vld [vmem:[%s12907_s30 + $0x208] ss:$16 sps:$4 sm:$0xff]  }
 0x523   :  { %7724 = vmatpush1.bf16.msra.mxu0 %v12387_v20  ;;  %7765 = vmatpush1.bf16.msra.mxu1 %v12390_v8 }
 0x524   :  { %7725 = vmatprep.subr.bf16.mxu0 %v12395_v22  ;;  %7766 = vmatprep.subr.bf16.mxu1 %v12398_v24  ;;  %v12443_v22 = vld [vmem:[%s12907_s30 + $0x2c] ss:$16 sps:$4 sm:$0xff]  }
 0x525   :  { %v12446_v24 = vld [vmem:[%s12907_s30 + $0x22c] ss:$16 sps:$4 sm:$0xff]  }
 0x527   :  { %7726 = vmatpush1.bf16.msra.mxu0 %v12393_v6  ;;  %7767 = vmatpush1.bf16.msra.mxu1 %v12396_v23  ;;  %v12441_v6 = vld [vmem:[%s12907_s30 + $0x28] ss:$16 sps:$4 sm:$0xff]  }
 0x528   :  { %7727 = vmatprep.subr.bf16.mxu0 %v12401_v9  ;;  %7768 = vmatprep.subr.bf16.mxu1 %v12404_v49  ;;  %v12444_v23 = vld [vmem:[%s12907_s30 + $0x228] ss:$16 sps:$4 sm:$0xff]   ;;  %v12449_v9 = vld [vmem:[%s12907_s30 + $0x4c] ss:$16 sps:$4 sm:$0xff]  }
 0x529   :  { %v12452_v49 = vld [vmem:[%s12907_s30 + $0x24c] ss:$16 sps:$4 sm:$0xff]  }
 0x52b   :  { %7728 = vmatpush1.bf16.msra.mxu0 %v12399_v27  ;;  %7769 = vmatpush1.bf16.msra.mxu1 %v12402_v29  ;;  %v12447_v27 = vld [vmem:[%s12907_s30 + $0x48] ss:$16 sps:$4 sm:$0xff]  }
 0x52c   :  { %7729 = vmatprep.subr.bf16.mxu0 %v12407_v30  ;;  %7770 = vmatprep.subr.bf16.mxu1 %v12410_v33  ;;  %v12450_v29 = vld [vmem:[%s12907_s30 + $0x248] ss:$16 sps:$4 sm:$0xff]   ;;  %v12455_v30 = vld [vmem:[%s12907_s30 + $0x6c] ss:$16 sps:$4 sm:$0xff]  }
 0x52d   :  { %v12458_v33 = vld [vmem:[%s12907_s30 + $0x26c] ss:$16 sps:$4 sm:$0xff]  }
 0x52f   :  { %7730 = vmatpush1.bf16.msra.mxu0 %v12405_v34  ;;  %7771 = vmatpush1.bf16.msra.mxu1 %v12408_v35  ;;  %v12453_v34 = vld [vmem:[%s12907_s30 + $0x68] ss:$16 sps:$4 sm:$0xff]  }
 0x530   :  { %7731 = vmatprep.subr.bf16.mxu0 %v12413_v21  ;;  %7772 = vmatprep.subr.bf16.mxu1 %v12416_v38  ;;  %v12456_v35 = vld [vmem:[%s12907_s30 + $0x268] ss:$16 sps:$4 sm:$0xff]   ;;  %v12461_v21 = vld [vmem:[%s12907_s30 + $0x8c] ss:$16 sps:$4 sm:$0xff]  }
 0x531   :  { %v12464_v38 = vld [vmem:[%s12907_s30 + $0x28c] ss:$16 sps:$4 sm:$0xff]  }
 0x533   :  { %7732 = vmatpush1.bf16.msra.mxu0 %v12411_v28  ;;  %7773 = vmatpush1.bf16.msra.mxu1 %v12414_v25  ;;  %v12459_v28 = vld [vmem:[%s12907_s30 + $0x88] ss:$16 sps:$4 sm:$0xff]  }
 0x534   :  { %7733 = vmatprep.subr.bf16.mxu0 %v12419_v46  ;;  %7774 = vmatprep.subr.bf16.mxu1 %v12422_v48  ;;  %v12462_v25 = vld [vmem:[%s12907_s30 + $0x288] ss:$16 sps:$4 sm:$0xff]   ;;  %v12467_v46 = vld [vmem:[%s12907_s30 + $0xac] ss:$16 sps:$4 sm:$0xff]  }
 0x535   :  { %v12470_v48 = vld [vmem:[%s12907_s30 + $0x2ac] ss:$16 sps:$4 sm:$0xff]  }
 0x537   :  { %7734 = vmatpush1.bf16.msra.mxu0 %v12417_v50  ;;  %7775 = vmatpush1.bf16.msra.mxu1 %v12420_v32  ;;  %v12465_v50 = vld [vmem:[%s12907_s30 + $0xa8] ss:$16 sps:$4 sm:$0xff]  }
 0x538   :  { %7735 = vmatprep.subr.bf16.mxu0 %v12425_v52  ;;  %7776 = vmatprep.subr.bf16.mxu1 %v12428_v53  ;;  %v12468_v32 = vld [vmem:[%s12907_s30 + $0x2a8] ss:$16 sps:$4 sm:$0xff]   ;;  %v12473_v52 = vld [vmem:[%s12907_s30 + $0xcc] ss:$16 sps:$4 sm:$0xff]  }
 0x539   :  { %v12476_v53 = vld [vmem:[%s12907_s30 + $0x2cc] ss:$16 sps:$4 sm:$0xff]  }
 0x53b   :  { %7736 = vmatpush1.bf16.msra.mxu0 %v12423_v54  ;;  %7777 = vmatpush1.bf16.msra.mxu1 %v12426_v55  ;;  %v12471_v54 = vld [vmem:[%s12907_s30 + $0xc8] ss:$16 sps:$4 sm:$0xff]  }
 0x53c   :  { %7737 = vmatprep.subr.bf16.mxu0 %v12431_v42  ;;  %7778 = vmatprep.subr.bf16.mxu1 %v12434_v57  ;;  %v12474_v55 = vld [vmem:[%s12907_s30 + $0x2c8] ss:$16 sps:$4 sm:$0xff]   ;;  %v12479_v42 = vld [vmem:[%s12907_s30 + $0xec] ss:$16 sps:$4 sm:$0xff]  }
 0x53d   :  { %v12482_v57 = vld [vmem:[%s12907_s30 + $0x2ec] ss:$16 sps:$4 sm:$0xff]  }
 0x53f   :  { %7738 = vmatpush1.bf16.msra.mxu0 %v12429_v40  ;;  %7779 = vmatpush1.bf16.msra.mxu1 %v12432_v59  ;;  %v12477_v40 = vld [vmem:[%s12907_s30 + $0xe8] ss:$16 sps:$4 sm:$0xff]  }
 0x540   :  { %7789 = vmatprep.subr.bf16.mxu0 %v12437_v60  ;;  %7830 = vmatprep.subr.bf16.mxu1 %v12440_v61  ;;  %v12480_v59 = vld [vmem:[%s12907_s30 + $0x2e8] ss:$16 sps:$4 sm:$0xff]   ;;  %v12485_v60 = vld [vmem:[%s12907_s30 + $0x10c] ss:$16 sps:$4 sm:$0xff]  }
 0x541   :  { %v12488_v61 = vld [vmem:[%s12907_s30 + $0x30c] ss:$16 sps:$4 sm:$0xff]  }
 0x5d5   :  { %v6755_v4 = vpop.f32.mrb[8].mxu0  ;;  %v6796_v5 = vpop.f32.mrb[8].mxu1 }
 0x5d6   :  { %v6756_v58 = vadd.f32 %v6755_v4, %v6384_v1  ;;  %v6797_v7 = vadd.f32 %v6796_v5, %v6392_v47  ;;  %v6757_v56 = vpop.f32.mrb[9].mxu0  ;;  %v6798_v10 = vpop.f32.mrb[9].mxu1  ;;  %v12486_v1 = vld [vmem:[%s12907_s30 + $0x308] ss:$16 sps:$4 sm:$0xff]   ;;  %v12491_v47 = vld [vmem:[%s12907_s30 + $0x12c] ss:$16 sps:$4 sm:$0xff]  }
 0x5d7   :  { %v6758_v43 = vadd.f32 %v6757_v56, %v6388_v2  ;;  %v6799_v11 = vadd.f32 %v6798_v10, %v6396_v3  ;;  %v6759_v12 = vpop.f32.mrb[10].mxu0  ;;  %v6800_v14 = vpop.f32.mrb[10].mxu1  ;;  %v12494_v2 = vld [vmem:[%s12907_s30 + $0x32c] ss:$16 sps:$4 sm:$0xff]   ;;  %v12489_v3 = vld [vmem:[%s12907_s30 + $0x128] ss:$16 sps:$4 sm:$0xff]  }
 0x5d8   :  { %v6760_v15 = vpop.f32.mrb[11].mxu0  ;;  %v6801_v16 = vpop.f32.mrb[11].mxu1  ;;  %v14095_v20 = vpack.c.bf16 %v6756_v58, %v6756_v58  ;;  %v14097_v8 = vpack.c.bf16 %v6797_v7, %v6797_v7  ;;  %v12492_v4 = vld [vmem:[%s12907_s30 + $0x328] ss:$16 sps:$4 sm:$0xff]   ;;  %v12497_v5 = vld [vmem:[%s12907_s30 + $0x14c] ss:$16 sps:$4 sm:$0xff]  }
 0x5d9   :  { %v6936_v62 = vpack.c.bf16 %v6758_v43, %v6758_v43  ;;  %v6938_v17 = vpack.c.bf16 %v6799_v11, %v6799_v11  ;;  %v12500_v58 = vld [vmem:[%s12907_s30 + $0x34c] ss:$16 sps:$4 sm:$0xff]   ;;  %v12495_v7 = vld [vmem:[%s12907_s30 + $0x148] ss:$16 sps:$4 sm:$0xff]  }
 0x5da   :  { %v12498_v56 = vld [vmem:[%s12907_s30 + $0x348] ss:$16 sps:$4 sm:$0xff]   ;;  %v12503_v10 = vld [vmem:[%s12907_s30 + $0x16c] ss:$16 sps:$4 sm:$0xff]  }
 0x5db   :  { %7739 = vmatprep.mubr.bf16.mxu0 %v6936_v62  ;;  %7780 = vmatprep.mubr.bf16.mxu1 %v6938_v17  ;;  %v12506_v43 = vld [vmem:[%s12907_s30 + $0x36c] ss:$16 sps:$4 sm:$0xff]   ;;  %v12501_v11 = vld [vmem:[%s12907_s30 + $0x168] ss:$16 sps:$4 sm:$0xff]  }
 0x5dc   :  { %7740 = vmatmul.mubr.bf16.vlgmr.msra.gmra.mrb[12].mxu0 %v14095_v20  ;;  %7781 = vmatmul.mubr.bf16.vlgmr.msra.gmra.mrb[12].mxu1 %v14097_v8  ;;  %v12504_v12 = vld [vmem:[%s12907_s30 + $0x368] ss:$16 sps:$4 sm:$0xff]   ;;  %v12509_v14 = vld [vmem:[%s12907_s30 + $0x18c] ss:$16 sps:$4 sm:$0xff]  }
 0x5dd   :  { %7790 = vmatpush1.bf16.msra.mxu0 %v12435_v18  ;;  %7831 = vmatpush1.bf16.msra.mxu1 %v12438_v19  ;;  %v12512_v15 = vld [vmem:[%s12907_s30 + $0x38c] ss:$16 sps:$4 sm:$0xff]   ;;  %v12507_v16 = vld [vmem:[%s12907_s30 + $0x188] ss:$16 sps:$4 sm:$0xff]  }
 0x5de   :  { %7821 = vmatprep.mubr.bf16.mxu0 %v6936_v62  ;;  %7862 = vmatprep.mubr.bf16.mxu1 %v6938_v17  ;;  %v12510_v62 = vld [vmem:[%s12907_s30 + $0x388] ss:$16 sps:$4 sm:$0xff]   ;;  %v12515_v17 = vld [vmem:[%s12907_s30 + $0x1ac] ss:$16 sps:$4 sm:$0xff]  }
 0x5df   :  { %7791 = vmatprep.subr.bf16.mxu0 %v12443_v22  ;;  %7832 = vmatprep.subr.bf16.mxu1 %v12446_v24  ;;  %v12518_v18 = vld [vmem:[%s12907_s30 + $0x3ac] ss:$16 sps:$4 sm:$0xff]   ;;  %v12513_v19 = vld [vmem:[%s12907_s30 + $0x1a8] ss:$16 sps:$4 sm:$0xff]  }
 0x5e0   :  { %v12516_v22 = vld [vmem:[%s12907_s30 + $0x3a8] ss:$16 sps:$4 sm:$0xff]   ;;  %v12521_v24 = vld [vmem:[%s12907_s30 + $0x1cc] ss:$16 sps:$4 sm:$0xff]  }
 0x5e1   :  { %7792 = vmatpush1.bf16.msra.mxu0 %v12441_v6  ;;  %7833 = vmatpush1.bf16.msra.mxu1 %v12444_v23  ;;  %v12524_v6 = vld [vmem:[%s12907_s30 + $0x3cc] ss:$16 sps:$4 sm:$0xff]   ;;  %v1098_v23 = vrot.slane %v13964_v36, %v14017_v13 }
 0x5e2   :  { %7793 = vmatprep.subr.bf16.mxu0 %v12449_v9  ;;  %7834 = vmatprep.subr.bf16.mxu1 %v12452_v49  ;;  %v1106_v9 = vrot.slane %v13964_v36, %v14087_v0  ;;  %v12519_v49 = vld [vmem:[%s12907_s30 + $0x1c8] ss:$16 sps:$4 sm:$0xff]  }
 0x5e5   :  { %7794 = vmatpush1.bf16.msra.mxu0 %v12447_v27  ;;  %7835 = vmatpush1.bf16.msra.mxu1 %v12450_v29  ;;  %v12522_v27 = vld [vmem:[%s12907_s30 + $0x3c8] ss:$16 sps:$4 sm:$0xff]   ;;  %v12527_v29 = vld [vmem:[%s12907_s30 + $0x1ec] ss:$16 sps:$4 sm:$0xff]  }
 0x5e6   :  { %7795 = vmatprep.subr.bf16.mxu0 %v12455_v30  ;;  %7836 = vmatprep.subr.bf16.mxu1 %v12458_v33  ;;  %v12530_v30 = vld [vmem:[%s12907_s30 + $0x3ec] ss:$16 sps:$4 sm:$0xff]   ;;  %v10902_v33 = vadd.f32 %v13972_v44, %v1098_v23  ;;  %v12531_v44 = vld [vmem:[%s12902_s24] ss:$16 sps:$4 sm:$0xff]   ;;  %v12596_v23 = vld [vmem:[%s12902_s24 + $0x344] ss:$16 sps:$4 sm:$0xff]  }
 0x5e9   :  { %7796 = vmatpush1.bf16.msra.mxu0 %v12453_v34  ;;  %7837 = vmatpush1.bf16.msra.mxu1 %v12456_v35  ;;  %v10904_v34 = vadd.f32 %v13974_v45, %v1106_v9  ;;  %v12525_v35 = vld [vmem:[%s12907_s30 + $0x1e8] ss:$16 sps:$4 sm:$0xff]   ;;  %v12534_v45 = vld [vmem:[%s12902_s24 + $0x200] ss:$16 sps:$4 sm:$0xff]  }
 0x5ea   :  { %7797 = vmatprep.subr.bf16.mxu0 %v12461_v21  ;;  %7838 = vmatprep.subr.bf16.mxu1 %v12464_v38  ;;  %v12528_v21 = vld [vmem:[%s12907_s30 + $0x3e8] ss:$16 sps:$4 sm:$0xff]   ;;  %v12533_v38 = vld [vmem:[%s12902_s24 + $0x4] ss:$16 sps:$4 sm:$0xff]   ;;  %v12591_v9 = vld [vmem:[%s12902_s24 + $0x140] ss:$16 sps:$4 sm:$0xff]  }
 0x5eb   :  { %s14466_s30 = sld [smem:[#allocation18_spill]] }
 0x5ed   :  { %7798 = vmatpush1.bf16.msra.mxu0 %v12459_v28  ;;  %7839 = vmatpush1.bf16.msra.mxu1 %v12462_v25  ;;  %v12536_v28 = vld [vmem:[%s12902_s24 + $0x204] ss:$16 sps:$4 sm:$0xff]   ;;  %v6102_v25 = vmax.f32 %v10902_v33, 0.0  ;;  %v12600_v33 = vld [vmem:[%s12902_s24 + $0x360] ss:$16 sps:$4 sm:$0xff]  }
 0x5ee   :  { %7799 = vmatprep.subr.bf16.mxu0 %v12467_v46  ;;  %7840 = vmatprep.subr.bf16.mxu1 %v12470_v48  ;;  %v6104_v46 = vmax.f32 %v10904_v34, 0.0  ;;  %v12605_v34 = vld [vmem:[%s12902_s24 + $0x184] ss:$16 sps:$4 sm:$0xff]  }
 0x5ef   :  { %v14171_v48 = vpack.c.bf16 %v6102_v25, %v6102_v25  ;;  %v12614_v25 = vld [vmem:[%s12902_s24 + $0x3a4] ss:$16 sps:$4 sm:$0xff]  }
 0x5f1   :  { %7800 = vmatpush1.bf16.msra.mxu0 %v12465_v50  ;;  %7841 = vmatpush1.bf16.msra.mxu1 %v12468_v32  ;;  %v12539_v50 = vld [vmem:[%s12902_s24 + $0x24] ss:$16 sps:$4 sm:$0xff]  }
 0x5f2   :  { %7801 = vmatprep.subr.bf16.mxu0 %v12473_v52  ;;  %7842 = vmatprep.subr.bf16.mxu1 %v12476_v53  ;;  %v12542_v32 = vld [vmem:[%s12902_s24 + $0x224] ss:$16 sps:$4 sm:$0xff]   ;;  %v14175_v52 = vpack.c.bf16 %v6104_v46, %v6104_v46  ;;  %v12537_v53 = vld [vmem:[%s12902_s24 + $0x20] ss:$16 sps:$4 sm:$0xff]  }
 0x5f3   :  { %v12609_v46 = vld [vmem:[%s12902_s24 + $0x1a0] ss:$16 sps:$4 sm:$0xff]  }
 0x5f5   :  { %7802 = vmatpush1.bf16.msra.mxu0 %v12471_v54  ;;  %7843 = vmatpush1.bf16.msra.mxu1 %v12474_v55  ;;  %v12540_v54 = vld [vmem:[%s12902_s24 + $0x220] ss:$16 sps:$4 sm:$0xff]   ;;  %v12545_v55 = vld [vmem:[%s12902_s24 + $0x44] ss:$16 sps:$4 sm:$0xff]  }
 0x5f6   :  { %7803 = vmatprep.subr.bf16.mxu0 %v12479_v42  ;;  %7844 = vmatprep.subr.bf16.mxu1 %v12482_v57  ;;  %v12546_v42 = vld [vmem:[%s12902_s24 + $0x240] ss:$16 sps:$4 sm:$0xff]   ;;  %v12551_v57 = vld [vmem:[%s12902_s24 + $0x64] ss:$16 sps:$4 sm:$0xff]  }
 0x5f9   :  { %7804 = vmatpush1.bf16.msra.mxu0 %v12477_v40  ;;  %7845 = vmatpush1.bf16.msra.mxu1 %v12480_v59  ;;  %v12554_v40 = vld [vmem:[%s12902_s24 + $0x264] ss:$16 sps:$4 sm:$0xff]   ;;  %v12549_v59 = vld [vmem:[%s12902_s24 + $0x60] ss:$16 sps:$4 sm:$0xff]  }
 0x5fa   :  { %7805 = vmatprep.subr.bf16.mxu0 %v12485_v60  ;;  %7846 = vmatprep.subr.bf16.mxu1 %v12488_v61  ;;  %v12552_v60 = vld [vmem:[%s12902_s24 + $0x260] ss:$16 sps:$4 sm:$0xff]   ;;  %v12557_v61 = vld [vmem:[%s12902_s24 + $0x84] ss:$16 sps:$4 sm:$0xff]  }
 0x5fd   :  { %7806 = vmatpush1.bf16.msra.mxu0 %v12483_v63  ;;  %7847 = vmatpush1.bf16.msra.mxu1 %v12486_v1  ;;  %v12560_v63 = vld [vmem:[%s12902_s24 + $0x284] ss:$16 sps:$4 sm:$0xff]   ;;  %v12555_v1 = vld [vmem:[%s12902_s24 + $0x80] ss:$16 sps:$4 sm:$0xff]  }
 0x5fe   :  { %7807 = vmatprep.subr.bf16.mxu0 %v12491_v47  ;;  %7848 = vmatprep.subr.bf16.mxu1 %v12494_v2  ;;  %v12558_v47 = vld [vmem:[%s12902_s24 + $0x280] ss:$16 sps:$4 sm:$0xff]   ;;  %v12563_v2 = vld [vmem:[%s12902_s24 + $0xa4] ss:$16 sps:$4 sm:$0xff]  }
 0x601   :  { %7808 = vmatpush1.bf16.msra.mxu0 %v12489_v3  ;;  %7849 = vmatpush1.bf16.msra.mxu1 %v12492_v4  ;;  %v12566_v3 = vld [vmem:[%s12902_s24 + $0x2a4] ss:$16 sps:$4 sm:$0xff]   ;;  %v12561_v4 = vld [vmem:[%s12902_s24 + $0xa0] ss:$16 sps:$4 sm:$0xff]  }
 0x602   :  { %7809 = vmatprep.subr.bf16.mxu0 %v12497_v5  ;;  %7850 = vmatprep.subr.bf16.mxu1 %v12500_v58  ;;  %v12564_v5 = vld [vmem:[%s12902_s24 + $0x2a0] ss:$16 sps:$4 sm:$0xff]   ;;  %v12569_v58 = vld [vmem:[%s12902_s24 + $0xc4] ss:$16 sps:$4 sm:$0xff]  }
 0x605   :  { %7810 = vmatpush1.bf16.msra.mxu0 %v12495_v7  ;;  %7851 = vmatpush1.bf16.msra.mxu1 %v12498_v56  ;;  %v12572_v7 = vld [vmem:[%s12902_s24 + $0x2c4] ss:$16 sps:$4 sm:$0xff]   ;;  %v12567_v56 = vld [vmem:[%s12902_s24 + $0xc0] ss:$16 sps:$4 sm:$0xff]  }
 0x606   :  { %7811 = vmatprep.subr.bf16.mxu0 %v12503_v10  ;;  %7852 = vmatprep.subr.bf16.mxu1 %v12506_v43  ;;  %v12570_v10 = vld [vmem:[%s12902_s24 + $0x2c0] ss:$16 sps:$4 sm:$0xff]   ;;  %v12575_v43 = vld [vmem:[%s12902_s24 + $0xe4] ss:$16 sps:$4 sm:$0xff]  }
 0x609   :  { %7812 = vmatpush1.bf16.msra.mxu0 %v12501_v11  ;;  %7853 = vmatpush1.bf16.msra.mxu1 %v12504_v12  ;;  %v12578_v11 = vld [vmem:[%s12902_s24 + $0x2e4] ss:$16 sps:$4 sm:$0xff]   ;;  %v12573_v12 = vld [vmem:[%s12902_s24 + $0xe0] ss:$16 sps:$4 sm:$0xff]  }
 0x60a   :  { %7813 = vmatprep.subr.bf16.mxu0 %v12509_v14  ;;  %7854 = vmatprep.subr.bf16.mxu1 %v12512_v15  ;;  %v12576_v14 = vld [vmem:[%s12902_s24 + $0x2e0] ss:$16 sps:$4 sm:$0xff]   ;;  %v12581_v15 = vld [vmem:[%s12902_s24 + $0x104] ss:$16 sps:$4 sm:$0xff]  }
 0x60d   :  { %7814 = vmatpush1.bf16.msra.mxu0 %v12507_v16  ;;  %7855 = vmatpush1.bf16.msra.mxu1 %v12510_v62  ;;  %v12584_v16 = vld [vmem:[%s12902_s24 + $0x304] ss:$16 sps:$4 sm:$0xff]   ;;  %v12579_v62 = vld [vmem:[%s12902_s24 + $0x100] ss:$16 sps:$4 sm:$0xff]  }
 0x60e   :  { %7815 = vmatprep.subr.bf16.mxu0 %v12515_v17  ;;  %7856 = vmatprep.subr.bf16.mxu1 %v12518_v18  ;;  %v12582_v17 = vld [vmem:[%s12902_s24 + $0x300] ss:$16 sps:$4 sm:$0xff]   ;;  %v12587_v18 = vld [vmem:[%s12902_s24 + $0x124] ss:$16 sps:$4 sm:$0xff]  }
 0x611   :  { %7816 = vmatpush1.bf16.msra.mxu0 %v12513_v19  ;;  %7857 = vmatpush1.bf16.msra.mxu1 %v12516_v22  ;;  %v12590_v19 = vld [vmem:[%s12902_s24 + $0x324] ss:$16 sps:$4 sm:$0xff]   ;;  %v12585_v22 = vld [vmem:[%s12902_s24 + $0x120] ss:$16 sps:$4 sm:$0xff]  }
 0x612   :  { %7817 = vmatprep.subr.bf16.mxu0 %v12521_v24  ;;  %7858 = vmatprep.subr.bf16.mxu1 %v12524_v6  ;;  %v12588_v24 = vld [vmem:[%s12902_s24 + $0x320] ss:$16 sps:$4 sm:$0xff]   ;;  %v12593_v6 = vld [vmem:[%s12902_s24 + $0x144] ss:$16 sps:$4 sm:$0xff]  }
 0x615   :  { %7818 = vmatpush1.bf16.msra.mxu0 %v12519_v49  ;;  %7859 = vmatpush1.bf16.msra.mxu1 %v12522_v27  ;;  %v12594_v49 = vld [vmem:[%s12902_s24 + $0x340] ss:$16 sps:$4 sm:$0xff]   ;;  %v12599_v27 = vld [vmem:[%s12902_s24 + $0x164] ss:$16 sps:$4 sm:$0xff]  }
 0x616   :  { %7819 = vmatprep.subr.bf16.mxu0 %v12527_v29  ;;  %7860 = vmatprep.subr.bf16.mxu1 %v12530_v30  ;;  %v12602_v29 = vld [vmem:[%s12902_s24 + $0x364] ss:$16 sps:$4 sm:$0xff]   ;;  %v12597_v30 = vld [vmem:[%s12902_s24 + $0x160] ss:$16 sps:$4 sm:$0xff]  }
 0x619   :  { %7820 = vmatpush1.bf16.msra.mxu0 %v12525_v35  ;;  %7861 = vmatpush1.bf16.msra.mxu1 %v12528_v21  ;;  %v12608_v35 = vld [vmem:[%s12902_s24 + $0x384] ss:$16 sps:$4 sm:$0xff]   ;;  %v12603_v21 = vld [vmem:[%s12902_s24 + $0x180] ss:$16 sps:$4 sm:$0xff]  }
 0x61a   :  { %8511 = vmatprep.subr.bf16.mxu0 %v12533_v38  ;;  %8552 = vmatprep.subr.bf16.mxu1 %v12536_v28  ;;  %v12606_v38 = vld [vmem:[%s12902_s24 + $0x380] ss:$16 sps:$4 sm:$0xff]   ;;  %v12611_v28 = vld [vmem:[%s12902_s24 + $0x1a4] ss:$16 sps:$4 sm:$0xff]  }
 0x61c   :  { %7822 = vmatmul.mubr.bf16.vlgmr.msra.gmra.mrb[16].mxu0 %v14095_v20  ;;  %7863 = vmatmul.mubr.bf16.vlgmr.msra.gmra.mrb[16].mxu1 %v14097_v8  ;;  %v12548_v20 = vld [vmem:[%s12902_s24 + $0x244] ss:$16 sps:$4 sm:$0xff]   ;;  %v12543_v8 = vld [vmem:[%s12902_s24 + $0x40] ss:$16 sps:$4 sm:$0xff]  }
 0x61d   :  { %8512 = vmatpush1.bf16.msra.mxu0 %v12531_v44  ;;  %8543 = vmatprep.mubr.bf16.mxu0 %v14171_v48  ;;  %v1094_v44 = vrot.slane %v13964_v36, %v14014_v31  ;;  %v12626_v36 = vld [vmem:[%s12902_s24 + $0x3e4] ss:$16 sps:$4 sm:$0xff]  }
 0x61e   :  { %8553 = vmatpush1.bf16.msra.mxu1 %v12534_v45  ;;  %8584 = vmatprep.mubr.bf16.mxu1 %v14175_v52  ;;  %v12612_v45 = vld [vmem:[%s12902_s24 + $0x3a0] ss:$16 sps:$4 sm:$0xff]  }
 0x61f   :  { %8513 = vmatprep.subr.bf16.mxu0 %v12539_v50  ;;  %8554 = vmatprep.subr.bf16.mxu1 %v12542_v32  ;;  %v12617_v50 = vld [vmem:[%s12902_s24 + $0x1c4] ss:$16 sps:$4 sm:$0xff]  }
 0x620   :  { %v12620_v32 = vld [vmem:[%s12902_s24 + $0x3c4] ss:$16 sps:$4 sm:$0xff]  }
 0x621   :  { %8514 = vmatpush1.bf16.msra.mxu0 %v12537_v53  ;;  %v12615_v53 = vld [vmem:[%s12902_s24 + $0x1c0] ss:$16 sps:$4 sm:$0xff]  }
 0x622   :  { %8555 = vmatpush1.bf16.msra.mxu1 %v12540_v54  ;;  %8515 = vmatprep.subr.bf16.mxu0 %v12545_v55  ;;  %v10901_v54 = vadd.f32 %v13968_v39, %v1094_v44  ;;  %v12618_v55 = vld [vmem:[%s12902_s24 + $0x3c0] ss:$16 sps:$4 sm:$0xff]   ;;  %v6103_v39 = vmax.f32 %v13970_v41, 0.0  ;;  %v12638_v41 = vld [vmem:[%s12902_s24 + $0x22c] ss:$16 sps:$4 sm:$0xff]  }
 0x623   :  { %8556 = vmatprep.subr.bf16.mxu1 %v12548_v20  ;;  %v12623_v20 = vld [vmem:[%s12902_s24 + $0x1e4] ss:$16 sps:$4 sm:$0xff]   ;;  %v12690_v44 = vld [vmem:[%s12902_s24 + $0x348] ss:$16 sps:$4 sm:$0xff]  }
 0x625   :  { %8516 = vmatpush1.bf16.msra.mxu0 %v12543_v8  ;;  %v12621_v8 = vld [vmem:[%s12902_s24 + $0x1e0] ss:$16 sps:$4 sm:$0xff]  }
 0x626   :  { %8557 = vmatpush1.bf16.msra.mxu1 %v12546_v42  ;;  %8517 = vmatprep.subr.bf16.mxu0 %v12551_v57  ;;  %v6101_v42 = vmax.f32 %v10901_v54, 0.0  ;;  %v12624_v57 = vld [vmem:[%s12902_s24 + $0x3e0] ss:$16 sps:$4 sm:$0xff]   ;;  %v12701_v54 = vld [vmem:[%s12902_s24 + $0x18c] ss:$16 sps:$4 sm:$0xff]  }
 0x627   :  { %8558 = vmatprep.subr.bf16.mxu1 %v12554_v40  ;;  %v12629_v40 = vld [vmem:[%s12902_s24 + $0xc] ss:$16 sps:$4 sm:$0xff]  }
 0x629   :  { %8518 = vmatpush1.bf16.msra.mxu0 %v12549_v59  ;;  %v12632_v59 = vld [vmem:[%s12902_s24 + $0x20c] ss:$16 sps:$4 sm:$0xff]  }
 0x62a   :  { %8559 = vmatpush1.bf16.msra.mxu1 %v12552_v60  ;;  %8519 = vmatprep.subr.bf16.mxu0 %v12557_v61  ;;  %v12627_v60 = vld [vmem:[%s12902_s24 + $0x8] ss:$16 sps:$4 sm:$0xff]   ;;  %v14246_v61 = vpack.c.bf16 %v6101_v42, %v6101_v42  ;;  %v12710_v42 = vld [vmem:[%s12902_s24 + $0x3ac] ss:$16 sps:$4 sm:$0xff]  }
 0x62b   :  { %8560 = vmatprep.subr.bf16.mxu1 %v12560_v63  ;;  %v12630_v63 = vld [vmem:[%s12902_s24 + $0x208] ss:$16 sps:$4 sm:$0xff]  }
 0x62d   :  { %8520 = vmatpush1.bf16.msra.mxu0 %v12555_v1  ;;  %v14249_v1 = vpack.c.bf16 %v6103_v39, %v6103_v39  ;;  %v12713_v39 = vld [vmem:[%s12902_s24 + $0x1cc] ss:$16 sps:$4 sm:$0xff]  }
 0x62e   :  { %8561 = vmatpush1.bf16.msra.mxu1 %v12558_v47  ;;  %8521 = vmatprep.subr.bf16.mxu0 %v12563_v2  ;;  %v12635_v47 = vld [vmem:[%s12902_s24 + $0x2c] ss:$16 sps:$4 sm:$0xff]   ;;  %v12633_v2 = vld [vmem:[%s12902_s24 + $0x28] ss:$16 sps:$4 sm:$0xff]  }
 0x62f   :  { %8562 = vmatprep.subr.bf16.mxu1 %v12566_v3  ;;  %v12636_v3 = vld [vmem:[%s12902_s24 + $0x228] ss:$16 sps:$4 sm:$0xff]  }
 0x631   :  { %8522 = vmatpush1.bf16.msra.mxu0 %v12561_v4  ;;  %v12641_v4 = vld [vmem:[%s12902_s24 + $0x4c] ss:$16 sps:$4 sm:$0xff]  }
 0x632   :  { %8563 = vmatpush1.bf16.msra.mxu1 %v12564_v5  ;;  %8523 = vmatprep.subr.bf16.mxu0 %v12569_v58  ;;  %v12644_v5 = vld [vmem:[%s12902_s24 + $0x24c] ss:$16 sps:$4 sm:$0xff]   ;;  %v12639_v58 = vld [vmem:[%s12902_s24 + $0x48] ss:$16 sps:$4 sm:$0xff]  }
 0x633   :  { %8564 = vmatprep.subr.bf16.mxu1 %v12572_v7  ;;  %v12642_v7 = vld [vmem:[%s12902_s24 + $0x248] ss:$16 sps:$4 sm:$0xff]  }
 0x635   :  { %8524 = vmatpush1.bf16.msra.mxu0 %v12567_v56  ;;  %v12650_v56 = vld [vmem:[%s12902_s24 + $0x26c] ss:$16 sps:$4 sm:$0xff]  }
 0x636   :  { %8565 = vmatpush1.bf16.msra.mxu1 %v12570_v10  ;;  %8525 = vmatprep.subr.bf16.mxu0 %v12575_v43  ;;  %v12648_v10 = vld [vmem:[%s12902_s24 + $0x268] ss:$16 sps:$4 sm:$0xff]   ;;  %v12653_v43 = vld [vmem:[%s12902_s24 + $0x8c] ss:$16 sps:$4 sm:$0xff]  }
 0x637   :  { %8566 = vmatprep.subr.bf16.mxu1 %v12578_v11  ;;  %v12656_v11 = vld [vmem:[%s12902_s24 + $0x28c] ss:$16 sps:$4 sm:$0xff]  }
 0x639   :  { %8526 = vmatpush1.bf16.msra.mxu0 %v12573_v12  ;;  %v12651_v12 = vld [vmem:[%s12902_s24 + $0x88] ss:$16 sps:$4 sm:$0xff]  }
 0x63a   :  { %8567 = vmatpush1.bf16.msra.mxu1 %v12576_v14  ;;  %8527 = vmatprep.subr.bf16.mxu0 %v12581_v15  ;;  %v12654_v14 = vld [vmem:[%s12902_s24 + $0x288] ss:$16 sps:$4 sm:$0xff]   ;;  %v12659_v15 = vld [vmem:[%s12902_s24 + $0xac] ss:$16 sps:$4 sm:$0xff]  }
 0x63b   :  { %8568 = vmatprep.subr.bf16.mxu1 %v12584_v16  ;;  %v12662_v16 = vld [vmem:[%s12902_s24 + $0x2ac] ss:$16 sps:$4 sm:$0xff]  }
 0x63d   :  { %8528 = vmatpush1.bf16.msra.mxu0 %v12579_v62  ;;  %v12657_v62 = vld [vmem:[%s12902_s24 + $0xa8] ss:$16 sps:$4 sm:$0xff]  }
 0x63e   :  { %8569 = vmatpush1.bf16.msra.mxu1 %v12582_v17  ;;  %8529 = vmatprep.subr.bf16.mxu0 %v12587_v18  ;;  %v12660_v17 = vld [vmem:[%s12902_s24 + $0x2a8] ss:$16 sps:$4 sm:$0xff]   ;;  %v12665_v18 = vld [vmem:[%s12902_s24 + $0xcc] ss:$16 sps:$4 sm:$0xff]  }
 0x63f   :  { %8570 = vmatprep.subr.bf16.mxu1 %v12590_v19  ;;  %v12668_v19 = vld [vmem:[%s12902_s24 + $0x2cc] ss:$16 sps:$4 sm:$0xff]  }
 0x641   :  { %8530 = vmatpush1.bf16.msra.mxu0 %v12585_v22  ;;  %v12663_v22 = vld [vmem:[%s12902_s24 + $0xc8] ss:$16 sps:$4 sm:$0xff]  }
 0x642   :  { %8571 = vmatpush1.bf16.msra.mxu1 %v12588_v24  ;;  %8531 = vmatprep.subr.bf16.mxu0 %v12593_v6  ;;  %v12666_v24 = vld [vmem:[%s12902_s24 + $0x2c8] ss:$16 sps:$4 sm:$0xff]   ;;  %v12671_v6 = vld [vmem:[%s12902_s24 + $0xec] ss:$16 sps:$4 sm:$0xff]  }
 0x643   :  { %8572 = vmatprep.subr.bf16.mxu1 %v12596_v23  ;;  %v12674_v23 = vld [vmem:[%s12902_s24 + $0x2ec] ss:$16 sps:$4 sm:$0xff]  }
 0x645   :  { %8532 = vmatpush1.bf16.msra.mxu0 %v12591_v9  ;;  %v12669_v9 = vld [vmem:[%s12902_s24 + $0xe8] ss:$16 sps:$4 sm:$0xff]  }
 0x646   :  { %8573 = vmatpush1.bf16.msra.mxu1 %v12594_v49  ;;  %8533 = vmatprep.subr.bf16.mxu0 %v12599_v27  ;;  %v12672_v49 = vld [vmem:[%s12902_s24 + $0x2e8] ss:$16 sps:$4 sm:$0xff]   ;;  %v12677_v27 = vld [vmem:[%s12902_s24 + $0x10c] ss:$16 sps:$4 sm:$0xff]  }
 0x647   :  { %8574 = vmatprep.subr.bf16.mxu1 %v12602_v29  ;;  %v12680_v29 = vld [vmem:[%s12902_s24 + $0x30c] ss:$16 sps:$4 sm:$0xff]  }
 0x649   :  { %8534 = vmatpush1.bf16.msra.mxu0 %v12597_v30  ;;  %v12675_v30 = vld [vmem:[%s12902_s24 + $0x108] ss:$16 sps:$4 sm:$0xff]  }
 0x64a   :  { %8575 = vmatpush1.bf16.msra.mxu1 %v12600_v33  ;;  %8535 = vmatprep.subr.bf16.mxu0 %v12605_v34  ;;  %v12678_v33 = vld [vmem:[%s12902_s24 + $0x308] ss:$16 sps:$4 sm:$0xff]   ;;  %v12683_v34 = vld [vmem:[%s12902_s24 + $0x12c] ss:$16 sps:$4 sm:$0xff]  }
 0x64b   :  { %8576 = vmatprep.subr.bf16.mxu1 %v12608_v35  ;;  %v12686_v35 = vld [vmem:[%s12902_s24 + $0x32c] ss:$16 sps:$4 sm:$0xff]  }
 0x64d   :  { %8536 = vmatpush1.bf16.msra.mxu0 %v12603_v21  ;;  %v12681_v21 = vld [vmem:[%s12902_s24 + $0x128] ss:$16 sps:$4 sm:$0xff]  }
 0x64e   :  { %8577 = vmatpush1.bf16.msra.mxu1 %v12606_v38  ;;  %8537 = vmatprep.subr.bf16.mxu0 %v12611_v28  ;;  %v12684_v38 = vld [vmem:[%s12902_s24 + $0x328] ss:$16 sps:$4 sm:$0xff]   ;;  %v12689_v28 = vld [vmem:[%s12902_s24 + $0x14c] ss:$16 sps:$4 sm:$0xff]  }
 0x64f   :  { %8578 = vmatprep.subr.bf16.mxu1 %v12614_v25  ;;  %v12692_v25 = vld [vmem:[%s12902_s24 + $0x34c] ss:$16 sps:$4 sm:$0xff]  }
 0x651   :  { %8538 = vmatpush1.bf16.msra.mxu0 %v12609_v46  ;;  %v12687_v46 = vld [vmem:[%s12902_s24 + $0x148] ss:$16 sps:$4 sm:$0xff]  }
 0x652   :  { %8579 = vmatpush1.bf16.msra.mxu1 %v12612_v45  ;;  %8539 = vmatprep.subr.bf16.mxu0 %v12617_v50  ;;  %v12695_v45 = vld [vmem:[%s12902_s24 + $0x16c] ss:$16 sps:$4 sm:$0xff]  }
 0x653   :  { %8580 = vmatprep.subr.bf16.mxu1 %v12620_v32  ;;  %v12698_v50 = vld [vmem:[%s12902_s24 + $0x36c] ss:$16 sps:$4 sm:$0xff]   ;;  %v12693_v32 = vld [vmem:[%s12902_s24 + $0x168] ss:$16 sps:$4 sm:$0xff]  }
 0x655   :  { %8540 = vmatpush1.bf16.msra.mxu0 %v12615_v53  ;;  %v12696_v53 = vld [vmem:[%s12902_s24 + $0x368] ss:$16 sps:$4 sm:$0xff]  }
 0x656   :  { %8581 = vmatpush1.bf16.msra.mxu1 %v12618_v55  ;;  %8541 = vmatprep.subr.bf16.mxu0 %v12623_v20  ;;  %v12704_v55 = vld [vmem:[%s12902_s24 + $0x38c] ss:$16 sps:$4 sm:$0xff]   ;;  %v12699_v20 = vld [vmem:[%s12902_s24 + $0x188] ss:$16 sps:$4 sm:$0xff]  }
 0x657   :  { %8582 = vmatprep.subr.bf16.mxu1 %v12626_v36  ;;  %v12702_v36 = vld [vmem:[%s12902_s24 + $0x388] ss:$16 sps:$4 sm:$0xff]  }
 0x659   :  { %8542 = vmatpush1.bf16.msra.mxu0 %v12621_v8  ;;  %v12707_v8 = vld [vmem:[%s12902_s24 + $0x1ac] ss:$16 sps:$4 sm:$0xff]  }
 0x65a   :  { %8583 = vmatpush1.bf16.msra.mxu1 %v12624_v57  ;;  %8593 = vmatprep.subr.bf16.mxu0 %v12629_v40  ;;  %v12705_v57 = vld [vmem:[%s12902_s24 + $0x1a8] ss:$16 sps:$4 sm:$0xff]  }
 0x65b   :  { %8634 = vmatprep.subr.bf16.mxu1 %v12632_v59  ;;  %v12708_v40 = vld [vmem:[%s12902_s24 + $0x3a8] ss:$16 sps:$4 sm:$0xff]   ;;  %v12716_v59 = vld [vmem:[%s12902_s24 + $0x3cc] ss:$16 sps:$4 sm:$0xff]  }
 0x65c   :  { %8544 = vmatmul.mubr.bf16.vlgmr.msra.gmra.mrb[20].mxu0 %v14246_v61 }
 0x65d   :  { %8585 = vmatmul.mubr.bf16.vlgmr.msra.gmra.mrb[20].mxu1 %v14249_v1  ;;  %8594 = vmatpush1.bf16.msra.mxu0 %v12627_v60  ;;  %v12711_v60 = vld [vmem:[%s12902_s24 + $0x1c8] ss:$16 sps:$4 sm:$0xff]  }
 0x65e   :  { %8625 = vmatprep.mubr.bf16.mxu0 %v14171_v48  ;;  %8635 = vmatpush1.bf16.msra.mxu1 %v12630_v63  ;;  %v12647_v48 = vld [vmem:[%s12902_s24 + $0x6c] ss:$16 sps:$4 sm:$0xff]   ;;  %v12714_v63 = vld [vmem:[%s12902_s24 + $0x3c8] ss:$16 sps:$4 sm:$0xff]  }
 0x65f   :  { %8666 = vmatprep.mubr.bf16.mxu1 %v14175_v52  ;;  %8595 = vmatprep.subr.bf16.mxu0 %v12635_v47  ;;  %v12645_v52 = vld [vmem:[%s12902_s24 + $0x68] ss:$16 sps:$4 sm:$0xff]   ;;  %v12719_v47 = vld [vmem:[%s12902_s24 + $0x1ec] ss:$16 sps:$4 sm:$0xff]  }
 0x660   :  { %8636 = vmatprep.subr.bf16.mxu1 %v12638_v41  ;;  %v12722_v41 = vld [vmem:[%s12902_s24 + $0x3ec] ss:$16 sps:$4 sm:$0xff]  }
 0x661   :  { %8596 = vmatpush1.bf16.msra.mxu0 %v12633_v2  ;;  %v12717_v2 = vld [vmem:[%s12902_s24 + $0x1e8] ss:$16 sps:$4 sm:$0xff]  }
 0x662   :  { %8637 = vmatpush1.bf16.msra.mxu1 %v12636_v3  ;;  %8597 = vmatprep.subr.bf16.mxu0 %v12641_v4  ;;  %v12720_v3 = vld [vmem:[%s12902_s24 + $0x3e8] ss:$16 sps:$4 sm:$0xff]   ;;  %v12723_v4 = vld [vmem:[%s12912_s6 + $0x4] ss:$16 sps:$4 sm:$0x1f]   ;;  %s14465_s24 = sld [smem:[#allocation17_spill]] }
 0x663   :  { %8638 = vmatprep.subr.bf16.mxu1 %v12644_v5  ;;  %v12725_v5 = vld [vmem:[%s12912_s6] ss:$16 sps:$4 sm:$0x1f]  }
 0x665   :  { %8598 = vmatpush1.bf16.msra.mxu0 %v12639_v58  ;;  %v8703_v58 = vsel %vm8701_vm4, %v12725_v5, 0 }
 0x666   :  { %8639 = vmatpush1.bf16.msra.mxu1 %v12642_v7  ;;  %8599 = vmatprep.subr.bf16.mxu0 %v12647_v48  ;;  %v12726_v7 = vld [vmem:[%s12912_s6 + $0xc] ss:$16 sps:$4 sm:$0x1f]   ;;  %v8675_v48 = vld [vmem:[%s12857_s13] sm:$0x3]  ;;  %s14456_s13 = sld [smem:[#allocation7_spill]] }
 0x667   :  { %8640 = vmatprep.subr.bf16.mxu1 %v12650_v56  ;;  %v12728_v56 = vld [vmem:[%s12912_s6 + $0x8] ss:$16 sps:$4 sm:$0x1f]   ;;  %s12838_s6 = smov [#allocation2]  }
 0x669   :  { %8600 = vmatpush1.bf16.msra.mxu0 %v12645_v52  ;;  %v8676_v52 = vpack.c.bf16 %v8675_v48, %v8675_v48 }
 0x66a   :  { %8641 = vmatpush1.bf16.msra.mxu1 %v12648_v10  ;;  %8601 = vmatprep.subr.bf16.mxu0 %v12653_v43  ;;  %v8709_v10 = vsel %vm8701_vm4, %v12728_v56, 0 }
 0x66b   :  { %8642 = vmatprep.subr.bf16.mxu1 %v12656_v11 }
 0x66d   :  { %8602 = vmatpush1.bf16.msra.mxu0 %v12651_v12 }
 0x66e   :  { %8643 = vmatpush1.bf16.msra.mxu1 %v12654_v14  ;;  %8603 = vmatprep.subr.bf16.mxu0 %v12659_v15 }
 0x66f   :  { %8644 = vmatprep.subr.bf16.mxu1 %v12662_v16 }
 0x671   :  { %8604 = vmatpush1.bf16.msra.mxu0 %v12657_v62 }
 0x672   :  { %8645 = vmatpush1.bf16.msra.mxu1 %v12660_v17  ;;  %8605 = vmatprep.subr.bf16.mxu0 %v12665_v18  ;;  %v12729_v18 = vld [vmem:[%s14453_s0 + $0x40] sm:$0xff]  }
 0x673   :  { %8646 = vmatprep.subr.bf16.mxu1 %v12668_v19  ;;  %v12730_v19 = vld [vmem:[%s14453_s0] sm:$0xff]  }
 0x675   :  { %8606 = vmatpush1.bf16.msra.mxu0 %v12663_v22  ;;  %v12734_v22 = vld [vmem:[%s14453_s0 + $0xc0] sm:$0xff]  }
 0x676   :  { %8647 = vmatpush1.bf16.msra.mxu1 %v12666_v24  ;;  %8607 = vmatprep.subr.bf16.mxu0 %v12671_v6  ;;  %v12732_v24 = vld [vmem:[%s14453_s0 + $0x8] sm:$0xff]   ;;  %v12733_v6 = vld [vmem:[%s14453_s0 + $0x50] sm:$0xff]  }
 0x677   :  { %8648 = vmatprep.subr.bf16.mxu1 %v12674_v23 }
 0x679   :  { %8608 = vmatpush1.bf16.msra.mxu0 %v12669_v9 }
 0x67a   :  { %8649 = vmatpush1.bf16.msra.mxu1 %v12672_v49  ;;  %8609 = vmatprep.subr.bf16.mxu0 %v12677_v27  ;;  %v12735_v49 = vld [vmem:[%s14453_s0 + $0x10] sm:$0xff]   ;;  %v12736_v27 = vld [vmem:[%s14453_s0 + $0x80] sm:$0xff]  }
 0x67b   :  { %8650 = vmatprep.subr.bf16.mxu1 %v12680_v29 }
 0x67d   :  { %8610 = vmatpush1.bf16.msra.mxu0 %v12675_v30 }
 0x67e   :  { %8651 = vmatpush1.bf16.msra.mxu1 %v12678_v33  ;;  %8611 = vmatprep.subr.bf16.mxu0 %v12683_v34 }
 0x67f   :  { %8652 = vmatprep.subr.bf16.mxu1 %v12686_v35 }
 0x681   :  { %8612 = vmatpush1.bf16.msra.mxu0 %v12681_v21 }
 0x682   :  { %8653 = vmatpush1.bf16.msra.mxu1 %v12684_v38  ;;  %8613 = vmatprep.subr.bf16.mxu0 %v12689_v28 }
 0x683   :  { %8654 = vmatprep.subr.bf16.mxu1 %v12692_v25  ;;  %v12737_v25 = vld [vmem:[%s14453_s0 + $0x58] sm:$0xff]  }
 0x685   :  { %8614 = vmatpush1.bf16.msra.mxu0 %v12687_v46  ;;  %v12738_v46 = vld [vmem:[%s14453_s0 + $0xc8] sm:$0xff]  }
 0x686   :  { %8655 = vmatpush1.bf16.msra.mxu1 %v12690_v44  ;;  %8615 = vmatprep.subr.bf16.mxu0 %v12695_v45  ;;  %v12739_v44 = vld [vmem:[%s14453_s0 + $0x18] sm:$0xff]   ;;  %v12740_v45 = vld [vmem:[%s14453_s0 + $0x88] sm:$0xff]  }
 0x687   :  { %8656 = vmatprep.subr.bf16.mxu1 %v12698_v50  ;;  %v12741_v50 = vld [vmem:[%s14453_s0 + $0x60] sm:$0xff]  }
 0x689   :  { %8616 = vmatpush1.bf16.msra.mxu0 %v12693_v32  ;;  %v12742_v32 = vld [vmem:[%s14453_s0 + $0xd0] sm:$0xff]  }
 0x68a   :  { %8657 = vmatpush1.bf16.msra.mxu1 %v12696_v53  ;;  %8617 = vmatprep.subr.bf16.mxu0 %v12701_v54  ;;  %v12743_v53 = vld [vmem:[%s14453_s0 + $0x20] sm:$0xff]   ;;  %v12744_v54 = vld [vmem:[%s14453_s0 + $0x90] sm:$0xff]  }
 0x68b   :  { %8658 = vmatprep.subr.bf16.mxu1 %v12704_v55  ;;  %v12745_v55 = vld [vmem:[%s14453_s0 + $0x68] sm:$0xff]  }
 0x68d   :  { %8618 = vmatpush1.bf16.msra.mxu0 %v12699_v20  ;;  %v12746_v20 = vld [vmem:[%s14453_s0 + $0xd8] sm:$0xff]  }
 0x68e   :  { %8659 = vmatpush1.bf16.msra.mxu1 %v12702_v36  ;;  %8619 = vmatprep.subr.bf16.mxu0 %v12707_v8  ;;  %v12747_v36 = vld [vmem:[%s14453_s0 + $0x28] sm:$0xff]   ;;  %v12748_v8 = vld [vmem:[%s14453_s0 + $0x98] sm:$0xff]  }
 0x68f   :  { %8660 = vmatprep.subr.bf16.mxu1 %v12710_v42  ;;  %v12749_v42 = vld [vmem:[%s14453_s0 + $0x70] sm:$0xff]  }
 0x691   :  { %8620 = vmatpush1.bf16.msra.mxu0 %v12705_v57  ;;  %v12750_v57 = vld [vmem:[%s14453_s0 + $0xe0] sm:$0xff]  }
 0x692   :  { %8661 = vmatpush1.bf16.msra.mxu1 %v12708_v40  ;;  %8621 = vmatprep.subr.bf16.mxu0 %v12713_v39  ;;  %v12751_v40 = vld [vmem:[%s14453_s0 + $0x30] sm:$0xff]   ;;  %v12752_v39 = vld [vmem:[%s14453_s0 + $0xa0] sm:$0xff]  }
 0x693   :  { %8662 = vmatprep.subr.bf16.mxu1 %v12716_v59  ;;  %v12753_v59 = vld [vmem:[%s14453_s0 + $0x78] sm:$0xff]  }
 0x695   :  { %8622 = vmatpush1.bf16.msra.mxu0 %v12711_v60  ;;  %v12754_v60 = vld [vmem:[%s14453_s0 + $0xe8] sm:$0xff]  }
 0x696   :  { %8663 = vmatpush1.bf16.msra.mxu1 %v12714_v63  ;;  %8623 = vmatprep.subr.bf16.mxu0 %v12719_v47  ;;  %v12755_v63 = vld [vmem:[%s14453_s0 + $0x38] sm:$0xff]   ;;  %v12756_v47 = vld [vmem:[%s14453_s0 + $0xa8] sm:$0xff]  }
 0x697   :  { %8664 = vmatprep.subr.bf16.mxu1 %v12722_v41  ;;  %v12757_v41 = vld [vmem:[%s14453_s0 + $0xf0] sm:$0xff]  }
 0x699   :  { %8624 = vmatpush1.bf16.msra.mxu0 %v12717_v2  ;;  %v12758_v2 = vld [vmem:[%s14453_s0 + $0xb0] sm:$0xff]  }
 0x69a   :  { %8665 = vmatpush1.bf16.msra.mxu1 %v12720_v3  ;;  %10730 = vmatprep.subr.msk.bf16.mxu0 %vm8701_vm4, %v12723_v4  ;;  %v12759_v3 = vld [vmem:[%s14453_s0 + $0xf8] sm:$0xff]  }
 0x69b   :  { %10816 = vmatprep.subr.bf16.mxu1 %v12734_v22  ;;  %v12760_v4 = vld [vmem:[%s14453_s0 + $0xb8] sm:$0xff]  }
 0x69c   :  { %8626 = vmatmul.mubr.bf16.vlgmr.msra.gmra.mrb[24].mxu0 %v14246_v61 }
 0x69d   :  { %8667 = vmatmul.mubr.bf16.vlgmr.msra.gmra.mrb[24].mxu1 %v14249_v1  ;;  %8715 = vmatpush1.bf16.msra.mxu0 %v8703_v58 }
 0x69e   :  { %8746 = vmatprep.mubr.bf16.mxu0 %v12835_v37  ;;  %10732 = vmatprep.subr.msk.bf16.mxu0 %vm8701_vm4, %v12726_v7 }
 0x69f   :  { %10817 = vmatpush3.bf16.msra.mxu1 %v12736_v27 }
 0x6a0   :  { %10818 = vmatprep.subr.bf16.mxu1 %v12738_v46 }
 0x6a3   :  { %10819 = vmatpush3.bf16.msra.mxu1 %v12740_v45 }
 0x6a4   :  { %10731 = vmatmul.mubr.msk.bf16.vlgmr.msra.gmra.mrb[28].mxu0 %vm8697_vm5, %v8676_v52  ;;  %10820 = vmatprep.subr.bf16.mxu1 %v12742_v32 }
 0x6a5   :  { %8756 = vmatpush1.bf16.msra.mxu0 %v8709_v10  ;;  %8787 = vmatprep.mubr.bf16.mxu0 %v12835_v37  ;;  %v12731_v37 = vld [vmem:[%s14453_s0 + $0x48] sm:$0xff]  }
 0x6a6   :  { %10794 = vmatprep.subr.bf16.mxu0 %v12729_v18 }
 0x6a7   :  { %10821 = vmatpush3.bf16.msra.mxu1 %v12744_v54 }
 0x6a8   :  { %10822 = vmatprep.subr.bf16.mxu1 %v12746_v20 }
 0x6ab   :  { %10823 = vmatpush3.bf16.msra.mxu1 %v12748_v8 }
 0x6ac   :  { %10733 = vmatmul.mubr.msk.bf16.vlgmr.msra.gmra.mrb[32].mxu0 %vm8697_vm5, %v8676_v52  ;;  %10824 = vmatprep.subr.bf16.mxu1 %v12750_v57 }
 0x6ad   :  { %10795 = vmatpush3.bf16.msra.mxu0 %v12730_v19 }
 0x6ae   :  { %10796 = vmatprep.subr.bf16.mxu0 %v12731_v37 }
 0x6af   :  { %v7741_v61 = vpop.f32.mrb[12].mxu0  ;;  %v7782_v1 = vpop.f32.mrb[12].mxu1  ;;  %10825 = vmatpush3.bf16.msra.mxu1 %v12752_v39 }
 0x6b0   :  { %v14324_v43 = vadd.f32 %v7782_v1, %v7741_v61  ;;  %v7743_v11 = vpop.f32.mrb[13].mxu0  ;;  %v7784_v12 = vpop.f32.mrb[13].mxu1  ;;  %10826 = vmatprep.subr.bf16.mxu1 %v12754_v60 }
 0x6b1   :  { %v14326_v14 = vadd.f32 %v7784_v12, %v7743_v11  ;;  %v7745_v15 = vpop.f32.mrb[14].mxu0  ;;  %v7786_v16 = vpop.f32.mrb[14].mxu1  ;;  %10797 = vmatpush3.bf16.msra.mxu0 %v12732_v24 }
 0x6b2   :  { %v7746_v62 = vpop.f32.mrb[15].mxu0  ;;  %v7787_v17 = vpop.f32.mrb[15].mxu1  ;;  %10798 = vmatprep.subr.bf16.mxu0 %v12733_v6 }
 0x6b3   :  { %10827 = vmatpush3.bf16.msra.mxu1 %v12756_v47 }
 0x6b4   :  { %10828 = vmatprep.subr.bf16.mxu1 %v12757_v41 }
 0x6b5   :  { %10799 = vmatpush3.bf16.msra.mxu0 %v12735_v49 }
 0x6b6   :  { %10800 = vmatprep.subr.bf16.mxu0 %v12737_v25 }
 0x6b7   :  { %10829 = vmatpush3.bf16.msra.mxu1 %v12758_v2 }
 0x6b8   :  { %10830 = vmatprep.subr.bf16.mxu1 %v12759_v3 }
 0x6b9   :  { %10801 = vmatpush3.bf16.msra.mxu0 %v12739_v44 }
 0x6ba   :  { %10802 = vmatprep.subr.bf16.mxu0 %v12741_v50 }
 0x6bb   :  { %10831 = vmatpush3.bf16.msra.mxu1 %v12760_v4  ;;  %v12761_v4 = vld [vmem:[%s14457_s17] sm:$0xff]  }
 0x6bc   :  { %10881 = vmatprep.subr.bf16.mxu1 %v12836_v51 }
 0x6bd   :  { %10803 = vmatpush3.bf16.msra.mxu0 %v12743_v53 }
 0x6be   :  { %10804 = vmatprep.subr.bf16.mxu0 %v12745_v55 }
 0x6c1   :  { %10805 = vmatpush3.bf16.msra.mxu0 %v12747_v36 }
 0x6c2   :  { %10806 = vmatprep.subr.bf16.mxu0 %v12749_v42 }
 0x6c5   :  { %10807 = vmatpush3.bf16.msra.mxu0 %v12751_v40 }
 0x6c6   :  { %10808 = vmatprep.subr.bf16.mxu0 %v12753_v59 }
 0x6c9   :  { %10809 = vmatpush3.bf16.msra.mxu0 %v12755_v63 }
 0x6ca   :  { %10861 = vmatprep.subr.bf16.mxu0 %v12836_v51 }
 0x6ef   :  { %v7823_v23 = vpop.f32.mrb[16].mxu0  ;;  %v7864_v9 = vpop.f32.mrb[16].mxu1 }
 0x6f0   :  { %v14336_v29 = vadd.f32 %v7864_v9, %v7823_v23  ;;  %v7825_v30 = vpop.f32.mrb[17].mxu0  ;;  %v7866_v33 = vpop.f32.mrb[17].mxu1  ;;  %v8800_v9 = vld [vmem:[%s14454_s5] sm:$0xf] }
 0x6f1   :  { %v14338_v34 = vadd.f32 %v7866_v33, %v7825_v30  ;;  %v7827_v35 = vpop.f32.mrb[18].mxu0  ;;  %v7868_v21 = vpop.f32.mrb[18].mxu1  ;;  %v8805_v49 = vrot.slane %v8800_v9, %v14014_v31  ;;  %v8830_v30 = vld [vmem:[%s14455_s9] sm:$0xf]  ;;  %v8809_v33 = vrot.slane %v8800_v9, %v14017_v13  ;;  %v8813_v20 = vrot.slane %v8800_v9, %v13961_v26 }
 0x6f2   :  { %v7828_v38 = vpop.f32.mrb[19].mxu0  ;;  %v7869_v28 = vpop.f32.mrb[19].mxu1  ;;  %v8856_v21 = vld [vmem:[%s14456_s13] sm:$0xf]  ;;  %v8835_v25 = vrot.slane %v8830_v30, %v14014_v31  ;;  %v8839_v45 = vrot.slane %v8830_v30, %v14017_v13  ;;  %v8817_v42 = vrot.slane %v8800_v9, %v14087_v0  ;;  %v8847_v2 = vrot.slane %v8830_v30, %v14087_v0 }
 0x6f3   :  { %v8861_v32 = vrot.slane %v8856_v21, %v14014_v31  ;;  %v8865_v54 = vrot.slane %v8856_v21, %v14017_v13  ;;  %v8843_v31 = vrot.slane %v8830_v30, %v13961_v26 }
 0x72f   :  { %v8545_v5 = vpop.f32.mrb[20].mxu0 }
 0x730   :  { %v8546_v58 = vadd.f32 %v8545_v5, %v14324_v43  ;;  %v8586_v7 = vpop.f32.mrb[20].mxu1  ;;  %v8547_v48 = vpop.f32.mrb[21].mxu0 }
 0x731   :  { %v8548_v56 = vadd.f32 %v8547_v48, %v14326_v14  ;;  %v8588_v52 = vpop.f32.mrb[21].mxu1  ;;  %v8549_v10 = vpop.f32.mrb[22].mxu0 }
 0x732   :  { %v8587_v61 = vadd.f32 %v8586_v7, %v8546_v58  ;;  %v8590_v1 = vpop.f32.mrb[22].mxu1  ;;  %v8550_v11 = vpop.f32.mrb[23].mxu0  ;;  %v8869_v58 = vrot.slane %v8856_v21, %v13961_v26 }
 0x733   :  { %v8589_v12 = vadd.f32 %v8588_v52, %v8548_v56  ;;  %v8591_v15 = vpop.f32.mrb[23].mxu1  ;;  %v8873_v56 = vrot.slane %v8856_v21, %v14087_v0  ;;  %v12764_v0 = vld [vmem:[%s14457_s17 + $0x18] sm:$0xff]  }
 0x76f   :  { %v8627_v16 = vpop.f32.mrb[24].mxu0 }
 0x770   :  { %v8628_v62 = vadd.f32 %v8627_v16, %v14336_v29  ;;  %v8668_v17 = vpop.f32.mrb[24].mxu1  ;;  %v8629_v18 = vpop.f32.mrb[25].mxu0  ;;  %v12765_v16 = vld [vmem:[%s14457_s17 + $0x20] sm:$0xff]  }
 0x771   :  { %v8630_v43 = vadd.f32 %v8629_v18, %v14338_v34  ;;  %v8670_v19 = vpop.f32.mrb[25].mxu1  ;;  %v8631_v37 = vpop.f32.mrb[26].mxu0  ;;  %v12768_v18 = vld [vmem:[%s14457_s17 + $0x38] sm:$0xff]  }
 0x772   :  { %v8669_v14 = vadd.f32 %v8668_v17, %v8628_v62  ;;  %v8672_v22 = vpop.f32.mrb[26].mxu1  ;;  %v8632_v24 = vpop.f32.mrb[27].mxu0  ;;  %v12766_v62 = vld [vmem:[%s14457_s17 + $0x28] sm:$0xff]   ;;  %v12767_v17 = vld [vmem:[%s14457_s17 + $0x30] sm:$0xff]  }
 0x773   :  { %v8671_v6 = vadd.f32 %v8670_v19, %v8630_v43  ;;  %v8673_v23 = vpop.f32.mrb[27].mxu1  ;;  %v12769_v43 = vld [vmem:[%s14458_s21] sm:$0xff]  }
 0x777   :  { %v8748_v27 = vpop.f32.mrb[28].mxu0 }
 0x778   :  { %v8796_v29 = vadd.f32 %v8748_v27, %v8587_v61  ;;  %v8750_v35 = vpop.f32.mrb[29].mxu0  ;;  %v12762_v61 = vld [vmem:[%s14457_s17 + $0x8] sm:$0xff]  }
 0x779   :  { %v8797_v38 = vadd.f32 %v8750_v35, %v8589_v12  ;;  %v8752_v28 = vpop.f32.mrb[30].mxu0  ;;  %v12763_v12 = vld [vmem:[%s14457_s17 + $0x10] sm:$0xff]   ;;  %v10767_v35 = vld [vmem:[%s14460_s29] ss:$0 sm:$0xff] }
 0x77a   :  { %v8822_v34 = vadd.f32 %v8805_v49, %v8796_v29  ;;  %v8753_v46 = vpop.f32.mrb[31].mxu0 }
 0x77b   :  { %v8823_v44 = vadd.f32 %v8809_v33, %v8797_v38  ;;  %v10768_v38 = vld [vmem:[%s14461_s3] ss:$0 sm:$0xff]  ;;  %v12770_v46 = vld [vmem:[%s14458_s21 + $0x8] sm:$0xff]  }
 0x77c   :  { %v8826_v50 = vmax.f32 %v8822_v34, 0.0 }
 0x77d   :  { %v8827_v53 = vmax.f32 %v8823_v44, 0.0  ;;  %v12771_v44 = vld [vmem:[%s14458_s21 + $0x10] sm:$0xff]  }
 0x77e   :  { %v8852_v55 = vmul.f32 %v8835_v25, %v8826_v50  ;;  %v10769_v50 = vld [vmem:[%s14462_s8] ss:$0 sm:$0xff] }
 0x77f   :  { %v8853_v36 = vmul.f32 %v8839_v45, %v8827_v53  ;;  %v8789_v8 = vpop.f32.mrb[32].mxu0  ;;  %v12772_v45 = vld [vmem:[%s14458_s21 + $0x18] sm:$0xff]  }
 0x780   :  { %v8878_v57 = vadd.f32 %v8861_v32, %v8852_v55  ;;  %v8798_v40 = vadd.f32 %v8789_v8, %v8669_v14  ;;  %v8791_v39 = vpop.f32.mrb[33].mxu0  ;;  %v10778_v55 = vld [vmem:[%s14463_s14] ss:$0 sm:$0xff] }
 0x781   :  { %v8799_v59 = vadd.f32 %v8791_v39, %v8671_v6  ;;  %v8793_v60 = vpop.f32.mrb[34].mxu0  ;;  %v8879_v63 = vadd.f32 %v8865_v54, %v8853_v36  ;;  %v10734_v6 = vld [vmem:[%s14459_s25] ss:$0 sm:$0xff] }
 0x782   :  { %v8824_v47 = vadd.f32 %v8813_v20, %v8798_v40  ;;  %v8794_v41 = vpop.f32.mrb[35].mxu0  ;;  %v8882_v7 = vpack.c.bf16 %v8878_v57, %v8878_v57  ;;  %v12774_v60 = vld [vmem:[%s12992_s4 + $0x8] sm:$0xff]  }
 0x783   :  { %v8825_v13 = vadd.f32 %v8817_v42, %v8799_v59  ;;  %v8883_v3 = vpack.c.bf16 %v8879_v63, %v8879_v63  ;;  %v10779_v42 = vld [vmem:[%s14464_s19] ss:$0 sm:$0xff] }
 0x784   :  { %v8828_v5 = vmax.f32 %v8824_v47, 0.0  ;;  %v12773_v59 = vld [vmem:[%s12992_s4] sm:$0xff]  }
 0x785   :  { %v8829_v48 = vmax.f32 %v8825_v13, 0.0  ;;  %9181 = vmatprep.mubr.bf16.mxu0 %v8883_v3  ;;  %v10780_v63 = vld [vmem:[%s14465_s24] ss:$0 sm:$0xff] }
 0x786   :  { %v8854_v52 = vmul.f32 %v8843_v31, %v8828_v5  ;;  %9182 = vmatmul.mubr.bf16.vlgmr.msra.gmra.mrb[36].mxu0 %v8882_v7  ;;  %v10786_v13 = vld [vmem:[%s14466_s30] ss:$0 sm:$0xff] }
 0x787   :  { %v8855_v10 = vmul.f32 %v8847_v2, %v8829_v48  ;;  %10862 = vmatpush3.bf16.msra.mxu0 %v12761_v4  ;;  %10877 = vmatprep.mubr.msk.bf16.mxu0 %vm12837_vm2, %v12836_v51  ;;  %v10787_v5 = vld [vmem:[%s12987_s27] ss:$0 sm:$0xff] }
 0x788   :  { %v8880_v1 = vadd.f32 %v8869_v58, %v8854_v52  ;;  %10863 = vmatprep.subr.bf16.mxu0 %v12836_v51 }
 0x789   :  { %v8881_v26 = vadd.f32 %v8873_v56, %v8855_v10  ;;  %v10788_v56 = vld [vmem:[%s12997_s12] ss:$0 sm:$0xff]  ;;  %s9562_s12 = sshll.u32 %s12838_s6, 4  ;;  %s9563_s12 = int_to_ptr.vmem [resolvable:$true] %s9562_s12 }
 0x78a   :  { %v8884_v15 = vpack.c.bf16 %v8880_v1, %v8880_v1  ;;  %s12779_s27 = scalar_lea.vmem %s9563_s12, 32  ;;  %p12784_p1 = scmp.lt.s32.totalorder %s9563_s12, %s9563_s12 }
 0x78b   :  { %v8885_v11 = vpack.c.bf16 %v8881_v26, %v8881_v26  ;;  %10864 = vmatpush3.bf16.msra.mxu0 %v12762_v61  ;;  %p12780_p0 = scmp.ne.s32.totalorder %s9563_s12, %s12779_s27  ;;  %p12785_p2 = scmp.lt.s32.totalorder %s12779_s27, %s12779_s27 }
 0x78c   :  { %10865 = vmatprep.subr.bf16.mxu0 %v12836_v51 }
 0x78d   :  { %9221 = vmatprep.mubr.bf16.mxu1 %v8885_v11  ;;  %p12786_p3 = por %p12785_p2, %p12784_p1 }
 0x78e   :  { %9222 = vmatmul.mubr.bf16.vlgmr.msra.gmra.mrb[28].mxu1 %v8884_v15 }
 0x78f   :  { %10866 = vmatpush3.bf16.msra.mxu0 %v12763_v12  ;;  %10889 = vmatprep.mubr.msk.bf16.mxu1 %vm12837_vm2, %v12836_v51  ;;  %p12787_p4 = pnand %p12786_p3, %p12780_p0 }
 0x790   :  { %10867 = vmatprep.subr.bf16.mxu0 %v12836_v51  ;;  %10882 = vmatpush3.bf16.msra.mxu1 %v12769_v43 }
 0x791   :  { %10883 = vmatprep.subr.bf16.mxu1 %v12836_v51 }
 0x793   :  { %10868 = vmatpush3.bf16.msra.mxu0 %v12764_v0 }
 0x794   :  { %10869 = vmatprep.subr.bf16.mxu0 %v12836_v51  ;;  %10884 = vmatpush3.bf16.msra.mxu1 %v12770_v46 }
 0x795   :  { %10885 = vmatprep.subr.bf16.mxu1 %v12836_v51 }
 0x797   :  { %10870 = vmatpush3.bf16.msra.mxu0 %v12765_v16 }
 0x798   :  { %10871 = vmatprep.subr.bf16.mxu0 %v12836_v51  ;;  %10886 = vmatpush3.bf16.msra.mxu1 %v12771_v44 }
 0x799   :  { %10887 = vmatprep.subr.bf16.mxu1 %v12836_v51 }
 0x79b   :  { %10872 = vmatpush3.bf16.msra.mxu0 %v12766_v62 }
 0x79c   :  { %10873 = vmatprep.subr.bf16.mxu0 %v12836_v51  ;;  %10888 = vmatpush3.bf16.msra.mxu1 %v12772_v45 }
 0x79d   :  { %10893 = vmatprep.subr.bf16.mxu1 %v12836_v51 }
 0x79f   :  { %10874 = vmatpush3.bf16.msra.mxu0 %v12767_v17 }
 0x7a0   :  { %10875 = vmatprep.subr.bf16.mxu0 %v12836_v51 }
 0x7a3   :  { %10876 = vmatpush3.bf16.msra.mxu0 %v12768_v18 }
 0x859   :  { %v10810_v19 = vpop.f32.mrb[36].mxu0 }
 0x85a   :  { %v10811_v37 = vpop.f32.mrb[37].mxu0 }
 0x85b   :  { %v10812_v14 = vadd.f32 %v10811_v37, %v10810_v19  ;;  %v10813_v22 = vpop.f32.mrb[38].mxu0 }
 0x85c   :  { %v10814_v24 = vpop.f32.mrb[39].mxu0 }
 0x85d   :  { %v9184_v49 = vadd.f32 %v10812_v14, %v10734_v6 }
 0x861   :  { %v10832_v23 = vpop.f32.mrb[28].mxu1 }
 0x862   :  { %v10833_v9 = vpop.f32.mrb[29].mxu1 }
 0x863   :  { %v10834_v27 = vadd.f32 %v10833_v9, %v10832_v23  ;;  %v10835_v30 = vpop.f32.mrb[30].mxu1 }
 0x864   :  { %v10836_v33 = vpop.f32.mrb[31].mxu1 }
 0x865   :  { %v9224_v29 = vadd.f32 %v10834_v27, %v9184_v49 }
 0x867   :  { %v9229_v21 = vmax.f32 %v9224_v29, 0.0 }
 0x869   :  { %v9237_v28 = vmul.f32 %v10767_v35, %v9229_v21 }
 0x86b   :  { %v9245_v34 = vadd.f32 %v10768_v38, %v9237_v28 }
 0x86d   :  { %v9246_v25 = vpack.c.bf16 %v9245_v34, %v9245_v34 }
 0x86f   :  { %10878 = vmatmul.mubr.bf16.vlgmr.msra.gmra.mrb[40].mxu0 %v9246_v25 }
 0x942   :  { %v9352_v32 = vpop.f32.mrb[40].mxu0 }
 0x943   :  { %v9353_v53 = vadd.f32 %v10769_v50, %v9352_v32  ;;  %v10879_v54 = vpop.f32.mrb[41].mxu0 }
 0x944   :  { %v9355_v20 = vpop.f32.mrb[42].mxu0 }
 0x945   :  { %v9358_v36 = vmax.f32 %v9353_v53, 0.0  ;;  %v10880_v8 = vpop.f32.mrb[43].mxu0 }
 0x947   :  { %v9366_v57 = vmul.f32 %v10778_v55, %v9358_v36 }
 0x949   :  { %v9374_v40 = vadd.f32 %v10779_v42, %v9366_v57 }
 0x94b   :  { %v9375_v39 = vpack.c.bf16 %v9374_v40, %v9374_v40 }
 0x94d   :  { %10890 = vmatmul.mubr.msk.bf16.vlgmr.msra.gmra.mrb[32].mxu1 %vm5031_vm1, %v9375_v39 }
 0x94e   :  { %10897 = vmatprep.mubr.msk.bf16.mxu1 %vm12837_vm2, %v12836_v51  ;;  %10894 = vmatpush3.bf16.msra.mxu1 %v12773_v59 }
 0x94f   :  { %10895 = vmatprep.subr.bf16.mxu1 %v12836_v51 }
 0x952   :  { %10896 = vmatpush3.bf16.msra.mxu1 %v12774_v60 }
 0xa20   :  { %v9452_v47 = vpop.f32.mrb[32].mxu1 }
 0xa21   :  { %v9453_v31 = vadd.f32 %v10780_v63, %v9452_v47  ;;  %v10891_v41 = vpop.f32.mrb[33].mxu1 }
 0xa22   :  { %v9455_v2 = vpop.f32.mrb[34].mxu1 }
 0xa23   :  { %v9458_v3 = vmax.f32 %v9453_v31, 0.0  ;;  %v10892_v4 = vpop.f32.mrb[35].mxu1 }
 0xa25   :  { %v9466_v58 = vmul.f32 %v10786_v13, %v9458_v3 }
 0xa27   :  { %v9474_v7 = vadd.f32 %v10787_v5, %v9466_v58 }
 0xa29   :  { %v9475_v48 = vpack.c.bf16 %v9474_v7, %v9474_v7 }
 0xa2b   :  { %10898 = vmatmul.mubr.msk.bf16.vlgmr.msra.gmra.mrb[36].mxu1 %vm9499_vm6, %v9475_v48 }
 0xafe   :  { %v9537_v52 = vpop.f32.mrb[36].mxu1 }
 0xaff   :  { %v9538_v51 = vadd.f32 %v10788_v56, %v9537_v52  ;;  %v10899_v10 = vpop.f32.mrb[37].mxu1 }
 0xb00   :  { %v9540_v61 = vpop.f32.mrb[38].mxu1 }
 0xb01   :  { %v10900_v1 = vpop.f32.mrb[39].mxu1  ;;  %v9544_v26 = vsel %vm9543_vm7, %v9538_v51, -inf }
 0xb02   :  { %9545 = vmax.xlane.f32.xlu0 %v9544_v26 }
 0xb8f   :  { %v9546_v11 = vpop.xlane.xlu0 %9545 }
 0xb90   :  { %v9547_v12 = vsub.f32 %v9538_v51, %v9546_v11 }
 0xb92   :  { %v9548_v15 = vmul.f32 1.442695, %v9547_v12 }
 0xb94   :  { %12775 = vpow2.f32 %v9548_v15 }
 0xb9e   :  { %v12776_v0 = vpop.eup %12775 }
 0xb9f   :  { %v9550_v16 = vsel %vm9543_vm7, %v12776_v0, 0.0 }
 0xba0   :  { %9551 = vadd.xlane.f32.xlu0 %v9550_v16 }
 0xc2d   :  { %v9552_v62 = vpop.xlane.xlu0 %9551 }
 0xc2e   :  { %12777 = vrcp.f32 %v9552_v62 }
 0xc38   :  { %v12778_v17 = vpop.eup %12777 }
 0xc39   :  { %v9554_v18 = vmul.f32 %v12778_v17, %v12776_v0 }
 0xc3b   :  { %9555 = vst.msk [vmem:[#allocation2] sm:$0x3] %vm9543_vm7, %v9554_v18 }
 0xc3c   :  { %12790 = shalt.err (!%p12787_p4)
}
 0xc3d   :  { %s12791_s4 = scalar_lea.hbm %s13002_s20, 32 }
 0xc3e   :  { %p12792_p5 = scmp.ne.s32.totalorder %s13002_s20, %s12791_s4  ;;  %p12795_p6 = scmp.lt.u32.totalorder %s12791_s4, %s13002_s20 }
 0xc40   :  { %p12797_p7 = pnand %p12795_p6, %p12792_p5 }
 0xc42   :  { %12800 = shalt.err (!%p12797_p7)
}
 0xc43   :  { %9565 = dma.vmem_to_hbm [thread:$0]  %s9563_s12, 32, %s13002_s20, [#allocation3]  }
 0xc44   :  { %12801 = dma.done.wait [#allocation3], 32  }
 0xc45   :  { %12802 = vsyncadd [#allocation3], 4294967264 }
 0xc46   :  { %9569 = vsyncpa [#allocation3], 1 }

</bundles_post_ra>
